<compile_context>
chip_gen: v6e
topology: v6e:2x2x1
jax: 0.10.0
libtpu: 0.0.40
codegen_flags: <defaults>
</compile_context>

<pallas_src>
import functools

import jax
import jax.numpy as jnp
from jax import lax
from jax.experimental import pallas as pl
from jax.experimental.pallas import tpu as pltpu

EPS = 1e-5      # nn.BatchNorm2d default eps


def _round_up(x, m):
    return (x + m - 1) // m * m


def _valid_mask(hw_p, w_p, w):
    # 1.0 on real output columns, 0.0 on the 2 "junk" columns of each padded
    # row of the flattened (H, W+2) layout.
    col = lax.broadcasted_iota(jnp.int32, (hw_p, 1), 0) % w_p
    return (col < w).astype(jnp.float32)


def _compiler_params(block_bytes):
    # Size the scoped-VMEM request to the real (double-buffered) working set
    # with headroom instead of relying on per-chip defaults (16/32 MiB).
    limit = int(min(64 << 20, max(32 << 20, 2 * block_bytes + (4 << 20))))
    return pltpu.CompilerParams(dimension_semantics=("parallel",),
                                vmem_limit_bytes=limit)


# ---------------------------------------------------------------------------
# Kernel A: conv1 (3x3, pad=1) + bias, plus per-image masked BN partial sums.
# Small-C_in path: single K = 9*C_in matmul on a wrapper-stacked tap slab.
# ---------------------------------------------------------------------------
def _conv1_im2col_kernel(xcol_ref, w_ref, b_ref, y_ref, sum_ref, sq_ref,
                         *, w_p, w):
    hw_p = xcol_ref.shape[0]
    y = jnp.dot(xcol_ref[...], w_ref[...], preferred_element_type=jnp.float32)
    y = y + b_ref[...]
    y_ref[...] = y.astype(y_ref.dtype)            # bf16 intermediate
    valid = _valid_mask(hw_p, w_p, w)             # exclude junk columns
    ym = y * valid
    sum_ref[...] = jnp.sum(ym, axis=0, keepdims=True)
    sq_ref[...] = jnp.sum(ym * y, axis=0, keepdims=True)


# General-C_in path: nine contiguous flattened-offset taps (K = C_in each).
def _conv1_taps_kernel(xpf_ref, w_ref, b_ref, y_ref, sum_ref, sq_ref,
                       *, h, w_p, w):
    hw_p = h * w_p
    c_pad = w_ref.shape[-1]
    acc = jnp.zeros((hw_p, c_pad), jnp.float32) + b_ref[...]   # bias-init acc
    for k in range(9):
        dy, dx = divmod(k, 3)
        xs = xpf_ref[pl.ds(dy * w_p + dx, hw_p), :]   # contiguous, no reshape
        acc = acc + jnp.dot(xs, w_ref[k], preferred_element_type=jnp.float32)
    y_ref[...] = acc.astype(y_ref.dtype)
    valid = _valid_mask(hw_p, w_p, w)
    ym = acc * valid
    sum_ref[...] = jnp.sum(ym, axis=0, keepdims=True)
    sq_ref[...] = jnp.sum(ym * acc, axis=0, keepdims=True)


def _conv1(x_nhwc, w1, b1, c_pad):
    n, h, w, c_in = x_nhwc.shape
    w_p = w + 2
    hw_p = h * w_p
    c_out = w1.shape[0]
    pc = c_pad - c_out

    # PyTorch (C_out, C_in, 3, 3) -> (kh, kw, cin, cout) -> (9, C_in, C_pad).
    wm = jnp.transpose(w1, (2, 3, 1, 0)).reshape(9, c_in, c_out)
    wm = jnp.pad(wm, ((0, 0), (0, 0), (0, pc))).astype(jnp.bfloat16)
    bm = jnp.pad(b1, (0, pc)).reshape(1, c_pad).astype(jnp.float32)

    out_shape = (jax.ShapeDtypeStruct((n, hw_p, c_pad), jnp.bfloat16),
                 jax.ShapeDtypeStruct((n, 1, c_pad), jnp.float32),
                 jax.ShapeDtypeStruct((n, 1, c_pad), jnp.float32))
    out_specs = (pl.BlockSpec((None, hw_p, c_pad), lambda i: (i, 0, 0)),
                 pl.BlockSpec((None, 1, c_pad), lambda i: (i, 0, 0)),
                 pl.BlockSpec((None, 1, c_pad), lambda i: (i, 0, 0)))

    if 9 * c_in <= 128:
        # Tiny stem channels (MNIST: 1-4): stack the 9 shifted taps channel-
        # wise in the wrapper.  Extra HBM is 9*C_in << C_pad channels of the
        # smallest tensor; conv1 becomes one K = 9*C_in matmul.
        k1 = 9 * c_in
        xq = jnp.pad(x_nhwc, ((0, 0), (1, 1), (1, 3), (0, 0)))
        cols = [xq[:, dy:dy + h, dx:dx + w_p, :]
                for dy in range(3) for dx in range(3)]
        xcol = jnp.concatenate(cols, axis=-1)
        xcol = xcol.reshape(n, hw_p, k1).astype(jnp.bfloat16)
        wk = wm.reshape(k1, c_pad)
        kern = functools.partial(_conv1_im2col_kernel, w_p=w_p, w=w)
        blk = (hw_p * k1 * 2 + k1 * c_pad * 2 + c_pad * 4
               + hw_p * c_pad * 2 + 2 * c_pad * 4)
        return pl.pallas_call(
            kern,
            grid=(n,),
            in_specs=[pl.BlockSpec((None, hw_p, k1), lambda i: (i, 0, 0)),
                      pl.BlockSpec((k1, c_pad), lambda i: (0, 0)),
                      pl.BlockSpec((1, c_pad), lambda i: (0, 0))],
            out_specs=out_specs,
            out_shape=out_shape,
            compiler_params=_compiler_params(blk),
        )(xcol, wk, bm)

    # General C_in: flattened padded input (top 1, bottom 2, left/right 1).
    xpf = jnp.pad(x_nhwc, ((0, 0), (1, 2), (1, 1), (0, 0)))
    xpf = xpf.reshape(n, (h + 3) * w_p, c_in).astype(jnp.bfloat16)
    kern = functools.partial(_conv1_taps_kernel, h=h, w_p=w_p, w=w)
    blk = ((h + 3) * w_p * c_in * 2 + 9 * c_in * c_pad * 2 + c_pad * 4
           + hw_p * c_pad * 2 + 2 * c_pad * 4)
    return pl.pallas_call(
        kern,
        grid=(n,),
        in_specs=[pl.BlockSpec((None, (h + 3) * w_p, c_in), lambda i: (i, 0, 0)),
                  pl.BlockSpec((9, c_in, c_pad), lambda i: (0, 0, 0)),
                  pl.BlockSpec((1, c_pad), lambda i: (0, 0))],
        out_specs=out_specs,
        out_shape=out_shape,
        compiler_params=_compiler_params(blk),
    )(xpf, wm, bm)


# ---------------------------------------------------------------------------
# Kernel B: fused BN1 (scale/shift) + ReLU + conv2 (3x3, pad=1) + bias,
# plus per-image BN2 partial sums.  h1 never leaves VMEM.
# ---------------------------------------------------------------------------
def _bn_relu_conv2_kernel(y1_ref, s_ref, t_ref, w_ref, b_ref,
                          y2_ref, sum_ref, sq_ref, pad_ref, *, h, w_p, w):
    hw_p = h * w_p
    hw = h * w
    c_pad = y1_ref.shape[-1]
    valid = _valid_mask(hw_p, w_p, w)

    # BN1 folded into one FMA + ReLU; junk columns forced to 0 so they become
    # conv2's left/right zero padding once staged into the flat pad buffer.
    h1 = jnp.maximum(y1_ref[...].astype(jnp.float32) * s_ref[...] + t_ref[...],
                     0.0)
    h1 = h1 * valid

    top = w_p + 1                                   # flat offset of pixel (0,0)
    bot = pad_ref.shape[0] - (top + hw_p)
    # Zero only the tiny top/bottom borders, then one contiguous interior
    # store (no full-scratch zero fill).
    pad_ref[pl.ds(0, top), :] = jnp.zeros((top, c_pad), pad_ref.dtype)
    pad_ref[pl.ds(top + hw_p, bot), :] = jnp.zeros((bot, c_pad), pad_ref.dtype)
    pad_ref[pl.ds(top, hw_p), :] = h1.astype(pad_ref.dtype)

    acc = jnp.zeros((hw_p, c_pad), jnp.float32) + b_ref[...]   # bias-init acc
    for k in range(9):
        dy, dx = divmod(k, 3)
        xs = pad_ref[pl.ds(dy * w_p + dx, hw_p), :]   # contiguous, no reshape
        acc = acc + jnp.dot(xs, w_ref[k], preferred_element_type=jnp.float32)

    # Drop the 2 junk columns: write y2 in the compact (H*W, C_pad) layout.
    y2 = acc.reshape(h, w_p, c_pad)[:, :w, :].reshape(hw, c_pad)
    y2_ref[...] = y2.astype(y2_ref.dtype)           # bf16 intermediate
    sum_ref[...] = jnp.sum(y2, axis=0, keepdims=True)
    sq_ref[...] = jnp.sum(y2 * y2, axis=0, keepdims=True)


def _bn_relu_conv2(y1, scale1, shift1, w2, b2, h, w, c_pad):
    n = y1.shape[0]
    w_p = w + 2
    hw_p = h * w_p
    hw = h * w
    c_out = w2.shape[0]
    pc = c_pad - c_out

    wm = jnp.transpose(w2, (2, 3, 1, 0)).reshape(9, c_out, c_out)
    wm = jnp.pad(wm, ((0, 0), (0, pc), (0, pc))).astype(jnp.bfloat16)
    bm = jnp.pad(b2, (0, pc)).reshape(1, c_pad).astype(jnp.float32)

    kern = functools.partial(_bn_relu_conv2_kernel, h=h, w_p=w_p, w=w)
    blk = (hw_p * c_pad * 2 + 2 * c_pad * 4 + 9 * c_pad * c_pad * 2 + c_pad * 4
           + hw * c_pad * 2 + 2 * c_pad * 4 + (h + 3) * w_p * c_pad * 2)
    return pl.pallas_call(
        kern,
        grid=(n,),
        in_specs=[pl.BlockSpec((None, hw_p, c_pad), lambda i: (i, 0, 0)),
                  pl.BlockSpec((1, c_pad), lambda i: (0, 0)),
                  pl.BlockSpec((1, c_pad), lambda i: (0, 0)),
                  pl.BlockSpec((9, c_pad, c_pad), lambda i: (0, 0, 0)),
                  pl.BlockSpec((1, c_pad), lambda i: (0, 0))],
        out_specs=(pl.BlockSpec((None, hw, c_pad), lambda i: (i, 0, 0)),
                   pl.BlockSpec((None, 1, c_pad), lambda i: (i, 0, 0)),
                   pl.BlockSpec((None, 1, c_pad), lambda i: (i, 0, 0))),
        out_shape=(jax.ShapeDtypeStruct((n, hw, c_pad), jnp.bfloat16),
                   jax.ShapeDtypeStruct((n, 1, c_pad), jnp.float32),
                   jax.ShapeDtypeStruct((n, 1, c_pad), jnp.float32)),
        scratch_shapes=[pltpu.VMEM(((h + 3) * w_p, c_pad), jnp.bfloat16)],
        compiler_params=_compiler_params(blk),
    )(y1, scale1, shift1, wm, bm)


# ---------------------------------------------------------------------------
# Kernel C: final BN2 (fused scale/shift) + ReLU, with the channel un-pad and
# the NHWC->NCHW layout change folded in (writes (C_out, H*W) per image).
# ---------------------------------------------------------------------------
def _bn_relu_nchw_kernel(y2_ref, s_ref, t_ref, o_ref, *, c_out):
    o = jnp.maximum(y2_ref[...].astype(jnp.float32) * s_ref[...] + t_ref[...],
                    0.0)                              # (H*W, C_pad)
    o_ref[...] = jnp.transpose(o)[:c_out, :]          # (C_out, H*W), lane-dense


def _bn_relu_out(y2, scale2, shift2, c_out, h, w):
    n, hw, c_pad = y2.shape
    kern = functools.partial(_bn_relu_nchw_kernel, c_out=c_out)
    blk = hw * c_pad * 2 + 2 * c_pad * 4 + c_out * hw * 4
    out = pl.pallas_call(
        kern,
        grid=(n,),
        in_specs=[pl.BlockSpec((None, hw, c_pad), lambda i: (i, 0, 0)),
                  pl.BlockSpec((1, c_pad), lambda i: (0, 0)),
                  pl.BlockSpec((1, c_pad), lambda i: (0, 0))],
        out_specs=pl.BlockSpec((None, c_out, hw), lambda i: (i, 0, 0)),
        out_shape=jax.ShapeDtypeStruct((n, c_out, hw), jnp.float32),
        compiler_params=_compiler_params(blk),
    )(y2, scale2, shift2)
    return out.reshape(n, c_out, h, w)                # contiguous: free reshape


def _bn_scale_shift(psum, psq, gamma, beta, count, c_pad):
    # Fold per-image partial sums into fused scale/shift (tiny XLA step).
    # Note: E[y^2]-E[y]^2 in f32 is fine at MNIST-UNet magnitudes/counts.
    pc = c_pad - gamma.shape[0]
    g = jnp.pad(gamma, (0, pc))
    b = jnp.pad(beta, (0, pc))
    mean = jnp.sum(psum, axis=0) / count                  # (1, C_pad)
    var = jnp.maximum(jnp.sum(psq, axis=0) / count - mean * mean, 0.0)
    scale = g[None, :] * lax.rsqrt(var + EPS)
    shift = b[None, :] - mean * scale
    return scale.astype(jnp.float32), shift.astype(jnp.float32)


def double_conv(x_nchw, params):
    """Forward pass of DoubleConv.  x_nchw: (N, C_in, H, W) float32 -> NCHW out."""
    w1, b1, g1, be1, w2, b2, g2, be2 = params
    n, c_in, h, w = x_nchw.shape
    c_out = w1.shape[0]
    # 256-wide channel tiles when C_out > 128 (fills the v6e/v7x 256-wide MXU).
    lane = 256 if c_out > 128 else 128
    c_pad = _round_up(c_out, lane)
    count = n * h * w                                 # BN over (N, H, W)

    x = jnp.transpose(x_nchw, (0, 2, 3, 1))           # NCHW -> NHWC

    # Layer 1: conv1 + bias with masked per-image BN partial sums.
    y1, s1, q1 = _conv1(x, w1, b1, c_pad)
    scale1, shift1 = _bn_scale_shift(s1, q1, g1, be1, count, c_pad)

    # Layer 2: BN1 + ReLU fused with conv2 + bias (h1 never leaves VMEM).
    y2, s2, q2 = _bn_relu_conv2(y1, scale1, shift1, w2, b2, h, w, c_pad)
    scale2, shift2 = _bn_scale_shift(s2, q2, g2, be2, count, c_pad)

    # Final BN2 + ReLU, un-pad channels and emit NCHW inside the kernel.
    return _bn_relu_out(y2, scale2, shift2, c_out, h, w)


def ref_double_conv(x, params):
    # Pure-JAX reference (XLA conv) for correctness checking.
    w1, b1, g1, be1, w2, b2, g2, be2 = params

    def conv(x, w, b):
        y = lax.conv_general_dilated(
            x, w, window_strides=(1, 1), padding=((1, 1), (1, 1)),
            dimension_numbers=('NCHW', 'OIHW', 'NCHW'))
        return y + b[None, :, None, None]

    def bn_relu_ref(y, g, be):
        mean = y.mean(axis=(0, 2, 3), keepdims=True)
        var = ((y - mean) ** 2).mean(axis=(0, 2, 3), keepdims=True)
        yn = (y - mean) / jnp.sqrt(var + EPS)
        return jnp.maximum(g[None, :, None, None] * yn
                           + be[None, :, None, None], 0.0)

    hmid = bn_relu_ref(conv(x, w1, b1), g1, be1)
    return bn_relu_ref(conv(hmid, w2, b2), g2, be2)


if __name__ == "__main__":
    key = jax.random.PRNGKey(0)
    N, C_IN, C_OUT, H, W = 2, 4, 8, 16, 16

    kx, kw1, kb1, kw2, kb2 = jax.random.split(key, 5)
    x = jax.random.normal(kx, (N, C_IN, H, W), dtype=jnp.float32)

    # Deterministic synthetic parameters (shapes match nn.Conv2d / nn.BatchNorm2d).
    w1 = jax.random.normal(kw1, (C_OUT, C_IN, 3, 3), dtype=jnp.float32) * 0.1
    b1 = jax.random.normal(kb1, (C_OUT,), dtype=jnp.float32) * 0.1
    w2 = jax.random.normal(kw2, (C_OUT, C_OUT, 3, 3), dtype=jnp.float32) * 0.1
    b2 = jax.random.normal(kb2, (C_OUT,), dtype=jnp.float32) * 0.1
    # BatchNorm affine params at nn.BatchNorm2d.__init__ defaults.
    g1 = jnp.ones((C_OUT,), jnp.float32)
    be1 = jnp.zeros((C_OUT,), jnp.float32)
    g2 = jnp.ones((C_OUT,), jnp.float32)
    be2 = jnp.zeros((C_OUT,), jnp.float32)

    params = (w1, b1, g1, be1, w2, b2, g2, be2)

    out = jax.block_until_ready(jax.jit(double_conv)(x, params))
    ref = jax.block_until_ready(jax.jit(ref_double_conv)(x, params))

    assert out.shape == (N, C_OUT, H, W), out.shape
    # Tolerance accounts for the intentional bf16 MXU operands + bf16 storage
    # of the two intermediate activations (per perf review) vs f32 reference.
    assert jnp.allclose(out, ref, atol=4e-2, rtol=4e-2), \
        float(jnp.max(jnp.abs(out - ref)))
    print("KERNEL_OK")
</pallas_src>

<mosaic_0001>
module attributes {stable_mosaic.version = 11 : i64} {
  func.func @_conv1_im2col_kernel(%arg0: i32, %arg1: memref<1x288x36xbf16, #tpu.memory_space<vmem>>, %arg2: memref<36x128xbf16, #tpu.memory_space<vmem>>, %arg3: memref<1x128xf32, #tpu.memory_space<vmem>>, %arg4: memref<1x288x128xbf16, #tpu.memory_space<vmem>>, %arg5: memref<1x1x128xf32, #tpu.memory_space<vmem>>, %arg6: memref<1x1x128xf32, #tpu.memory_space<vmem>>) attributes {dimension_semantics = [#tpu.dimension_semantics<parallel>], iteration_bounds = array<i64: 2>, scalar_prefetch = 0 : i64, scratch_operands = 0 : i64, tpu.core_type = #tpu.core_type<tc>, window_params = [{transform_indices = @transform_0, window_bounds = array<i64: 1, 288, 36>}, {pipeline_mode = #tpu.pipeline_mode<synchronous>, transform_indices = @transform_1, window_bounds = array<i64: 36, 128>}, {pipeline_mode = #tpu.pipeline_mode<synchronous>, transform_indices = @transform_2, window_bounds = array<i64: 1, 128>}, {transform_indices = @transform_3, window_bounds = array<i64: 1, 288, 128>}, {transform_indices = @transform_4, window_bounds = array<i64: 1, 1, 128>}, {transform_indices = @transform_5, window_bounds = array<i64: 1, 1, 128>}]} {
    %c0 = arith.constant 0 : index
    %c0_0 = arith.constant 0 : index
    %c0_1 = arith.constant 0 : index
    %0 = vector.load %arg1[%c0, %c0_0, %c0_1] : memref<1x288x36xbf16, #tpu.memory_space<vmem>>, vector<1x288x36xbf16>
    %1 = vector.shape_cast %0 : vector<1x288x36xbf16> to vector<288x36xbf16>
    %c0_2 = arith.constant 0 : index
    %c0_3 = arith.constant 0 : index
    %2 = vector.load %arg2[%c0_2, %c0_3] : memref<36x128xbf16, #tpu.memory_space<vmem>>, vector<36x128xbf16>
    %cst = arith.constant dense<0.000000e+00> : vector<288x128xf32>
    %3 = tpu.matmul %1, %2, %cst {dimension_numbers = #tpu.dot_dimension_numbers<[1], [0], [0], [1], [0, 0, 1, 1], [], []>} : vector<288x36xbf16>, vector<36x128xbf16>, vector<288x128xf32> -> vector<288x128xf32>
    %c0_4 = arith.constant 0 : index
    %c0_5 = arith.constant 0 : index
    %4 = vector.load %arg3[%c0_4, %c0_5] : memref<1x128xf32, #tpu.memory_space<vmem>>, vector<1x128xf32>
    %5 = vector.broadcast %4 : vector<1x128xf32> to vector<288x128xf32>
    %6 = arith.addf %3, %5 : vector<288x128xf32>
    %7 = arith.truncf %6 : vector<288x128xf32> to vector<288x128xbf16>
    %c0_6 = arith.constant 0 : index
    %c0_7 = arith.constant 0 : index
    %c0_8 = arith.constant 0 : index
    %8 = vector.load %arg4[%c0_6, %c0_7, %c0_8] : memref<1x288x128xbf16, #tpu.memory_space<vmem>>, vector<1x288x128xbf16>
    %9 = vector.shape_cast %8 : vector<1x288x128xbf16> to vector<288x128xbf16>
    %10 = vector.shape_cast %7 : vector<288x128xbf16> to vector<1x288x128xbf16>
    tpu.vector_store %arg4[%c0_6, %c0_7, %c0_8], %10 {strides = array<i32>} : memref<1x288x128xbf16, #tpu.memory_space<vmem>>, vector<1x288x128xbf16>,
    %11 = tpu.iota {dimensions = array<i32: 0>} : vector<288x1xi32>
    %c18_i32 = arith.constant 18 : i32
    %c0_i32 = arith.constant 0 : i32
    %12 = arith.cmpi eq, %c18_i32, %c0_i32 : i32
    %c1_i32 = arith.constant 1 : i32
    %13 = arith.select %12, %c1_i32, %c18_i32 : i32
    %14 = vector.broadcast %13 : i32 to vector<288x1xi32>
    %15 = arith.remsi %11, %14 : vector<288x1xi32>
    %c0_i32_9 = arith.constant 0 : i32
    %16 = vector.broadcast %c0_i32_9 : i32 to vector<288x1xi32>
    %17 = arith.cmpi ne, %15, %16 : vector<288x1xi32>
    %c0_i32_10 = arith.constant 0 : i32
    %18 = vector.broadcast %c0_i32_10 : i32 to vector<288x1xi32>
    %19 = arith.cmpi slt, %15, %18 : vector<288x1xi32>
    %c0_i32_11 = arith.constant 0 : i32
    %20 = arith.cmpi slt, %13, %c0_i32_11 : i32
    %21 = vector.broadcast %20 : i1 to vector<288x1xi1>
    %22 = vector.broadcast %21 : vector<288x1xi1> to vector<288x1xi1>
    %23 = arith.xori %19, %22 : vector<288x1xi1>
    %24 = arith.andi %23, %17 : vector<288x1xi1>
    %25 = vector.broadcast %13 : i32 to vector<288x1xi32>
    %26 = arith.addi %15, %25 : vector<288x1xi32>
    %27 = arith.select %24, %26, %15 : vector<288x1xi1>, vector<288x1xi32>
    %c16_i32 = arith.constant 16 : i32
    %28 = vector.broadcast %c16_i32 : i32 to vector<288x1xi32>
    %29 = arith.cmpi slt, %27, %28 : vector<288x1xi32>
    %30 = arith.extui %29 : vector<288x1xi1> to vector<288x1xi32>
    %31 = arith.sitofp %30 : vector<288x1xi32> to vector<288x1xf32>
    %32 = vector.broadcast %31 : vector<288x1xf32> to vector<288x128xf32>
    %33 = arith.mulf %6, %32 : vector<288x128xf32>
    %cst_12 = arith.constant dense<0.000000e+00> : vector<128xf32>
    %34 = vector.multi_reduction <add>, %33, %cst_12 [0] : vector<288x128xf32> to vector<128xf32>
    %35 = vector.shape_cast %34 : vector<128xf32> to vector<1x128xf32>
    %c0_13 = arith.constant 0 : index
    %c0_14 = arith.constant 0 : index
    %c0_15 = arith.constant 0 : index
    %36 = vector.load %arg5[%c0_13, %c0_14, %c0_15] : memref<1x1x128xf32, #tpu.memory_space<vmem>>, vector<1x1x128xf32>
    %37 = vector.shape_cast %36 : vector<1x1x128xf32> to vector<1x128xf32>
    %38 = vector.shape_cast %35 : vector<1x128xf32> to vector<1x1x128xf32>
    tpu.vector_store %arg5[%c0_13, %c0_14, %c0_15], %38 {strides = array<i32>} : memref<1x1x128xf32, #tpu.memory_space<vmem>>, vector<1x1x128xf32>,
    %39 = arith.mulf %33, %6 : vector<288x128xf32>
    %cst_16 = arith.constant dense<0.000000e+00> : vector<128xf32>
    %40 = vector.multi_reduction <add>, %39, %cst_16 [0] : vector<288x128xf32> to vector<128xf32>
    %41 = vector.shape_cast %40 : vector<128xf32> to vector<1x128xf32>
    %c0_17 = arith.constant 0 : index
    %c0_18 = arith.constant 0 : index
    %c0_19 = arith.constant 0 : index
    %42 = vector.load %arg6[%c0_17, %c0_18, %c0_19] : memref<1x1x128xf32, #tpu.memory_space<vmem>>, vector<1x1x128xf32>
    %43 = vector.shape_cast %42 : vector<1x1x128xf32> to vector<1x128xf32>
    %44 = vector.shape_cast %41 : vector<1x128xf32> to vector<1x1x128xf32>
    tpu.vector_store %arg6[%c0_17, %c0_18, %c0_19], %44 {strides = array<i32>} : memref<1x1x128xf32, #tpu.memory_space<vmem>>, vector<1x1x128xf32>,
    return
  }
  func.func @transform_0(%arg0: i32) -> (i32, i32, i32) {
    %c0_i32 = arith.constant 0 : i32
    %c0_i32_0 = arith.constant 0 : i32
    %c0_i32_1 = arith.constant 0 : i32
    return %arg0, %c0_i32, %c0_i32_0 : i32, i32, i32
  }
  func.func @transform_1(%arg0: i32) -> (i32, i32) {
    %c0_i32 = arith.constant 0 : i32
    %c0_i32_0 = arith.constant 0 : i32
    %c0_i32_1 = arith.constant 0 : i32
    return %c0_i32, %c0_i32_0 : i32, i32
  }
  func.func @transform_2(%arg0: i32) -> (i32, i32) {
    %c0_i32 = arith.constant 0 : i32
    %c0_i32_0 = arith.constant 0 : i32
    %c0_i32_1 = arith.constant 0 : i32
    return %c0_i32, %c0_i32_0 : i32, i32
  }
  func.func @transform_3(%arg0: i32) -> (i32, i32, i32) {
    %c0_i32 = arith.constant 0 : i32
    %c0_i32_0 = arith.constant 0 : i32
    %c0_i32_1 = arith.constant 0 : i32
    return %arg0, %c0_i32, %c0_i32_0 : i32, i32, i32
  }
  func.func @transform_4(%arg0: i32) -> (i32, i32, i32) {
    %c0_i32 = arith.constant 0 : i32
    %c0_i32_0 = arith.constant 0 : i32
    %c0_i32_1 = arith.constant 0 : i32
    return %arg0, %c0_i32, %c0_i32_0 : i32, i32, i32
  }
  func.func @transform_5(%arg0: i32) -> (i32, i32, i32) {
    %c0_i32 = arith.constant 0 : i32
    %c0_i32_0 = arith.constant 0 : i32
    %c0_i32_1 = arith.constant 0 : i32
    return %arg0, %c0_i32, %c0_i32_0 : i32, i32, i32
  }
}

module attributes {stable_mosaic.version = 11 : i64} {
  func.func @_bn_relu_conv2_kernel(%arg0: i32, %arg1: memref<1x288x128xbf16, #tpu.memory_space<vmem>>, %arg2: memref<1x128xf32, #tpu.memory_space<vmem>>, %arg3: memref<1x128xf32, #tpu.memory_space<vmem>>, %arg4: memref<9x128x128xbf16, #tpu.memory_space<vmem>>, %arg5: memref<1x128xf32, #tpu.memory_space<vmem>>, %arg6: memref<1x256x128xbf16, #tpu.memory_space<vmem>>, %arg7: memref<1x1x128xf32, #tpu.memory_space<vmem>>, %arg8: memref<1x1x128xf32, #tpu.memory_space<vmem>>, %arg9: memref<342x128xbf16, #tpu.memory_space<vmem>>) attributes {dimension_semantics = [#tpu.dimension_semantics<parallel>], iteration_bounds = array<i64: 2>, scalar_prefetch = 0 : i64, scratch_operands = 1 : i64, tpu.core_type = #tpu.core_type<tc>, window_params = [{transform_indices = @transform_0, window_bounds = array<i64: 1, 288, 128>}, {pipeline_mode = #tpu.pipeline_mode<synchronous>, transform_indices = @transform_1, window_bounds = array<i64: 1, 128>}, {pipeline_mode = #tpu.pipeline_mode<synchronous>, transform_indices = @transform_2, window_bounds = array<i64: 1, 128>}, {pipeline_mode = #tpu.pipeline_mode<synchronous>, transform_indices = @transform_3, window_bounds = array<i64: 9, 128, 128>}, {pipeline_mode = #tpu.pipeline_mode<synchronous>, transform_indices = @transform_4, window_bounds = array<i64: 1, 128>}, {transform_indices = @transform_5, window_bounds = array<i64: 1, 256, 128>}, {transform_indices = @transform_6, window_bounds = array<i64: 1, 1, 128>}, {transform_indices = @transform_7, window_bounds = array<i64: 1, 1, 128>}]} {
    %0 = tpu.iota {dimensions = array<i32: 0>} : vector<288x1xi32>
    %c18_i32 = arith.constant 18 : i32
    %c0_i32 = arith.constant 0 : i32
    %1 = arith.cmpi eq, %c18_i32, %c0_i32 : i32
    %c1_i32 = arith.constant 1 : i32
    %2 = arith.select %1, %c1_i32, %c18_i32 : i32
    %3 = vector.broadcast %2 : i32 to vector<288x1xi32>
    %4 = arith.remsi %0, %3 : vector<288x1xi32>
    %c0_i32_0 = arith.constant 0 : i32
    %5 = vector.broadcast %c0_i32_0 : i32 to vector<288x1xi32>
    %6 = arith.cmpi ne, %4, %5 : vector<288x1xi32>
    %c0_i32_1 = arith.constant 0 : i32
    %7 = vector.broadcast %c0_i32_1 : i32 to vector<288x1xi32>
    %8 = arith.cmpi slt, %4, %7 : vector<288x1xi32>
    %c0_i32_2 = arith.constant 0 : i32
    %9 = arith.cmpi slt, %2, %c0_i32_2 : i32
    %10 = vector.broadcast %9 : i1 to vector<288x1xi1>
    %11 = vector.broadcast %10 : vector<288x1xi1> to vector<288x1xi1>
    %12 = arith.xori %8, %11 : vector<288x1xi1>
    %13 = arith.andi %12, %6 : vector<288x1xi1>
    %14 = vector.broadcast %2 : i32 to vector<288x1xi32>
    %15 = arith.addi %4, %14 : vector<288x1xi32>
    %16 = arith.select %13, %15, %4 : vector<288x1xi1>, vector<288x1xi32>
    %c16_i32 = arith.constant 16 : i32
    %17 = vector.broadcast %c16_i32 : i32 to vector<288x1xi32>
    %18 = arith.cmpi slt, %16, %17 : vector<288x1xi32>
    %19 = arith.extui %18 : vector<288x1xi1> to vector<288x1xi32>
    %20 = arith.sitofp %19 : vector<288x1xi32> to vector<288x1xf32>
    %c0 = arith.constant 0 : index
    %c0_3 = arith.constant 0 : index
    %c0_4 = arith.constant 0 : index
    %21 = vector.load %arg1[%c0, %c0_3, %c0_4] : memref<1x288x128xbf16, #tpu.memory_space<vmem>>, vector<1x288x128xbf16>
    %22 = vector.shape_cast %21 : vector<1x288x128xbf16> to vector<288x128xbf16>
    %23 = arith.extf %22 : vector<288x128xbf16> to vector<288x128xf32>
    %c0_5 = arith.constant 0 : index
    %c0_6 = arith.constant 0 : index
    %24 = vector.load %arg2[%c0_5, %c0_6] : memref<1x128xf32, #tpu.memory_space<vmem>>, vector<1x128xf32>
    %25 = vector.broadcast %24 : vector<1x128xf32> to vector<288x128xf32>
    %26 = arith.mulf %23, %25 : vector<288x128xf32>
    %c0_7 = arith.constant 0 : index
    %c0_8 = arith.constant 0 : index
    %27 = vector.load %arg3[%c0_7, %c0_8] : memref<1x128xf32, #tpu.memory_space<vmem>>, vector<1x128xf32>
    %28 = vector.broadcast %27 : vector<1x128xf32> to vector<288x128xf32>
    %29 = arith.addf %26, %28 : vector<288x128xf32>
    %cst = arith.constant 0.000000e+00 : f32
    %30 = vector.broadcast %cst : f32 to vector<288x128xf32>
    %31 = arith.maximumf %29, %30 : vector<288x128xf32>
    %32 = vector.broadcast %20 : vector<288x1xf32> to vector<288x128xf32>
    %33 = arith.mulf %31, %32 : vector<288x128xf32>
    %cst_9 = arith.constant 0.000000e+00 : bf16
    %34 = vector.broadcast %cst_9 : bf16 to vector<19x128xbf16>
    %c0_10 = arith.constant 0 : index
    %c0_11 = arith.constant 0 : index
    %35 = vector.load %arg9[%c0_10, %c0_11] : memref<342x128xbf16, #tpu.memory_space<vmem>>, vector<19x128xbf16>
    tpu.vector_store %arg9[%c0_10, %c0_11], %34 {strides = array<i32>} : memref<342x128xbf16, #tpu.memory_space<vmem>>, vector<19x128xbf16>,
    %cst_12 = arith.constant 0.000000e+00 : bf16
    %36 = vector.broadcast %cst_12 : bf16 to vector<35x128xbf16>
    %c307 = arith.constant 307 : index
    %c0_13 = arith.constant 0 : index
    %37 = vector.load %arg9[%c307, %c0_13] : memref<342x128xbf16, #tpu.memory_space<vmem>>, vector<35x128xbf16>
    tpu.vector_store %arg9[%c307, %c0_13], %36 {strides = array<i32>} : memref<342x128xbf16, #tpu.memory_space<vmem>>, vector<35x128xbf16>,
    %38 = arith.truncf %33 : vector<288x128xf32> to vector<288x128xbf16>
    %c19 = arith.constant 19 : index
    %c0_14 = arith.constant 0 : index
    %39 = vector.load %arg9[%c19, %c0_14] : memref<342x128xbf16, #tpu.memory_space<vmem>>, vector<288x128xbf16>
    tpu.vector_store %arg9[%c19, %c0_14], %38 {strides = array<i32>} : memref<342x128xbf16, #tpu.memory_space<vmem>>, vector<288x128xbf16>,
    %cst_15 = arith.constant 0.000000e+00 : f32
    %40 = vector.broadcast %cst_15 : f32 to vector<288x128xf32>
    %c0_16 = arith.constant 0 : index
    %c0_17 = arith.constant 0 : index
    %41 = vector.load %arg5[%c0_16, %c0_17] : memref<1x128xf32, #tpu.memory_space<vmem>>, vector<1x128xf32>
    %42 = vector.broadcast %41 : vector<1x128xf32> to vector<288x128xf32>
    %43 = arith.addf %40, %42 : vector<288x128xf32>
    %c0_18 = arith.constant 0 : index
    %c0_19 = arith.constant 0 : index
    %44 = vector.load %arg9[%c0_18, %c0_19] : memref<342x128xbf16, #tpu.memory_space<vmem>>, vector<288x128xbf16>
    %c0_20 = arith.constant 0 : index
    %c0_21 = arith.constant 0 : index
    %c0_22 = arith.constant 0 : index
    %45 = vector.load %arg4[%c0_20, %c0_21, %c0_22] : memref<9x128x128xbf16, #tpu.memory_space<vmem>>, vector<1x128x128xbf16>
    %46 = vector.shape_cast %45 : vector<1x128x128xbf16> to vector<128x128xbf16>
    %cst_23 = arith.constant dense<0.000000e+00> : vector<288x128xf32>
    %47 = tpu.matmul %44, %46, %cst_23 {dimension_numbers = #tpu.dot_dimension_numbers<[1], [0], [0], [1], [0, 0, 1, 1], [], []>} : vector<288x128xbf16>, vector<128x128xbf16>, vector<288x128xf32> -> vector<288x128xf32>
    %48 = arith.addf %43, %47 : vector<288x128xf32>
    %c1 = arith.constant 1 : index
    %c0_24 = arith.constant 0 : index
    %49 = vector.load %arg9[%c1, %c0_24] : memref<342x128xbf16, #tpu.memory_space<vmem>>, vector<288x128xbf16>
    %c1_25 = arith.constant 1 : index
    %c0_26 = arith.constant 0 : index
    %c0_27 = arith.constant 0 : index
    %50 = vector.load %arg4[%c1_25, %c0_26, %c0_27] : memref<9x128x128xbf16, #tpu.memory_space<vmem>>, vector<1x128x128xbf16>
    %51 = vector.shape_cast %50 : vector<1x128x128xbf16> to vector<128x128xbf16>
    %cst_28 = arith.constant dense<0.000000e+00> : vector<288x128xf32>
    %52 = tpu.matmul %49, %51, %cst_28 {dimension_numbers = #tpu.dot_dimension_numbers<[1], [0], [0], [1], [0, 0, 1, 1], [], []>} : vector<288x128xbf16>, vector<128x128xbf16>, vector<288x128xf32> -> vector<288x128xf32>
    %53 = arith.addf %48, %52 : vector<288x128xf32>
    %c2 = arith.constant 2 : index
    %c0_29 = arith.constant 0 : index
    %54 = vector.load %arg9[%c2, %c0_29] : memref<342x128xbf16, #tpu.memory_space<vmem>>, vector<288x128xbf16>
    %c2_30 = arith.constant 2 : index
    %c0_31 = arith.constant 0 : index
    %c0_32 = arith.constant 0 : index
    %55 = vector.load %arg4[%c2_30, %c0_31, %c0_32] : memref<9x128x128xbf16, #tpu.memory_space<vmem>>, vector<1x128x128xbf16>
    %56 = vector.shape_cast %55 : vector<1x128x128xbf16> to vector<128x128xbf16>
    %cst_33 = arith.constant dense<0.000000e+00> : vector<288x128xf32>
    %57 = tpu.matmul %54, %56, %cst_33 {dimension_numbers = #tpu.dot_dimension_numbers<[1], [0], [0], [1], [0, 0, 1, 1], [], []>} : vector<288x128xbf16>, vector<128x128xbf16>, vector<288x128xf32> -> vector<288x128xf32>
    %58 = arith.addf %53, %57 : vector<288x128xf32>
    %c18 = arith.constant 18 : index
    %c0_34 = arith.constant 0 : index
    %59 = vector.load %arg9[%c18, %c0_34] : memref<342x128xbf16, #tpu.memory_space<vmem>>, vector<288x128xbf16>
    %c3 = arith.constant 3 : index
    %c0_35 = arith.constant 0 : index
    %c0_36 = arith.constant 0 : index
    %60 = vector.load %arg4[%c3, %c0_35, %c0_36] : memref<9x128x128xbf16, #tpu.memory_space<vmem>>, vector<1x128x128xbf16>
    %61 = vector.shape_cast %60 : vector<1x128x128xbf16> to vector<128x128xbf16>
    %cst_37 = arith.constant dense<0.000000e+00> : vector<288x128xf32>
    %62 = tpu.matmul %59, %61, %cst_37 {dimension_numbers = #tpu.dot_dimension_numbers<[1], [0], [0], [1], [0, 0, 1, 1], [], []>} : vector<288x128xbf16>, vector<128x128xbf16>, vector<288x128xf32> -> vector<288x128xf32>
    %63 = arith.addf %58, %62 : vector<288x128xf32>
    %c19_38 = arith.constant 19 : index
    %c0_39 = arith.constant 0 : index
    %64 = vector.load %arg9[%c19_38, %c0_39] : memref<342x128xbf16, #tpu.memory_space<vmem>>, vector<288x128xbf16>
    %c4 = arith.constant 4 : index
    %c0_40 = arith.constant 0 : index
    %c0_41 = arith.constant 0 : index
    %65 = vector.load %arg4[%c4, %c0_40, %c0_41] : memref<9x128x128xbf16, #tpu.memory_space<vmem>>, vector<1x128x128xbf16>
    %66 = vector.shape_cast %65 : vector<1x128x128xbf16> to vector<128x128xbf16>
    %cst_42 = arith.constant dense<0.000000e+00> : vector<288x128xf32>
    %67 = tpu.matmul %64, %66, %cst_42 {dimension_numbers = #tpu.dot_dimension_numbers<[1], [0], [0], [1], [0, 0, 1, 1], [], []>} : vector<288x128xbf16>, vector<128x128xbf16>, vector<288x128xf32> -> vector<288x128xf32>
    %68 = arith.addf %63, %67 : vector<288x128xf32>
    %c20 = arith.constant 20 : index
    %c0_43 = arith.constant 0 : index
    %69 = vector.load %arg9[%c20, %c0_43] : memref<342x128xbf16, #tpu.memory_space<vmem>>, vector<288x128xbf16>
    %c5 = arith.constant 5 : index
    %c0_44 = arith.constant 0 : index
    %c0_45 = arith.constant 0 : index
    %70 = vector.load %arg4[%c5, %c0_44, %c0_45] : memref<9x128x128xbf16, #tpu.memory_space<vmem>>, vector<1x128x128xbf16>
    %71 = vector.shape_cast %70 : vector<1x128x128xbf16> to vector<128x128xbf16>
    %cst_46 = arith.constant dense<0.000000e+00> : vector<288x128xf32>
    %72 = tpu.matmul %69, %71, %cst_46 {dimension_numbers = #tpu.dot_dimension_numbers<[1], [0], [0], [1], [0, 0, 1, 1], [], []>} : vector<288x128xbf16>, vector<128x128xbf16>, vector<288x128xf32> -> vector<288x128xf32>
    %73 = arith.addf %68, %72 : vector<288x128xf32>
    %c36 = arith.constant 36 : index
    %c0_47 = arith.constant 0 : index
    %74 = vector.load %arg9[%c36, %c0_47] : memref<342x128xbf16, #tpu.memory_space<vmem>>, vector<288x128xbf16>
    %c6 = arith.constant 6 : index
    %c0_48 = arith.constant 0 : index
    %c0_49 = arith.constant 0 : index
    %75 = vector.load %arg4[%c6, %c0_48, %c0_49] : memref<9x128x128xbf16, #tpu.memory_space<vmem>>, vector<1x128x128xbf16>
    %76 = vector.shape_cast %75 : vector<1x128x128xbf16> to vector<128x128xbf16>
    %cst_50 = arith.constant dense<0.000000e+00> : vector<288x128xf32>
    %77 = tpu.matmul %74, %76, %cst_50 {dimension_numbers = #tpu.dot_dimension_numbers<[1], [0], [0], [1], [0, 0, 1, 1], [], []>} : vector<288x128xbf16>, vector<128x128xbf16>, vector<288x128xf32> -> vector<288x128xf32>
    %78 = arith.addf %73, %77 : vector<288x128xf32>
    %c37 = arith.constant 37 : index
    %c0_51 = arith.constant 0 : index
    %79 = vector.load %arg9[%c37, %c0_51] : memref<342x128xbf16, #tpu.memory_space<vmem>>, vector<288x128xbf16>
    %c7 = arith.constant 7 : index
    %c0_52 = arith.constant 0 : index
    %c0_53 = arith.constant 0 : index
    %80 = vector.load %arg4[%c7, %c0_52, %c0_53] : memref<9x128x128xbf16, #tpu.memory_space<vmem>>, vector<1x128x128xbf16>
    %81 = vector.shape_cast %80 : vector<1x128x128xbf16> to vector<128x128xbf16>
    %cst_54 = arith.constant dense<0.000000e+00> : vector<288x128xf32>
    %82 = tpu.matmul %79, %81, %cst_54 {dimension_numbers = #tpu.dot_dimension_numbers<[1], [0], [0], [1], [0, 0, 1, 1], [], []>} : vector<288x128xbf16>, vector<128x128xbf16>, vector<288x128xf32> -> vector<288x128xf32>
    %83 = arith.addf %78, %82 : vector<288x128xf32>
    %c38 = arith.constant 38 : index
    %c0_55 = arith.constant 0 : index
    %84 = vector.load %arg9[%c38, %c0_55] : memref<342x128xbf16, #tpu.memory_space<vmem>>, vector<288x128xbf16>
    %c8 = arith.constant 8 : index
    %c0_56 = arith.constant 0 : index
    %c0_57 = arith.constant 0 : index
    %85 = vector.load %arg4[%c8, %c0_56, %c0_57] : memref<9x128x128xbf16, #tpu.memory_space<vmem>>, vector<1x128x128xbf16>
    %86 = vector.shape_cast %85 : vector<1x128x128xbf16> to vector<128x128xbf16>
    %cst_58 = arith.constant dense<0.000000e+00> : vector<288x128xf32>
    %87 = tpu.matmul %84, %86, %cst_58 {dimension_numbers = #tpu.dot_dimension_numbers<[1], [0], [0], [1], [0, 0, 1, 1], [], []>} : vector<288x128xbf16>, vector<128x128xbf16>, vector<288x128xf32> -> vector<288x128xf32>
    %88 = arith.addf %83, %87 : vector<288x128xf32>
    %89 = vector.shape_cast %88 : vector<288x128xf32> to vector<16x18x128xf32>
    %90 = vector.extract_strided_slice %89 {offsets = [0, 0, 0], sizes = [16, 16, 128], strides = [1, 1, 1]} : vector<16x18x128xf32> to vector<16x16x128xf32>
    %91 = vector.shape_cast %90 : vector<16x16x128xf32> to vector<256x128xf32>
    %92 = arith.truncf %91 : vector<256x128xf32> to vector<256x128xbf16>
    %c0_59 = arith.constant 0 : index
    %c0_60 = arith.constant 0 : index
    %c0_61 = arith.constant 0 : index
    %93 = vector.load %arg6[%c0_59, %c0_60, %c0_61] : memref<1x256x128xbf16, #tpu.memory_space<vmem>>, vector<1x256x128xbf16>
    %94 = vector.shape_cast %93 : vector<1x256x128xbf16> to vector<256x128xbf16>
    %95 = vector.shape_cast %92 : vector<256x128xbf16> to vector<1x256x128xbf16>
    tpu.vector_store %arg6[%c0_59, %c0_60, %c0_61], %95 {strides = array<i32>} : memref<1x256x128xbf16, #tpu.memory_space<vmem>>, vector<1x256x128xbf16>,
    %cst_62 = arith.constant dense<0.000000e+00> : vector<128xf32>
    %96 = vector.multi_reduction <add>, %91, %cst_62 [0] : vector<256x128xf32> to vector<128xf32>
    %97 = vector.shape_cast %96 : vector<128xf32> to vector<1x128xf32>
    %c0_63 = arith.constant 0 : index
    %c0_64 = arith.constant 0 : index
    %c0_65 = arith.constant 0 : index
    %98 = vector.load %arg7[%c0_63, %c0_64, %c0_65] : memref<1x1x128xf32, #tpu.memory_space<vmem>>, vector<1x1x128xf32>
    %99 = vector.shape_cast %98 : vector<1x1x128xf32> to vector<1x128xf32>
    %100 = vector.shape_cast %97 : vector<1x128xf32> to vector<1x1x128xf32>
    tpu.vector_store %arg7[%c0_63, %c0_64, %c0_65], %100 {strides = array<i32>} : memref<1x1x128xf32, #tpu.memory_space<vmem>>, vector<1x1x128xf32>,
    %101 = arith.mulf %91, %91 : vector<256x128xf32>
    %cst_66 = arith.constant dense<0.000000e+00> : vector<128xf32>
    %102 = vector.multi_reduction <add>, %101, %cst_66 [0] : vector<256x128xf32> to vector<128xf32>
    %103 = vector.shape_cast %102 : vector<128xf32> to vector<1x128xf32>
    %c0_67 = arith.constant 0 : index
    %c0_68 = arith.constant 0 : index
    %c0_69 = arith.constant 0 : index
    %104 = vector.load %arg8[%c0_67, %c0_68, %c0_69] : memref<1x1x128xf32, #tpu.memory_space<vmem>>, vector<1x1x128xf32>
    %105 = vector.shape_cast %104 : vector<1x1x128xf32> to vector<1x128xf32>
    %106 = vector.shape_cast %103 : vector<1x128xf32> to vector<1x1x128xf32>
    tpu.vector_store %arg8[%c0_67, %c0_68, %c0_69], %106 {strides = array<i32>} : memref<1x1x128xf32, #tpu.memory_space<vmem>>, vector<1x1x128xf32>,
    return
  }
  func.func @transform_0(%arg0: i32) -> (i32, i32, i32) {
    %c0_i32 = arith.constant 0 : i32
    %c0_i32_0 = arith.constant 0 : i32
    %c0_i32_1 = arith.constant 0 : i32
    return %arg0, %c0_i32, %c0_i32_0 : i32, i32, i32
  }
  func.func @transform_1(%arg0: i32) -> (i32, i32) {
    %c0_i32 = arith.constant 0 : i32
    %c0_i32_0 = arith.constant 0 : i32
    %c0_i32_1 = arith.constant 0 : i32
    return %c0_i32, %c0_i32_0 : i32, i32
  }
  func.func @transform_2(%arg0: i32) -> (i32, i32) {
    %c0_i32 = arith.constant 0 : i32
    %c0_i32_0 = arith.constant 0 : i32
    %c0_i32_1 = arith.constant 0 : i32
    return %c0_i32, %c0_i32_0 : i32, i32
  }
  func.func @transform_3(%arg0: i32) -> (i32, i32, i32) {
    %c0_i32 = arith.constant 0 : i32
    %c0_i32_0 = arith.constant 0 : i32
    %c0_i32_1 = arith.constant 0 : i32
    %c0_i32_2 = arith.constant 0 : i32
    return %c0_i32, %c0_i32_0, %c0_i32_1 : i32, i32, i32
  }
  func.func @transform_4(%arg0: i32) -> (i32, i32) {
    %c0_i32 = arith.constant 0 : i32
    %c0_i32_0 = arith.constant 0 : i32
    %c0_i32_1 = arith.constant 0 : i32
    return %c0_i32, %c0_i32_0 : i32, i32
  }
  func.func @transform_5(%arg0: i32) -> (i32, i32, i32) {
    %c0_i32 = arith.constant 0 : i32
    %c0_i32_0 = arith.constant 0 : i32
    %c0_i32_1 = arith.constant 0 : i32
    return %arg0, %c0_i32, %c0_i32_0 : i32, i32, i32
  }
  func.func @transform_6(%arg0: i32) -> (i32, i32, i32) {
    %c0_i32 = arith.constant 0 : i32
    %c0_i32_0 = arith.constant 0 : i32
    %c0_i32_1 = arith.constant 0 : i32
    return %arg0, %c0_i32, %c0_i32_0 : i32, i32, i32
  }
  func.func @transform_7(%arg0: i32) -> (i32, i32, i32) {
    %c0_i32 = arith.constant 0 : i32
    %c0_i32_0 = arith.constant 0 : i32
    %c0_i32_1 = arith.constant 0 : i32
    return %arg0, %c0_i32, %c0_i32_0 : i32, i32, i32
  }
}

module attributes {stable_mosaic.version = 11 : i64} {
  func.func @_bn_relu_nchw_kernel(%arg0: i32, %arg1: memref<1x256x128xbf16, #tpu.memory_space<vmem>>, %arg2: memref<1x128xf32, #tpu.memory_space<vmem>>, %arg3: memref<1x128xf32, #tpu.memory_space<vmem>>, %arg4: memref<1x8x256xf32, #tpu.memory_space<vmem>>) attributes {dimension_semantics = [#tpu.dimension_semantics<parallel>], iteration_bounds = array<i64: 2>, scalar_prefetch = 0 : i64, scratch_operands = 0 : i64, tpu.core_type = #tpu.core_type<tc>, window_params = [{transform_indices = @transform_0, window_bounds = array<i64: 1, 256, 128>}, {pipeline_mode = #tpu.pipeline_mode<synchronous>, transform_indices = @transform_1, window_bounds = array<i64: 1, 128>}, {pipeline_mode = #tpu.pipeline_mode<synchronous>, transform_indices = @transform_2, window_bounds = array<i64: 1, 128>}, {transform_indices = @transform_3, window_bounds = array<i64: 1, 8, 256>}]} {
    %c0 = arith.constant 0 : index
    %c0_0 = arith.constant 0 : index
    %c0_1 = arith.constant 0 : index
    %0 = vector.load %arg1[%c0, %c0_0, %c0_1] : memref<1x256x128xbf16, #tpu.memory_space<vmem>>, vector<1x256x128xbf16>
    %1 = vector.shape_cast %0 : vector<1x256x128xbf16> to vector<256x128xbf16>
    %2 = arith.extf %1 : vector<256x128xbf16> to vector<256x128xf32>
    %c0_2 = arith.constant 0 : index
    %c0_3 = arith.constant 0 : index
    %3 = vector.load %arg2[%c0_2, %c0_3] : memref<1x128xf32, #tpu.memory_space<vmem>>, vector<1x128xf32>
    %4 = vector.broadcast %3 : vector<1x128xf32> to vector<256x128xf32>
    %5 = arith.mulf %2, %4 : vector<256x128xf32>
    %c0_4 = arith.constant 0 : index
    %c0_5 = arith.constant 0 : index
    %6 = vector.load %arg3[%c0_4, %c0_5] : memref<1x128xf32, #tpu.memory_space<vmem>>, vector<1x128xf32>
    %7 = vector.broadcast %6 : vector<1x128xf32> to vector<256x128xf32>
    %8 = arith.addf %5, %7 : vector<256x128xf32>
    %cst = arith.constant 0.000000e+00 : f32
    %9 = vector.broadcast %cst : f32 to vector<256x128xf32>
    %10 = arith.maximumf %8, %9 : vector<256x128xf32>
    %11 = tpu.transpose %10, [1, 0] : vector<256x128xf32> -> vector<128x256xf32>
    %12 = vector.extract_strided_slice %11 {offsets = [0, 0], sizes = [8, 256], strides = [1, 1]} : vector<128x256xf32> to vector<8x256xf32>
    %c0_6 = arith.constant 0 : index
    %c0_7 = arith.constant 0 : index
    %c0_8 = arith.constant 0 : index
    %13 = vector.load %arg4[%c0_6, %c0_7, %c0_8] : memref<1x8x256xf32, #tpu.memory_space<vmem>>, vector<1x8x256xf32>
    %14 = vector.shape_cast %13 : vector<1x8x256xf32> to vector<8x256xf32>
    %15 = vector.shape_cast %12 : vector<8x256xf32> to vector<1x8x256xf32>
    tpu.vector_store %arg4[%c0_6, %c0_7, %c0_8], %15 {strides = array<i32>} : memref<1x8x256xf32, #tpu.memory_space<vmem>>, vector<1x8x256xf32>,
    return
  }
  func.func @transform_0(%arg0: i32) -> (i32, i32, i32) {
    %c0_i32 = arith.constant 0 : i32
    %c0_i32_0 = arith.constant 0 : i32
    %c0_i32_1 = arith.constant 0 : i32
    return %arg0, %c0_i32, %c0_i32_0 : i32, i32, i32
  }
  func.func @transform_1(%arg0: i32) -> (i32, i32) {
    %c0_i32 = arith.constant 0 : i32
    %c0_i32_0 = arith.constant 0 : i32
    %c0_i32_1 = arith.constant 0 : i32
    return %c0_i32, %c0_i32_0 : i32, i32
  }
  func.func @transform_2(%arg0: i32) -> (i32, i32) {
    %c0_i32 = arith.constant 0 : i32
    %c0_i32_0 = arith.constant 0 : i32
    %c0_i32_1 = arith.constant 0 : i32
    return %c0_i32, %c0_i32_0 : i32, i32
  }
  func.func @transform_3(%arg0: i32) -> (i32, i32, i32) {
    %c0_i32 = arith.constant 0 : i32
    %c0_i32_0 = arith.constant 0 : i32
    %c0_i32_1 = arith.constant 0 : i32
    return %arg0, %c0_i32, %c0_i32_0 : i32, i32, i32
  }
}

</mosaic_0001>

<bundles_post_ra>
// kernel: double_conv.5
= control target key start
LH: loop header
LB: loop body
LE: loop exit
PB: predicated region body
PF: predicated region fallthrough
CT: control target
= control target key end

     0   :  { %s596_s12 = smov 0   ;;  %s709_s0 = inlined_call_operand.vmem [shape: bf16[2,256,128], index: 0, kind: input, shape index: {}]   ;;  %s710_s1 = inlined_call_operand.vmem [shape: f32[1,128], index: 1, kind: input, shape index: {}]   ;;  %s711_s2 = inlined_call_operand.vmem [shape: f32[1,128], index: 2, kind: input, shape index: {}]   ;;  %s712_s3 = inlined_call_operand.vmem [shape: f32[2,8,256], index: 3, kind: output, shape index: {}]  }
   0x1 LB: > { %s466_s13 = sadd.s32 4294967295, %s574_s12   ;;  %p470_p0 = scmp.ge.s32.totalorder %s574_s12, 1  ;;  %s574_s12 = sphi %s596_s12, %s13_s12  }
   0x2   : > { %p137_p1 = scmp.lt.s32.totalorder %s574_s12, 3 }
   0x4   : > { %p138_p2 = pnand %p470_p0, %p137_p1 }
   0x5   : > { %p161_p3 = scmp.lt.s32.totalorder (!%p138_p2), %s466_s13, 1 }
   0x6   : > { %141 = sbr.rel (%p138_p2) target bundleno = 150 (0x96), region = 32 }
   0xb   : > { %s714_s13 = smov (!%p161_p3, %s466_s13), 1  ;;  %v615_v0 = vld [vmem:[%s710_s1] ss:$0 sm:$0xff] }
   0xc   : > { %s479_s14 = sshll.u32 %s714_s13, 7  ;;  %v624_v9 = vld [vmem:[%s711_s2] ss:$0 sm:$0xff]  ;;  %s480_s22 = sshll.u32 %s714_s13, 4 }
   0xd   : > { %s610_s17 = scalar_lea.vmem %s709_s0, %s479_s14  ;;  %s170_s25 = scalar_lea.vmem %s712_s3, %s480_s22 }
   0xe   : > { %v552_v1 = vld [vmem:[%s610_s17 + $0x40] sm:$0xff]   ;;  %v553_v3 = vld [vmem:[%s610_s17 + $0x48] sm:$0xff]   ;;  %v554_v24 = vld [vmem:[%s610_s17 + $0x50] sm:$0xff]  }
   0xf   : > { %v482_v2 = vld [vmem:[%s610_s17] sm:$0xff]   ;;  %v515_v4 = vunpack.c.l.bf16 %v552_v1  ;;  %v516_v6 = vunpack.c.h.bf16 %v552_v1  ;;  %v545_v8 = vld [vmem:[%s610_s17 + $0x8] sm:$0xff]   ;;  %v519_v10 = vunpack.c.l.bf16 %v553_v3  ;;  %v520_v18 = vunpack.c.h.bf16 %v553_v3  ;;  %v546_v25 = vld [vmem:[%s610_s17 + $0x10] sm:$0xff]  }
  0x10   : > { %v483_v5 = vunpack.c.l.bf16 %v482_v2  ;;  %v484_v7 = vunpack.c.h.bf16 %v482_v2  ;;  %v487_v11 = vunpack.c.l.bf16 %v545_v8  ;;  %v488_v19 = vunpack.c.h.bf16 %v545_v8  ;;  %v555_v44 = vld [vmem:[%s610_s17 + $0x58] sm:$0xff]   ;;  %v556_v62 = vld [vmem:[%s610_s17 + $0x60] sm:$0xff]  }
  0x11   : > { %v258_v12 = vmul.f32 %v515_v4, %v615_v0  ;;  %v259_v14 = vmul.f32 %v516_v6, %v615_v0  ;;  %v260_v16 = vmul.f32 %v519_v10, %v615_v0  ;;  %v261_v30 = vmul.f32 %v520_v18, %v615_v0  ;;  %v547_v45 = vld [vmem:[%s610_s17 + $0x18] sm:$0xff]   ;;  %v548_v63 = vld [vmem:[%s610_s17 + $0x20] sm:$0xff]   ;;  %v557_v18 = vld [vmem:[%s610_s17 + $0x68] sm:$0xff]  }
  0x12   : > { %v242_v13 = vmul.f32 %v483_v5, %v615_v0  ;;  %v243_v15 = vmul.f32 %v484_v7, %v615_v0  ;;  %v244_v17 = vmul.f32 %v487_v11, %v615_v0  ;;  %v245_v31 = vmul.f32 %v488_v19, %v615_v0  ;;  %v549_v19 = vld [vmem:[%s610_s17 + $0x28] sm:$0xff]  }
  0x13   : > { %v297_v20 = vadd.f32 %v624_v9, %v258_v12  ;;  %v298_v22 = vadd.f32 %v624_v9, %v259_v14  ;;  %v299_v28 = vadd.f32 %v624_v9, %v260_v16  ;;  %v523_v34 = vunpack.c.l.bf16 %v554_v24 }
  0x14   : > { %v281_v21 = vadd.f32 %v624_v9, %v242_v13  ;;  %v282_v23 = vadd.f32 %v624_v9, %v243_v15  ;;  %v283_v29 = vadd.f32 %v624_v9, %v244_v17  ;;  %v491_v35 = vunpack.c.l.bf16 %v546_v25 }
  0x15   : > { %v329_v26 = vmax.f32 %v297_v20, 0.0  ;;  %v330_v32 = vmax.f32 %v298_v22, 0.0  ;;  %v331_v36 = vmax.f32 %v299_v28, 0.0  ;;  %v300_v37 = vadd.f32 %v624_v9, %v261_v30 }
  0x16   : > { %v313_v27 = vmax.f32 %v281_v21, 0.0  ;;  %v314_v33 = vmax.f32 %v282_v23, 0.0  ;;  %v284_v38 = vadd.f32 %v624_v9, %v245_v31  ;;  %v524_v39 = vunpack.c.h.bf16 %v554_v24 }
  0x17   : > { %377 = vxpose.xlu1.b32.start [1/16] (narrow) %v329_v26, 8  ;;  %v315_v40 = vmax.f32 %v283_v29, 0.0  ;;  %v262_v41 = vmul.f32 %v523_v34, %v615_v0  ;;  %v246_v42 = vmul.f32 %v491_v35, %v615_v0  ;;  %v492_v43 = vunpack.c.h.bf16 %v546_v25 }
  0x18   : > { %345 = vxpose.xlu0.b32.start [1/16] (narrow) %v313_v27, 8  ;;  %v332_v46 = vmax.f32 %v300_v37, 0.0  ;;  %v263_v47 = vmul.f32 %v524_v39, %v615_v0  ;;  %v527_v48 = vunpack.c.l.bf16 %v555_v44  ;;  %v495_v49 = vunpack.c.l.bf16 %v547_v45  ;;  %v550_v37 = vld [vmem:[%s610_s17 + $0x30] sm:$0xff]  }
  0x19   : > { %v316_v50 = vmax.f32 %v284_v38, 0.0  ;;  %v301_v51 = vadd.f32 %v624_v9, %v262_v41  ;;  %v285_v52 = vadd.f32 %v624_v9, %v246_v42  ;;  %v247_v53 = vmul.f32 %v492_v43, %v615_v0 }
  0x1a   : > { %v264_v54 = vmul.f32 %v527_v48, %v615_v0  ;;  %v248_v55 = vmul.f32 %v495_v49, %v615_v0  ;;  %v528_v56 = vunpack.c.h.bf16 %v555_v44  ;;  %v496_v57 = vunpack.c.h.bf16 %v547_v45 }
  0x1b   : > { %378 = vxpose.xlu1.b32.cont [2/16] (narrow) %v330_v32, 8  ;;  %v333_v58 = vmax.f32 %v301_v51, 0.0  ;;  %v317_v59 = vmax.f32 %v285_v52, 0.0  ;;  %v302_v60 = vadd.f32 %v624_v9, %v263_v47  ;;  %v286_v61 = vadd.f32 %v624_v9, %v247_v53 }
  0x1c   : > { %346 = vxpose.xlu0.b32.cont [2/16] (narrow) %v314_v33, 8  ;;  %v303_v1 = vadd.f32 %v624_v9, %v264_v54  ;;  %v265_v2 = vmul.f32 %v528_v56, %v615_v0  ;;  %v249_v3 = vmul.f32 %v496_v57, %v615_v0  ;;  %v531_v4 = vunpack.c.l.bf16 %v556_v62  ;;  %v559_v54 = vld [vmem:[%s610_s17 + $0x78] sm:$0xff]  }
  0x1d   : > { %v334_v5 = vmax.f32 %v302_v60, 0.0  ;;  %v318_v6 = vmax.f32 %v286_v61, 0.0  ;;  %v287_v7 = vadd.f32 %v624_v9, %v248_v55  ;;  %v499_v8 = vunpack.c.l.bf16 %v548_v63  ;;  %v551_v55 = vld [vmem:[%s610_s17 + $0x38] sm:$0xff]  }
  0x1e   : > { %v335_v10 = vmax.f32 %v303_v1, 0.0  ;;  %v304_v11 = vadd.f32 %v624_v9, %v265_v2  ;;  %v288_v12 = vadd.f32 %v624_v9, %v249_v3  ;;  %v266_v13 = vmul.f32 %v531_v4, %v615_v0 }
  0x1f   : > { %379 = vxpose.xlu1.b32.cont [3/16] (narrow) %v331_v36, 8  ;;  %v319_v14 = vmax.f32 %v287_v7, 0.0  ;;  %v250_v15 = vmul.f32 %v499_v8, %v615_v0  ;;  %v532_v16 = vunpack.c.h.bf16 %v556_v62  ;;  %v500_v17 = vunpack.c.h.bf16 %v548_v63  ;;  %v558_v36 = vld [vmem:[%s610_s17 + $0x70] sm:$0xff]  }
  0x20   : > { %347 = vxpose.xlu0.b32.cont [3/16] (narrow) %v315_v40, 8  ;;  %v336_v20 = vmax.f32 %v304_v11, 0.0  ;;  %v305_v21 = vadd.f32 %v624_v9, %v266_v13  ;;  %v535_v22 = vunpack.c.l.bf16 %v557_v18  ;;  %v503_v23 = vunpack.c.l.bf16 %v549_v19 }
  0x21   : > { %v320_v24 = vmax.f32 %v288_v12, 0.0  ;;  %v289_v25 = vadd.f32 %v624_v9, %v250_v15  ;;  %v267_v26 = vmul.f32 %v532_v16, %v615_v0  ;;  %v251_v27 = vmul.f32 %v500_v17, %v615_v0 }
  0x22   : > { %v268_v28 = vmul.f32 %v535_v22, %v615_v0  ;;  %v252_v29 = vmul.f32 %v503_v23, %v615_v0  ;;  %v536_v30 = vunpack.c.h.bf16 %v557_v18  ;;  %v504_v31 = vunpack.c.h.bf16 %v549_v19 }
  0x23   : > { %380 = vxpose.xlu1.b32.cont [4/16] (narrow) %v332_v46, 8  ;;  %v337_v32 = vmax.f32 %v305_v21, 0.0  ;;  %v321_v33 = vmax.f32 %v289_v25, 0.0  ;;  %v306_v34 = vadd.f32 %v624_v9, %v267_v26  ;;  %v290_v35 = vadd.f32 %v624_v9, %v251_v27 }
  0x24   : > { %348 = vxpose.xlu0.b32.cont [4/16] (narrow) %v316_v50, 8  ;;  %v307_v38 = vadd.f32 %v624_v9, %v268_v28  ;;  %v269_v39 = vmul.f32 %v536_v30, %v615_v0  ;;  %v253_v40 = vmul.f32 %v504_v31, %v615_v0  ;;  %v539_v41 = vunpack.c.l.bf16 %v558_v36 }
  0x25   : > { %v338_v42 = vmax.f32 %v306_v34, 0.0  ;;  %v322_v43 = vmax.f32 %v290_v35, 0.0  ;;  %v291_v44 = vadd.f32 %v624_v9, %v252_v29  ;;  %v507_v45 = vunpack.c.l.bf16 %v550_v37 }
  0x26   : > { %v339_v46 = vmax.f32 %v307_v38, 0.0  ;;  %v308_v47 = vadd.f32 %v624_v9, %v269_v39  ;;  %v292_v48 = vadd.f32 %v624_v9, %v253_v40  ;;  %v270_v49 = vmul.f32 %v539_v41, %v615_v0 }
  0x27   : > { %381 = vxpose.xlu1.b32.cont [5/16] (narrow) %v333_v58, 8  ;;  %v323_v50 = vmax.f32 %v291_v44, 0.0  ;;  %v254_v51 = vmul.f32 %v507_v45, %v615_v0  ;;  %v540_v52 = vunpack.c.h.bf16 %v558_v36  ;;  %v508_v53 = vunpack.c.h.bf16 %v550_v37 }
  0x28   : > { %349 = vxpose.xlu0.b32.cont [5/16] (narrow) %v317_v59, 8  ;;  %v340_v56 = vmax.f32 %v308_v47, 0.0  ;;  %v309_v57 = vadd.f32 %v624_v9, %v270_v49  ;;  %v543_v58 = vunpack.c.l.bf16 %v559_v54  ;;  %v511_v59 = vunpack.c.l.bf16 %v551_v55 }
  0x29   : > { %v324_v60 = vmax.f32 %v292_v48, 0.0  ;;  %v293_v61 = vadd.f32 %v624_v9, %v254_v51  ;;  %v271_v62 = vmul.f32 %v540_v52, %v615_v0  ;;  %v255_v63 = vmul.f32 %v508_v53, %v615_v0 }
  0x2a   : > { %v272_v1 = vmul.f32 %v543_v58, %v615_v0  ;;  %v256_v2 = vmul.f32 %v511_v59, %v615_v0  ;;  %v544_v3 = vunpack.c.h.bf16 %v559_v54  ;;  %v512_v4 = vunpack.c.h.bf16 %v551_v55 }
  0x2b   : > { %382 = vxpose.xlu1.b32.cont [6/16] (narrow) %v334_v5, 8  ;;  %v341_v5 = vmax.f32 %v309_v57, 0.0  ;;  %v310_v7 = vadd.f32 %v624_v9, %v271_v62  ;;  %v294_v8 = vadd.f32 %v624_v9, %v255_v63 }
  0x2c   : > { %350 = vxpose.xlu0.b32.cont [6/16] (narrow) %v318_v6, 8  ;;  %v325_v6 = vmax.f32 %v293_v61, 0.0  ;;  %v257_v11 = vmul.f32 %v512_v4, %v615_v0  ;;  %v295_v15 = vadd.f32 %v624_v9, %v256_v2 }
  0x2d   : > { %v342_v12 = vmax.f32 %v310_v7, 0.0  ;;  %v326_v13 = vmax.f32 %v294_v8, 0.0 }
  0x2e   : > { %v327_v17 = vmax.f32 %v295_v15, 0.0  ;;  %v296_v19 = vadd.f32 %v624_v9, %v257_v11 }
  0x2f   : > { %383 = vxpose.xlu1.b32.cont [7/16] (narrow) %v335_v10, 8  ;;  %v273_v10 = vmul.f32 %v544_v3, %v615_v0 }
  0x30   : > { %351 = vxpose.xlu0.b32.cont [7/16] (narrow) %v319_v14, 8  ;;  %v311_v14 = vadd.f32 %v624_v9, %v272_v1 }
  0x31   : > { %v312_v18 = vadd.f32 %v624_v9, %v273_v10 }
  0x32   : > { %v343_v16 = vmax.f32 %v311_v14, 0.0 }
  0x33   : > { %384 = vxpose.xlu1.b32.cont [8/16] (narrow) %v336_v20, 8  ;;  %v344_v0 = vmax.f32 %v312_v18, 0.0  ;;  %v328_v20 = vmax.f32 %v296_v19, 0.0 }
  0x34   : > { %352 = vxpose.xlu0.b32.cont [8/16] (narrow) %v320_v24, 8 }
  0x37   : > { %385 = vxpose.xlu1.b32.cont [9/16] (narrow) %v337_v32, 8 }
  0x38   : > { %353 = vxpose.xlu0.b32.cont [9/16] (narrow) %v321_v33, 8 }
  0x3b   : > { %386 = vxpose.xlu1.b32.cont [10/16] (narrow) %v338_v42, 8 }
  0x3c   : > { %354 = vxpose.xlu0.b32.cont [10/16] (narrow) %v322_v43, 8 }
  0x3f   : > { %387 = vxpose.xlu1.b32.cont [11/16] (narrow) %v339_v46, 8 }
  0x40   : > { %355 = vxpose.xlu0.b32.cont [11/16] (narrow) %v323_v50, 8 }
  0x43   : > { %388 = vxpose.xlu1.b32.cont [12/16] (narrow) %v340_v56, 8 }
  0x44   : > { %356 = vxpose.xlu0.b32.cont [12/16] (narrow) %v324_v60, 8 }
  0x47   : > { %389 = vxpose.xlu1.b32.cont [13/16] (narrow) %v341_v5, 8 }
  0x48   : > { %357 = vxpose.xlu0.b32.cont [13/16] (narrow) %v325_v6, 8 }
  0x4b   : > { %390 = vxpose.xlu1.b32.cont [14/16] (narrow) %v342_v12, 8 }
  0x4c   : > { %358 = vxpose.xlu0.b32.cont [14/16] (narrow) %v326_v13, 8 }
  0x4f   : > { %391 = vxpose.xlu1.b32.cont [15/16] (narrow) %v343_v16, 8 }
  0x50   : > { %359 = vxpose.xlu0.b32.cont [15/16] (narrow) %v327_v17, 8 }
  0x53   : > { %392 = vxpose.xlu1.b32.end [16/16] (narrow) %v344_v0, 8 }
  0x54   : > { %360 = vxpose.xlu0.b32.end [16/16] (narrow) %v328_v20, 8 }
  0x93   : > { %v393_v21 = vpop.trf.xlu1 }
  0x94   : > { %v361_v22 = vpop.trf.xlu0  ;;  %410 = vst [vmem:[%s170_s25 + $0x8] sm:$0xff] %v393_v21 }
  0x95   : > { %409 = vst [vmem:[%s170_s25] sm:$0xff] %v361_v22 }
  0x96 PF: > { %s13_s12 = sadd.s32 1, %s574_s12  }
  0x97   : > { %p10_p4 = scmp.ge.s32.totalorder %s13_s12, 4  }
  0x99   :  { %12 = sbr.rel (!%p10_p4) target bundleno = 1 (0x1), region = 62 }

// kernel: double_conv.3
= control target key start
LH: loop header
LB: loop body
LE: loop exit
PB: predicated region body
PF: predicated region fallthrough
CT: control target
= control target key end

     0   :  { %s2271_s18 = smov 0   ;;  %s3406_s0 = inlined_call_operand.vmem [shape: bf16[2,288,36], index: 0, kind: input, shape index: {}]   ;;  %s3407_s1 = inlined_call_operand.vmem [shape: bf16[36,128], index: 1, kind: input, shape index: {}]   ;;  %s3408_s2 = inlined_call_operand.vmem [shape: f32[1,128], index: 2, kind: input, shape index: {}]   ;;  %s3409_s3 = inlined_call_operand.vmem [shape: bf16[2,288,128], index: 3, kind: output, shape index: {0}]   ;;  %s3410_s4 = inlined_call_operand.vmem [shape: f32[2,1,128], index: 4, kind: output, shape index: {1}]   ;;  %s3411_s5 = inlined_call_operand.vmem [shape: f32[2,1,128], index: 5, kind: output, shape index: {2}]  }
   0x1 LB: > { %s1794_s19 = sadd.s32 4294967295, %s2238_s18   ;;  %p1798_p0 = scmp.ge.s32.totalorder %s2238_s18, 1  ;;  %s2238_s18 = sphi %s2271_s18, %s16_s18  }
   0x2   : > { %p192_p1 = scmp.lt.s32.totalorder %s2238_s18, 3 }
   0x4   : > { %p193_p2 = pnand %p1798_p0, %p192_p1 }
   0x6   : > { %196 = sbr.rel (%p193_p2) target bundleno = 313 (0x139), region = 32 }
   0xb   : > { %v2211_v0 = vld [vmem:[%s3407_s1 + $0x10] ss:$0 sps:$4 sm:$0x33]   ;;  %vm451_vm0 = vcmask 1041408   ;;  %v2212_v1 = vld [vmem:[%s3407_s1 + $0x8] sm:$0xff]   ;;  %p226_p3 = scmp.lt.s32.totalorder %s1794_s19, 1  ;;  %v812_v22 = vlaneseq }
   0xc   : > { %2127 = vmatprep.subr.msk.bf16.mxu0 %vm451_vm0, %v2211_v0  ;;  %v453_v2 = vsel %vm451_vm0, %v2211_v0, 0  ;;  %2128 = vmatprep.subr.msk.bf16.mxu1 %vm451_vm0, %v2211_v0  ;;  %v2213_v3 = vld [vmem:[%s3407_s1] sm:$0xff]   ;;  %vm396_vm1 = vcmask 293888  }
   0xd   : > { %2080 = vmatpush3.bf16.msra.mxu0 %v453_v2  ;;  %s3538_s19 = smov (!%p226_p3, %s1794_s19), 1  ;;  %2124 = vmatpush3.bf16.msra.mxu1 %v453_v2  ;;  %v2334_v23 = vshrl.u32 %v812_v22, 7  ;;  %v3412_v22 = vmov 0.0  }
   0xe   : > { %2081 = vmatprep.subr.bf16.mxu0 %v2212_v1  ;;  %2122 = vmatprep.subr.bf16.mxu1 %v2212_v1  ;;  %s2129_s26 = smul.u32 144, %s3538_s19  ;;  %s238_s12 = scalar_lea.vmem %s3410_s4, %s3538_s19 }
   0xf   : > { %v815_v24 = vadd.s32 16, %v2334_v23  ;;  %v2341_v27 = vmul.u32.u64.low 3817748708, %v2334_v23  ;;  %v2342_v28 = vmul.u32.u64.high 3817748708, %v2334_v23, %v2341_v27  ;;  %v816_v29 = vadd.s32 24, %v2334_v23  ;;  %s241_s15 = scalar_lea.vmem %s3411_s5, %s3538_s19 }
  0x10   : > { %s2296_s29 = scalar_lea.vmem %s3406_s0, %s2129_s26  ;;  %v814_v34 = vadd.s32 8, %v2334_v23  ;;  %v819_v37 = vadd.s32 48, %v2334_v23  ;;  %v817_v40 = vadd.s32 32, %v2334_v23  ;;  %v2357_v41 = vadd.s32 56, %v2334_v23  ;;  %s3031_s9 = scalar_lea.vmem %s3409_s3, %s2129_s26 }
  0x11   : > { %2082 = vmatpush3.bf16.msra.mxu0 %v2212_v1  ;;  %2125 = vmatpush3.bf16.msra.mxu1 %v2212_v1  ;;  %v2214_v4 = vld [vmem:[%s2296_s29] sm:$0xff]   ;;  %v2215_v5 = vld [vmem:[%s2296_s29 + $0x8] sm:$0xff]   ;;  %v2216_v6 = vld [vmem:[%s2296_s29 + $0x10] sm:$0xff]   ;;  %v2337_v25 = vmul.u32.u64.low 3817748708, %v815_v24  ;;  %v2338_v26 = vmul.u32.u64.high 3817748708, %v815_v24, %v2337_v25  ;;  %v855_v33 = vshrl.u32 %v2342_v28, 4 }
  0x12   : > { %2083 = vmatprep.subr.bf16.mxu0 %v2213_v3  ;;  %2123 = vmatprep.subr.bf16.mxu1 %v2213_v3  ;;  %v2217_v7 = vld [vmem:[%s2296_s29 + $0x18] sm:$0xff]   ;;  %v2223_v8 = vld [vmem:[%s2296_s29 + $0x50] sm:$0xff]   ;;  %v2218_v9 = vld [vmem:[%s2296_s29 + $0x20] sm:$0xff]   ;;  %v2346_v31 = vmul.u32.u64.low 3817748708, %v816_v29  ;;  %v2347_v32 = vmul.u32.u64.high 3817748708, %v816_v29, %v2346_v31  ;;  %v2365_v47 = vadd.s32 40, %v2334_v23 }
  0x13   : > { %2085 = vmatprep.mubr.msk.bf16.mxu0 %vm396_vm1, %v2214_v4  ;;  %2105 = vmatprep.mubr.msk.bf16.mxu1 %vm396_vm1, %v2223_v8  ;;  %v2225_v10 = vld [vmem:[%s2296_s29 + $0x58] sm:$0xff]   ;;  %v2226_v11 = vld [vmem:[%s2296_s29 + $0x60] sm:$0xff]   ;;  %v2227_v12 = vld [vmem:[%s2296_s29 + $0x68] sm:$0xff]   ;;  %v877_v30 = vshrl.u32 %v2338_v26, 4  ;;  %v856_v36 = vmul.u32 18, %v855_v33  ;;  %v2375_v52 = vadd.s32 80, %v2334_v23 }
  0x14   : > { %v2219_v13 = vld [vmem:[%s2296_s29 + $0x28] sm:$0xff]   ;;  %v2228_v14 = vld [vmem:[%s2296_s29 + $0x70] sm:$0xff]   ;;  %v2229_v16 = vld [vmem:[%s2296_s29 + $0x78] sm:$0xff]   ;;  %v2352_v38 = vmul.u32.u64.low 3817748708, %v814_v34  ;;  %v2353_v39 = vmul.u32.u64.high 3817748708, %v814_v34, %v2352_v38  ;;  %v888_v43 = vshrl.u32 %v2347_v32, 4 }
  0x15   : > { %2084 = vmatpush3.bf16.msra.mxu0 %v2213_v3  ;;  %2126 = vmatpush3.bf16.msra.mxu1 %v2213_v3  ;;  %v2220_v15 = vld [vmem:[%s2296_s29 + $0x30] sm:$0xff]   ;;  %v2221_v17 = vld [vmem:[%s2296_s29 + $0x38] sm:$0xff]   ;;  %v2230_v18 = vld [vmem:[%s2296_s29 + $0x80] sm:$0xff]   ;;  %v878_v35 = vmul.u32 18, %v877_v30  ;;  %v857_v44 = vsub.s32 %v2334_v23, %v856_v36  ;;  %v2361_v45 = vmul.u32.u64.low 3817748708, %v819_v37  ;;  %v2362_v46 = vmul.u32.u64.high 3817748708, %v819_v37, %v2361_v45 }
  0x16   : > { %v2222_v19 = vld [vmem:[%s2296_s29 + $0x40] sm:$0xff]   ;;  %v2231_v20 = vld [vmem:[%s2296_s29 + $0x88] sm:$0xff]   ;;  %v2367_v48 = vmul.u32.u64.low 3817748708, %v817_v40  ;;  %v2368_v49 = vmul.u32.u64.high 3817748708, %v817_v40, %v2367_v48  ;;  %v2371_v50 = vmul.u32.u64.low 3817748708, %v2357_v41  ;;  %v2372_v51 = vmul.u32.u64.high 3817748708, %v2357_v41, %v2371_v50 }
  0x17   : > { %v2224_v21 = vld [vmem:[%s2296_s29 + $0x48] sm:$0xff]   ;;  %v879_v42 = vsub.s32 %v815_v24, %v878_v35  ;;  %v889_v53 = vmul.u32 18, %v888_v43  ;;  %v2378_v54 = vadd.s32 64, %v2334_v23  ;;  %vm1245_vm4 = vcmp.ne.s32.totalorder %v857_v44, 0 }
  0x18   : > { %2086 = vmatmul.mubr.msk.bf16.vlgmr.msra.gmra.mxu0 %vm396_vm1, %v2215_v5  ;;  %2106 = vmatmul.mubr.msk.bf16.vlgmr.msra.gmra.mxu1 %vm396_vm1, %v2225_v10  ;;  %vm1281_vm5 = vcmp.lt.s32.totalorder %v857_v44, 0  ;;  %v2381_v55 = vmul.u32.u64.low 3817748708, %v2365_v47  ;;  %v2382_v56 = vmul.u32.u64.high 3817748708, %v2365_v47, %v2381_v55  ;;  %v866_v58 = vshrl.u32 %v2353_v39, 4 }
  0x19   : > { %2089 = vmatprep.mubr.msk.bf16.mxu0 %vm396_vm1, %v2216_v6  ;;  %2109 = vmatprep.mubr.msk.bf16.mxu1 %vm396_vm1, %v2226_v11  ;;  %vm1247_vm2 = vcmp.ne.s32.totalorder %v879_v42, 0  ;;  %vm1283_vm3 = vcmp.lt.s32.totalorder %v879_v42, 0  ;;  %v1355_v57 = vadd.s32 18, %v879_v42  ;;  %v1353_v60 = vadd.s32 18, %v857_v44  ;;  %vm2393_vm7 = vmand %vm1281_vm5, %vm1245_vm4 }
  0x1a   : > { %vm2385_vm6 = vmand %vm1283_vm3, %vm1247_vm2  ;;  %v2390_v61 = vmul.u32.u64.low 3817748708, %v2375_v52  ;;  %v2391_v62 = vmul.u32.u64.high 3817748708, %v2375_v52, %v2390_v61  ;;  %v2397_v0 = vsub.s32 %v816_v29, %v889_v53  ;;  %v2404_v3 = vadd.s32 88, %v2334_v23 }
  0x1b   : > { %v2400_v1 = vmul.u32.u64.low 3817748708, %v2378_v54  ;;  %v2401_v2 = vmul.u32.u64.high 3817748708, %v2378_v54, %v2400_v1  ;;  %v921_v4 = vshrl.u32 %v2362_v46, 4  ;;  %v1391_v5 = vsel %vm2385_vm6, %v1355_v57, %v879_v42 }
  0x1c   : > { %v867_v6 = vmul.u32 18, %v866_v58  ;;  %v1389_v8 = vsel %vm2393_vm7, %v1353_v60, %v857_v44  ;;  %vm1248_vm8 = vcmp.ne.s32.totalorder %v2397_v0, 0  ;;  %vm1284_vm9 = vcmp.lt.s32.totalorder %v2397_v0, 0 }
  0x1d   : > { %v2416_v10 = vmul.u32.u64.low 3817748708, %v2404_v3  ;;  %v2417_v11 = vmul.u32.u64.high 3817748708, %v2404_v3, %v2416_v10  ;;  %vm1427_vm10 = vcmp.lt.s32.totalorder %v1391_v5, 16  ;;  %vm1425_vm11 = vcmp.lt.s32.totalorder %v1389_v8, 16  ;;  %vm2423_vm12 = vmand %vm1284_vm9, %vm1248_vm8 }
  0x1e   : > { %v2433_v24 = vsel %vm1427_vm10, 1.0, %v3412_v22  ;;  %v2436_v25 = vsel %vm1425_vm11, 1.0, %v3412_v22  ;;  %v2447_v30 = vadd.s32 112, %v2334_v23  ;;  %v2454_v33 = vadd.s32 96, %v2334_v23 }
  0x1f   : > { %v976_v35 = vshrl.u32 %v2417_v11, 4  ;;  %v2477_v43 = vadd.s32 120, %v2334_v23  ;;  %v2639_v50 = vadd.s32 160, %v2334_v23  ;;  %v2704_v11 = vadd.s32 208, %v2334_v23 }
  0x20   : > { %2090 = vmatmul.mubr.msk.bf16.gmra.mxu0 %vm396_vm1, %v2217_v7  ;;  %2110 = vmatmul.mubr.msk.bf16.gmra.mxu1 %vm396_vm1, %v2227_v12  ;;  %v899_v7 = vshrl.u32 %v2368_v49, 4  ;;  %v922_v12 = vmul.u32 18, %v921_v4  ;;  %v2482_v45 = vmul.u32.u64.low 3817748708, %v2454_v33  ;;  %v2483_v46 = vmul.u32.u64.high 3817748708, %v2454_v33, %v2482_v45 }
  0x21   : > { %2093 = vmatprep.mubr.msk.bf16.mxu0 %vm396_vm1, %v2218_v9  ;;  %2113 = vmatprep.mubr.msk.bf16.mxu1 %vm396_vm1, %v2228_v14  ;;  %v932_v9 = vshrl.u32 %v2372_v51, 4  ;;  %v1356_v14 = vadd.s32 18, %v2397_v0  ;;  %v977_v48 = vmul.u32 18, %v976_v35  ;;  %v2502_v51 = vadd.s32 104, %v2334_v23 }
  0x22   : > { %v2438_v26 = vsub.s32 %v819_v37, %v922_v12  ;;  %v987_v12 = vshrl.u32 %v2483_v46, 4 }
  0x23   : > { %v1392_v28 = vsel %vm2423_vm12, %v1356_v14, %v2397_v0  ;;  %v978_v61 = vsub.s32 %v2404_v3, %v977_v48  ;;  %v2567_v14 = vadd.s32 144, %v2334_v23  ;;  %v2690_v3 = vadd.s32 136, %v2334_v23 }
  0x24   : > { %vm1251_vm15 = vcmp.ne.s32.totalorder %v2438_v26, 0  ;;  %vm1287_vm0 = vcmp.lt.s32.totalorder %v2438_v26, 0 }
  0x25   : > { %vm2495_vm6 = vmand %vm1287_vm0, %vm1251_vm15  ;;  %vm2530_vm0 = vcmp.lt.s32.totalorder %v1392_v28, 16 }
  0x28   : > { %2094 = vmatmul.mubr.msk.bf16.gmra.mxu0 %vm396_vm1, %v2219_v13  ;;  %2114 = vmatmul.mubr.msk.bf16.gmra.mxu1 %vm396_vm1, %v2229_v16  ;;  %v910_v13 = vshrl.u32 %v2382_v56, 4  ;;  %v900_v16 = vmul.u32 18, %v899_v7  ;;  %v2513_v55 = vmul.u32.u64.low 3817748708, %v2477_v43  ;;  %v2514_v56 = vmul.u32.u64.high 3817748708, %v2477_v43, %v2513_v55 }
  0x29   : > { %2097 = vmatprep.mubr.msk.bf16.mxu0 %vm396_vm1, %v2220_v15  ;;  %2117 = vmatprep.mubr.msk.bf16.mxu1 %vm396_vm1, %v2230_v18  ;;  %v2421_v15 = vsub.s32 %v814_v34, %v867_v6  ;;  %v933_v18 = vmul.u32 18, %v932_v9  ;;  %v2653_v55 = vadd.s32 152, %v2334_v23 }
  0x2a   : > { %v911_v27 = vmul.u32 18, %v910_v13  ;;  %v2444_v29 = vsub.s32 %v817_v40, %v900_v16 }
  0x2b   : > { %vm1246_vm13 = vcmp.ne.s32.totalorder %v2421_v15, 0  ;;  %vm1282_vm14 = vcmp.lt.s32.totalorder %v2421_v15, 0  ;;  %v2451_v31 = vsub.s32 %v2357_v41, %v933_v18  ;;  %v1354_v38 = vadd.s32 18, %v2421_v15 }
  0x2c   : > { %v2465_v39 = vsub.s32 %v2365_v47, %v911_v27  ;;  %vm1249_vm2 = vcmp.ne.s32.totalorder %v2444_v29, 0  ;;  %v2473_v41 = vmul.u32.u64.low 3817748708, %v2447_v30  ;;  %v2474_v42 = vmul.u32.u64.high 3817748708, %v2447_v30, %v2473_v41 }
  0x2d   : > { %vm1285_vm3 = vcmp.lt.s32.totalorder %v2444_v29, 0  ;;  %vm1252_vm4 = vcmp.ne.s32.totalorder %v2451_v31, 0  ;;  %vm1288_vm5 = vcmp.lt.s32.totalorder %v2451_v31, 0  ;;  %v1360_v58 = vadd.s32 18, %v2451_v31 }
  0x2e   : > { %vm1250_vm7 = vcmp.ne.s32.totalorder %v2465_v39, 0  ;;  %vm1286_vm8 = vcmp.lt.s32.totalorder %v2465_v39, 0  ;;  %vm2507_vm9 = vmand %vm1285_vm3, %vm1249_vm2  ;;  %v1358_v59 = vadd.s32 18, %v2465_v39  ;;  %v1009_v7 = vshrl.u32 %v2474_v42, 4 }
  0x2f   : > { %vm2518_vm10 = vmand %vm1288_vm5, %vm1252_vm4  ;;  %vm1256_vm4 = vcmp.ne.s32.totalorder %v978_v61, 0  ;;  %vm1292_vm5 = vcmp.lt.s32.totalorder %v978_v61, 0  ;;  %v1020_v27 = vshrl.u32 %v2514_v56, 4  ;;  %v2620_v41 = vadd.s32 176, %v2334_v23 }
  0x30   : > { %2098 = vmatmul.mubr.msk.bf16.gmra.mxu0 %vm396_vm1, %v2221_v17  ;;  %2118 = vmatmul.mubr.msk.bf16.gmra.mxu1 %vm396_vm1, %v2231_v20  ;;  %v943_v20 = vshrl.u32 %v2401_v2, 4  ;;  %v2535_v1 = vmul.u32.u64.low 3817748708, %v2502_v51  ;;  %v2536_v2 = vmul.u32.u64.high 3817748708, %v2502_v51, %v2535_v1  ;;  %v1396_v9 = vsel %vm2518_vm10, %v1360_v58, %v2451_v31  ;;  %vm2594_vm10 = vmand %vm1292_vm5, %vm1256_vm4 }
  0x31   : > { %2101 = vmatprep.mubr.msk.bf16.mxu0 %vm396_vm1, %v2222_v19  ;;  %v965_v19 = vshrl.u32 %v2391_v62, 4  ;;  %v988_v31 = vmul.u32 18, %v987_v12  ;;  %v1021_v40 = vmul.u32 18, %v1020_v27  ;;  %v2661_v58 = vadd.s32 184, %v2334_v23 }
  0x32   : > { %v944_v34 = vmul.u32 18, %v943_v20  ;;  %v1364_v20 = vadd.s32 18, %v978_v61  ;;  %v2723_v27 = vadd.s32 192, %v2334_v23 }
  0x33   : > { %v966_v32 = vmul.u32 18, %v965_v19  ;;  %v989_v46 = vsub.s32 %v2454_v33, %v988_v31  ;;  %v2644_v33 = vmul.u32.u64.low 3817748708, %v2620_v41  ;;  %v2645_v53 = vmul.u32.u64.high 3817748708, %v2620_v41, %v2644_v33 }
  0x34   : > { %v945_v47 = vsub.s32 %v2378_v54, %v944_v34  ;;  %v1357_v54 = vadd.s32 18, %v2444_v29  ;;  %v2600_v34 = vmul.u32.u64.low 3817748708, %v2567_v14  ;;  %v2601_v35 = vmul.u32.u64.high 3817748708, %v2567_v14, %v2600_v34 }
  0x35   : > { %v967_v44 = vsub.s32 %v2375_v52, %v966_v32  ;;  %v1359_v52 = vadd.s32 18, %v2438_v26  ;;  %vm1293_vm4 = vcmp.lt.s32.totalorder %v989_v46, 0  ;;  %v1097_v17 = vshrl.u32 %v2645_v53, 4 }
  0x36   : > { %vm1289_vm15 = vcmp.lt.s32.totalorder %v945_v47, 0  ;;  %v1393_v5 = vsel %vm2507_vm9, %v1357_v54, %v2444_v29  ;;  %v1361_v6 = vadd.s32 18, %v945_v47  ;;  %v1053_v56 = vshrl.u32 %v2601_v35, 4 }
  0x37   : > { %vm1255_vm11 = vcmp.ne.s32.totalorder %v967_v44, 0  ;;  %vm1291_vm12 = vcmp.lt.s32.totalorder %v967_v44, 0  ;;  %v1363_v0 = vadd.s32 18, %v967_v44  ;;  %v1395_v4 = vsel %vm2495_vm6, %v1359_v52, %v2438_v26 }
  0x38   : > { %2102 = vmatmul.mubr.msk.bf16.gmra.mxu0 %vm396_vm1, %v2224_v21  ;;  %v2430_v21 = vadd.s32 72, %v2334_v23  ;;  %vm2467_vm1 = vmand %vm1282_vm14, %vm1246_vm13  ;;  %vm1253_vm14 = vcmp.ne.s32.totalorder %v945_v47, 0  ;;  %vm2574_vm6 = vcmp.lt.s32.totalorder %v1395_v4, 16  ;;  %v1010_v26 = vmul.u32 18, %v1009_v7 }
  0x39   : > { %v1390_v49 = vsel %vm2467_vm1, %v1354_v38, %v2421_v15  ;;  %vm2524_vm13 = vmand %vm1286_vm8, %vm1250_vm7  ;;  %v2572_v15 = vsel %vm2530_vm0, 1.0, %v3412_v22  ;;  %vm2578_vm7 = vcmp.lt.s32.totalorder %v1393_v5, 16  ;;  %vm1432_vm8 = vcmp.lt.s32.totalorder %v1396_v9, 16 }
  0x3a   : > { %v2458_v36 = vmul.u32.u64.low 3817748708, %v2430_v21  ;;  %v2459_v37 = vmul.u32.u64.high 3817748708, %v2430_v21, %v2458_v36  ;;  %vm2544_vm1 = vmand %vm1291_vm12, %vm1255_vm11  ;;  %vm2549_vm2 = vcmp.lt.s32.totalorder %v1390_v49, 16  ;;  %v1394_v10 = vsel %vm2524_vm13, %v1358_v59, %v2465_v39 }
  0x3b   : > { %vm2561_vm3 = vmand %vm1289_vm15, %vm1253_vm14  ;;  %v1399_v18 = vsel %vm2544_vm1, %v1363_v0, %v967_v44  ;;  %v2590_v28 = vsel %vm2549_vm2, 1.0, %v3412_v22  ;;  %vm1430_vm9 = vcmp.lt.s32.totalorder %v1394_v10, 16  ;;  %v2606_v36 = vsel %vm2574_vm6, 1.0, %v3412_v22 }
  0x3c   : > { %v954_v62 = vshrl.u32 %v2459_v37, 4  ;;  %v1397_v19 = vsel %vm2561_vm3, %v1361_v6, %v945_v47  ;;  %vm1435_vm11 = vcmp.lt.s32.totalorder %v1399_v18, 16  ;;  %v2611_v37 = vsel %vm2578_vm7, 1.0, %v3412_v22 }
  0x3d   : > { %vm1433_vm12 = vcmp.lt.s32.totalorder %v1397_v19, 16  ;;  %v998_v38 = vshrl.u32 %v2536_v2, 4  ;;  %v2617_v39 = vsub.s32 %v2447_v30, %v1010_v26  ;;  %v2623_v42 = vsel %vm1432_vm8, 1.0, %v3412_v22 }
  0x3e   : > { %v955_v13 = vmul.u32 18, %v954_v62  ;;  %v2626_v44 = vsel %vm1430_vm9, 1.0, %v3412_v22  ;;  %v2629_v45 = vsel %vm1435_vm11, 1.0, %v3412_v22  ;;  %v2633_v47 = vsel %vm1433_vm12, 1.0, %v3412_v22 }
  0x3f   : > { %v2636_v30 = vadd.s32 128, %v2334_v23  ;;  %v999_v49 = vmul.u32 18, %v998_v38  ;;  %vm1259_vm0 = vcmp.ne.s32.totalorder %v2617_v39, 0  ;;  %v1022_v52 = vsub.s32 %v2477_v43, %v1021_v40 }
  0x40   : > { %v956_v32 = vsub.s32 %v2430_v21, %v955_v13  ;;  %v1400_v21 = vsel %vm2594_vm10, %v1364_v20, %v978_v61  ;;  %vm1295_vm2 = vcmp.lt.s32.totalorder %v2617_v39, 0  ;;  %vm1257_vm3 = vcmp.ne.s32.totalorder %v989_v46, 0 }
  0x41   : > { %vm1436_vm15 = vcmp.lt.s32.totalorder %v1400_v21, 16  ;;  %v2657_v57 = vmul.u32.u64.low 3817748708, %v2636_v30  ;;  %v2658_v43 = vmul.u32.u64.high 3817748708, %v2636_v30, %v2657_v57  ;;  %v1000_v60 = vsub.s32 %v2502_v51, %v999_v49  ;;  %vm2675_vm5 = vmand %vm1295_vm2, %vm1259_vm0 }
  0x42   : > { %vm1254_vm13 = vcmp.ne.s32.totalorder %v956_v32, 0  ;;  %vm1290_vm14 = vcmp.lt.s32.totalorder %v956_v32, 0  ;;  %v1362_v48 = vadd.s32 18, %v956_v32  ;;  %v2664_v59 = vsel %vm1436_vm15, 1.0, %v3412_v22  ;;  %vm2681_vm7 = vmand %vm1293_vm4, %vm1257_vm3 }
  0x43   : > { %vm2647_vm1 = vmand %vm1290_vm14, %vm1254_vm13  ;;  %v2668_v61 = vmul.u32.u64.low 3817748708, %v2639_v50  ;;  %v2669_v62 = vmul.u32.u64.high 3817748708, %v2639_v50, %v2668_v61  ;;  %v1367_v1 = vadd.s32 18, %v2617_v39  ;;  %v1365_v2 = vadd.s32 18, %v989_v46 }
  0x44   : > { %v1398_v63 = vsel %vm2647_vm1, %v1362_v48, %v956_v32  ;;  %vm1260_vm6 = vcmp.ne.s32.totalorder %v1022_v52, 0  ;;  %vm1296_vm8 = vcmp.lt.s32.totalorder %v1022_v52, 0  ;;  %v1054_v6 = vmul.u32 18, %v1053_v56 }
  0x45   : > { %v2686_v4 = vmul.u32.u64.low 3817748708, %v2653_v55  ;;  %v2687_v5 = vmul.u32.u64.high 3817748708, %v2653_v55, %v2686_v4  ;;  %v2693_v7 = vmul.u32.u64.low 3817748708, %v2661_v58  ;;  %v2694_v8 = vmul.u32.u64.high 3817748708, %v2661_v58, %v2693_v7  ;;  %vm2714_vm12 = vmand %vm1296_vm8, %vm1260_vm6 }
  0x46   : > { %v2697_v9 = vadd.s32 168, %v2334_v23  ;;  %vm2699_vm9 = vcmp.lt.s32.totalorder %v1398_v63, 16  ;;  %vm1258_vm10 = vcmp.ne.s32.totalorder %v1000_v60, 0  ;;  %vm1294_vm11 = vcmp.lt.s32.totalorder %v1000_v60, 0 }
  0x47   : > { %v1403_v12 = vsel %vm2675_vm5, %v1367_v1, %v2617_v39  ;;  %v1401_v13 = vsel %vm2681_vm7, %v1365_v2, %v989_v46  ;;  %v1368_v16 = vadd.s32 18, %v1022_v52  ;;  %v1366_v19 = vadd.s32 18, %v1000_v60  ;;  %vm2725_vm13 = vmand %vm1294_vm11, %vm1258_vm10 }
  0x48   : > { %v2719_v20 = vmul.u32.u64.low 3817748708, %v2690_v3  ;;  %v2720_v26 = vmul.u32.u64.high 3817748708, %v2690_v3, %v2719_v20  ;;  %v1055_v31 = vsub.s32 %v2567_v14, %v1054_v6  ;;  %v1031_v32 = vshrl.u32 %v2658_v43, 4 }
  0x49   : > { %v2732_v34 = vmul.u32.u64.low 3817748708, %v2697_v9  ;;  %v2733_v35 = vmul.u32.u64.high 3817748708, %v2697_v9, %v2732_v34  ;;  %v1075_v38 = vshrl.u32 %v2669_v62, 4  ;;  %v2741_v40 = vadd.s32 216, %v2334_v23 }
  0x4a   : > { %v2737_v21 = vmul.u32.u64.low 3817748708, %v2704_v11  ;;  %v2738_v39 = vmul.u32.u64.high 3817748708, %v2704_v11, %v2737_v21  ;;  %vm2743_vm14 = vcmp.lt.s32.totalorder %v1403_v12, 16  ;;  %vm2747_vm15 = vcmp.lt.s32.totalorder %v1401_v13, 16 }
  0x4b   : > { %v1404_v48 = vsel %vm2714_vm12, %v1368_v16, %v1022_v52  ;;  %v1098_v49 = vmul.u32 18, %v1097_v17  ;;  %v1402_v33 = vsel %vm2725_vm13, %v1366_v19, %v1000_v60  ;;  %v1064_v53 = vshrl.u32 %v2687_v5, 4 }
  0x4c   : > { %v2757_v54 = vmul.u32.u64.low 3817748708, %v2723_v27  ;;  %v2758_v56 = vmul.u32.u64.high 3817748708, %v2723_v27, %v2757_v54  ;;  %vm1263_vm0 = vcmp.ne.s32.totalorder %v1055_v31, 0  ;;  %vm1299_vm1 = vcmp.lt.s32.totalorder %v1055_v31, 0 }
  0x4d   : > { %v1032_v57 = vmul.u32 18, %v1031_v32  ;;  %v1108_v43 = vshrl.u32 %v2694_v8, 4  ;;  %vm2761_vm2 = vcmp.lt.s32.totalorder %v1404_v48, 16  ;;  %v1076_v52 = vmul.u32 18, %v1075_v38  ;;  %vm2786_vm4 = vmand %vm1299_vm1, %vm1263_vm0 }
  0x4e   : > { %v2766_v62 = vmul.u32.u64.low 3817748708, %v2741_v40  ;;  %v2767_v63 = vmul.u32.u64.high 3817748708, %v2741_v40, %v2766_v62  ;;  %vm1438_vm3 = vcmp.lt.s32.totalorder %v1402_v33, 16  ;;  %v1371_v60 = vadd.s32 18, %v1055_v31 }
  0x4f   : > { %v2770_v0 = vsub.s32 %v2620_v41, %v1098_v49  ;;  %v2773_v1 = vadd.s32 200, %v2334_v23  ;;  %v2778_v2 = vsel %vm2699_vm9, 1.0, %v3412_v22  ;;  %v2783_v51 = vsel %vm2743_vm14, 1.0, %v3412_v22 }
  0x50   : > { %v1065_v41 = vmul.u32 18, %v1064_v53  ;;  %v1042_v5 = vshrl.u32 %v2720_v26, 4  ;;  %v2794_v6 = vsel %vm2747_vm15, 1.0, %v3412_v22  ;;  %v2797_v7 = vsub.s32 %v2636_v30, %v1032_v57 }
  0x51   : > { %v1109_v8 = vmul.u32 18, %v1108_v43  ;;  %v1086_v10 = vshrl.u32 %v2733_v35, 4  ;;  %v2803_v12 = vsel %vm2761_vm2, 1.0, %v3412_v22  ;;  %v2806_v13 = vsel %vm1438_vm3, 1.0, %v3412_v22 }
  0x52   : > { %v2809_v16 = vsub.s32 %v2639_v50, %v1076_v52  ;;  %v1141_v17 = vshrl.u32 %v2738_v39, 4  ;;  %v1407_v30 = vsel %vm2786_vm4, %v1371_v60, %v1055_v31  ;;  %vm1267_vm5 = vcmp.ne.s32.totalorder %v2770_v0, 0 }
  0x53   : > { %v2816_v18 = vmul.u32.u64.low 3817748708, %v2773_v1  ;;  %v2817_v19 = vmul.u32.u64.high 3817748708, %v2773_v1, %v2816_v18  ;;  %vm1303_vm6 = vcmp.lt.s32.totalorder %v2770_v0, 0  ;;  %v1066_v20 = vsub.s32 %v2653_v55, %v1065_v41 }
  0x54   : > { %v1043_v26 = vmul.u32 18, %v1042_v5  ;;  %v1119_v29 = vshrl.u32 %v2758_v56, 4  ;;  %vm1261_vm7 = vcmp.ne.s32.totalorder %v2797_v7, 0  ;;  %vm1297_vm8 = vcmp.lt.s32.totalorder %v2797_v7, 0  ;;  %vm2834_vm12 = vmand %vm1303_vm6, %vm1267_vm5 }
  0x55   : > { %v1110_v50 = vsub.s32 %v2661_v58, %v1109_v8  ;;  %v1087_v31 = vmul.u32 18, %v1086_v10  ;;  %vm1265_vm9 = vcmp.ne.s32.totalorder %v2809_v16, 0  ;;  %vm1301_vm10 = vcmp.lt.s32.totalorder %v2809_v16, 0  ;;  %vm2841_vm13 = vmand %vm1297_vm8, %vm1261_vm7 }
  0x56   : > { %v1142_v32 = vmul.u32 18, %v1141_v17  ;;  %v1152_v34 = vshrl.u32 %v2767_v63, 4  ;;  %vm2828_vm11 = vcmp.lt.s32.totalorder %v1407_v30, 16  ;;  %v1375_v58 = vadd.s32 18, %v2770_v0  ;;  %vm2850_vm0 = vmand %vm1301_vm10, %vm1265_vm9 }
  0x57   : > { %v1369_v38 = vadd.s32 18, %v2797_v7  ;;  %v1373_v21 = vadd.s32 18, %v2809_v16  ;;  %vm1264_vm14 = vcmp.ne.s32.totalorder %v1066_v20, 0  ;;  %vm1300_vm15 = vcmp.lt.s32.totalorder %v1066_v20, 0 }
  0x58   : > { %v2846_v46 = vsub.s32 %v2690_v3, %v1043_v26  ;;  %v1120_v14 = vmul.u32 18, %v1119_v29  ;;  %vm1268_vm1 = vcmp.ne.s32.totalorder %v1110_v50, 0  ;;  %vm1304_vm2 = vcmp.lt.s32.totalorder %v1110_v50, 0  ;;  %vm2871_vm3 = vmand %vm1300_vm15, %vm1264_vm14 }
  0x59   : > { %v1088_v49 = vsub.s32 %v2697_v9, %v1087_v31  ;;  %v2856_v33 = vadd.s32 240, %v2334_v23  ;;  %v2861_v53 = vsel %vm2828_vm11, 1.0, %v3412_v22  ;;  %v1372_v3 = vadd.s32 18, %v1066_v20  ;;  %vm2879_vm4 = vmand %vm1304_vm2, %vm1268_vm1 }
  0x5a   : > { %v1143_v54 = vsub.s32 %v2704_v11, %v1142_v32  ;;  %v1153_v56 = vmul.u32 18, %v1152_v34  ;;  %v1411_v57 = vsel %vm2834_vm12, %v1375_v58, %v2770_v0  ;;  %v1405_v9 = vsel %vm2841_vm13, %v1369_v38, %v2797_v7 }
  0x5b   : > { %v1376_v61 = vadd.s32 18, %v1110_v50  ;;  %v1130_v52 = vshrl.u32 %v2817_v19, 4  ;;  %v1409_v11 = vsel %vm2850_vm0, %v1373_v21, %v2809_v16  ;;  %vm1262_vm5 = vcmp.ne.s32.totalorder %v2846_v46, 0 }
  0x5c   : > { %vm1298_vm6 = vcmp.lt.s32.totalorder %v2846_v46, 0  ;;  %v1121_v63 = vsub.s32 %v2723_v27, %v1120_v14  ;;  %vm1266_vm7 = vcmp.ne.s32.totalorder %v1088_v49, 0  ;;  %vm1302_vm8 = vcmp.lt.s32.totalorder %v1088_v49, 0 }
  0x5d   : > { %v2887_v60 = vmul.u32.u64.low 3817748708, %v2856_v33  ;;  %v2888_v0 = vmul.u32.u64.high 3817748708, %v2856_v33, %v2887_v60  ;;  %v1408_v4 = vsel %vm2871_vm3, %v1372_v3, %v1066_v20  ;;  %vm1271_vm9 = vcmp.ne.s32.totalorder %v1143_v54, 0  ;;  %vm2895_vm11 = vmand %vm1298_vm6, %vm1262_vm5 }
  0x5e   : > { %vm1307_vm10 = vcmp.lt.s32.totalorder %v1143_v54, 0  ;;  %v1154_v41 = vsub.s32 %v2741_v40, %v1153_v56  ;;  %v1412_v5 = vsel %vm2879_vm4, %v1376_v61, %v1110_v50  ;;  %v1370_v27 = vadd.s32 18, %v2846_v46  ;;  %vm2903_vm12 = vmand %vm1302_vm8, %vm1266_vm7 }
  0x5f   : > { %v1131_v8 = vmul.u32 18, %v1130_v52  ;;  %v2901_v10 = vadd.s32 224, %v2334_v23  ;;  %v1374_v17 = vadd.s32 18, %v1088_v49  ;;  %v1379_v30 = vadd.s32 18, %v1143_v54  ;;  %vm2925_vm3 = vmand %vm1307_vm10, %vm1271_vm9 }
  0x60   : > { %vm1269_vm13 = vcmp.ne.s32.totalorder %v1121_v63, 0  ;;  %vm1305_vm14 = vcmp.lt.s32.totalorder %v1121_v63, 0  ;;  %vm2907_vm15 = vcmp.lt.s32.totalorder %v1411_v57, 16  ;;  %vm2911_vm0 = vcmp.lt.s32.totalorder %v1405_v9, 16  ;;  %v2992_v9 = vld [vmem:[%s3408_s2] ss:$0 sm:$0xff] }
  0x61   : > { %vm2915_vm1 = vcmp.lt.s32.totalorder %v1409_v11, 16  ;;  %vm2919_vm2 = vcmp.lt.s32.totalorder %v1408_v4, 16  ;;  %vm2929_vm4 = vcmp.lt.s32.totalorder %v1412_v5, 16  ;;  %v1377_v50 = vadd.s32 18, %v1121_v63  ;;  %vm2936_vm7 = vmand %vm1305_vm14, %vm1269_vm13 }
  0x62   : > { %vm1272_vm5 = vcmp.ne.s32.totalorder %v1154_v41, 0  ;;  %vm1308_vm6 = vcmp.lt.s32.totalorder %v1154_v41, 0  ;;  %v1406_v31 = vsel %vm2895_vm11, %v1370_v27, %v2846_v46  ;;  %v2941_v34 = vsub.s32 %v2773_v1, %v1131_v8 }
  0x63   : > { %v2944_v35 = vmul.u32.u64.low 3817748708, %v2901_v10  ;;  %v2945_v55 = vmul.u32.u64.high 3817748708, %v2901_v10, %v2944_v35  ;;  %v1410_v58 = vsel %vm2903_vm12, %v1374_v17, %v1088_v49  ;;  %v1415_v38 = vsel %vm2925_vm3, %v1379_v30, %v1143_v54  ;;  %vm2975_vm8 = vmand %vm1308_vm6, %vm1272_vm5 }
  0x64   : > { %v1380_v21 = vadd.s32 18, %v1154_v41  ;;  %v2952_v39 = vadd.s32 248, %v2334_v23  ;;  %v2957_v46 = vsel %vm2907_vm15, 1.0, %v3412_v22  ;;  %v2962_v1 = vsel %vm2911_vm0, 1.0, %v3412_v22 }
  0x65   : > { %v2967_v14 = vsel %vm2915_vm1, 1.0, %v3412_v22  ;;  %v2972_v48 = vsel %vm2919_vm2, 1.0, %v3412_v22  ;;  %v2982_v54 = vsel %vm2929_vm4, 1.0, %v3412_v22  ;;  %vm1442_vm9 = vcmp.lt.s32.totalorder %v1406_v31, 16 }
  0x66   : > { %v1413_v56 = vsel %vm2936_vm7, %v1377_v50, %v1121_v63  ;;  %v1185_v57 = vshrl.u32 %v2888_v0, 4  ;;  %vm1446_vm10 = vcmp.lt.s32.totalorder %v1410_v58, 16  ;;  %vm1451_vm11 = vcmp.lt.s32.totalorder %v1415_v38, 16 }
  0x67   : > { %vm1270_vm12 = vcmp.ne.s32.totalorder %v2941_v34, 0  ;;  %vm1306_vm13 = vcmp.lt.s32.totalorder %v2941_v34, 0  ;;  %v1416_v61 = vsel %vm2975_vm8, %v1380_v21, %v1154_v41  ;;  %v3001_v62 = vadd.s32 232, %v2334_v23 }
  0x68   : > { %v2997_v52 = vmul.u32.u64.low 3817748708, %v2952_v39  ;;  %v2998_v11 = vmul.u32.u64.high 3817748708, %v2952_v39, %v2997_v52  ;;  %v3005_v60 = vsel %vm1442_vm9, 1.0, %v3412_v22  ;;  %vm1449_vm14 = vcmp.lt.s32.totalorder %v1413_v56, 16  ;;  %vm3016_vm15 = vmand %vm1306_vm13, %vm1270_vm12 }
  0x69   : > { %v1378_v0 = vadd.s32 18, %v2941_v34  ;;  %v3009_v5 = vsel %vm1446_vm10, 1.0, %v3412_v22  ;;  %v3012_v41 = vsel %vm1451_vm11, 1.0, %v3412_v22  ;;  %v1186_v27 = vmul.u32 18, %v1185_v57 }
  0x6a   : > { %3500 = vst [vmem:[#allocation2_spill] sm:$0xff] %v3012_v41  ;;  %v3021_v8 = vadd.s32 272, %v2334_v23  ;;  %vm1452_vm0 = vcmp.lt.s32.totalorder %v1416_v61, 16  ;;  %v1163_v30 = vshrl.u32 %v2945_v55, 4  ;;  %v3034_v18 = vsel %vm1449_vm14, 1.0, %v3412_v22 }
  0x6b   : > { %v3037_v19 = vmul.u32.u64.low 3817748708, %v3001_v62  ;;  %v3038_v20 = vmul.u32.u64.high 3817748708, %v3001_v62, %v3037_v19  ;;  %v3042_v26 = vadd.s32 256, %v2334_v23  ;;  %v1414_v35 = vsel %vm3016_vm15, %v1378_v0, %v2941_v34 }
  0x6c   : > { %v3050_v58 = vsel %vm1452_vm0, 1.0, %v3412_v22  ;;  %v3053_v38 = vsub.s32 %v2856_v33, %v1186_v27  ;;  %v3056_v21 = vmul.u32.u64.low 3817748708, %v3021_v8  ;;  %v3057_v49 = vmul.u32.u64.high 3817748708, %v3021_v8, %v3056_v21 }
  0x6d   : > { %3503 = vst [vmem:[#allocation3_spill] sm:$0xff] %v3050_v58  ;;  %v1164_v57 = vmul.u32 18, %v1163_v30  ;;  %vm3064_vm1 = vcmp.lt.s32.totalorder %v1414_v35, 16  ;;  %v1196_v33 = vshrl.u32 %v2998_v11, 4  ;;  %v3070_v0 = vadd.s32 280, %v2334_v23 }
  0x6e   : > { %v3082_v11 = vadd.s32 18, %v3053_v38  ;;  %vm1275_vm5 = vcmp.ne.s32.totalorder %v3053_v38, 0  ;;  %vm1311_vm6 = vcmp.lt.s32.totalorder %v3053_v38, 0 }
  0x6f   : > { %vm3258_vm10 = vmand %vm1311_vm6, %vm1275_vm5 }
  0xd8   : > { %v2087_v3 = vpop.f32.mrf.mxu0  ;;  %v2107_v32 = vpop.f32.mrf.mxu1 }
  0xd9   : > { %v498_v16 = vadd.f32 %v2087_v3, %v2992_v9 }
  0xda   : > { %v489_v43 = vpop.f32.mrf.mxu0  ;;  %v569_v34 = vpop.f32.mrf.mxu1 }
  0xdb   : > { %v490_v63 = vadd.f32 %v2992_v9, %v489_v43 }
  0xdc   : > { %v2088_v4 = vpop.f32.mrf.mxu0  ;;  %v2108_v27 = vpop.f32.mrf.mxu1 }
  0xdd   : > { %v501_v17 = vadd.f32 %v2088_v4, %v2992_v9  ;;  %v1533_v29 = vmul.f32 %v2436_v25, %v490_v63  ;;  %v1535_v25 = vmul.f32 %v2433_v24, %v498_v16  ;;  %v3079_v19 = vadd.f32 %v2108_v27, %v2992_v9 }
  0xde   : > { %v492_v40 = vpop.f32.mrf.mxu0 }
  0xdf   : > { %v1959_v50 = vpack.c.bf16 %v501_v17, %v498_v16  ;;  %v493_v31 = vadd.f32 %v2992_v9, %v492_v40  ;;  %v1536_v43 = vmul.f32 %v2572_v15, %v501_v17  ;;  %v1611_v4 = vmul.f32 %v1533_v29, %v490_v63 }
  0xe0   : > { %v2091_v55 = vpop.f32.mrf.mxu0  ;;  %v3076_v40 = vadd.f32 %v2107_v32, %v2992_v9 }
  0xe1   : > { %2041 = vst [vmem:[%s3031_s9 + $0x8] sm:$0xff] %v1959_v50   ;;  %v1954_v3 = vpack.c.bf16 %v493_v31, %v490_v63  ;;  %v1534_v56 = vmul.f32 %v2590_v28, %v493_v31  ;;  %v514_v30 = vadd.f32 %v2091_v55, %v2992_v9  ;;  %v1613_v50 = vmul.f32 %v1535_v25, %v498_v16 }
  0xe2   : > { %v505_v61 = vpop.f32.mrf.mxu0  ;;  %v1614_v21 = vmul.f32 %v1536_v43, %v501_v17  ;;  %v2009_v32 = vpack.c.bf16 %v3079_v19, %v3076_v40 }
  0xe3   : > { %1955 = vst [vmem:[%s3031_s9] sm:$0xff] %v1954_v3   ;;  %v1569_v24 = vadd.f32 %v1534_v56, %v1533_v29  ;;  %v1612_v7 = vmul.f32 %v1534_v56, %v493_v31  ;;  %v506_v28 = vadd.f32 %v2992_v9, %v505_v61  ;;  %v572_v31 = vpop.f32.mrf.mxu1  ;;  %v3091_v56 = vsel %vm3064_vm1, 1.0, %v3412_v22 }
  0xe4   : > { %v2092_v15 = vpop.f32.mrf.mxu0  ;;  %2051 = vst [vmem:[%s3031_s9 + $0x58] sm:$0xff] %v2009_v32   ;;  %v3100_v52 = vadd.f32 %v2992_v9, %v572_v31  ;;  %v3108_v22 = vsub.s32 %v2901_v10, %v1164_v57  ;;  %v1197_v32 = vmul.u32 18, %v1196_v33 }
  0xe5   : > { %v1570_v63 = vadd.f32 %v1569_v24, %v1535_v25  ;;  %v1647_v35 = vadd.f32 %v1612_v7, %v1611_v4  ;;  %v1537_v29 = vmul.f32 %v2611_v37, %v506_v28  ;;  %v517_v55 = vadd.f32 %v2092_v15, %v2992_v9  ;;  %v2111_v17 = vpop.f32.mrf.mxu1 }
  0xe6   : > { %v508_v3 = vpop.f32.mrf.mxu0  ;;  %v3095_v37 = vadd.f32 %v2992_v9, %v569_v34  ;;  %v1539_v4 = vmul.f32 %v2606_v36, %v514_v30  ;;  %vm1273_vm2 = vcmp.ne.s32.totalorder %v3108_v22, 0  ;;  %vm1309_vm3 = vcmp.lt.s32.totalorder %v3108_v22, 0 }
  0xe7   : > { %v1648_v61 = vadd.f32 %v1647_v35, %v1613_v50  ;;  %v1571_v16 = vadd.f32 %v1570_v63, %v1536_v43  ;;  %v509_v25 = vadd.f32 %v2992_v9, %v508_v3  ;;  %v1615_v24 = vmul.f32 %v1537_v29, %v506_v28  ;;  %v585_v63 = vpop.f32.mrf.mxu1  ;;  %vm3184_vm4 = vmand %vm1309_vm3, %vm1273_vm2 }
  0xe8   : > { %v1969_v7 = vpack.c.bf16 %v517_v55, %v514_v30  ;;  %v2095_v27 = vpop.f32.mrf.mxu0  ;;  %v1540_v34 = vmul.f32 %v2623_v42, %v517_v55  ;;  %v2004_v36 = vpack.c.bf16 %v3100_v52, %v3095_v37 }
  0xe9   : > { %v1572_v15 = vadd.f32 %v1571_v16, %v1537_v29  ;;  %v1649_v50 = vadd.f32 %v1648_v61, %v1614_v21  ;;  %v1964_v35 = vpack.c.bf16 %v509_v25, %v506_v28  ;;  %v1538_v43 = vmul.f32 %v2626_v44, %v509_v25  ;;  %v2112_v44 = vpop.f32.mrf.mxu1 }
  0xea   : > { %2043 = vst [vmem:[%s3031_s9 + $0x18] sm:$0xff] %v1969_v7   ;;  %v521_v3 = vpop.f32.mrf.mxu0  ;;  %v1617_v61 = vmul.f32 %v1539_v4, %v514_v30  ;;  %v530_v16 = vadd.f32 %v2095_v27, %v2992_v9  ;;  %2050 = vst [vmem:[%s3031_s9 + $0x50] sm:$0xff] %v2004_v36   ;;  %v3115_v42 = vmul.u32.u64.low 3817748708, %v3042_v26  ;;  %v3116_v58 = vmul.u32.u64.high 3817748708, %v3042_v26, %v3115_v42 }
  0xeb   : > { %v1650_v31 = vadd.f32 %v1649_v50, %v1615_v24  ;;  %2042 = vst [vmem:[%s3031_s9 + $0x10] sm:$0xff] %v1964_v35   ;;  %v1573_v29 = vadd.f32 %v1572_v15, %v1538_v43  ;;  %v1616_v21 = vmul.f32 %v1538_v43, %v509_v25  ;;  %v522_v28 = vadd.f32 %v2992_v9, %v521_v3  ;;  %v588_v25 = vpop.f32.mrf.mxu1 }
  0xec   : > { %v2096_v7 = vpop.f32.mrf.mxu0  ;;  %v1618_v15 = vmul.f32 %v1540_v34, %v517_v55  ;;  %v3122_v30 = vadd.f32 %v2111_v17, %v2992_v9  ;;  %v1174_v27 = vshrl.u32 %v3038_v20, 4  ;;  %v3126_v35 = vadd.s32 264, %v2334_v23 }
  0xed   : > { %v1574_v10 = vadd.f32 %v1573_v29, %v1539_v4  ;;  %v1651_v57 = vadd.f32 %v1650_v31, %v1616_v21  ;;  %v1541_v33 = vmul.f32 %v2633_v47, %v522_v28  ;;  %v533_v24 = vadd.f32 %v2096_v7, %v2992_v9  ;;  %v2115_v47 = vpop.f32.mrf.mxu1 }
  0xee   : > { %v524_v50 = vpop.f32.mrf.mxu0  ;;  %3506 = vst [vmem:[#allocation4_spill] sm:$0xff] %v3122_v30  ;;  %v3129_v36 = vadd.f32 %v2112_v44, %v2992_v9  ;;  %v3135_v20 = vmul.u32.u64.low 3817748708, %v3070_v0  ;;  %v3136_v17 = vmul.u32.u64.high 3817748708, %v3070_v0, %v3135_v20 }
  0xef   : > { %v1652_v43 = vadd.f32 %v1651_v57, %v1617_v61  ;;  %v1575_v3 = vadd.f32 %v1574_v10, %v1540_v34  ;;  %v1979_v4 = vpack.c.bf16 %v533_v24, %v530_v16  ;;  %v525_v55 = vadd.f32 %v2992_v9, %v524_v50  ;;  %v601_v44 = vpop.f32.mrf.mxu1 }
  0xf0   : > { %3507 = vst [vmem:[#allocation5_spill] sm:$0xff] %v3129_v36  ;;  %v2099_v31 = vpop.f32.mrf.mxu0  ;;  %v1619_v34 = vmul.f32 %v1541_v33, %v522_v28  ;;  %v2019_v21 = vpack.c.bf16 %v3129_v36, %v3122_v30  ;;  %v1543_v61 = vmul.f32 %v2629_v45, %v530_v16  ;;  %v3145_v57 = vadd.s32 18, %v3108_v22 }
  0xf1   : > { %v1576_v23 = vadd.f32 %v1575_v3, %v1541_v33  ;;  %v1653_v29 = vadd.f32 %v1652_v43, %v1618_v15  ;;  %2045 = vst [vmem:[%s3031_s9 + $0x28] sm:$0xff] %v1979_v4   ;;  %v1974_v7 = vpack.c.bf16 %v525_v55, %v522_v28  ;;  %v1542_v42 = vmul.f32 %v2778_v2, %v525_v55  ;;  %v2116_v43 = vpop.f32.mrf.mxu1 }
  0xf2   : > { %v537_v10 = vpop.f32.mrf.mxu0  ;;  %v3149_v33 = vadd.f32 %v2992_v9, %v585_v63  ;;  %2053 = vst [vmem:[%s3031_s9 + $0x68] sm:$0xff] %v2019_v21   ;;  %v3153_v15 = vadd.f32 %v2992_v9, %v588_v25  ;;  %v1544_v45 = vmul.f32 %v2664_v59, %v533_v24  ;;  %v3158_v20 = vsub.s32 %v2952_v39, %v1197_v32 }
  0xf3   : > { %v1654_v50 = vadd.f32 %v1653_v29, %v1619_v34  ;;  %v538_v3 = vadd.f32 %v2992_v9, %v537_v10  ;;  %2044 = vst [vmem:[%s3031_s9 + $0x20] sm:$0xff] %v1974_v7   ;;  %v1577_v28 = vadd.f32 %v1576_v23, %v1542_v42  ;;  %v1620_v2 = vmul.f32 %v1542_v42, %v525_v55  ;;  %v604_v25 = vpop.f32.mrf.mxu1 }
  0xf4   : > { %v2100_v4 = vpop.f32.mrf.mxu0  ;;  %v546_v34 = vadd.f32 %v2099_v31, %v2992_v9  ;;  %v2014_v29 = vpack.c.bf16 %v3153_v15, %v3149_v33  ;;  %v1175_v21 = vmul.u32 18, %v1174_v27  ;;  %v1621_v10 = vmul.f32 %v1543_v61, %v530_v16 }
  0xf5   : > { %v549_v63 = vadd.f32 %v2100_v4, %v2992_v9  ;;  %v1578_v59 = vadd.f32 %v1577_v28, %v1543_v61  ;;  %v1655_v7 = vadd.f32 %v1654_v50, %v1620_v2  ;;  %v1545_v23 = vmul.f32 %v2794_v6, %v538_v3  ;;  %v3167_v32 = vpop.f32.mrf.mxu1 }
  0xf6   : > { %v540_v55 = vpop.f32.mrf.mxu0  ;;  %2052 = vst [vmem:[%s3031_s9 + $0x60] sm:$0xff] %v2014_v29   ;;  %v3170_v31 = vmul.u32.u64.low 3817748708, %v3126_v35  ;;  %v3171_v4 = vmul.u32.u64.high 3817748708, %v3126_v35, %v3170_v31  ;;  %v1622_v36 = vmul.f32 %v1544_v45, %v533_v24  ;;  %v1229_v61 = vshrl.u32 %v3057_v49, 4 }
  0xf7   : > { %v1989_v42 = vpack.c.bf16 %v549_v63, %v546_v34  ;;  %v541_v39 = vadd.f32 %v2992_v9, %v540_v55  ;;  %v1656_v41 = vadd.f32 %v1655_v7, %v1621_v10  ;;  %v1579_v27 = vadd.f32 %v1578_v59, %v1544_v45  ;;  %v617_v29 = vpop.f32.mrf.mxu1 }
  0xf8   : > { %v2103_v16 = vpop.f32.mrf.mxu0  ;;  %v1547_v6 = vmul.f32 %v2783_v51, %v546_v34  ;;  %v3178_v2 = vadd.f32 %v2115_v47, %v2992_v9  ;;  %v1623_v30 = vmul.f32 %v1545_v23, %v538_v3  ;;  %v3189_v51 = vadd.f32 %v2116_v43, %v2992_v9 }
  0xf9   : > { %2047 = vst [vmem:[%s3031_s9 + $0x38] sm:$0xff] %v1989_v42   ;;  %v1984_v50 = vpack.c.bf16 %v541_v39, %v538_v3  ;;  %v1546_v28 = vmul.f32 %v2806_v13, %v541_v39  ;;  %v1580_v55 = vadd.f32 %v1579_v27, %v1545_v23  ;;  %v1657_v31 = vadd.f32 %v1656_v41, %v1622_v36  ;;  %v2120_v7 = vpop.f32.mrf.mxu1 }
  0xfa   : > { %v553_v24 = vpop.f32.mrf.mxu0  ;;  %v1548_v13 = vmul.f32 %v2803_v12, %v549_v63  ;;  %v3197_v41 = vadd.f32 %v2992_v9, %v601_v44  ;;  %v2029_v43 = vpack.c.bf16 %v3189_v51, %v3178_v2  ;;  %v3202_v12 = vadd.f32 %v2992_v9, %v604_v25 }
  0xfb   : > { %2046 = vst [vmem:[%s3031_s9 + $0x30] sm:$0xff] %v1984_v50   ;;  %v1624_v47 = vmul.f32 %v1546_v28, %v541_v39  ;;  %v554_v10 = vadd.f32 %v2992_v9, %v553_v24  ;;  %v1658_v36 = vadd.f32 %v1657_v31, %v1623_v30  ;;  %v1581_v3 = vadd.f32 %v1580_v55, %v1546_v28  ;;  %v620_v24 = vpop.f32.mrf.mxu1 }
  0xfc   : > { %v2104_v59 = vpop.f32.mrf.mxu0  ;;  %v1625_v23 = vmul.f32 %v1547_v6, %v546_v34  ;;  %v562_v42 = vadd.f32 %v2103_v16, %v2992_v9  ;;  %v1417_v30 = vsel %vm3184_vm4, %v3145_v57, %v3108_v22  ;;  %2055 = vst [vmem:[%s3031_s9 + $0x78] sm:$0xff] %v2029_v43   ;;  %v2024_v34 = vpack.c.bf16 %v3202_v12, %v3197_v41 }
  0xfd   : > { %v565_v39 = vadd.f32 %v2104_v59, %v2992_v9  ;;  %v1582_v44 = vadd.f32 %v1581_v3, %v1547_v6  ;;  %v1659_v27 = vadd.f32 %v1658_v36, %v1624_v47  ;;  %v1549_v50 = vmul.f32 %v2962_v1, %v554_v10 }
  0xfe   : > { %v556_v28 = vpop.f32.mrf.mxu0  ;;  %vm1276_vm7 = vcmp.ne.s32.totalorder %v3158_v20, 0  ;;  %v3217_v55 = vsub.s32 %v3001_v62, %v1175_v21  ;;  %v1626_v31 = vmul.f32 %v1548_v13, %v549_v63  ;;  %vm3219_vm8 = vcmp.lt.s32.totalorder %v1417_v30, 16  ;;  %2054 = vst [vmem:[%s3031_s9 + $0x70] sm:$0xff] %v2024_v34  }
  0xff   : > { %v1999_v25 = vpack.c.bf16 %v565_v39, %v562_v42  ;;  %v557_v16 = vadd.f32 %v2992_v9, %v556_v28  ;;  %v1660_v22 = vadd.f32 %v1659_v27, %v1625_v23  ;;  %v1583_v57 = vadd.f32 %v1582_v44, %v1548_v13 }
 0x100   : > { %v1207_v6 = vshrl.u32 %v3116_v58, 4  ;;  %v1551_v45 = vmul.f32 %v2861_v53, %v562_v42  ;;  %v1218_v62 = vshrl.u32 %v3171_v4, 4  ;;  %v1627_v21 = vmul.f32 %v1549_v50, %v554_v10 }
 0x101   : > { %2049 = vst [vmem:[%s3031_s9 + $0x48] sm:$0xff] %v1999_v25   ;;  %v1994_v47 = vpack.c.bf16 %v557_v16, %v554_v10  ;;  %v1550_v36 = vmul.f32 %v3005_v60, %v557_v16  ;;  %v1584_v63 = vadd.f32 %v1583_v57, %v1549_v50  ;;  %v1661_v3 = vadd.f32 %v1660_v22, %v1626_v31 }
 0x102   : > { %v3231_v13 = vadd.f32 %v3167_v32, %v2992_v9  ;;  %v3235_v58 = vadd.f32 %v2992_v9, %v617_v29  ;;  %v3238_v53 = vadd.f32 %v2120_v7, %v2992_v9  ;;  %v3241_v43 = vadd.f32 %v2992_v9, %v620_v24 }
 0x103   : > { %2048 = vst [vmem:[%s3031_s9 + $0x40] sm:$0xff] %v1994_v47   ;;  %v1628_v59 = vmul.f32 %v1550_v36, %v557_v16  ;;  %v1662_v60 = vadd.f32 %v1661_v3, %v1627_v21  ;;  %v1552_v4 = vmul.f32 %v2972_v48, %v565_v39  ;;  %v1585_v10 = vadd.f32 %v1584_v63, %v1550_v36 }
 0x104   : > { %vm1312_vm9 = vcmp.lt.s32.totalorder %v3158_v20, 0  ;;  %v3246_v32 = vadd.s32 18, %v3158_v20  ;;  %v1208_v23 = vmul.u32 18, %v1207_v6  ;;  %v2039_v29 = vpack.c.bf16 %v3238_v53, %v3231_v13 }
 0x105   : > { %v2034_v7 = vpack.c.bf16 %v3241_v43, %v3235_v58  ;;  %v1629_v9 = vmul.f32 %v1551_v45, %v562_v42  ;;  %v1553_v30 = vmul.f32 %v2967_v14, %v3095_v37  ;;  %v1586_v44 = vadd.f32 %v1585_v10, %v1551_v45  ;;  %vm3273_vm13 = vmand %vm1312_vm9, %vm1276_vm7  ;;  %v3526_v10 = vld [vmem:[#allocation2_spill] sm:$0xff] }
 0x106   : > { %v1663_v48 = vadd.f32 %v1662_v60, %v1628_v59  ;;  %vm1274_vm11 = vcmp.ne.s32.totalorder %v3217_v55, 0  ;;  %vm1310_vm12 = vcmp.lt.s32.totalorder %v3217_v55, 0  ;;  %2057 = vst [vmem:[%s3031_s9 + $0x88] sm:$0xff] %v2039_v29   ;;  %v1240_v42 = vshrl.u32 %v3136_v17, 4 }
 0x107   : > { %2056 = vst [vmem:[%s3031_s9 + $0x80] sm:$0xff] %v2034_v7   ;;  %v1219_v50 = vmul.u32 18, %v1218_v62  ;;  %v1630_v14 = vmul.f32 %v1552_v4, %v565_v39  ;;  %v1554_v34 = vmul.f32 %v3009_v5, %v3100_v52  ;;  %v1587_v25 = vadd.f32 %v1586_v44, %v1552_v4  ;;  %vm3292_vm14 = vmand %vm1310_vm12, %vm1274_vm11  ;;  %v3529_v44 = vld [vmem:[#allocation5_spill] sm:$0xff] }
 0x108   : > { %v1664_v28 = vadd.f32 %v1663_v48, %v1629_v9  ;;  %v1419_v17 = vsel %vm3258_vm10, %v3082_v11, %v3053_v38  ;;  %v1382_v39 = vadd.s32 18, %v3217_v55  ;;  %v1230_v31 = vmul.u32 18, %v1229_v61  ;;  %v3530_v48 = vld [vmem:[#allocation3_spill] sm:$0xff] }
 0x109   : > { %v1209_v5 = vsub.s32 %v3042_v26, %v1208_v23  ;;  %v1555_v22 = vmul.f32 %v2957_v46, %v3076_v40  ;;  %v1631_v57 = vmul.f32 %v1553_v30, %v3095_v37  ;;  %v1588_v6 = vadd.f32 %v1587_v25, %v1553_v30 }
 0x10a   : > { %v1665_v24 = vadd.f32 %v1664_v28, %v1630_v14  ;;  %v3518_v11 = vmov 0.0   ;;  %v1420_v46 = vsel %vm3273_vm13, %v3246_v32, %v3158_v20  ;;  %v1241_v26 = vmul.u32 18, %v1240_v42 }
 0x10b   : > { %v1905_v49 = vsel %vm3219_vm8, 1.0, %v3518_v11  ;;  %v1220_v37 = vsub.s32 %v3126_v35, %v1219_v50  ;;  %v1556_v61 = vmul.f32 %v2982_v54, %v3079_v19  ;;  %v1589_v45 = vadd.f32 %v1588_v6, %v1554_v34 }
 0x10c   : > { %v1632_v47 = vmul.f32 %v1554_v34, %v3100_v52  ;;  %v1666_v36 = vadd.f32 %v1665_v24, %v1631_v57  ;;  %vm3307_vm15 = vcmp.lt.s32.totalorder %v1419_v17, 16  ;;  %v1418_v1 = vsel %vm3292_vm14, %v1382_v39, %v3217_v55 }
 0x10d   : > { %v1231_v20 = vsub.s32 %v3021_v8, %v1230_v31  ;;  %vm1277_vm0 = vcmp.ne.s32.totalorder %v1209_v5, 0  ;;  %vm1313_vm1 = vcmp.lt.s32.totalorder %v1209_v5, 0  ;;  %v1633_v35 = vmul.f32 %v1555_v22, %v3076_v40 }
 0x10e   : > { %v1590_v63 = vadd.f32 %v1589_v45, %v1555_v22  ;;  %v1667_v54 = vadd.f32 %v1666_v36, %v1632_v47  ;;  %v1557_v52 = vmul.f32 %v3034_v18, %v3149_v33  ;;  %v1385_v21 = vadd.s32 18, %v1209_v5  ;;  %vm3322_vm4 = vmand %vm1313_vm1, %vm1277_vm0 }
 0x10f   : > { %v1242_v3 = vsub.s32 %v3070_v0, %v1241_v26  ;;  %vm1278_vm2 = vcmp.ne.s32.totalorder %v1220_v37, 0  ;;  %vm1314_vm3 = vcmp.lt.s32.totalorder %v1220_v37, 0  ;;  %v1634_v59 = vmul.f32 %v1556_v61, %v3079_v19  ;;  %v3525_v0 = vld [vmem:[#allocation4_spill] sm:$0xff] }
 0x110   : > { %v1668_v60 = vadd.f32 %v1667_v54, %v1633_v35  ;;  %v1591_v55 = vadd.f32 %v1590_v63, %v1556_v61  ;;  %v1558_v8 = vmul.f32 %v3091_v56, %v3153_v15  ;;  %vm3326_vm5 = vcmp.lt.s32.totalorder %v1418_v1, 16  ;;  %vm3334_vm8 = vmand %vm1314_vm3, %vm1278_vm2 }
 0x111   : > { %vm1279_vm6 = vcmp.ne.s32.totalorder %v1231_v20, 0  ;;  %vm1315_vm7 = vcmp.lt.s32.totalorder %v1231_v20, 0  ;;  %v1386_v18 = vadd.s32 18, %v1220_v37  ;;  %v1559_v32 = vmul.f32 %v3526_v10, %v3525_v0 }
 0x112   : > { %v1592_v19 = vadd.f32 %v1591_v55, %v1557_v52  ;;  %v1635_v23 = vmul.f32 %v1557_v52, %v3149_v33  ;;  %v1669_v29 = vadd.f32 %v1668_v60, %v1634_v59  ;;  %v1387_v7 = vadd.s32 18, %v1231_v20  ;;  %vm3345_vm11 = vmand %vm1315_vm7, %vm1279_vm6 }
 0x113   : > { %v1421_v9 = vsel %vm3322_vm4, %v1385_v21, %v1209_v5  ;;  %vm1280_vm9 = vcmp.ne.s32.totalorder %v1242_v3, 0  ;;  %vm1316_vm10 = vcmp.lt.s32.totalorder %v1242_v3, 0  ;;  %v1560_v27 = vmul.f32 %v3530_v48, %v3529_v44 }
 0x114   : > { %v1670_v30 = vadd.f32 %v1669_v29, %v1635_v23  ;;  %v1593_v42 = vadd.f32 %v1592_v19, %v1558_v8  ;;  %v1636_v50 = vmul.f32 %v1558_v8, %v3153_v15  ;;  %vm3349_vm12 = vcmp.lt.s32.totalorder %v1420_v46, 16  ;;  %vm3361_vm13 = vmand %vm1316_vm10, %vm1280_vm9 }
 0x115   : > { %v1906_v28 = vsel %vm3326_vm5, 1.0, %v3518_v11  ;;  %v1388_v34 = vadd.s32 18, %v1242_v3  ;;  %v1422_v25 = vsel %vm3334_vm8, %v1386_v18, %v1220_v37  ;;  %v1637_v15 = vmul.f32 %v1559_v32, %v3525_v0 }
 0x116   : > { %v1594_v16 = vadd.f32 %v1593_v42, %v1559_v32  ;;  %v1671_v17 = vadd.f32 %v1670_v30, %v1636_v50  ;;  %v1561_v39 = vmul.f32 %v1905_v49, %v3197_v41  ;;  %v1907_v5 = vsel %vm3307_vm15, 1.0, %v3518_v11 }
 0x117   : > { %v1423_v22 = vsel %vm3345_vm11, %v1387_v7, %v1231_v20  ;;  %vm1457_vm14 = vcmp.lt.s32.totalorder %v1421_v9, 16  ;;  %v1638_v57 = vmul.f32 %v1560_v27, %v3529_v44  ;;  %v1562_v38 = vmul.f32 %v1906_v28, %v3202_v12 }
 0x118   : > { %v1672_v6 = vadd.f32 %v1671_v17, %v1637_v15  ;;  %v1595_v24 = vadd.f32 %v1594_v16, %v1560_v27  ;;  %v1908_v49 = vsel %vm3349_vm12, 1.0, %v3518_v11  ;;  %v1424_v46 = vsel %vm3361_vm13, %v1388_v34, %v1242_v3 }
 0x119   : > { %vm1458_vm0 = vcmp.lt.s32.totalorder %v1422_v25, 16  ;;  %v1563_v26 = vmul.f32 %v1907_v5, %v3178_v2  ;;  %v1639_v61 = vmul.f32 %v1561_v39, %v3197_v41  ;;  %vm1459_vm15 = vcmp.lt.s32.totalorder %v1423_v22, 16 }
 0x11a   : > { %v1596_v37 = vadd.f32 %v1595_v24, %v1561_v39  ;;  %v1673_v45 = vadd.f32 %v1672_v6, %v1638_v57  ;;  %v1909_v47 = vsel %vm1457_vm14, 1.0, %v3518_v11  ;;  %v1564_v62 = vmul.f32 %v1908_v49, %v3189_v51 }
 0x11b   : > { %v1640_v20 = vmul.f32 %v1562_v38, %v3202_v12  ;;  %vm1460_vm1 = vcmp.lt.s32.totalorder %v1424_v46, 16  ;;  %v1910_v35 = vsel %vm1458_vm0, 1.0, %v3518_v11  ;;  %v1641_v63 = vmul.f32 %v1563_v26, %v3178_v2 }
 0x11c   : > { %v1674_v36 = vadd.f32 %v1673_v45, %v1639_v61  ;;  %v1597_v1 = vadd.f32 %v1596_v37, %v1562_v38  ;;  %v1565_v21 = vmul.f32 %v1909_v47, %v3235_v58  ;;  %v1911_v41 = vsel %vm1459_vm15, 1.0, %v3518_v11 }
 0x11d   : > { %v1642_v3 = vmul.f32 %v1564_v62, %v3189_v51  ;;  %v1566_v55 = vmul.f32 %v1910_v35, %v3241_v43  ;;  %v1912_v8 = vsel %vm1460_vm1, 1.0, %v3518_v11  ;;  %v1567_v12 = vmul.f32 %v1911_v41, %v3231_v13 }
 0x11e   : > { %v1598_v54 = vadd.f32 %v1597_v1, %v1563_v26  ;;  %v1675_v52 = vadd.f32 %v1674_v36, %v1640_v20  ;;  %v1643_v40 = vmul.f32 %v1565_v21, %v3235_v58  ;;  %v1568_v0 = vmul.f32 %v1912_v8, %v3238_v53 }
 0x11f   : > { %v1644_v32 = vmul.f32 %v1566_v55, %v3241_v43  ;;  %v1645_v51 = vmul.f32 %v1567_v12, %v3231_v13 }
 0x120   : > { %v1676_v59 = vadd.f32 %v1675_v52, %v1641_v63  ;;  %v1599_v60 = vadd.f32 %v1598_v54, %v1564_v62  ;;  %v1646_v29 = vmul.f32 %v1568_v0, %v3238_v53 }
 0x122   : > { %v1600_v4 = vadd.f32 %v1599_v60, %v1565_v21  ;;  %v1677_v2 = vadd.f32 %v1676_v59, %v1642_v3 }
 0x124   : > { %v1678_v18 = vadd.f32 %v1677_v2, %v1643_v40  ;;  %v1601_v10 = vadd.f32 %v1600_v4, %v1566_v55 }
 0x126   : > { %v1602_v19 = vadd.f32 %v1601_v10, %v1567_v12  ;;  %v1679_v23 = vadd.f32 %v1678_v18, %v1644_v32 }
 0x128   : > { %v1603_v11 = vadd.f32 %v1602_v19, %v1568_v0  ;;  %v1680_v56 = vadd.f32 %v1679_v23, %v1645_v51 }
 0x12a   : > { %v1604_v7 = vrot.slane %v1603_v11, 4  ;;  %v1681_v9 = vadd.f32 %v1680_v56, %v1646_v29 }
 0x12c   : > { %v1605_v58 = vadd.f32 %v1604_v7, %v1603_v11  ;;  %v1682_v30 = vrot.slane %v1681_v9, 4 }
 0x12e   : > { %v1606_v44 = vrot.slane %v1605_v58, 2  ;;  %v1683_v48 = vadd.f32 %v1682_v30, %v1681_v9 }
 0x130   : > { %v1607_v27 = vadd.f32 %v1606_v44, %v1605_v58  ;;  %v1684_v42 = vrot.slane %v1683_v48, 2 }
 0x132   : > { %v1608_v50 = vrot.slane %v1607_v27, 1  ;;  %v1685_v43 = vadd.f32 %v1684_v42, %v1683_v48 }
 0x134   : > { %v1609_v13 = vadd.f32 %v1608_v50, %v1607_v27  ;;  %v1686_v33 = vrot.slane %v1685_v43, 1 }
 0x136   : > { %1610 = vst [vmem:[%s238_s12] sm:$0x1] %v1609_v13  ;;  %v1687_v53 = vadd.f32 %v1686_v33, %v1685_v43 }
 0x138   : > { %1688 = vst [vmem:[%s241_s15] sm:$0x1] %v1687_v53 }
 0x139 PF: > { %s16_s18 = sadd.s32 1, %s2238_s18  }
 0x13a   : > { %p13_p4 = scmp.ge.s32.totalorder %s16_s18, 4  }
 0x13c   :  { %15 = sbr.rel (!%p13_p4) target bundleno = 1 (0x1), region = 86 }

// kernel: double_conv.4
= control target key start
LH: loop header
LB: loop body
LE: loop exit
PB: predicated region body
PF: predicated region fallthrough
CT: control target
= control target key end

     0   :  { %s9879_s24 = smov 0   ;;  %s12537_s0 = inlined_call_operand.vmem [shape: bf16[2,288,128], index: 0, kind: input, shape index: {}]   ;;  %s12538_s1 = inlined_call_operand.vmem [shape: f32[1,128], index: 1, kind: input, shape index: {}]   ;;  %s12539_s2 = inlined_call_operand.vmem [shape: f32[1,128], index: 2, kind: input, shape index: {}]   ;;  %s12540_s3 = inlined_call_operand.vmem [shape: bf16[9,128,128], index: 3, kind: input, shape index: {}]   ;;  %s12541_s4 = inlined_call_operand.vmem [shape: f32[1,128], index: 4, kind: input, shape index: {}]   ;;  %s12542_s5 = inlined_call_operand.vmem [shape: bf16[2,256,128], index: 5, kind: output, shape index: {0}]   ;;  %s12543_s6 = inlined_call_operand.vmem [shape: f32[2,1,128], index: 6, kind: output, shape index: {1}]   ;;  %s12544_s7 = inlined_call_operand.vmem [shape: f32[2,1,128], index: 7, kind: output, shape index: {2}]  }
   0x1 LB: > { %s8216_s25 = sadd.s32 4294967295, %s9834_s24   ;;  %p8220_p0 = scmp.ge.s32.totalorder %s9834_s24, 1  ;;  %s9834_s24 = sphi %s9879_s24, %s18_s24  }
   0x2   : > { %p242_p1 = scmp.lt.s32.totalorder %s9834_s24, 3 }
   0x4   : > { %p243_p2 = pnand %p8220_p0, %p242_p1 }
   0x6   : > { %246 = sbr.rel (%p243_p2) target bundleno = 889 (0x379), region = 40 }
   0xb   : > { %v9668_v0 = vld [vmem:[%s12540_s3 + $0x38] sm:$0xff]   ;;  %p280_p3 = scmp.lt.s32.totalorder %s8216_s25, 1  ;;  %v297_v1 = vlaneseq  ;;  %v9669_v2 = vld [vmem:[%s12540_s3 + $0x30] sm:$0xff]   ;;  %v9670_v4 = vld [vmem:[%s12540_s3 + $0x28] sm:$0xff]   ;;  %v9836_v35 = vmov 0  }
   0xc   : > { %9568 = vmatprep.subr.bf16.mxu1 %v9668_v0  ;;  %9100 = vmatprep.subr.bf16.mxu0 %v9668_v0  ;;  %v9671_v7 = vld [vmem:[%s12540_s3 + $0x20] sm:$0xff]   ;;  %v9672_v26 = vld [vmem:[%s12540_s3 + $0x18] sm:$0xff]   ;;  %1248 = vst [vmem:[#allocation2] sm:$0xf] %v9836_v35  ;;  %1249 = vst [vmem:[#allocation2 + $0x4] sm:$0xf] %v9836_v35 }
   0xd   : > { %s12681_s25 = smov (!%p280_p3, %s8216_s25), 1  ;;  %9576 = vmatpush3.bf16.msra.mxu1 %v9668_v0  ;;  %9101 = vmatpush3.bf16.msra.mxu0 %v9668_v0  ;;  %v9895_v3 = vshrl.u32 %v297_v1, 7  ;;  %v9926_v19 = vld [vmem:[%s12538_s1] ss:$0 sm:$0xff]  ;;  %1262 = vst [vmem:[#allocation2 + $0x9c] sm:$0xf] %v9836_v35 }
   0xe   : > { %9569 = vmatprep.subr.bf16.mxu1 %v9669_v2  ;;  %9102 = vmatprep.subr.bf16.mxu0 %v9669_v2  ;;  %s9584_s9 = smul.u32 144, %s12681_s25  ;;  %v9931_v21 = vld [vmem:[%s12539_s2] ss:$0 sm:$0xff]  ;;  %1263 = vst [vmem:[#allocation2 + $0xa0] sm:$0xf] %v9836_v35  ;;  %v9673_v44 = vld [vmem:[%s12540_s3 + $0x10] sm:$0xff]   ;;  %s292_s10 = scalar_lea.vmem %s12543_s6, %s12681_s25 }
   0xf   : > { %12552 = vst [vmem:[#allocation3_spill] sm:$0xff] %v9895_v3  ;;  %v311_v5 = vadd.s32 104, %v9895_v3  ;;  %v312_v6 = vadd.s32 112, %v9895_v3  ;;  %v313_v8 = vadd.s32 120, %v9895_v3  ;;  %v9936_v24 = vadd.s32 128, %v9895_v3  ;;  %v9674_v53 = vld [vmem:[%s12540_s3 + $0x8] sm:$0xff]   ;;  %s295_s13 = scalar_lea.vmem %s12544_s7, %s12681_s25 }
  0x10   : > { %s9905_s12 = scalar_lea.vmem %s12537_s0, %s9584_s9  ;;  %v9939_v25 = vadd.s32 136, %v9895_v3  ;;  %vm1374_vm11 = vsmask.f32 5392  ;;  %vm1251_vm13 = vsmask.f32 1280  ;;  %s8613_s27 = sshll.u32 %s12681_s25, 7 }
  0x11   : > { %9577 = vmatpush3.bf16.msra.mxu1 %v9669_v2  ;;  %9103 = vmatpush3.bf16.msra.mxu0 %v9669_v2  ;;  %v9912_v9 = vmul.u32.u64.low 3817748708, %v311_v5  ;;  %v9913_v10 = vmul.u32.u64.high 3817748708, %v311_v5, %v9912_v9  ;;  %v9915_v11 = vmul.u32.u64.low 3817748708, %v312_v6  ;;  %v9916_v12 = vmul.u32.u64.high 3817748708, %v312_v6, %v9915_v11  ;;  %v8839_v13 = vld [vmem:[%s9905_s12 + $0x30] sm:$0xff]   ;;  %v8840_v14 = vld [vmem:[%s9905_s12 + $0x38] sm:$0xff]   ;;  %s12121_s30 = scalar_lea.vmem %s12542_s5, %s8613_s27 }
  0x12   : > { %9570 = vmatprep.subr.bf16.mxu1 %v9670_v4  ;;  %9104 = vmatprep.subr.bf16.mxu0 %v9670_v4  ;;  %v9920_v15 = vmul.u32.u64.low 3817748708, %v313_v8  ;;  %v9921_v16 = vmul.u32.u64.high 3817748708, %v313_v8, %v9920_v15  ;;  %v8709_v17 = vunpack.c.h.bf16 %v8839_v13  ;;  %v8712_v18 = vunpack.c.l.bf16 %v8840_v14  ;;  %v8841_v30 = vld [vmem:[%s9905_s12 + $0x40] sm:$0xff]  }
  0x13   : > { %v8713_v20 = vunpack.c.h.bf16 %v8840_v14  ;;  %v483_v27 = vshrl.u32 %v9913_v10, 4  ;;  %v494_v28 = vshrl.u32 %v9916_v12, 4  ;;  %v8716_v34 = vunpack.c.l.bf16 %v8841_v30  ;;  %v9679_v61 = vld [vmem:[#allocation2] sm:$0xff]  }
  0x14   : > { %v1110_v22 = vmul.f32 %v8709_v17, %v9926_v19  ;;  %v1111_v23 = vmul.f32 %v8712_v18, %v9926_v19  ;;  %v505_v31 = vshrl.u32 %v9921_v16, 4  ;;  %v8717_v39 = vunpack.c.h.bf16 %v8841_v30  ;;  %9116 = vmatprep.mubr.bf16.mxu0 %v9679_v61  ;;  %v10024_v30 = vld [vmem:[%s12540_s3 + $0xb8] sm:$0xff]  }
  0x15   : > { %9578 = vmatpush3.bf16.msra.mxu1 %v9670_v4  ;;  %9105 = vmatpush3.bf16.msra.mxu0 %v9670_v4  ;;  %v1112_v29 = vmul.f32 %v8713_v20, %v9926_v19  ;;  %v484_v36 = vmul.u32 18, %v483_v27  ;;  %v495_v37 = vmul.u32 18, %v494_v28  ;;  %v1113_v43 = vmul.f32 %v8716_v34, %v9926_v19  ;;  %v9675_v4 = vld [vmem:[%s12540_s3] sm:$0xff]  }
  0x16   : > { %9571 = vmatprep.subr.bf16.mxu1 %v9671_v7  ;;  %9106 = vmatprep.subr.bf16.mxu0 %v9671_v7  ;;  %v9950_v32 = vadd.f32 %v9931_v21, %v1110_v22  ;;  %v9953_v33 = vadd.f32 %v9931_v21, %v1111_v23  ;;  %v506_v40 = vmul.u32 18, %v505_v31  ;;  %v1114_v48 = vmul.f32 %v8717_v39, %v9926_v19 }
  0x17   : > { %v9956_v38 = vadd.f32 %v9931_v21, %v1112_v29  ;;  %v485_v45 = vsub.s32 %v311_v5, %v484_v36  ;;  %v496_v46 = vsub.s32 %v312_v6, %v495_v37  ;;  %v9971_v52 = vadd.f32 %v9931_v21, %v1113_v43  ;;  %v10019_v29 = vld [vmem:[%s12540_s3 + $0x78] sm:$0xff]  }
  0x18   : > { %v1189_v41 = vmax.f32 %v9950_v32, 0.0  ;;  %v1190_v42 = vmax.f32 %v9953_v33, 0.0  ;;  %v507_v49 = vsub.s32 %v313_v8, %v506_v40  ;;  %v9985_v60 = vadd.f32 %v9931_v21, %v1114_v48 }
  0x19   : > { %9579 = vmatpush3.bf16.msra.mxu1 %v9671_v7  ;;  %9107 = vmatpush3.bf16.msra.mxu0 %v9671_v7  ;;  %v1191_v47 = vmax.f32 %v9956_v38, 0.0  ;;  %v9967_v50 = vmul.u32.u64.low 3817748708, %v9936_v24  ;;  %v9968_v51 = vmul.u32.u64.high 3817748708, %v9936_v24, %v9967_v50  ;;  %vm743_vm0 = vcmp.ne.s32.totalorder %v485_v45, 0  ;;  %v10002_v7 = vld [vmem:[%s9905_s12] sm:$0xff]  }
  0x1a   : > { %9572 = vmatprep.subr.bf16.mxu1 %v9672_v26  ;;  %9108 = vmatprep.subr.bf16.mxu0 %v9672_v26  ;;  %vm744_vm1 = vcmp.ne.s32.totalorder %v496_v46, 0  ;;  %vm779_vm2 = vcmp.lt.s32.totalorder %v485_v45, 0  ;;  %vm780_vm3 = vcmp.lt.s32.totalorder %v496_v46, 0  ;;  %vm745_vm4 = vcmp.ne.s32.totalorder %v507_v49, 0 }
  0x1b   : > { %vm781_vm5 = vcmp.lt.s32.totalorder %v507_v49, 0  ;;  %vm9976_vm6 = vmand %vm779_vm2, %vm743_vm0  ;;  %v851_v55 = vadd.s32 18, %v485_v45  ;;  %v852_v56 = vadd.s32 18, %v496_v46  ;;  %v853_v57 = vadd.s32 18, %v507_v49 }
  0x1c   : > { %vm816_vm7 = vmand %vm780_vm3, %vm744_vm1  ;;  %v9981_v58 = vmul.u32.u64.low 3817748708, %v9939_v25  ;;  %v9982_v59 = vmul.u32.u64.high 3817748708, %v9939_v25, %v9981_v58  ;;  %v516_v1 = vshrl.u32 %v9968_v51, 4  ;;  %v1192_v2 = vmax.f32 %v9971_v52, 0.0 }
  0x1d   : > { %9580 = vmatpush3.bf16.msra.mxu1 %v9672_v26  ;;  %9109 = vmatpush3.bf16.msra.mxu0 %v9672_v26  ;;  %vm9987_vm8 = vmand %vm781_vm5, %vm745_vm4  ;;  %v887_v63 = vsel %vm9976_vm6, %v851_v55, %v485_v45  ;;  %v888_v0 = vsel %vm816_vm7, %v852_v56, %v496_v46  ;;  %v1193_v6 = vmax.f32 %v9985_v60, 0.0  ;;  %v9837_v8 = vmov 0.0  }
  0x1e   : > { %9573 = vmatprep.subr.bf16.mxu1 %v9673_v44  ;;  %9110 = vmatprep.subr.bf16.mxu0 %v9673_v44  ;;  %v889_v5 = vsel %vm9987_vm8, %v853_v57, %v507_v49  ;;  %vm923_vm9 = vcmp.lt.s32.totalorder %v887_v63, 16  ;;  %vm924_vm10 = vcmp.lt.s32.totalorder %v888_v0, 16  ;;  %v517_v11 = vmul.u32 18, %v516_v1  ;;  %vm10039_vm5 = vmor %vm1251_vm13, %vm1374_vm11 }
  0x1f   : > { %vm925_vm12 = vcmp.lt.s32.totalorder %v889_v5, 16  ;;  %v8237_v9 = vsel %vm923_vm9, 1.0, %v9837_v8  ;;  %v8238_v10 = vsel %vm924_vm10, 1.0, %v9837_v8  ;;  %v527_v15 = vshrl.u32 %v9982_v59, 4 }
  0x20   : > { %v8239_v12 = vsel %vm925_vm12, 1.0, %v9837_v8  ;;  %v1225_v13 = vmul.f32 %v8237_v9, %v1189_v41  ;;  %v1226_v14 = vmul.f32 %v8238_v10, %v1190_v42  ;;  %v518_v17 = vsub.s32 %v9936_v24, %v517_v11  ;;  %v8850_v9 = vld [vmem:[%s9905_s12 + $0x88] sm:$0xff]  }
  0x21   : > { %9581 = vmatpush3.bf16.msra.mxu1 %v9673_v44  ;;  %9111 = vmatpush3.bf16.msra.mxu0 %v9673_v44  ;;  %v1227_v16 = vmul.f32 %v8239_v12, %v1191_v47  ;;  %v10010_v18 = vadd.s32 8, %v9895_v3  ;;  %v10013_v20 = vadd.s32 280, %v9895_v3  ;;  %v528_v26 = vmul.u32 18, %v527_v15 }
  0x22   : > { %9574 = vmatprep.subr.bf16.mxu1 %v9674_v53  ;;  %9112 = vmatprep.subr.bf16.mxu0 %v9674_v53  ;;  %v8627_v22 = vpack.c.bf16 %v1225_v13, %v1225_v13  ;;  %v8628_v23 = vpack.c.bf16 %v1226_v14, %v1226_v14  ;;  %v8684_v27 = vunpack.c.l.bf16 %v10002_v7  ;;  %vm746_vm14 = vcmp.ne.s32.totalorder %v518_v17, 0 }
  0x23   : > { %v8629_v28 = vpack.c.bf16 %v1227_v16, %v1227_v16  ;;  %vm782_vm15 = vcmp.lt.s32.totalorder %v518_v17, 0  ;;  %v854_v24 = vadd.s32 18, %v518_v17  ;;  %v529_v38 = vsub.s32 %v9939_v25, %v528_v26 }
  0x24   : > { %v1506_v31 = vshrl.u32 %v8627_v22, 16  ;;  %v1509_v32 = vshll.u32 %v8627_v22, 16  ;;  %v1516_v33 = vshrl.u32 %v8628_v23, 16  ;;  %v1519_v34 = vshll.u32 %v8628_v23, 16  ;;  %vm10026_vm0 = vmand %vm782_vm15, %vm746_vm14 }
  0x25   : > { %9582 = vmatpush3.bf16.msra.mxu1 %v9674_v53  ;;  %9113 = vmatpush3.bf16.msra.mxu0 %v9674_v53  ;;  %v1526_v36 = vshrl.u32 %v8629_v28, 16  ;;  %v1529_v37 = vshll.u32 %v8629_v28, 16  ;;  %v890_v39 = vsel %vm10026_vm0, %v854_v24, %v518_v17  ;;  %vm747_vm1 = vcmp.ne.s32.totalorder %v529_v38, 0 }
  0x26   : > { %9575 = vmatprep.subr.bf16.mxu1 %v9675_v4  ;;  %9114 = vmatprep.subr.bf16.mxu0 %v9675_v4  ;;  %v1508_v40 = vrot.slane %v1506_v31, 6  ;;  %v1511_v41 = vrot.slane %v1509_v32, 7  ;;  %v1518_v42 = vrot.slane %v1516_v33, 6  ;;  %v1521_v43 = vrot.slane %v1519_v34, 7  ;;  %v10077_v32 = vld [vmem:[%s9905_s12 + $0x48] sm:$0xff]  }
  0x27   : > { %v1528_v44 = vrot.slane %v1526_v36, 6  ;;  %v1531_v45 = vrot.slane %v1529_v37, 7  ;;  %vm783_vm2 = vcmp.lt.s32.totalorder %v529_v38, 0  ;;  %v855_v25 = vadd.s32 18, %v529_v38 }
  0x28   : > { %v10033_v46 = vor.u32 %v1511_v41, %v1508_v40  ;;  %v1522_v47 = vor.u32 %v1521_v43, %v1518_v42  ;;  %vm819_vm3 = vmand %vm783_vm2, %vm747_vm1  ;;  %vm926_vm4 = vcmp.lt.s32.totalorder %v890_v39, 16  ;;  %v8685_v12 = vunpack.c.h.bf16 %v10002_v7 }
  0x29   : > { %9583 = vmatpush3.bf16.msra.mxu1 %v9675_v4  ;;  %9115 = vmatpush3.bf16.msra.mxu0 %v9675_v4  ;;  %v1532_v49 = vor.u32 %v1531_v45, %v1528_v44  ;;  %v8240_v50 = vsel %vm926_vm4, 1.0, %v9837_v8  ;;  %v10045_v51 = vmul.u32.u64.low 3817748708, %v9895_v3  ;;  %v10046_v53 = vmul.u32.u64.high 3817748708, %v9895_v3, %v10045_v51  ;;  %v1253_v45 = vld [vmem:[#allocation2 + $0x8] sm:$0x3] }
  0x2a   : > { %9152 = vmatprep.subr.bf16.mxu1 %v10019_v29  ;;  %9204 = vmatprep.subr.bf16.mxu0 %v10024_v30  ;;  %v1514_v54 = vrot.slane %v10033_v46, 4  ;;  %v1524_v55 = vrot.slane %v1522_v47, 4  ;;  %v891_v56 = vsel %vm819_vm3, %v855_v25, %v529_v38  ;;  %v1228_v57 = vmul.f32 %v8240_v50, %v1192_v2 }
  0x2b   : > { %v1534_v58 = vrot.slane %v1532_v49, 4  ;;  %vm927_vm6 = vcmp.lt.s32.totalorder %v891_v56, 16  ;;  %v10052_v59 = vmul.u32.u64.low 3817748708, %v10010_v18  ;;  %v10053_v61 = vmul.u32.u64.high 3817748708, %v10010_v18, %v10052_v59 }
  0x2c   : > { %v1523_v62 = vsel %vm10039_vm5, %v1514_v54, %v1522_v47  ;;  %v1533_v63 = vsel %vm10039_vm5, %v1524_v55, %v1532_v49  ;;  %v8241_v0 = vsel %vm927_vm6, 1.0, %v9837_v8  ;;  %v8630_v1 = vpack.c.bf16 %v1228_v57, %v1228_v57 }
  0x2d   : > { %1788 = vst [vmem:[#allocation2 + $0x40] sm:$0xf] %v1523_v62  ;;  %1789 = vst [vmem:[#allocation2 + $0x44] sm:$0xf] %v1533_v63  ;;  %v1229_v52 = vmul.f32 %v8241_v0, %v1193_v6  ;;  %v340_v2 = vshrl.u32 %v10046_v53, 4  ;;  %v8753_v13 = vunpack.c.h.bf16 %v8850_v9  ;;  %v351_v16 = vshrl.u32 %v10053_v61, 4 }
  0x2e   : > { %v10064_v4 = vmul.u32.u64.low 3817748708, %v10013_v20  ;;  %v10065_v5 = vmul.u32.u64.high 3817748708, %v10013_v20, %v10064_v4  ;;  %v1536_v10 = vshrl.u32 %v8630_v1, 16  ;;  %v1539_v11 = vshll.u32 %v8630_v1, 16 }
  0x2f   : > { %v8631_v14 = vpack.c.bf16 %v1229_v52, %v1229_v52  ;;  %v341_v15 = vmul.u32 18, %v340_v2  ;;  %v1097_v60 = vmul.f32 %v8684_v27, %v9926_v19  ;;  %v1098_v22 = vmul.f32 %v8685_v12, %v9926_v19 }
  0x30   : > { %v1538_v6 = vrot.slane %v1536_v10, 6  ;;  %v1541_v17 = vrot.slane %v1539_v11, 7  ;;  %v1132_v23 = vmul.f32 %v8753_v13, %v9926_v19  ;;  %v352_v31 = vmul.u32 18, %v351_v16 }
  0x31   : > { %v1546_v26 = vshrl.u32 %v8631_v14, 16  ;;  %v1549_v28 = vshll.u32 %v8631_v14, 16  ;;  %v342_v24 = vsub.s32 %v9895_v3, %v341_v15  ;;  %v725_v34 = vshrl.u32 %v10065_v5, 4 }
  0x32   : > { %v1542_v33 = vor.u32 %v1541_v17, %v1538_v6  ;;  %v1140_v35 = vadd.f32 %v9931_v21, %v1097_v60  ;;  %v1141_v7 = vadd.f32 %v9931_v21, %v1098_v22  ;;  %v353_v37 = vsub.s32 %v10010_v18, %v352_v31  ;;  %v9686_v18 = vld [vmem:[%s12540_s3 + $0x68] sm:$0xff]  }
  0x33   : > { %v1548_v27 = vrot.slane %v1546_v26, 6  ;;  %v1551_v36 = vrot.slane %v1549_v28, 7  ;;  %vm730_vm7 = vcmp.ne.s32.totalorder %v342_v24, 0  ;;  %v1175_v41 = vadd.f32 %v9931_v21, %v1132_v23  ;;  %v9681_v23 = vld [vmem:[%s12540_s3 + $0x70] sm:$0xff]  }
  0x34   : > { %v9676_v38 = vld [vmem:[#allocation2 + $0x40] sm:$0xff]   ;;  %v1543_v39 = vsel %vm10039_vm5, %v1534_v58, %v1542_v33  ;;  %v1544_v40 = vrot.slane %v1542_v33, 4  ;;  %v8720_v42 = vunpack.c.l.bf16 %v10077_v32  ;;  %v726_v44 = vmul.u32 18, %v725_v34  ;;  %v1259_v58 = vld [vmem:[#allocation2 + $0x98] sm:$0xe] }
  0x35   : > { %v10087_v43 = vor.u32 %v1551_v36, %v1548_v27  ;;  %1790 = vst [vmem:[#allocation2 + $0x48] sm:$0xf] %v1543_v39  ;;  %vm731_vm8 = vcmp.ne.s32.totalorder %v353_v37, 0  ;;  %vm766_vm9 = vcmp.lt.s32.totalorder %v342_v24, 0  ;;  %9132 = vmatprep.mubr.bf16.mxu1 %v9676_v38  ;;  %vm767_vm10 = vcmp.lt.s32.totalorder %v353_v37, 0 }
  0x36   : > { %vm10089_vm11 = vmand %vm766_vm9, %vm730_vm7  ;;  %v838_v47 = vadd.s32 18, %v342_v24  ;;  %v839_v25 = vadd.s32 18, %v353_v37  ;;  %v1176_v49 = vmax.f32 %v1140_v35, 0.0  ;;  %v727_v51 = vsub.s32 %v10013_v20, %v726_v44  ;;  %v9695_v20 = vld [vmem:[%s12540_s3 + $0x58] sm:$0xff]  }
  0x37   : > { %v1553_v50 = vsel %vm10039_vm5, %v1544_v40, %v10087_v43  ;;  %vm10097_vm12 = vmand %vm767_vm10, %vm731_vm8  ;;  %v1177_v54 = vmax.f32 %v1141_v7, 0.0  ;;  %v1211_v55 = vmax.f32 %v1175_v41, 0.0  ;;  %vm1250_vm14 = vcmask 1041408  }
  0x38   : > { %1791 = vst [vmem:[#allocation2 + $0x4c] sm:$0xf] %v1553_v50  ;;  %v874_v56 = vsel %vm10089_vm11, %v838_v47, %v342_v24  ;;  %v875_v57 = vsel %vm10097_vm12, %v839_v25, %v353_v37  ;;  %vm1256_vm15 = vcmask 1043457   ;;  %vm765_vm0 = vcmp.ne.s32.totalorder %v727_v51, 0  ;;  %vm10106_vm3 = vmand %vm1250_vm14, %vm1251_vm13  ;;  %v8843_v50 = vld [vmem:[%s9905_s12 + $0x50] sm:$0xff]  }
  0x39   : > { %vm801_vm1 = vcmp.lt.s32.totalorder %v727_v51, 0  ;;  %v873_v59 = vadd.s32 18, %v727_v51  ;;  %vm910_vm2 = vcmp.lt.s32.totalorder %v874_v56, 16  ;;  %vm911_vm6 = vcmp.lt.s32.totalorder %v875_v57, 16 }
  0x3a   : > { %vm837_vm4 = vmand %vm801_vm1, %vm765_vm0  ;;  %v8224_v61 = vsel %vm910_vm2, 1.0, %v9837_v8  ;;  %v1254_v62 = vsel %vm10106_vm3, 0, %v1253_v45  ;;  %vm1257_vm7 = vsmask.f32 7942  ;;  %v8225_v0 = vsel %vm911_vm6, 1.0, %v9837_v8 }
  0x3b   : > { %v909_v63 = vsel %vm837_vm4, %v873_v59, %v727_v51  ;;  %v1212_v1 = vmul.f32 %v8224_v61, %v1176_v49  ;;  %1255 = vst [vmem:[#allocation2 + $0x8] sm:$0x3] %v1254_v62  ;;  %vm10115_vm8 = vmand %vm1256_vm15, %vm1257_vm7  ;;  %v316_v2 = vadd.s32 144, %v9895_v3  ;;  %v1213_v4 = vmul.f32 %v8225_v0, %v1177_v54  ;;  %v9690_v62 = vld [vmem:[%s12540_s3 + $0x60] sm:$0xff]  }
  0x3c   : > { %vm945_vm13 = vcmp.lt.s32.totalorder %v909_v63, 16  ;;  %v1260_v5 = vsel %vm10115_vm8, 0, %v1259_v58  ;;  %v317_v9 = vadd.s32 152, %v9895_v3  ;;  %v8721_v26 = vunpack.c.h.bf16 %v10077_v32 }
  0x3d   : > { %v8259_v10 = vsel %vm945_vm13, 1.0, %v9837_v8  ;;  %1261 = vst [vmem:[#allocation2 + $0x98] sm:$0xe] %v1260_v5  ;;  %v8614_v11 = vpack.c.bf16 %v1212_v1, %v1212_v1  ;;  %v10124_v12 = vmul.u32.u64.low 3817748708, %v316_v2  ;;  %v10125_v13 = vmul.u32.u64.high 3817748708, %v316_v2, %v10124_v12 }
  0x3e   : > { %v1247_v14 = vmul.f32 %v8259_v10, %v1211_v55  ;;  %v8615_v15 = vpack.c.bf16 %v1213_v4, %v1213_v4  ;;  %v10127_v16 = vmul.u32.u64.low 3817748708, %v317_v9  ;;  %v10128_v60 = vmul.u32.u64.high 3817748708, %v317_v9, %v10127_v16 }
  0x3f   : > { %v9678_v6 = vld [vmem:[#allocation2 + $0x48] sm:$0xff]   ;;  %v1377_v17 = vshrl.u32 %v8614_v11, 16  ;;  %v1380_v22 = vshll.u32 %v8614_v11, 16  ;;  %v1115_v28 = vmul.f32 %v8720_v42, %v9926_v19  ;;  %v1554_v34 = vrot.slane %v10087_v43, 4 }
  0x40   : > { %v8649_v24 = vpack.c.bf16 %v1247_v14, %v1247_v14  ;;  %v1386_v31 = vshrl.u32 %v8615_v15, 16  ;;  %v1389_v33 = vshll.u32 %v8615_v15, 16  ;;  %9133 = vmatmul.mubr.bf16.vlgmr.msra.gmra.mxu1 %v9678_v6  ;;  %v538_v27 = vshrl.u32 %v10125_v13, 4 }
  0x41   : > { %v1379_v35 = vrot.slane %v1377_v17, 6  ;;  %v1382_v7 = vrot.slane %v1380_v22, 7  ;;  %v1116_v36 = vmul.f32 %v8721_v26, %v9926_v19  ;;  %9153 = vmatpush3.bf16.msra.mxu1 %v10019_v29  ;;  %v549_v44 = vshrl.u32 %v10128_v60, 4  ;;  %v9685_v26 = vld [vmem:[%s12540_s3 + $0xb0] sm:$0xff]  }
  0x42   : > { %v1388_v37 = vrot.slane %v1386_v31, 6  ;;  %v1391_v38 = vrot.slane %v1389_v33, 7  ;;  %v1726_v32 = vshrl.u32 %v8649_v24, 16  ;;  %v1729_v39 = vshll.u32 %v8649_v24, 16  ;;  %v1772_v40 = vld [vmem:[#allocation2 + $0x8] sm:$0xe]  ;;  %9154 = vmatprep.subr.bf16.mxu1 %v9681_v23 }
  0x43   : > { %v1383_v41 = vor.u32 %v1382_v7, %v1379_v35  ;;  %v539_v42 = vmul.u32 18, %v538_v27  ;;  %v1158_v45 = vadd.f32 %v9931_v21, %v1115_v28  ;;  %v1159_v49 = vadd.f32 %v9931_v21, %v1116_v36  ;;  %v8834_v27 = vld [vmem:[%s9905_s12 + $0x8] sm:$0xff]  }
  0x44   : > { %v10144_v47 = vor.u32 %v1391_v38, %v1388_v37  ;;  %v1728_v29 = vrot.slane %v1726_v32, 6  ;;  %v1731_v25 = vrot.slane %v1729_v39, 7  ;;  %v1810_v54 = vld [vmem:[#allocation2 + $0x98] sm:$0x3]  ;;  %v550_v56 = vmul.u32 18, %v549_v44 }
  0x45   : > { %v1384_v51 = vrot.slane %v1383_v41, 4  ;;  %v1773_v53 = vsel %vm10115_vm8, %v1383_v41, %v1772_v40  ;;  %v540_v55 = vsub.s32 %v316_v2, %v539_v42  ;;  %9155 = vmatpush3.bf16.msra.mxu1 %v9681_v23  ;;  %v1194_v58 = vmax.f32 %v1158_v45, 0.0 }
  0x46   : > { %v10150_v57 = vor.u32 %v1731_v25, %v1728_v29  ;;  %1774 = vst [vmem:[#allocation2 + $0x8] sm:$0xe] %v1773_v53  ;;  %v1195_v59 = vmax.f32 %v1159_v49, 0.0  ;;  %v10153_v61 = vadd.s32 160, %v9895_v3  ;;  %v551_v0 = vsub.s32 %v317_v9, %v550_v56  ;;  %9156 = vmatprep.subr.bf16.mxu1 %v9686_v18 }
  0x47   : > { %v1393_v63 = vsel %vm10039_vm5, %v1384_v51, %v10144_v47  ;;  %vm748_vm9 = vcmp.ne.s32.totalorder %v540_v55, 0  ;;  %vm784_vm10 = vcmp.lt.s32.totalorder %v540_v55, 0  ;;  %v856_v52 = vadd.s32 18, %v540_v55 }
  0x48   : > { %v1734_v1 = vrot.slane %v10150_v57, 4  ;;  %1775 = vst [vmem:[#allocation2 + $0xc] sm:$0xf] %v1393_v63  ;;  %vm820_vm11 = vmand %vm784_vm10, %vm748_vm9  ;;  %v319_v2 = vadd.s32 168, %v9895_v3  ;;  %v8724_v4 = vunpack.c.l.bf16 %v8843_v50  ;;  %vm749_vm12 = vcmp.ne.s32.totalorder %v551_v0, 0 }
  0x49   : > { %vm785_vm14 = vcmp.lt.s32.totalorder %v551_v0, 0  ;;  %v857_v5 = vadd.s32 18, %v551_v0  ;;  %v8725_v10 = vunpack.c.h.bf16 %v8843_v50  ;;  %v892_v9 = vsel %vm820_vm11, %v856_v52, %v540_v55  ;;  %9157 = vmatpush3.bf16.msra.mxu1 %v9686_v18 }
  0x4a   : > { %v1811_v11 = vsel %vm10106_vm3, %v1734_v1, %v1810_v54  ;;  %vm821_vm15 = vmand %vm785_vm14, %vm749_vm12  ;;  %v10166_v12 = vmul.u32.u64.low 3817748708, %v10153_v61  ;;  %v10167_v13 = vmul.u32.u64.high 3817748708, %v10153_v61, %v10166_v12  ;;  %vm928_vm0 = vcmp.lt.s32.totalorder %v892_v9, 16  ;;  %9158 = vmatprep.subr.bf16.mxu1 %v9690_v62 }
  0x4b   : > { %1812 = vst [vmem:[#allocation2 + $0x98] sm:$0x3] %v1811_v11  ;;  %v893_v14 = vsel %vm821_vm15, %v857_v5, %v551_v0  ;;  %v10169_v15 = vmul.u32.u64.low 3817748708, %v319_v2  ;;  %v10170_v16 = vmul.u32.u64.high 3817748708, %v319_v2, %v10169_v15  ;;  %v8242_v60 = vsel %vm928_vm0, 1.0, %v9837_v8 }
  0x4c   : > { %vm929_vm1 = vcmp.lt.s32.totalorder %v893_v14, 16  ;;  %v1117_v6 = vmul.f32 %v8724_v4, %v9926_v19  ;;  %v1118_v17 = vmul.f32 %v8725_v10, %v9926_v19  ;;  %v1230_v23 = vmul.f32 %v8242_v60, %v1194_v58  ;;  %v9693_v14 = vld [vmem:[%s12540_s3 + $0xa0] sm:$0xff]  }
  0x4d   : > { %v8243_v22 = vsel %vm929_vm1, 1.0, %v9837_v8  ;;  %v10183_v28 = vadd.s32 16, %v9895_v3  ;;  %v10186_v24 = vadd.s32 24, %v9895_v3  ;;  %v560_v33 = vshrl.u32 %v10167_v13, 4  ;;  %9159 = vmatpush3.bf16.msra.mxu1 %v9690_v62 }
  0x4e   : > { %v1231_v31 = vmul.f32 %v8243_v22, %v1195_v59  ;;  %v10190_v35 = vadd.f32 %v9931_v21, %v1117_v6  ;;  %v10193_v7 = vadd.f32 %v9931_v21, %v1118_v17  ;;  %v8632_v37 = vpack.c.bf16 %v1230_v23, %v1230_v23  ;;  %9160 = vmatprep.subr.bf16.mxu1 %v9695_v20  ;;  %v9689_v59 = vld [vmem:[%s12540_s3 + $0xa8] sm:$0xff]  }
  0x4f   : > { %v9680_v36 = vld [vmem:[#allocation2 + $0x8] sm:$0xff]   ;;  %v571_v38 = vshrl.u32 %v10170_v16, 4  ;;  %v10198_v32 = vmul.u32.u64.low 3817748708, %v10183_v28  ;;  %v10199_v39 = vmul.u32.u64.high 3817748708, %v10183_v28, %v10198_v32  ;;  %v561_v41 = vmul.u32 18, %v560_v33 }
  0x50   : > { %v8633_v40 = vpack.c.bf16 %v1231_v31, %v1231_v31  ;;  %v1196_v42 = vmax.f32 %v10190_v35, 0.0  ;;  %v1197_v44 = vmax.f32 %v10193_v7, 0.0  ;;  %9117 = vmatmul.mubr.bf16.vlgmr.msra.gmra.mxu0 %v9680_v36  ;;  %v1556_v45 = vshrl.u32 %v8632_v37, 16 }
  0x51   : > { %v1559_v18 = vshll.u32 %v8632_v37, 16  ;;  %v572_v29 = vmul.u32 18, %v571_v38  ;;  %v8688_v25 = vunpack.c.l.bf16 %v8834_v27  ;;  %9205 = vmatpush3.bf16.msra.mxu0 %v10024_v30  ;;  %v562_v51 = vsub.s32 %v10153_v61, %v561_v41  ;;  %9161 = vmatpush3.bf16.msra.mxu1 %v9695_v20  ;;  %v9700_v30 = vld [vmem:[%s12540_s3 + $0x50] sm:$0xff]  }
  0x52   : > { %v1566_v49 = vshrl.u32 %v8633_v40, 16  ;;  %v1569_v50 = vshll.u32 %v8633_v40, 16  ;;  %v8689_v53 = vunpack.c.h.bf16 %v8834_v27  ;;  %v1558_v54 = vrot.slane %v1556_v45, 6  ;;  %9206 = vmatprep.subr.bf16.mxu0 %v9685_v26  ;;  %9162 = vmatprep.subr.bf16.mxu1 %v9700_v30  ;;  %v8835_v27 = vld [vmem:[%s9905_s12 + $0x10] sm:$0xff]  }
  0x53   : > { %v1561_v55 = vrot.slane %v1559_v18, 7  ;;  %v573_v56 = vsub.s32 %v319_v2, %v572_v29  ;;  %v362_v58 = vshrl.u32 %v10199_v39, 4  ;;  %vm750_vm2 = vcmp.ne.s32.totalorder %v562_v51, 0  ;;  %v9701_v39 = vld [vmem:[%s12540_s3 + $0x90] sm:$0xff]  }
  0x54   : > { %v1568_v62 = vrot.slane %v1566_v49, 6  ;;  %v1571_v63 = vrot.slane %v1569_v50, 7  ;;  %vm786_vm3 = vcmp.lt.s32.totalorder %v562_v51, 0  ;;  %v858_v1 = vadd.s32 18, %v562_v51 }
  0x55   : > { %v1562_v61 = vor.u32 %v1561_v55, %v1558_v54  ;;  %vm751_vm4 = vcmp.ne.s32.totalorder %v573_v56, 0  ;;  %vm787_vm6 = vcmp.lt.s32.totalorder %v573_v56, 0  ;;  %vm10212_vm7 = vmand %vm786_vm3, %vm750_vm2  ;;  %v859_v4 = vadd.s32 18, %v573_v56  ;;  %9207 = vmatpush3.bf16.msra.mxu0 %v9685_v26  ;;  %9163 = vmatpush3.bf16.msra.mxu1 %v9700_v30 }
  0x56   : > { %v10216_v52 = vor.u32 %v1571_v63, %v1568_v62  ;;  %vm10218_vm8 = vmand %vm787_vm6, %vm751_vm4  ;;  %v363_v5 = vmul.u32 18, %v362_v58  ;;  %v1099_v10 = vmul.f32 %v8688_v25, %v9926_v19  ;;  %v894_v12 = vsel %vm10212_vm7, %v858_v1, %v562_v51  ;;  %9208 = vmatprep.subr.bf16.mxu0 %v9689_v59  ;;  %v10280_v1 = vld [vmem:[%s12538_s1] ss:$0 sm:$0xff] }
  0x57   : > { %v1563_v11 = vsel %vm10039_vm5, %v1554_v34, %v1562_v61  ;;  %v1564_v9 = vrot.slane %v1562_v61, 4  ;;  %v1100_v13 = vmul.f32 %v8689_v53, %v9926_v19  ;;  %v895_v15 = vsel %vm10218_vm8, %v859_v4, %v573_v56  ;;  %v8844_v4 = vld [vmem:[%s9905_s12 + $0x58] sm:$0xff]  }
  0x58   : > { %1792 = vst [vmem:[#allocation2 + $0x50] sm:$0xf] %v1563_v11  ;;  %vm930_vm13 = vcmp.lt.s32.totalorder %v894_v12, 16  ;;  %v1574_v43 = vrot.slane %v10216_v52, 4  ;;  %v364_v34 = vsub.s32 %v10183_v28, %v363_v5  ;;  %vm931_vm9 = vcmp.lt.s32.totalorder %v895_v15, 16  ;;  %v9697_v28 = vld [vmem:[%s12540_s3 + $0x98] sm:$0xff]  }
  0x59   : > { %v1573_v16 = vsel %vm10039_vm5, %v1564_v9, %v10216_v52  ;;  %v8244_v19 = vsel %vm930_vm13, 1.0, %v9837_v8  ;;  %v1142_v20 = vadd.f32 %v9931_v21, %v1099_v10  ;;  %v8245_v60 = vsel %vm931_vm9, 1.0, %v9837_v8  ;;  %9209 = vmatpush3.bf16.msra.mxu0 %v9689_v59 }
  0x5a   : > { %1793 = vst [vmem:[#allocation2 + $0x54] sm:$0xf] %v1573_v16  ;;  %v1232_v6 = vmul.f32 %v8244_v19, %v1196_v42  ;;  %v10244_v17 = vmul.u32.u64.low 3817748708, %v10186_v24  ;;  %v10245_v22 = vmul.u32.u64.high 3817748708, %v10186_v24, %v10244_v17  ;;  %v1233_v23 = vmul.f32 %v8245_v60, %v1197_v44  ;;  %9210 = vmatprep.subr.bf16.mxu0 %v9693_v14 }
  0x5b   : > { %vm732_vm10 = vcmp.ne.s32.totalorder %v364_v34, 0  ;;  %vm768_vm11 = vcmp.lt.s32.totalorder %v364_v34, 0  ;;  %v840_v26 = vadd.s32 18, %v364_v34  ;;  %v10251_v33 = vadd.f32 %v9931_v21, %v1100_v13  ;;  %v9704_v13 = vld [vmem:[%s12540_s3 + $0x88] sm:$0xff]  }
  0x5c   : > { %v8634_v31 = vpack.c.bf16 %v1232_v6, %v1232_v6  ;;  %vm804_vm12 = vmand %vm768_vm11, %vm732_vm10  ;;  %v1178_v35 = vmax.f32 %v1142_v20, 0.0  ;;  %v1394_v7 = vrot.slane %v10144_v47, 4  ;;  %v8635_v36 = vpack.c.bf16 %v1233_v23, %v1233_v23  ;;  %v9705_v17 = vld [vmem:[%s12540_s3 + $0x48] sm:$0xff]  }
  0x5d   : > { %v876_v37 = vsel %vm804_vm12, %v840_v26, %v364_v34  ;;  %v10256_v38 = vadd.s32 32, %v9895_v3  ;;  %v10259_v32 = vadd.s32 40, %v9895_v3  ;;  %v373_v21 = vshrl.u32 %v10245_v22, 4  ;;  %9211 = vmatpush3.bf16.msra.mxu0 %v9693_v14  ;;  %v10304_v34 = vld [vmem:[%s12539_s2] ss:$0 sm:$0xff]  ;;  %9164 = vmatprep.subr.bf16.mxu1 %v9705_v17 }
  0x5e   : > { %v1576_v40 = vshrl.u32 %v8634_v31, 16  ;;  %v1579_v41 = vshll.u32 %v8634_v31, 16  ;;  %vm912_vm14 = vcmp.lt.s32.totalorder %v876_v37, 16  ;;  %v1586_v42 = vshrl.u32 %v8635_v36, 16  ;;  %9212 = vmatprep.subr.bf16.mxu0 %v9697_v28  ;;  %9165 = vmatpush3.bf16.msra.mxu1 %v9705_v17 }
  0x5f   : > { %v1589_v44 = vshll.u32 %v8635_v36, 16  ;;  %v8226_v45 = vsel %vm912_vm14, 1.0, %v9837_v8  ;;  %v1179_v18 = vmax.f32 %v10251_v33, 0.0  ;;  %v374_v49 = vmul.u32 18, %v373_v21 }
  0x60   : > { %v1578_v29 = vrot.slane %v1576_v40, 6  ;;  %v1581_v25 = vrot.slane %v1579_v41, 7  ;;  %v1214_v50 = vmul.f32 %v8226_v45, %v1178_v35  ;;  %v1588_v53 = vrot.slane %v1586_v42, 6 }
  0x61   : > { %v9683_v51 = vld [vmem:[#allocation2 + $0x50] sm:$0xff]   ;;  %v1591_v54 = vrot.slane %v1589_v44, 7  ;;  %v8692_v55 = vunpack.c.l.bf16 %v8835_v27  ;;  %v8693_v56 = vunpack.c.h.bf16 %v8835_v27  ;;  %v375_v59 = vsub.s32 %v10186_v24, %v374_v49  ;;  %9213 = vmatpush3.bf16.msra.mxu0 %v9697_v28 }
  0x62   : > { %v1582_v58 = vor.u32 %v1581_v25, %v1578_v29  ;;  %v8616_v62 = vpack.c.bf16 %v1214_v50, %v1214_v50  ;;  %v10269_v63 = vadd.s32 176, %v9895_v3  ;;  %9136 = vmatprep.mubr.bf16.mxu1 %v9683_v51  ;;  %9214 = vmatprep.subr.bf16.mxu0 %v9701_v39  ;;  %v10320_v26 = vadd.s32 184, %v9895_v3 }
  0x63   : > { %v10271_v30 = vor.u32 %v1591_v54, %v1588_v53  ;;  %v10274_v61 = vmul.u32.u64.low 3817748708, %v10256_v38  ;;  %v10275_v0 = vmul.u32.u64.high 3817748708, %v10256_v38, %v10274_v61  ;;  %v1101_v52 = vmul.f32 %v10280_v1, %v8692_v55 }
  0x64   : > { %v1583_v24 = vsel %vm10039_vm5, %v1574_v43, %v1582_v58  ;;  %v1584_v2 = vrot.slane %v1582_v58, 4  ;;  %vm733_vm15 = vcmp.ne.s32.totalorder %v375_v59, 0  ;;  %vm769_vm0 = vcmp.lt.s32.totalorder %v375_v59, 0 }
  0x65   : > { %1794 = vst [vmem:[#allocation2 + $0x58] sm:$0xf] %v1583_v24  ;;  %vm10286_vm1 = vmand %vm769_vm0, %vm733_vm15  ;;  %v841_v10 = vadd.s32 18, %v375_v59  ;;  %v1396_v11 = vshrl.u32 %v8616_v62, 16  ;;  %v1399_v9 = vshll.u32 %v8616_v62, 16  ;;  %v1102_v12 = vmul.f32 %v10280_v1, %v8693_v56  ;;  %9215 = vmatpush3.bf16.msra.mxu0 %v9701_v39 }
  0x66   : > { %v1593_v14 = vsel %vm10039_vm5, %v1584_v2, %v10271_v30  ;;  %v10298_v15 = vmul.u32.u64.low 3817748708, %v10259_v32  ;;  %v10299_v43 = vmul.u32.u64.high 3817748708, %v10259_v32, %v10298_v15  ;;  %v10307_v16 = vadd.f32 %v10304_v34, %v1101_v52  ;;  %9216 = vmatprep.subr.bf16.mxu0 %v9704_v13 }
  0x67   : > { %1795 = vst [vmem:[#allocation2 + $0x5c] sm:$0xf] %v1593_v14  ;;  %v877_v19 = vsel %vm10286_vm1, %v841_v10, %v375_v59  ;;  %v1398_v20 = vrot.slane %v1396_v11, 6  ;;  %v1401_v60 = vrot.slane %v1399_v9, 7  ;;  %v384_v6 = vshrl.u32 %v10275_v0, 4  ;;  %v8845_v14 = vld [vmem:[%s9905_s12 + $0x60] sm:$0xff]  }
  0x68   : > { %vm913_vm2 = vcmp.lt.s32.totalorder %v877_v19, 16  ;;  %v10316_v22 = vadd.f32 %v10304_v34, %v1102_v12  ;;  %v1180_v23 = vmax.f32 %v10307_v16, 0.0  ;;  %v8728_v35 = vunpack.c.l.bf16 %v8844_v4 }
  0x69   : > { %v8227_v28 = vsel %vm913_vm2, 1.0, %v9837_v8  ;;  %v1402_v31 = vor.u32 %v1401_v60, %v1398_v20  ;;  %v385_v33 = vmul.u32 18, %v384_v6  ;;  %v395_v36 = vshrl.u32 %v10299_v43, 4  ;;  %9217 = vmatpush3.bf16.msra.mxu0 %v9704_v13 }
  0x6a   : > { %v1215_v27 = vmul.f32 %v8227_v28, %v1179_v18  ;;  %v1181_v37 = vmax.f32 %v10316_v22, 0.0  ;;  %v8729_v39 = vunpack.c.h.bf16 %v8844_v4  ;;  %v1119_v42 = vmul.f32 %v10280_v1, %v8728_v35 }
  0x6b   : > { %v1403_v40 = vsel %vm10039_vm5, %v1394_v7, %v1402_v31  ;;  %v1404_v41 = vrot.slane %v1402_v31, 4  ;;  %v386_v21 = vsub.s32 %v10256_v38, %v385_v33  ;;  %v396_v45 = vmul.u32 18, %v395_v36 }
  0x6c   : > { %v8617_v44 = vpack.c.bf16 %v1215_v27, %v1215_v27  ;;  %1776 = vst [vmem:[#allocation2 + $0x10] sm:$0xf] %v1403_v40  ;;  %v10332_v18 = vmul.u32.u64.low 3817748708, %v10269_v63  ;;  %v10333_v29 = vmul.u32.u64.high 3817748708, %v10269_v63, %v10332_v18  ;;  %v1120_v47 = vmul.f32 %v10280_v1, %v8729_v39 }
  0x6d   : > { %vm734_vm3 = vcmp.ne.s32.totalorder %v386_v21, 0  ;;  %vm770_vm4 = vcmp.lt.s32.totalorder %v386_v21, 0  ;;  %v842_v25 = vadd.s32 18, %v386_v21  ;;  %v397_v51 = vsub.s32 %v10259_v32, %v396_v45 }
  0x6e   : > { %v9684_v49 = vld [vmem:[#allocation2 + $0x58] sm:$0xff]   ;;  %v1406_v50 = vshrl.u32 %v8617_v44, 16  ;;  %v1409_v7 = vshll.u32 %v8617_v44, 16  ;;  %vm806_vm6 = vmand %vm770_vm4, %vm734_vm3  ;;  %v10338_v38 = vadd.f32 %v10304_v34, %v1119_v42  ;;  %v10345_v56 = vadd.f32 %v10304_v34, %v1120_v47 }
  0x6f   : > { %v878_v53 = vsel %vm806_vm6, %v842_v25, %v386_v21  ;;  %v10341_v54 = vmul.u32.u64.low 3817748708, %v10320_v26  ;;  %v10342_v55 = vmul.u32.u64.high 3817748708, %v10320_v26, %v10341_v54  ;;  %9137 = vmatmul.mubr.bf16.gmra.mxu1 %v9684_v49  ;;  %vm735_vm7 = vcmp.ne.s32.totalorder %v397_v51, 0 }
  0x70   : > { %v1408_v58 = vrot.slane %v1406_v50, 6  ;;  %v1411_v59 = vrot.slane %v1409_v7, 7  ;;  %vm771_vm8 = vcmp.lt.s32.totalorder %v397_v51, 0  ;;  %v843_v62 = vadd.s32 18, %v397_v51  ;;  %v9708_v50 = vld [vmem:[%s12540_s3 + $0x80] sm:$0xff]  }
  0x71   : > { %vm807_vm13 = vmand %vm771_vm8, %vm735_vm7  ;;  %vm914_vm9 = vcmp.lt.s32.totalorder %v878_v53, 16  ;;  %v582_v32 = vshrl.u32 %v10333_v29, 4  ;;  %v1198_v61 = vmax.f32 %v10338_v38, 0.0  ;;  %v1199_v24 = vmax.f32 %v10345_v56, 0.0  ;;  %9218 = vmatprep.subr.bf16.mxu0 %v9708_v50 }
  0x72   : > { %v1412_v0 = vor.u32 %v1411_v59, %v1408_v58  ;;  %v8228_v52 = vsel %vm914_vm9, 1.0, %v9837_v8  ;;  %v1594_v2 = vrot.slane %v10271_v30, 4  ;;  %v879_v4 = vsel %vm807_vm13, %v843_v62, %v397_v51  ;;  %v9709_v59 = vld [vmem:[%s12540_s3 + $0x40] sm:$0xff]   ;;  %9219 = vmatpush3.bf16.msra.mxu0 %v9708_v50 }
  0x73   : > { %v1216_v5 = vmul.f32 %v8228_v52, %v1180_v23  ;;  %v583_v10 = vmul.u32 18, %v582_v32  ;;  %v593_v11 = vshrl.u32 %v10342_v55, 4  ;;  %vm915_vm10 = vcmp.lt.s32.totalorder %v879_v4, 16  ;;  %v9714_v52 = vld [vmem:[%s12540_s3 + $0xf8] sm:$0xff]   ;;  %9166 = vmatprep.subr.bf16.mxu1 %v9709_v59 }
  0x74   : > { %v1413_v9 = vsel %vm10039_vm5, %v1404_v41, %v1412_v0  ;;  %v1414_v12 = vrot.slane %v1412_v0, 4  ;;  %v322_v13 = vadd.s32 192, %v9895_v3  ;;  %v8229_v15 = vsel %vm915_vm10, 1.0, %v9837_v8  ;;  %9167 = vmatpush3.bf16.msra.mxu1 %v9709_v59 }
  0x75   : > { %1777 = vst [vmem:[#allocation2 + $0x14] sm:$0xf] %v1413_v9  ;;  %v8618_v43 = vpack.c.bf16 %v1216_v5, %v1216_v5  ;;  %v584_v16 = vsub.s32 %v10269_v63, %v583_v10  ;;  %v594_v19 = vmul.u32 18, %v593_v11  ;;  %v1217_v20 = vmul.f32 %v8229_v15, %v1181_v37  ;;  %9256 = vmatprep.subr.bf16.mxu1 %v9714_v52 }
  0x76   : > { %v10360_v60 = vadd.s32 200, %v9895_v3  ;;  %v10362_v6 = vmul.u32.u64.low 3817748708, %v322_v13  ;;  %v10363_v17 = vmul.u32.u64.high 3817748708, %v322_v13, %v10362_v6  ;;  %v8732_v35 = vunpack.c.l.bf16 %v8845_v14 }
  0x77   : > { %v1416_v22 = vshrl.u32 %v8618_v43, 16  ;;  %v1419_v23 = vshll.u32 %v8618_v43, 16  ;;  %v595_v28 = vsub.s32 %v10320_v26, %v594_v19  ;;  %vm752_vm11 = vcmp.ne.s32.totalorder %v584_v16, 0 }
  0x78   : > { %v8619_v31 = vpack.c.bf16 %v1217_v20, %v1217_v20  ;;  %vm788_vm12 = vcmp.lt.s32.totalorder %v584_v16, 0  ;;  %v860_v33 = vadd.s32 18, %v584_v16  ;;  %v604_v21 = vshrl.u32 %v10363_v17, 4 }
  0x79   : > { %v1418_v27 = vrot.slane %v1416_v22, 6  ;;  %v1421_v36 = vrot.slane %v1419_v23, 7  ;;  %vm753_vm14 = vcmp.ne.s32.totalorder %v595_v28, 0  ;;  %vm789_vm15 = vcmp.lt.s32.totalorder %v595_v28, 0  ;;  %vm824_vm0 = vmand %vm788_vm12, %vm752_vm11 }
  0x7a   : > { %v1426_v63 = vshrl.u32 %v8619_v31, 16  ;;  %v1429_v37 = vshll.u32 %v8619_v31, 16  ;;  %vm825_vm1 = vmand %vm789_vm15, %vm753_vm14  ;;  %v861_v39 = vadd.s32 18, %v595_v28  ;;  %v896_v40 = vsel %vm824_vm0, %v860_v33, %v584_v16 }
  0x7b   : > { %v1422_v41 = vor.u32 %v1421_v36, %v1418_v27  ;;  %vm932_vm2 = vcmp.lt.s32.totalorder %v896_v40, 16  ;;  %v8733_v26 = vunpack.c.h.bf16 %v8845_v14  ;;  %v605_v38 = vmul.u32 18, %v604_v21 }
  0x7c   : > { %v9687_v42 = vld [vmem:[#allocation2 + $0x10] sm:$0xff]   ;;  %v1428_v44 = vrot.slane %v1426_v63, 6  ;;  %v1431_v45 = vrot.slane %v1429_v37, 7  ;;  %v897_v18 = vsel %vm825_vm1, %v861_v39, %v595_v28  ;;  %v8246_v29 = vsel %vm932_vm2, 1.0, %v9837_v8 }
  0x7d   : > { %v1423_v25 = vsel %vm10039_vm5, %v1414_v12, %v1422_v41  ;;  %v1424_v47 = vrot.slane %v1422_v41, 4  ;;  %vm933_vm3 = vcmp.lt.s32.totalorder %v897_v18, 16  ;;  %v1234_v49 = vmul.f32 %v8246_v29, %v1198_v61  ;;  %9120 = vmatprep.mubr.bf16.mxu0 %v9687_v42  ;;  %v8836_v12 = vld [vmem:[%s9905_s12 + $0x18] sm:$0xff]  }
  0x7e   : > { %v10373_v7 = vor.u32 %v1431_v45, %v1428_v44  ;;  %1778 = vst [vmem:[#allocation2 + $0x18] sm:$0xf] %v1423_v25  ;;  %v8247_v51 = vsel %vm933_vm3, 1.0, %v9837_v8  ;;  %v1121_v53 = vmul.f32 %v10280_v1, %v8732_v35  ;;  %v606_v32 = vsub.s32 %v322_v13, %v605_v38  ;;  %v9715_v42 = vld [vmem:[%s12540_s3 + $0x138] sm:$0xff]  }
  0x7f   : > { %v1235_v54 = vmul.f32 %v8247_v51, %v1199_v24  ;;  %v8636_v55 = vpack.c.bf16 %v1234_v49, %v1234_v49  ;;  %v10378_v56 = vmul.u32.u64.low 3817748708, %v10360_v60  ;;  %v10379_v58 = vmul.u32.u64.high 3817748708, %v10360_v60, %v10378_v56  ;;  %9308 = vmatprep.subr.bf16.mxu0 %v9715_v42  ;;  %v10464_v42 = vld [vmem:[%s9905_s12 + $0x68] sm:$0xff]  }
  0x80   : > { %v1433_v62 = vsel %vm10039_vm5, %v1424_v47, %v10373_v7  ;;  %v1122_v61 = vmul.f32 %v10280_v1, %v8733_v26  ;;  %v1164_v0 = vadd.f32 %v10304_v34, %v1121_v53  ;;  %v10393_v10 = vadd.s32 48, %v9895_v3 }
  0x81   : > { %1779 = vst [vmem:[#allocation2 + $0x1c] sm:$0xf] %v1433_v62  ;;  %v8637_v24 = vpack.c.bf16 %v1235_v54, %v1235_v54  ;;  %v1596_v4 = vshrl.u32 %v8636_v55, 16  ;;  %v1599_v5 = vshll.u32 %v8636_v55, 16  ;;  %vm754_vm4 = vcmp.ne.s32.totalorder %v606_v32, 0  ;;  %v8837_v54 = vld [vmem:[%s9905_s12 + $0x20] sm:$0xff]  }
  0x82   : > { %vm790_vm6 = vcmp.lt.s32.totalorder %v606_v32, 0  ;;  %v862_v11 = vadd.s32 18, %v606_v32  ;;  %v1165_v9 = vadd.f32 %v10304_v34, %v1122_v61  ;;  %v615_v16 = vshrl.u32 %v10379_v58, 4 }
  0x83   : > { %v1598_v13 = vrot.slane %v1596_v4, 6  ;;  %v1601_v14 = vrot.slane %v1599_v5, 7  ;;  %v1606_v15 = vshrl.u32 %v8637_v24, 16  ;;  %v1609_v43 = vshll.u32 %v8637_v24, 16  ;;  %vm826_vm7 = vmand %vm790_vm6, %vm754_vm4 }
  0x84   : > { %v898_v19 = vsel %vm826_vm7, %v862_v11, %v606_v32  ;;  %v1200_v20 = vmax.f32 %v1164_v0, 0.0  ;;  %v1201_v6 = vmax.f32 %v1165_v9, 0.0  ;;  %v616_v28 = vmul.u32 18, %v615_v16 }
  0x85   : > { %v1602_v17 = vor.u32 %v1601_v14, %v1598_v13  ;;  %v1608_v22 = vrot.slane %v1606_v15, 6  ;;  %v1611_v23 = vrot.slane %v1609_v43, 7  ;;  %vm934_vm8 = vcmp.lt.s32.totalorder %v898_v19, 16 }
  0x86   : > { %v8248_v31 = vsel %vm934_vm8, 1.0, %v9837_v8  ;;  %v10400_v33 = vadd.s32 56, %v9895_v3  ;;  %v8696_v35 = vunpack.c.l.bf16 %v8836_v12  ;;  %v617_v40 = vsub.s32 %v10360_v60, %v616_v28 }
  0x87   : > { %v1603_v27 = vsel %vm10039_vm5, %v1594_v2, %v1602_v17  ;;  %v1604_v36 = vrot.slane %v1602_v17, 4  ;;  %v1612_v63 = vor.u32 %v1611_v23, %v1608_v22  ;;  %v1236_v37 = vmul.f32 %v8248_v31, %v1200_v20 }
  0x88   : > { %v9688_v39 = vld [vmem:[#allocation2 + $0x18] sm:$0xff]   ;;  %1796 = vst [vmem:[#allocation2 + $0x60] sm:$0xf] %v1603_v27  ;;  %v10408_v41 = vmul.u32.u64.low 3817748708, %v10393_v10  ;;  %v10409_v21 = vmul.u32.u64.high 3817748708, %v10393_v10, %v10408_v41  ;;  %v8697_v26 = vunpack.c.h.bf16 %v8836_v12  ;;  %v1103_v45 = vmul.f32 %v10280_v1, %v8696_v35 }
  0x89   : > { %v1613_v30 = vsel %vm10039_vm5, %v1604_v36, %v1612_v63  ;;  %v8638_v2 = vpack.c.bf16 %v1236_v37, %v1236_v37  ;;  %v1614_v44 = vrot.slane %v1612_v63, 4  ;;  %9121 = vmatmul.mubr.bf16.gmra.mxu0 %v9688_v39  ;;  %vm755_vm13 = vcmp.ne.s32.totalorder %v617_v40, 0 }
  0x8a   : > { %1797 = vst [vmem:[#allocation2 + $0x64] sm:$0xf] %v1613_v30  ;;  %vm791_vm9 = vcmp.lt.s32.totalorder %v617_v40, 0  ;;  %v863_v60 = vadd.s32 18, %v617_v40  ;;  %v1104_v18 = vmul.f32 %v10280_v1, %v8697_v26  ;;  %v406_v51 = vshrl.u32 %v10409_v21, 4 }
  0x8b   : > { %vm827_vm10 = vmand %vm791_vm9, %vm755_vm13  ;;  %v1616_v29 = vshrl.u32 %v8638_v2, 16  ;;  %v1619_v25 = vshll.u32 %v8638_v2, 16  ;;  %v10419_v47 = vmul.u32.u64.low 3817748708, %v10400_v33  ;;  %v10420_v49 = vmul.u32.u64.high 3817748708, %v10400_v33, %v10419_v47 }
  0x8c   : > { %v899_v50 = vsel %vm827_vm10, %v863_v60, %v617_v40  ;;  %v1146_v38 = vadd.f32 %v10304_v34, %v1103_v45  ;;  %v10425_v53 = vadd.f32 %v10304_v34, %v1104_v18  ;;  %v1434_v58 = vrot.slane %v10373_v7, 4 }
  0x8d   : > { %vm935_vm11 = vcmp.lt.s32.totalorder %v899_v50, 16  ;;  %v1618_v55 = vrot.slane %v1616_v29, 6  ;;  %v1621_v56 = vrot.slane %v1619_v25, 7  ;;  %v407_v62 = vmul.u32 18, %v406_v51 }
  0x8e   : > { %v8249_v59 = vsel %vm935_vm11, 1.0, %v9837_v8  ;;  %v1182_v32 = vmax.f32 %v1146_v38, 0.0  ;;  %v1183_v61 = vmax.f32 %v10425_v53, 0.0  ;;  %v417_v24 = vshrl.u32 %v10420_v49, 4 }
  0x8f   : > { %v1237_v0 = vmul.f32 %v8249_v59, %v1201_v6  ;;  %v1622_v52 = vor.u32 %v1621_v56, %v1618_v55  ;;  %v306_v4 = vadd.s32 64, %v9895_v3  ;;  %v408_v5 = vsub.s32 %v10393_v10, %v407_v62 }
  0x90   : > { %v10435_v11 = vadd.s32 72, %v9895_v3  ;;  %v8700_v9 = vunpack.c.l.bf16 %v8837_v54  ;;  %v8701_v12 = vunpack.c.h.bf16 %v8837_v54  ;;  %v418_v16 = vmul.u32 18, %v417_v24 }
  0x91   : > { %v9691_v13 = vld [vmem:[#allocation2 + $0x60] sm:$0xff]   ;;  %v8639_v14 = vpack.c.bf16 %v1237_v0, %v1237_v0  ;;  %v1623_v15 = vsel %vm10039_vm5, %v1614_v44, %v1622_v52  ;;  %v1624_v43 = vrot.slane %v1622_v52, 4  ;;  %vm736_vm12 = vcmp.ne.s32.totalorder %v408_v5, 0 }
  0x92   : > { %1798 = vst [vmem:[#allocation2 + $0x68] sm:$0xf] %v1623_v15  ;;  %vm772_vm14 = vcmp.lt.s32.totalorder %v408_v5, 0  ;;  %v844_v19 = vadd.s32 18, %v408_v5  ;;  %v1105_v20 = vmul.f32 %v10280_v1, %v8700_v9  ;;  %9140 = vmatprep.mubr.bf16.mxu1 %v9691_v13  ;;  %v419_v17 = vsub.s32 %v10400_v33, %v418_v16 }
  0x93   : > { %v1626_v10 = vshrl.u32 %v8639_v14, 16  ;;  %v1629_v6 = vshll.u32 %v8639_v14, 16  ;;  %vm808_vm15 = vmand %vm772_vm14, %vm736_vm12  ;;  %v1106_v22 = vmul.f32 %v10280_v1, %v8701_v12  ;;  %v324_v45 = vadd.s32 208, %v9895_v3 }
  0x94   : > { %v880_v23 = vsel %vm808_vm15, %v844_v19, %v408_v5  ;;  %v10442_v28 = vmul.u32.u64.low 3817748708, %v306_v4  ;;  %v10443_v31 = vmul.u32.u64.high 3817748708, %v306_v4, %v10442_v28  ;;  %v10446_v35 = vadd.f32 %v10304_v34, %v1105_v20 }
  0x95   : > { %v1628_v27 = vrot.slane %v1626_v10, 6  ;;  %v1631_v36 = vrot.slane %v1629_v6, 7  ;;  %vm737_vm0 = vcmp.ne.s32.totalorder %v419_v17, 0  ;;  %vm773_vm1 = vcmp.lt.s32.totalorder %v419_v17, 0 }
  0x96   : > { %vm10448_vm2 = vmand %vm773_vm1, %vm737_vm0  ;;  %v845_v33 = vadd.s32 18, %v419_v17  ;;  %vm916_vm3 = vcmp.lt.s32.totalorder %v880_v23, 16  ;;  %v10453_v37 = vmul.u32.u64.low 3817748708, %v10435_v11  ;;  %v10454_v39 = vmul.u32.u64.high 3817748708, %v10435_v11, %v10453_v37 }
  0x97   : > { %v10456_v40 = vor.u32 %v1631_v36, %v1628_v27  ;;  %v8230_v41 = vsel %vm916_vm3, 1.0, %v9837_v8  ;;  %v10460_v21 = vadd.f32 %v10304_v34, %v1106_v22  ;;  %v1184_v26 = vmax.f32 %v10446_v35, 0.0 }
  0x98   : > { %v881_v30 = vsel %vm10448_vm2, %v845_v33, %v419_v17  ;;  %v1218_v2 = vmul.f32 %v8230_v41, %v1182_v32  ;;  %v428_v44 = vshrl.u32 %v10443_v31, 4  ;;  %v10475_v29 = vadd.s32 216, %v9895_v3 }
  0x99   : > { %v1633_v60 = vsel %vm10039_vm5, %v1624_v43, %v10456_v40  ;;  %vm917_vm4 = vcmp.lt.s32.totalorder %v881_v30, 16  ;;  %v1185_v18 = vmax.f32 %v10460_v21, 0.0  ;;  %v439_v50 = vshrl.u32 %v10454_v39, 4 }
  0x9a   : > { %1799 = vst [vmem:[#allocation2 + $0x6c] sm:$0xf] %v1633_v60  ;;  %v8231_v25 = vsel %vm917_vm4, 1.0, %v9837_v8  ;;  %v8620_v47 = vpack.c.bf16 %v1218_v2, %v1218_v2  ;;  %v429_v49 = vmul.u32 18, %v428_v44  ;;  %v8736_v54 = vunpack.c.l.bf16 %v10464_v42 }
  0x9b   : > { %v1219_v51 = vmul.f32 %v8231_v25, %v1183_v61  ;;  %v10479_v38 = vmul.u32.u64.low 3817748708, %v324_v45  ;;  %v10480_v53 = vmul.u32.u64.high 3817748708, %v324_v45, %v10479_v38  ;;  %v440_v62 = vmul.u32 18, %v439_v50 }
  0x9c   : > { %v1436_v55 = vshrl.u32 %v8620_v47, 16  ;;  %v1439_v56 = vshll.u32 %v8620_v47, 16  ;;  %v430_v59 = vsub.s32 %v306_v4, %v429_v49  ;;  %v8737_v24 = vunpack.c.h.bf16 %v10464_v42 }
  0x9d   : > { %v8621_v32 = vpack.c.bf16 %v1219_v51, %v1219_v51  ;;  %v10484_v0 = vmul.u32.u64.low 3817748708, %v10475_v29  ;;  %v10485_v52 = vmul.u32.u64.high 3817748708, %v10475_v29, %v10484_v0  ;;  %v441_v61 = vsub.s32 %v10435_v11, %v440_v62 }
  0x9e   : > { %v1438_v5 = vrot.slane %v1436_v55, 6  ;;  %v1441_v9 = vrot.slane %v1439_v56, 7  ;;  %vm738_vm6 = vcmp.ne.s32.totalorder %v430_v59, 0  ;;  %vm774_vm7 = vcmp.lt.s32.totalorder %v430_v59, 0 }
  0x9f   : > { %v1446_v12 = vshrl.u32 %v8621_v32, 16  ;;  %v1449_v13 = vshll.u32 %v8621_v32, 16  ;;  %v846_v14 = vadd.s32 18, %v430_v59  ;;  %vm739_vm8 = vcmp.ne.s32.totalorder %v441_v61, 0  ;;  %vm810_vm9 = vmand %vm774_vm7, %vm738_vm6 }
  0xa0   : > { %v1442_v15 = vor.u32 %v1441_v9, %v1438_v5  ;;  %vm775_vm13 = vcmp.lt.s32.totalorder %v441_v61, 0  ;;  %v847_v4 = vadd.s32 18, %v441_v61  ;;  %v626_v10 = vshrl.u32 %v10480_v53, 4  ;;  %v8847_v9 = vld [vmem:[%s9905_s12 + $0x70] sm:$0xff]  }
  0xa1   : > { %v9692_v43 = vld [vmem:[#allocation2 + $0x68] sm:$0xff]   ;;  %v1448_v16 = vrot.slane %v1446_v12, 6  ;;  %v1451_v19 = vrot.slane %v1449_v13, 7  ;;  %vm811_vm10 = vmand %vm775_vm13, %vm739_vm8  ;;  %v882_v20 = vsel %vm810_vm9, %v846_v14, %v430_v59  ;;  %v637_v27 = vshrl.u32 %v10485_v52, 4 }
  0xa2   : > { %v1443_v11 = vsel %vm10039_vm5, %v1434_v58, %v1442_v15  ;;  %v1444_v6 = vrot.slane %v1442_v15, 4  ;;  %v883_v17 = vsel %vm811_vm10, %v847_v4, %v441_v61  ;;  %vm918_vm11 = vcmp.lt.s32.totalorder %v882_v20, 16  ;;  %9141 = vmatmul.mubr.bf16.gmra.mxu1 %v9692_v43  ;;  %v8838_v15 = vld [vmem:[%s9905_s12 + $0x28] sm:$0xff]  }
  0xa3   : > { %v1452_v22 = vor.u32 %v1451_v19, %v1448_v16  ;;  %1780 = vst [vmem:[#allocation2 + $0x20] sm:$0xf] %v1443_v11  ;;  %vm919_vm12 = vcmp.lt.s32.totalorder %v883_v17, 16  ;;  %v8232_v23 = vsel %vm918_vm11, 1.0, %v9837_v8  ;;  %v627_v28 = vmul.u32 18, %v626_v10 }
  0xa4   : > { %v8233_v31 = vsel %vm919_vm12, 1.0, %v9837_v8  ;;  %v1220_v35 = vmul.f32 %v8232_v23, %v1184_v26  ;;  %v1123_v7 = vmul.f32 %v10280_v1, %v8736_v54  ;;  %v638_v39 = vmul.u32 18, %v637_v27 }
  0xa5   : > { %v1453_v58 = vsel %vm10039_vm5, %v1444_v6, %v1452_v22  ;;  %v1221_v36 = vmul.f32 %v8233_v31, %v1185_v18  ;;  %v1454_v63 = vrot.slane %v1452_v22, 4  ;;  %v628_v33 = vsub.s32 %v324_v45, %v627_v28 }
  0xa6   : > { %1781 = vst [vmem:[#allocation2 + $0x24] sm:$0xf] %v1453_v58  ;;  %v8622_v37 = vpack.c.bf16 %v1220_v35, %v1220_v35  ;;  %v1124_v41 = vmul.f32 %v10280_v1, %v8737_v24  ;;  %v1166_v21 = vadd.f32 %v10304_v34, %v1123_v7  ;;  %v639_v44 = vsub.s32 %v10475_v29, %v638_v39 }
  0xa7   : > { %v8623_v42 = vpack.c.bf16 %v1221_v36, %v1221_v36  ;;  %vm756_vm14 = vcmp.ne.s32.totalorder %v628_v33, 0  ;;  %vm792_vm15 = vcmp.lt.s32.totalorder %v628_v33, 0  ;;  %v864_v26 = vadd.s32 18, %v628_v33 }
  0xa8   : > { %v1456_v30 = vshrl.u32 %v8622_v37, 16  ;;  %v1459_v2 = vshll.u32 %v8622_v37, 16  ;;  %vm828_vm0 = vmand %vm792_vm15, %vm756_vm14  ;;  %v1167_v60 = vadd.f32 %v10304_v34, %v1124_v41  ;;  %v1202_v47 = vmax.f32 %v1166_v21, 0.0 }
  0xa9   : > { %v1466_v18 = vshrl.u32 %v8623_v42, 16  ;;  %v1469_v45 = vshll.u32 %v8623_v42, 16  ;;  %v900_v25 = vsel %vm828_vm0, %v864_v26, %v628_v33  ;;  %vm757_vm1 = vcmp.ne.s32.totalorder %v639_v44, 0 }
  0xaa   : > { %v1458_v49 = vrot.slane %v1456_v30, 6  ;;  %v1461_v50 = vrot.slane %v1459_v2, 7  ;;  %vm793_vm2 = vcmp.lt.s32.totalorder %v639_v44, 0  ;;  %v865_v53 = vadd.s32 18, %v639_v44 }
  0xab   : > { %v1468_v51 = vrot.slane %v1466_v18, 6  ;;  %v1471_v38 = vrot.slane %v1469_v45, 7  ;;  %vm829_vm3 = vmand %vm793_vm2, %vm757_vm1  ;;  %vm936_vm4 = vcmp.lt.s32.totalorder %v900_v25, 16  ;;  %v1203_v55 = vmax.f32 %v1167_v60, 0.0 }
  0xac   : > { %v1462_v54 = vor.u32 %v1461_v50, %v1458_v49  ;;  %v8250_v29 = vsel %vm936_vm4, 1.0, %v9837_v8  ;;  %v901_v62 = vsel %vm829_vm3, %v865_v53, %v639_v44  ;;  %v326_v0 = vadd.s32 224, %v9895_v3  ;;  %v10543_v49 = vld [vmem:[%s12538_s1] ss:$0 sm:$0xff] }
  0xad   : > { %v9694_v56 = vld [vmem:[#allocation2 + $0x20] sm:$0xff]   ;;  %v10505_v59 = vor.u32 %v1471_v38, %v1468_v51  ;;  %v1238_v32 = vmul.f32 %v8250_v29, %v1202_v47  ;;  %vm937_vm6 = vcmp.lt.s32.totalorder %v901_v62, 16  ;;  %v327_v5 = vadd.s32 232, %v9895_v3 }
  0xae   : > { %v1463_v52 = vsel %vm10039_vm5, %v1454_v63, %v1462_v54  ;;  %v1464_v24 = vrot.slane %v1462_v54, 4  ;;  %9124 = vmatprep.mubr.bf16.mxu0 %v9694_v56  ;;  %v8251_v61 = vsel %vm937_vm6, 1.0, %v9837_v8  ;;  %v8740_v11 = vunpack.c.l.bf16 %v8847_v9 }
  0xaf   : > { %1782 = vst [vmem:[#allocation2 + $0x28] sm:$0xf] %v1463_v52  ;;  %v8640_v12 = vpack.c.bf16 %v1238_v32, %v1238_v32  ;;  %v10513_v13 = vmul.u32.u64.low 3817748708, %v326_v0  ;;  %v10514_v14 = vmul.u32.u64.high 3817748708, %v326_v0, %v10513_v13  ;;  %v1239_v43 = vmul.f32 %v8251_v61, %v1203_v55 }
  0xb0   : > { %v1473_v4 = vsel %vm10039_vm5, %v1464_v24, %v10505_v59  ;;  %v10520_v16 = vmul.u32.u64.low 3817748708, %v327_v5  ;;  %v10521_v19 = vmul.u32.u64.high 3817748708, %v327_v5, %v10520_v16  ;;  %v8741_v6 = vunpack.c.h.bf16 %v8847_v9  ;;  %v10562_v24 = vld [vmem:[%s12539_s2] ss:$0 sm:$0xff] }
  0xb1   : > { %1783 = vst [vmem:[#allocation2 + $0x2c] sm:$0xf] %v1473_v4  ;;  %v1636_v20 = vshrl.u32 %v8640_v12, 16  ;;  %v1639_v10 = vshll.u32 %v8640_v12, 16  ;;  %v8641_v17 = vpack.c.bf16 %v1239_v43, %v1239_v43  ;;  %v1634_v22 = vrot.slane %v10456_v40, 4 }
  0xb2   : > { %v10525_v23 = vadd.s32 80, %v9895_v3  ;;  %v8704_v28 = vunpack.c.l.bf16 %v8838_v15  ;;  %v648_v27 = vshrl.u32 %v10514_v14, 4  ;;  %v1125_v7 = vmul.f32 %v10280_v1, %v8740_v11 }
  0xb3   : > { %v1638_v31 = vrot.slane %v1636_v20, 6  ;;  %v1641_v35 = vrot.slane %v1639_v10, 7  ;;  %v1646_v58 = vshrl.u32 %v8641_v17, 16  ;;  %v1649_v36 = vshll.u32 %v8641_v17, 16 }
  0xb4   : > { %v659_v63 = vshrl.u32 %v10521_v19, 4  ;;  %v1126_v33 = vmul.f32 %v10280_v1, %v8741_v6  ;;  %v649_v39 = vmul.u32 18, %v648_v27  ;;  %v1168_v40 = vadd.f32 %v10304_v34, %v1125_v7  ;;  %v10577_v19 = vld [vmem:[%s9905_s12 + $0x78] sm:$0xff]  }
  0xb5   : > { %v1642_v37 = vor.u32 %v1641_v35, %v1638_v31  ;;  %v8705_v41 = vunpack.c.h.bf16 %v8838_v15  ;;  %v1648_v21 = vrot.slane %v1646_v58, 6  ;;  %v1651_v42 = vrot.slane %v1649_v36, 7 }
  0xb6   : > { %v660_v26 = vmul.u32 18, %v659_v63  ;;  %v10533_v30 = vadd.s32 88, %v9895_v3  ;;  %v650_v60 = vsub.s32 %v326_v0, %v649_v39  ;;  %v1169_v18 = vadd.f32 %v10304_v34, %v1126_v33 }
  0xb7   : > { %v1643_v2 = vsel %vm10039_vm5, %v1634_v22, %v1642_v37  ;;  %v1644_v44 = vrot.slane %v1642_v37, 4  ;;  %v10538_v1 = vor.u32 %v1651_v42, %v1648_v21  ;;  %v1204_v47 = vmax.f32 %v1168_v40, 0.0 }
  0xb8   : > { %v9696_v45 = vld [vmem:[#allocation2 + $0x28] sm:$0xff]   ;;  %1800 = vst [vmem:[#allocation2 + $0x70] sm:$0xf] %v1643_v2  ;;  %v661_v25 = vsub.s32 %v327_v5, %v660_v26  ;;  %v1107_v50 = vmul.f32 %v10543_v49, %v8704_v28  ;;  %vm758_vm7 = vcmp.ne.s32.totalorder %v650_v60, 0  ;;  %vm794_vm8 = vcmp.lt.s32.totalorder %v650_v60, 0  ;;  %v9824_v28 = vld [vmem:[%s9905_s12 + $0x30] sm:$0xff]  }
  0xb9   : > { %v866_v51 = vadd.s32 18, %v650_v60  ;;  %v1108_v38 = vmul.f32 %v10543_v49, %v8705_v41  ;;  %9125 = vmatmul.mubr.bf16.gmra.mxu0 %v9696_v45  ;;  %v1653_v34 = vsel %vm10039_vm5, %v1644_v44, %v10538_v1  ;;  %vm830_vm10 = vmand %vm794_vm8, %vm758_vm7  ;;  %v1205_v29 = vmax.f32 %v1169_v18, 0.0 }
  0xba   : > { %vm759_vm13 = vcmp.ne.s32.totalorder %v661_v25, 0  ;;  %vm795_vm9 = vcmp.lt.s32.totalorder %v661_v25, 0  ;;  %v867_v53 = vadd.s32 18, %v661_v25  ;;  %1801 = vst [vmem:[#allocation2 + $0x74] sm:$0xf] %v1653_v34  ;;  %v10565_v5 = vadd.f32 %v10562_v24, %v1107_v50 }
  0xbb   : > { %vm831_vm11 = vmand %vm795_vm9, %vm759_vm13  ;;  %v902_v54 = vsel %vm830_vm10, %v866_v51, %v650_v60  ;;  %v10551_v55 = vmul.u32.u64.low 3817748708, %v10525_v23  ;;  %v10552_v56 = vmul.u32.u64.high 3817748708, %v10525_v23, %v10551_v55  ;;  %v10568_v9 = vadd.f32 %v10562_v24, %v1108_v38 }
  0xbc   : > { %v903_v62 = vsel %vm831_vm11, %v867_v53, %v661_v25  ;;  %vm938_vm12 = vcmp.lt.s32.totalorder %v902_v54, 16  ;;  %v10555_v32 = vmul.u32.u64.low 3817748708, %v10533_v30  ;;  %v10556_v0 = vmul.u32.u64.high 3817748708, %v10533_v30, %v10555_v32 }
  0xbd   : > { %vm939_vm14 = vcmp.lt.s32.totalorder %v903_v62, 16  ;;  %v8252_v52 = vsel %vm938_vm12, 1.0, %v9837_v8  ;;  %v1654_v13 = vrot.slane %v10538_v1, 4  ;;  %v310_v14 = vadd.s32 96, %v9895_v3 }
  0xbe   : > { %v8253_v61 = vsel %vm939_vm14, 1.0, %v9837_v8  ;;  %v1240_v12 = vmul.f32 %v8252_v52, %v1204_v47  ;;  %v450_v4 = vshrl.u32 %v10552_v56, 4  ;;  %v1186_v43 = vmax.f32 %v10565_v5, 0.0 }
  0xbf   : > { %v1241_v15 = vmul.f32 %v8253_v61, %v1205_v29  ;;  %v1187_v16 = vmax.f32 %v10568_v9, 0.0  ;;  %v461_v10 = vshrl.u32 %v10556_v0, 4  ;;  %v8708_v31 = vunpack.c.l.bf16 %v9824_v28 }
  0xc0   : > { %v8642_v20 = vpack.c.bf16 %v1240_v12, %v1240_v12  ;;  %v10580_v11 = vmul.u32.u64.low 3817748708, %v310_v14  ;;  %v10581_v6 = vmul.u32.u64.high 3817748708, %v310_v14, %v10580_v11  ;;  %v451_v22 = vmul.u32 18, %v450_v4 }
  0xc1   : > { %v8643_v17 = vpack.c.bf16 %v1241_v15, %v1241_v15  ;;  %v10585_v35 = vadd.s32 240, %v9895_v3  ;;  %v9698_v27 = vld [vmem:[#allocation2 + $0x70] sm:$0xff]   ;;  %v462_v36 = vmul.u32 18, %v461_v10  ;;  %v8744_v63 = vunpack.c.l.bf16 %v10577_v19 }
  0xc2   : > { %v1656_v7 = vshrl.u32 %v8642_v20, 16  ;;  %v1659_v58 = vshll.u32 %v8642_v20, 16  ;;  %v452_v39 = vsub.s32 %v10525_v23, %v451_v22  ;;  %v1109_v40 = vmul.f32 %v10543_v49, %v8708_v31  ;;  %9144 = vmatprep.mubr.bf16.mxu1 %v9698_v27 }
  0xc3   : > { %v1666_v33 = vshrl.u32 %v8643_v17, 16  ;;  %v1669_v37 = vshll.u32 %v8643_v17, 16  ;;  %v463_v42 = vsub.s32 %v10533_v30, %v462_v36  ;;  %v472_v26 = vshrl.u32 %v10581_v6, 4 }
  0xc4   : > { %v1658_v41 = vrot.slane %v1656_v7, 6  ;;  %v1661_v21 = vrot.slane %v1659_v58, 7  ;;  %vm740_vm15 = vcmp.ne.s32.totalorder %v452_v39, 0  ;;  %vm776_vm0 = vcmp.lt.s32.totalorder %v452_v39, 0 }
  0xc5   : > { %v1668_v2 = vrot.slane %v1666_v33, 6  ;;  %v1671_v44 = vrot.slane %v1669_v37, 7  ;;  %vm741_vm1 = vcmp.ne.s32.totalorder %v463_v42, 0  ;;  %vm777_vm2 = vcmp.lt.s32.totalorder %v463_v42, 0  ;;  %vm812_vm3 = vmand %vm776_vm0, %vm740_vm15 }
  0xc6   : > { %v1662_v60 = vor.u32 %v1661_v21, %v1658_v41  ;;  %v848_v18 = vadd.s32 18, %v452_v39  ;;  %vm813_vm4 = vmand %vm777_vm2, %vm741_vm1  ;;  %v849_v23 = vadd.s32 18, %v463_v42  ;;  %v473_v1 = vmul.u32 18, %v472_v26 }
  0xc7   : > { %v10592_v45 = vor.u32 %v1671_v44, %v1668_v2  ;;  %v1152_v25 = vadd.f32 %v10562_v24, %v1109_v40  ;;  %v329_v51 = vadd.s32 248, %v9895_v3  ;;  %v8745_v55 = vunpack.c.h.bf16 %v10577_v19 }
  0xc8   : > { %v1663_v30 = vsel %vm10039_vm5, %v1654_v13, %v1662_v60  ;;  %v1664_v47 = vrot.slane %v1662_v60, 4  ;;  %v884_v50 = vsel %vm812_vm3, %v848_v18, %v452_v39  ;;  %v885_v38 = vsel %vm813_vm4, %v849_v23, %v463_v42 }
  0xc9   : > { %1802 = vst [vmem:[#allocation2 + $0x78] sm:$0xf] %v1663_v30  ;;  %vm920_vm6 = vcmp.lt.s32.totalorder %v884_v50, 16  ;;  %v474_v34 = vsub.s32 %v310_v14, %v473_v1  ;;  %v1188_v53 = vmax.f32 %v1152_v25, 0.0  ;;  %vm921_vm7 = vcmp.lt.s32.totalorder %v885_v38, 16 }
  0xca   : > { %v1673_v54 = vsel %vm10039_vm5, %v1664_v47, %v10592_v45  ;;  %v8234_v29 = vsel %vm920_vm6, 1.0, %v9837_v8  ;;  %v8235_v56 = vsel %vm921_vm7, 1.0, %v9837_v8  ;;  %v1127_v13 = vmul.f32 %v10543_v49, %v8744_v63 }
  0xcb   : > { %1803 = vst [vmem:[#allocation2 + $0x7c] sm:$0xf] %v1673_v54  ;;  %v1222_v62 = vmul.f32 %v8234_v29, %v1186_v43  ;;  %vm742_vm8 = vcmp.ne.s32.totalorder %v474_v34, 0  ;;  %vm778_vm13 = vcmp.lt.s32.totalorder %v474_v34, 0  ;;  %v1223_v32 = vmul.f32 %v8235_v56, %v1187_v16  ;;  %v8849_v29 = vld [vmem:[%s9905_s12 + $0x80] sm:$0xff]  }
  0xcc   : > { %vm814_vm9 = vmand %vm778_vm13, %vm742_vm8  ;;  %v850_v0 = vadd.s32 18, %v474_v34  ;;  %v10605_v52 = vmul.u32.u64.low 3817748708, %v10585_v35  ;;  %v10606_v5 = vmul.u32.u64.high 3817748708, %v10585_v35, %v10605_v52  ;;  %v1474_v15 = vrot.slane %v10505_v59, 4 }
  0xcd   : > { %v8624_v9 = vpack.c.bf16 %v1222_v62, %v1222_v62  ;;  %v10608_v61 = vmul.u32.u64.low 3817748708, %v329_v51  ;;  %v10609_v12 = vmul.u32.u64.high 3817748708, %v329_v51, %v10608_v61  ;;  %v8625_v14 = vpack.c.bf16 %v1223_v32, %v1223_v32 }
  0xce   : > { %v886_v4 = vsel %vm814_vm9, %v850_v0, %v474_v34  ;;  %v1128_v43 = vmul.f32 %v10543_v49, %v8745_v55  ;;  %v1170_v20 = vadd.f32 %v10562_v24, %v1127_v13  ;;  %v670_v17 = vshrl.u32 %v10606_v5, 4  ;;  %v10637_v13 = vld [vmem:[#allocation2 + $0x4] sm:$0xf] }
  0xcf   : > { %v1476_v19 = vshrl.u32 %v8624_v9, 16  ;;  %v1479_v16 = vshll.u32 %v8624_v9, 16  ;;  %vm922_vm10 = vcmp.lt.s32.totalorder %v886_v4, 16  ;;  %v1486_v10 = vshrl.u32 %v8625_v14, 16 }
  0xd0   : > { %v1489_v11 = vshll.u32 %v8625_v14, 16  ;;  %v8236_v6 = vsel %vm922_vm10, 1.0, %v9837_v8  ;;  %v681_v27 = vshrl.u32 %v10609_v12, 4  ;;  %v671_v36 = vmul.u32 18, %v670_v17  ;;  %v2817_v14 = vld [vmem:[#allocation2] sm:$0xe] }
  0xd1   : > { %v1478_v22 = vrot.slane %v1476_v19, 6  ;;  %v1481_v28 = vrot.slane %v1479_v16, 7  ;;  %v1224_v31 = vmul.f32 %v8236_v6, %v1188_v53  ;;  %v1488_v7 = vrot.slane %v1486_v10, 6 }
  0xd2   : > { %v9699_v59 = vld [vmem:[#allocation2 + $0x78] sm:$0xff]   ;;  %v1491_v58 = vrot.slane %v1489_v11, 7  ;;  %v1171_v63 = vadd.f32 %v10562_v24, %v1128_v43  ;;  %v682_v39 = vmul.u32 18, %v681_v27  ;;  %v1206_v40 = vmax.f32 %v1170_v20, 0.0 }
  0xd3   : > { %v1482_v33 = vor.u32 %v1481_v28, %v1478_v22  ;;  %v8626_v37 = vpack.c.bf16 %v1224_v31, %v1224_v31  ;;  %9145 = vmatmul.mubr.bf16.gmra.mxu1 %v9699_v59  ;;  %v672_v21 = vsub.s32 %v10585_v35, %v671_v36  ;;  %v330_v26 = vadd.s32 256, %v9895_v3 }
  0xd4   : > { %v1492_v41 = vor.u32 %v1491_v58, %v1488_v7  ;;  %v1207_v42 = vmax.f32 %v1171_v63, 0.0  ;;  %v683_v1 = vsub.s32 %v329_v51, %v682_v39  ;;  %v331_v38 = vadd.s32 264, %v9895_v3 }
  0xd5   : > { %v1483_v2 = vsel %vm10039_vm5, %v1474_v15, %v1482_v33  ;;  %v1484_v44 = vrot.slane %v1482_v33, 4  ;;  %v1496_v60 = vshrl.u32 %v8626_v37, 16  ;;  %v1499_v18 = vshll.u32 %v8626_v37, 16 }
  0xd6   : > { %1784 = vst [vmem:[#allocation2 + $0x30] sm:$0xf] %v1483_v2  ;;  %v1494_v23 = vrot.slane %v1492_v41, 4  ;;  %vm760_vm11 = vcmp.ne.s32.totalorder %v672_v21, 0  ;;  %vm796_vm12 = vcmp.lt.s32.totalorder %v672_v21, 0  ;;  %v868_v47 = vadd.s32 18, %v672_v21 }
  0xd7   : > { %v1493_v25 = vsel %vm10039_vm5, %v1484_v44, %v1492_v41  ;;  %v1498_v30 = vrot.slane %v1496_v60, 6  ;;  %v1501_v35 = vrot.slane %v1499_v18, 7  ;;  %vm832_vm14 = vmand %vm796_vm12, %vm760_vm11  ;;  %vm761_vm15 = vcmp.ne.s32.totalorder %v683_v1, 0  ;;  %v10652_v41 = vld [vmem:[#allocation2 + $0x10] sm:$0xff]  }
  0xd8   : > { %1785 = vst [vmem:[#allocation2 + $0x34] sm:$0xf] %v1493_v25  ;;  %vm797_vm0 = vcmp.lt.s32.totalorder %v683_v1, 0  ;;  %v869_v50 = vadd.s32 18, %v683_v1  ;;  %v904_v53 = vsel %vm832_vm14, %v868_v47, %v672_v21  ;;  %v8748_v61 = vunpack.c.l.bf16 %v8849_v29 }
  0xd9   : > { %v1502_v34 = vor.u32 %v1501_v35, %v1498_v30  ;;  %vm833_vm1 = vmand %vm797_vm0, %vm761_vm15  ;;  %v10626_v51 = vmul.u32.u64.low 3817748708, %v330_v26  ;;  %v10627_v54 = vmul.u32.u64.high 3817748708, %v330_v26, %v10626_v51  ;;  %vm940_vm2 = vcmp.lt.s32.totalorder %v904_v53, 16 }
  0xda   : > { %v905_v55 = vsel %vm833_vm1, %v869_v50, %v683_v1  ;;  %v10630_v56 = vmul.u32.u64.low 3817748708, %v331_v38  ;;  %v10631_v62 = vmul.u32.u64.high 3817748708, %v331_v38, %v10630_v56  ;;  %v8254_v52 = vsel %vm940_vm2, 1.0, %v9837_v8 }
  0xdb   : > { %v1503_v32 = vsel %vm10039_vm5, %v1494_v23, %v1502_v34  ;;  %v1504_v0 = vrot.slane %v1502_v34, 4  ;;  %vm941_vm3 = vcmp.lt.s32.totalorder %v905_v55, 16  ;;  %v1242_v9 = vmul.f32 %v8254_v52, %v1206_v40  ;;  %v10650_v40 = vld [vmem:[#allocation2 + $0x8] sm:$0xff]   ;;  %v10658_v34 = vld [vmem:[#allocation2 + $0x18] sm:$0xff]  }
  0xdc   : > { %1786 = vst [vmem:[#allocation2 + $0x38] sm:$0xf] %v1503_v32  ;;  %v8255_v5 = vsel %vm941_vm3, 1.0, %v9837_v8  ;;  %v8749_v12 = vunpack.c.h.bf16 %v8849_v29  ;;  %v1674_v43 = vrot.slane %v10592_v45, 4  ;;  %v692_v19 = vshrl.u32 %v10627_v54, 4 }
  0xdd   : > { %v1513_v15 = vsel %vm10039_vm5, %v1504_v0, %v10033_v46  ;;  %v1243_v4 = vmul.f32 %v8255_v5, %v1207_v42  ;;  %v8644_v16 = vpack.c.bf16 %v1242_v9, %v1242_v9  ;;  %v703_v20 = vshrl.u32 %v10631_v62, 4  ;;  %v2242_v62 = vld [vmem:[#allocation2] sm:$0xf] }
  0xde   : > { %1787 = vst [vmem:[#allocation2 + $0x3c] sm:$0xf] %v1513_v15  ;;  %v1129_v10 = vmul.f32 %v10543_v49, %v8748_v61  ;;  %v1130_v11 = vmul.f32 %v10543_v49, %v8749_v12  ;;  %v693_v22 = vmul.u32 18, %v692_v19  ;;  %v8384_v28 = vcombine.low %v2817_v14, %v10637_v13  ;;  %v10667_v9 = vld [vmem:[#allocation2 + $0x20] sm:$0xff]  }
  0xdf   : > { %v9702_v6 = vld [vmem:[#allocation2 + $0x30] sm:$0xff]   ;;  %v8645_v17 = vpack.c.bf16 %v1243_v4, %v1243_v4  ;;  %vm2838_vm4 = vcmask 1046528   ;;  %v1676_v46 = vshrl.u32 %v8644_v16, 16  ;;  %v1679_v31 = vshll.u32 %v8644_v16, 16 }
  0xe0   : > { %v704_v27 = vmul.u32 18, %v703_v20  ;;  %v1172_v45 = vadd.f32 %v10562_v24, %v1129_v10  ;;  %9128 = vmatprep.mubr.bf16.mxu0 %v9702_v6  ;;  %v694_v58 = vsub.s32 %v330_v26, %v693_v22  ;;  %v1173_v36 = vadd.f32 %v10562_v24, %v1130_v11  ;;  %v9719_v4 = vld [vmem:[%s12540_s3 + $0x130] sm:$0xff]  }
  0xe1   : > { %v1686_v59 = vshrl.u32 %v8645_v17, 16  ;;  %v1689_v7 = vshll.u32 %v8645_v17, 16  ;;  %v1678_v63 = vrot.slane %v1676_v46, 6  ;;  %v1681_v33 = vrot.slane %v1679_v31, 7 }
  0xe2   : > { %v705_v37 = vsub.s32 %v331_v38, %v704_v27  ;;  %v1208_v39 = vmax.f32 %v1172_v45, 0.0  ;;  %vm762_vm6 = vcmp.ne.s32.totalorder %v694_v58, 0  ;;  %vm798_vm7 = vcmp.lt.s32.totalorder %v694_v58, 0  ;;  %v9724_v27 = vld [vmem:[%s12540_s3 + $0x128] sm:$0xff]  }
  0xe3   : > { %v1688_v21 = vrot.slane %v1686_v59, 6  ;;  %v1691_v42 = vrot.slane %v1689_v7, 7  ;;  %v1682_v2 = vor.u32 %v1681_v33, %v1678_v63  ;;  %vm834_vm9 = vmand %vm798_vm7, %vm762_vm6  ;;  %v870_v44 = vadd.s32 18, %v694_v58  ;;  %v10689_v33 = vld [vmem:[#allocation2 + $0x30] sm:$0xff]  }
  0xe4   : > { %vm763_vm8 = vcmp.ne.s32.totalorder %v705_v37, 0  ;;  %vm799_vm13 = vcmp.lt.s32.totalorder %v705_v37, 0  ;;  %v871_v18 = vadd.s32 18, %v705_v37  ;;  %v1209_v23 = vmax.f32 %v1173_v36, 0.0 }
  0xe5   : > { %v9703_v26 = vld [vmem:[#allocation2 + $0x38] sm:$0xff]   ;;  %v1692_v60 = vor.u32 %v1691_v42, %v1688_v21  ;;  %vm835_vm10 = vmand %vm799_vm13, %vm763_vm8  ;;  %v2839_v1 = vrot.slane %v8384_v28, 1  ;;  %v1683_v25 = vsel %vm10039_vm5, %v1674_v43, %v1682_v2  ;;  %v1684_v30 = vrot.slane %v1682_v2, 4  ;;  %v10674_v43 = vld [vmem:[#allocation2 + $0x28] sm:$0xff]  }
  0xe6   : > { %v906_v35 = vsel %vm834_vm9, %v870_v44, %v694_v58  ;;  %v2840_v47 = vrot.slane %v10650_v40, 1  ;;  %9129 = vmatmul.mubr.bf16.gmra.mxu0 %v9703_v26  ;;  %1804 = vst [vmem:[#allocation2 + $0x80] sm:$0xf] %v1683_v25  ;;  %v907_v50 = vsel %vm835_vm10, %v871_v18, %v705_v37  ;;  %v2842_v38 = vrot.slane %v10652_v41, 1  ;;  %v10696_v2 = vld [vmem:[#allocation2 + $0x38] sm:$0xff]   ;;  %v9729_v44 = vld [vmem:[%s12540_s3 + $0x120] sm:$0xff]  }
  0xe7   : > { %vm942_vm11 = vcmp.lt.s32.totalorder %v906_v35, 16  ;;  %v1693_v53 = vsel %vm10039_vm5, %v1684_v30, %v1692_v60  ;;  %vm943_vm12 = vcmp.lt.s32.totalorder %v907_v50, 16  ;;  %v2844_v0 = vrot.slane %v10658_v34, 1  ;;  %v10708_v35 = vld [vmem:[#allocation2 + $0x40] sm:$0xff]  }
  0xe8   : > { %v8256_v51 = vsel %vm942_vm11, 1.0, %v9837_v8  ;;  %v2841_v54 = vsel %vm2838_vm4, %v2839_v1, %v2840_v47  ;;  %1805 = vst [vmem:[#allocation2 + $0x84] sm:$0xf] %v1693_v53  ;;  %v8257_v29 = vsel %vm943_vm12, 1.0, %v9837_v8  ;;  %v2843_v5 = vsel %vm2838_vm4, %v2840_v47, %v2842_v38  ;;  %v9733_v1 = vld [vmem:[%s12540_s3 + $0x118] sm:$0xff]  }
  0xe9   : > { %v1244_v55 = vmul.f32 %v8256_v51, %v1208_v39  ;;  %9220 = vmatprep.mubr.bf16.mxu0 %v2841_v54  ;;  %v1245_v56 = vmul.f32 %v8257_v29, %v1209_v23  ;;  %v8341_v14 = vcombine.low %v2242_v62, %v10637_v13  ;;  %v2845_v15 = vsel %vm2838_vm4, %v2842_v38, %v2844_v0  ;;  %v9825_v13 = vld [vmem:[%s12540_s3 + $0x138] sm:$0xff]   ;;  %v10715_v29 = vld [vmem:[#allocation2 + $0x48] sm:$0xff]  }
  0xea   : > { %v1694_v20 = vrot.slane %v1692_v60, 4  ;;  %v2846_v28 = vrot.slane %v10667_v9, 1  ;;  %v2848_v59 = vrot.slane %v10674_v43, 1  ;;  %v2398_v21 = vshll.u32 %v10650_v40, 16 }
  0xeb   : > { %v8646_v32 = vpack.c.bf16 %v1244_v55, %v1244_v55  ;;  %v8647_v52 = vpack.c.bf16 %v1245_v56, %v1245_v56  ;;  %v2393_v31 = vshll.u32 %v8341_v14, 16  ;;  %v2391_v36 = vshrl.u32 %v8341_v14, 16 }
  0xec   : > { %v2847_v63 = vsel %vm2838_vm4, %v2844_v0, %v2846_v28  ;;  %v2849_v42 = vsel %vm2838_vm4, %v2846_v28, %v2848_v59  ;;  %v2850_v26 = vrot.slane %v10689_v33, 1  ;;  %v2400_v18 = vrot.slane %v2398_v21, 1 }
  0xed   : > { %v1696_v61 = vshrl.u32 %v8646_v32, 16  ;;  %v1699_v12 = vshll.u32 %v8646_v32, 16  ;;  %v1706_v19 = vshrl.u32 %v8647_v52, 16  ;;  %v1709_v16 = vshll.u32 %v8647_v52, 16  ;;  %v9741_v52 = vld [vmem:[%s12540_s3 + $0x108] sm:$0xff]  }
  0xee   : > { %9221 = vmatmul.mubr.bf16.vlgmr.msra.gmra.mxu0 %v2843_v5  ;;  %v2395_v39 = vrot.slane %v2393_v31, 1  ;;  %v2852_v23 = vrot.slane %v10696_v2, 1  ;;  %vm2389_vm14 = vsmask.f32 7424  ;;  %v2402_v25 = vshrl.u32 %v10650_v40, 16  ;;  %v9737_v40 = vld [vmem:[%s12540_s3 + $0x110] sm:$0xff]  }
  0xef   : > { %v1698_v10 = vrot.slane %v1696_v61, 6  ;;  %v1701_v11 = vrot.slane %v1699_v12, 7  ;;  %v9706_v6 = vld [vmem:[#allocation2 + $0x80] sm:$0xff]   ;;  %v1708_v17 = vrot.slane %v1706_v19, 6  ;;  %v1711_v22 = vrot.slane %v1709_v16, 7  ;;  %9309 = vmatpush3.bf16.msra.mxu0 %v9825_v13  ;;  %9224 = vmatprep.mubr.bf16.mxu0 %v2845_v15  ;;  %v10729_v15 = vld [vmem:[#allocation2 + $0x50] sm:$0xff]  }
  0xf0   : > { %9310 = vmatprep.subr.bf16.mxu0 %v9719_v4  ;;  %9148 = vmatprep.mubr.bf16.mxu1 %v9706_v6  ;;  %v2396_v60 = vor.u32 %v2395_v39, %v2391_v36  ;;  %v2406_v30 = vshll.u32 %v10652_v41, 16  ;;  %v2851_v47 = vsel %vm2838_vm4, %v2848_v59, %v2850_v26  ;;  %v2410_v53 = vshrl.u32 %v10652_v41, 16  ;;  %v9718_v19 = vld [vmem:[%s12540_s3 + $0xf0] sm:$0xff]   ;;  %v9745_v6 = vld [vmem:[%s12540_s3 + $0x100] sm:$0xff]   ;;  %v9827_v59 = vld [vmem:[%s9905_s12 + $0x88] sm:$0xff]  }
  0xf1   : > { %v1702_v46 = vor.u32 %v1701_v11, %v1698_v10  ;;  %v10683_v45 = vor.u32 %v1711_v22, %v1708_v17  ;;  %v2414_v51 = vshll.u32 %v10658_v34, 16  ;;  %v2853_v54 = vsel %vm2838_vm4, %v2850_v26, %v2852_v23  ;;  %v10738_v11 = vld [vmem:[#allocation2 + $0x58] sm:$0xff]  }
  0xf2   : > { %v2401_v38 = vsel %vm2389_vm14, %v2396_v60, %v2400_v18  ;;  %v2408_v55 = vrot.slane %v2406_v30, 1  ;;  %v2404_v56 = vor.u32 %v2402_v25, %v2400_v18  ;;  %v2854_v62 = vrot.slane %v10708_v35, 1  ;;  %v9726_v18 = vld [vmem:[%s12540_s3 + $0xe0] sm:$0xff]   ;;  %v10775_v25 = vld [vmem:[%s12540_s3 + $0x1b8] sm:$0xff]  }
  0xf3   : > { %v1703_v7 = vsel %vm10039_vm5, %v1694_v20, %v1702_v46  ;;  %v1704_v58 = vrot.slane %v1702_v46, 4  ;;  %9311 = vmatpush3.bf16.msra.mxu0 %v9719_v4  ;;  %v2416_v32 = vrot.slane %v2414_v51, 1  ;;  %v2856_v0 = vrot.slane %v10715_v29, 1  ;;  %v9722_v46 = vld [vmem:[%s12540_s3 + $0xe8] sm:$0xff]  }
  0xf4   : > { %1806 = vst [vmem:[#allocation2 + $0x88] sm:$0xf] %v1703_v7  ;;  %9312 = vmatprep.subr.bf16.mxu0 %v9724_v27  ;;  %v2412_v41 = vor.u32 %v2410_v53, %v2408_v55  ;;  %v2422_v5 = vshll.u32 %v10667_v9, 16  ;;  %v2409_v61 = vsel %vm2389_vm14, %v2404_v56, %v2408_v55  ;;  %v2418_v12 = vshrl.u32 %v10658_v34, 16 }
  0xf5   : > { %v1713_v37 = vsel %vm10039_vm5, %v1704_v58, %v10683_v45  ;;  %v2855_v14 = vsel %vm2838_vm4, %v2852_v23, %v2854_v62  ;;  %v2426_v16 = vshrl.u32 %v10667_v9, 16  ;;  %v2430_v20 = vshll.u32 %v10674_v43, 16  ;;  %v9826_v9 = vld [vmem:[%s12540_s3 + $0xf8] sm:$0xff]  }
  0xf6   : > { %1807 = vst [vmem:[#allocation2 + $0x8c] sm:$0xf] %v1713_v37  ;;  %9225 = vmatmul.mubr.bf16.gmra.mxu0 %v2847_v63  ;;  %v2417_v4 = vsel %vm2389_vm14, %v2412_v41, %v2416_v32  ;;  %v2857_v10 = vsel %vm2838_vm4, %v2854_v62, %v2856_v0  ;;  %v2424_v34 = vrot.slane %v2422_v5, 1  ;;  %v2420_v17 = vor.u32 %v2418_v12, %v2416_v32  ;;  %v10791_v5 = vld [vmem:[#allocation2 + $0x70] sm:$0xff]  }
  0xf7   : > { %9228 = vmatprep.mubr.bf16.mxu0 %v2849_v42  ;;  %9313 = vmatpush3.bf16.msra.mxu0 %v9724_v27  ;;  %v2858_v22 = vrot.slane %v10729_v15, 1  ;;  %v2432_v28 = vrot.slane %v2430_v20, 1  ;;  %v332_v31 = vadd.s32 272, %v9895_v3  ;;  %v2860_v27 = vrot.slane %v10738_v11, 1  ;;  %v10760_v42 = vld [vmem:[#allocation2 + $0x60] sm:$0xff]  }
  0xf8   : > { %9314 = vmatprep.subr.bf16.mxu0 %v9729_v44  ;;  %v2428_v13 = vor.u32 %v2426_v16, %v2424_v34  ;;  %v8752_v7 = vunpack.c.l.bf16 %v9827_v59  ;;  %v2438_v58 = vshll.u32 %v10689_v33, 16  ;;  %v2425_v37 = vsel %vm2389_vm14, %v2420_v17, %v2424_v34 }
  0xf9   : > { %v10754_v36 = vmul.u32.u64.low 3817748708, %v332_v31  ;;  %v10755_v63 = vmul.u32.u64.high 3817748708, %v332_v31, %v10754_v36  ;;  %v2434_v39 = vshrl.u32 %v10674_v43, 16  ;;  %v2859_v21 = vsel %vm2838_vm4, %v2856_v0, %v2858_v22 }
  0xfa   : > { %v2442_v26 = vshrl.u32 %v10689_v33, 16  ;;  %v2446_v60 = vshll.u32 %v10696_v2, 16  ;;  %v2861_v23 = vsel %vm2838_vm4, %v2858_v22, %v2860_v27  ;;  %v1131_v43 = vmul.f32 %v10543_v49, %v8752_v7  ;;  %v9731_v49 = vld [vmem:[%s12540_s3 + $0xd8] sm:$0xff]   ;;  %v3155_v7 = vld [vmem:[#allocation2 + $0x8] sm:$0xe] }
  0xfb   : > { %9315 = vmatpush3.bf16.msra.mxu0 %v9729_v44  ;;  %v2433_v44 = vsel %vm2389_vm14, %v2428_v13, %v2432_v28  ;;  %v2440_v33 = vrot.slane %v2438_v58, 1  ;;  %v714_v30 = vshrl.u32 %v10755_v63, 4  ;;  %v2450_v55 = vshrl.u32 %v10696_v2, 16  ;;  %v9736_v2 = vld [vmem:[%s12540_s3 + $0xd0] sm:$0xff]   ;;  %v10812_v58 = vld [vmem:[#allocation2 + $0xc] sm:$0xf] }
  0xfc   : > { %9316 = vmatprep.subr.bf16.mxu0 %v9733_v1  ;;  %v2448_v53 = vrot.slane %v2446_v60, 1  ;;  %v2454_v56 = vshll.u32 %v10708_v35, 16  ;;  %v2458_v32 = vshrl.u32 %v10708_v35, 16  ;;  %v2462_v0 = vshll.u32 %v10715_v29, 16 }
  0xfd   : > { %v9707_v50 = vld [vmem:[#allocation2 + $0x88] sm:$0xff]   ;;  %v715_v51 = vmul.u32 18, %v714_v30  ;;  %v2866_v20 = vrot.slane %v10791_v5, 1  ;;  %v2470_v13 = vshll.u32 %v10729_v15, 16  ;;  %v2478_v63 = vshll.u32 %v10738_v11, 16 }
  0xfe   : > { %9149 = vmatmul.mubr.bf16.gmra.mxu1 %v9707_v50  ;;  %9229 = vmatmul.mubr.bf16.gmra.mxu0 %v2851_v47  ;;  %v2436_v47 = vor.u32 %v2434_v39, %v2432_v28  ;;  %v2862_v50 = vrot.slane %v10760_v42, 1  ;;  %v2452_v16 = vor.u32 %v2450_v55, %v2448_v53  ;;  %v2464_v34 = vrot.slane %v2462_v0, 1  ;;  %v10818_v39 = vld [vmem:[#allocation2 + $0x88] sm:$0xff]  }
  0xff   : > { %9168 = vmatprep.mubr.bf16.mxu1 %v2401_v38  ;;  %9232 = vmatprep.mubr.bf16.mxu0 %v2853_v54  ;;  %v2444_v38 = vor.u32 %v2442_v26, %v2440_v33  ;;  %v716_v62 = vsub.s32 %v332_v31, %v715_v51  ;;  %v1714_v26 = vrot.slane %v10683_v45, 4  ;;  %v2472_v60 = vrot.slane %v2470_v13, 1 }
 0x100   : > { %9317 = vmatpush3.bf16.msra.mxu0 %v9733_v1  ;;  %v10769_v1 = vld [vmem:[#allocation2 + $0x68] sm:$0xff]   ;;  %v2441_v41 = vsel %vm2389_vm14, %v2436_v47, %v2440_v33  ;;  %v2872_v45 = vrot.slane %v10818_v39, 1  ;;  %vm3639_vm3 = vsmask.f32 6400  ;;  %vm5382_vm6 = vcmask 1044480  }
 0x101   : > { %9318 = vmatprep.subr.bf16.mxu0 %v9737_v40  ;;  %v2864_v54 = vrot.slane %v10769_v1, 1  ;;  %vm764_vm15 = vcmp.ne.s32.totalorder %v716_v62, 0  ;;  %vm800_vm0 = vcmp.lt.s32.totalorder %v716_v62, 0  ;;  %v872_v12 = vadd.s32 18, %v716_v62 }
 0x102   : > { %vm836_vm1 = vmand %vm800_vm0, %vm764_vm15  ;;  %vm4911_vm7 = vsmask.f32 5376 }
 0x103   : > { %v2865_v35 = vsel %vm2838_vm4, %v2862_v50, %v2864_v54  ;;  %v2867_v31 = vsel %vm2838_vm4, %v2864_v54, %v2866_v20 }
 0x104   : > { %9319 = vmatpush3.bf16.msra.mxu0 %v9737_v40  ;;  %v1174_v40 = vadd.f32 %v10562_v24, %v1131_v43  ;;  %v2449_v24 = vsel %vm2389_vm14, %v2444_v38, %v2448_v53  ;;  %v2486_v38 = vshll.u32 %v10760_v42, 16 }
 0x105   : > { %9320 = vmatprep.subr.bf16.mxu0 %v9741_v52 }
 0x106   : > { %9169 = vmatmul.mubr.bf16.vlgmr.msra.gmra.mxu1 %v2409_v61  ;;  %9233 = vmatmul.mubr.bf16.gmra.mxu0 %v2855_v14  ;;  %v10797_v61 = vld [vmem:[#allocation2 + $0x78] sm:$0xff]   ;;  %v1210_v14 = vmax.f32 %v1174_v40, 0.0 }
 0x107   : > { %9257 = vmatpush3.bf16.msra.mxu1 %v9826_v9  ;;  %9172 = vmatprep.mubr.bf16.mxu1 %v2417_v4  ;;  %v2456_v4 = vrot.slane %v2454_v56, 1  ;;  %v9740_v9 = vld [vmem:[%s12540_s3 + $0xc8] sm:$0xff]  }
 0x108   : > { %9258 = vmatprep.subr.bf16.mxu1 %v9718_v19  ;;  %9236 = vmatprep.mubr.bf16.mxu0 %v2857_v10 }
 0x109   : > { %9321 = vmatpush3.bf16.msra.mxu0 %v9741_v52  ;;  %v2863_v52 = vsel %vm2838_vm4, %v2860_v27, %v2862_v50  ;;  %v2460_v10 = vor.u32 %v2458_v32, %v2456_v4  ;;  %v2457_v28 = vsel %vm2389_vm14, %v2452_v16, %v2456_v4  ;;  %v10810_v27 = vld [vmem:[#allocation2 + $0x80] sm:$0xff]   ;;  %v2480_v50 = vrot.slane %v2478_v63, 1 }
 0x10a   : > { %9322 = vmatprep.subr.bf16.mxu0 %v9745_v6  ;;  %v2870_v43 = vrot.slane %v10810_v27, 1 }
 0x10b   : > { %9259 = vmatpush3.bf16.msra.mxu1 %v9718_v19  ;;  %v908_v19 = vsel %vm836_vm1, %v872_v12, %v716_v62  ;;  %v2465_v36 = vsel %vm2389_vm14, %v2460_v10, %v2464_v34  ;;  %v2482_v62 = vshrl.u32 %v10738_v11, 16  ;;  %v2488_v12 = vrot.slane %v2486_v38, 1 }
 0x10c   : > { %9260 = vmatprep.subr.bf16.mxu1 %v9722_v46  ;;  %vm944_vm2 = vcmp.lt.s32.totalorder %v908_v19, 16  ;;  %v2526_v38 = vshll.u32 %v10818_v39, 16 }
 0x10d   : > { %9323 = vmatpush3.bf16.msra.mxu0 %v9745_v6  ;;  %v2868_v6 = vrot.slane %v10797_v61, 1  ;;  %v8258_v17 = vsel %vm944_vm2, 1.0, %v9837_v8  ;;  %v2474_v8 = vshrl.u32 %v10729_v15, 16  ;;  %v10825_v15 = vcombine.low %v3155_v7, %v10812_v58 }
 0x10e   : > { %9173 = vmatmul.mubr.bf16.gmra.mxu1 %v2425_v37  ;;  %9237 = vmatmul.mubr.bf16.gmra.mxu0 %v2859_v21  ;;  %v1246_v22 = vmul.f32 %v8258_v17, %v1210_v14  ;;  %v2484_v16 = vor.u32 %v2482_v62, %v2480_v50  ;;  %v2506_v17 = vshrl.u32 %v10791_v5, 16  ;;  %v10889_v62 = vld [vmem:[#allocation2 + $0x38] sm:$0xff]  }
 0x10f   : > { %9176 = vmatprep.mubr.bf16.mxu1 %v2433_v44  ;;  %9261 = vmatpush3.bf16.msra.mxu1 %v9722_v46  ;;  %v2466_v46 = vshrl.u32 %v10715_v29, 16  ;;  %v2869_v37 = vsel %vm2838_vm4, %v2866_v20, %v2868_v6  ;;  %v9744_v44 = vld [vmem:[%s12540_s3 + $0xc0] sm:$0xff]   ;;  %v2476_v47 = vor.u32 %v2474_v8, %v2472_v60  ;;  %v3641_v51 = vshrl.u32 %v10825_v15, 16 }
 0x110   : > { %9262 = vmatprep.subr.bf16.mxu1 %v9726_v18  ;;  %9240 = vmatprep.mubr.bf16.mxu0 %v2861_v23  ;;  %v8648_v59 = vpack.c.bf16 %v1246_v22, %v1246_v22  ;;  %v3644_v54 = vshll.u32 %v10825_v15, 16  ;;  %v2489_v7 = vsel %vm2389_vm14, %v2484_v16, %v2488_v12 }
 0x111   : > { %9412 = vmatprep.subr.bf16.mxu0 %v10775_v25  ;;  %v2468_v23 = vor.u32 %v2466_v46, %v2464_v34  ;;  %v2481_v0 = vsel %vm2389_vm14, %v2476_v47, %v2480_v50  ;;  %v3643_v11 = vrot.slane %v3641_v51, 1  ;;  %v2522_v50 = vshrl.u32 %v10810_v27, 16 }
 0x112   : > { %v1716_v29 = vshrl.u32 %v8648_v59, 16  ;;  %v1719_v21 = vshll.u32 %v8648_v59, 16  ;;  %v3646_v14 = vrot.slane %v3644_v54, 2 }
 0x113   : > { %9263 = vmatpush3.bf16.msra.mxu1 %v9726_v18  ;;  %v10827_v18 = vld [vmem:[#allocation2 + $0x10] sm:$0xff]   ;;  %v2473_v56 = vsel %vm2389_vm14, %v2468_v23, %v2472_v60 }
 0x114   : > { %9264 = vmatprep.subr.bf16.mxu1 %v9731_v49  ;;  %v1718_v33 = vrot.slane %v1716_v29, 6  ;;  %v1721_v30 = vrot.slane %v1719_v21, 7  ;;  %v3649_v40 = vshrl.u32 %v10827_v18, 16  ;;  %v3652_v55 = vshll.u32 %v10827_v18, 16  ;;  %v10873_v21 = vld [vmem:[#allocation2 + $0x28] sm:$0xff]  }
 0x115   : > { %v2514_v29 = vshrl.u32 %v10797_v61, 16  ;;  %v3679_v51 = vshll.u32 %v10873_v21, 16 }
 0x116   : > { %9177 = vmatmul.mubr.bf16.gmra.mxu1 %v2441_v41  ;;  %9241 = vmatmul.mubr.bf16.gmra.mxu0 %v2863_v52  ;;  %v1722_v53 = vor.u32 %v1721_v30, %v1718_v33  ;;  %v2871_v41 = vsel %vm2838_vm4, %v2868_v6, %v2870_v43  ;;  %v2490_v52 = vshrl.u32 %v10760_v42, 16  ;;  %v3651_v4 = vrot.slane %v3649_v40, 1  ;;  %v10855_v42 = vld [vmem:[#allocation2 + $0x20] sm:$0xff]  }
 0x117   : > { %9180 = vmatprep.mubr.bf16.mxu1 %v2449_v24  ;;  %9265 = vmatpush3.bf16.msra.mxu1 %v9731_v49  ;;  %v10835_v49 = vld [vmem:[%s12540_s3 + $0x178] sm:$0xff]   ;;  %v2494_v24 = vshll.u32 %v10769_v1, 16  ;;  %v3654_v19 = vrot.slane %v3652_v55, 2  ;;  %v2498_v6 = vshrl.u32 %v10769_v1, 16  ;;  %v3670_v59 = vshll.u32 %v10855_v42, 16 }
 0x118   : > { %9244 = vmatprep.mubr.bf16.mxu0 %v2865_v35  ;;  %9266 = vmatprep.subr.bf16.mxu1 %v9736_v2  ;;  %v1723_v32 = vsel %vm10039_vm5, %v1714_v26, %v1722_v53  ;;  %v10852_v35 = vld [vmem:[#allocation2 + $0x18] sm:$0xff]   ;;  %v1724_v20 = vrot.slane %v1722_v53, 4  ;;  %v2492_v10 = vor.u32 %v2490_v52, %v2488_v12  ;;  %v2518_v26 = vshll.u32 %v10810_v27, 16 }
 0x119   : > { %1808 = vst [vmem:[#allocation2 + $0x90] sm:$0xf] %v1723_v32  ;;  %v2496_v34 = vrot.slane %v2494_v24, 1  ;;  %v3658_v22 = vshrl.u32 %v10852_v35, 16  ;;  %v3661_v13 = vshll.u32 %v10852_v35, 16  ;;  %v3655_v46 = vor.u32 %v3654_v19, %v3651_v4 }
 0x11a   : > { %v3672_v30 = vrot.slane %v3670_v59, 2  ;;  %v3676_v53 = vshrl.u32 %v10873_v21, 16  ;;  %v2520_v55 = vrot.slane %v2518_v26, 1  ;;  %v2528_v52 = vrot.slane %v2526_v38, 1  ;;  %v10921_v26 = vld [vmem:[#allocation2 + $0x50] sm:$0xff]  }
 0x11b   : > { %9267 = vmatpush3.bf16.msra.mxu1 %v9736_v2  ;;  %v2873_v2 = vsel %vm2838_vm4, %v2870_v43, %v2872_v45  ;;  %v2497_v8 = vsel %vm2389_vm14, %v2492_v10, %v2496_v34  ;;  %v2500_v63 = vor.u32 %v2498_v6, %v2496_v34  ;;  %v3660_v23 = vrot.slane %v3658_v22, 1  ;;  %v10900_v10 = vld [vmem:[#allocation2 + $0x40] sm:$0xff]   ;;  %v4089_v34 = vld [vmem:[#allocation2 + $0x8] sm:$0xc] }
 0x11c   : > { %9268 = vmatprep.subr.bf16.mxu1 %v9740_v9  ;;  %v3663_v43 = vrot.slane %v3661_v13, 2  ;;  %v3678_v24 = vrot.slane %v3676_v53, 1  ;;  %v3694_v4 = vshrl.u32 %v10889_v62, 16  ;;  %v3697_v19 = vshll.u32 %v10889_v62, 16 }
 0x11d   : > { %v4112_v59 = vrot.slane %v10827_v18, 2 }
 0x11e   : > { %9181 = vmatmul.mubr.bf16.gmra.mxu1 %v2457_v28  ;;  %9245 = vmatmul.mubr.bf16.gmra.mxu0 %v2867_v31  ;;  %v3647_v28 = vor.u32 %v3646_v14, %v3643_v11  ;;  %v3667_v31 = vshrl.u32 %v10855_v42, 16 }
 0x11f   : > { %9184 = vmatprep.mubr.bf16.mxu1 %v2465_v36  ;;  %9248 = vmatprep.mubr.bf16.mxu0 %v2869_v37  ;;  %v2510_v36 = vshll.u32 %v10797_v61, 16 }
 0x120   : > { %9269 = vmatpush3.bf16.msra.mxu1 %v9740_v9  ;;  %v2502_v9 = vshll.u32 %v10791_v5, 16  ;;  %v10866_v1 = vld [vmem:[#allocation2 + $0x90] ss:$0 sps:$4 sm:$0x11]   ;;  %v1733_v5 = vsel %vm10039_vm5, %v1724_v20, %v10150_v57  ;;  %v3656_v57 = vsel %vm3639_vm3, %v3647_v28, %v3655_v46  ;;  %v3669_v33 = vrot.slane %v3667_v31, 1 }
 0x121   : > { %9270 = vmatprep.subr.bf16.mxu1 %v9744_v44  ;;  %1809 = vst [vmem:[#allocation2 + $0x94] sm:$0xf] %v1733_v5  ;;  %v2874_v60 = vrot.slane %v10866_v1, 1  ;;  %v2512_v47 = vrot.slane %v2510_v36, 1  ;;  %v9754_v20 = vld [vmem:[%s12540_s3 + $0x1b0] sm:$0xff]   ;;  %v3696_v28 = vrot.slane %v3694_v4, 1  ;;  %v8477_v31 = vcombine.low %v4089_v34, %v10812_v58 }
 0x122   : > { %v2504_v37 = vrot.slane %v2502_v9, 1  ;;  %v3703_v36 = vshrl.u32 %v10900_v10, 16  ;;  %v3706_v5 = vshll.u32 %v10900_v10, 16  ;;  %v3303_v58 = vrot.slane %v10827_v18, 1 }
 0x123   : > { %v2875_v61 = vsel %vm2838_vm4, %v2872_v45, %v2874_v60  ;;  %v2516_v32 = vor.u32 %v2514_v29, %v2512_v47  ;;  %vm4110_vm5 = vcmask 1045504   ;;  %v4118_v18 = vrot.slane %v10873_v21, 2 }
 0x124   : > { %9271 = vmatpush3.bf16.msra.mxu1 %v9744_v44  ;;  %v10875_v44 = vld [vmem:[#allocation2 + $0x30] sm:$0xff]   ;;  %v2508_v48 = vor.u32 %v2506_v17, %v2504_v37  ;;  %v2505_v45 = vsel %vm2389_vm14, %v2500_v63, %v2504_v37  ;;  %v2530_v17 = vshrl.u32 %v10818_v39, 16  ;;  %v9759_v39 = vld [vmem:[%s12540_s3 + $0x1a8] sm:$0xff]   ;;  %v2534_v63 = vshll.u32 %v10866_v1, 16 }
 0x125   : > { %9360 = vmatprep.subr.bf16.mxu1 %v10835_v49  ;;  %v3685_v54 = vshrl.u32 %v10875_v44, 16  ;;  %v3688_v40 = vshll.u32 %v10875_v44, 16  ;;  %v2521_v6 = vsel %vm2389_vm14, %v2516_v32, %v2520_v55  ;;  %v4111_v37 = vrot.slane %v8477_v31, 2 }
 0x126   : > { %9185 = vmatmul.mubr.bf16.gmra.mxu1 %v2473_v56  ;;  %9249 = vmatmul.mubr.bf16.gmra.mxu0 %v2871_v41  ;;  %v3664_v56 = vor.u32 %v3663_v43, %v3660_v23  ;;  %v3673_v41 = vor.u32 %v3672_v30, %v3669_v33  ;;  %v2513_v27 = vsel %vm2389_vm14, %v2508_v48, %v2512_v47  ;;  %v4116_v23 = vrot.slane %v10855_v42, 2  ;;  %v9764_v47 = vld [vmem:[%s12540_s3 + $0x1a0] sm:$0xff]  }
 0x127   : > { %9188 = vmatprep.mubr.bf16.mxu1 %v2481_v0  ;;  %9252 = vmatprep.mubr.bf16.mxu0 %v2873_v2  ;;  %v2524_v0 = vor.u32 %v2522_v50, %v2520_v55  ;;  %v3681_v2 = vrot.slane %v3679_v51, 2  ;;  %v3687_v12 = vrot.slane %v3685_v54, 1  ;;  %v3690_v11 = vrot.slane %v3688_v40, 2  ;;  %v10944_v40 = vld [vmem:[#allocation2 + $0x58] sm:$0xff]  }
 0x128   : > { %v3665_v14 = vsel %vm3639_vm3, %v3655_v46, %v3664_v56  ;;  %v3674_v16 = vsel %vm3639_vm3, %v3664_v56, %v3673_v41  ;;  %v3699_v46 = vrot.slane %v3697_v19, 2  ;;  %v10929_v1 = vsel %vm4110_vm5, %v4111_v37, %v4112_v59 }
 0x129   : > { %v2529_v9 = vsel %vm2389_vm14, %v2524_v0, %v2528_v52  ;;  %v3682_v22 = vor.u32 %v3681_v2, %v3678_v24  ;;  %v3691_v13 = vor.u32 %v3690_v11, %v3687_v12  ;;  %v3708_v33 = vrot.slane %v3706_v5, 2  ;;  %v10958_v24 = vld [vmem:[#allocation2 + $0x60] sm:$0xff]   ;;  %v9768_v2 = vld [vmem:[%s12540_s3 + $0x198] sm:$0xff]   ;;  %v10991_v5 = vld [vmem:[#allocation2 + $0x70] sm:$0xff]  }
 0x12a   : > { %v3700_v48 = vor.u32 %v3699_v46, %v3696_v28  ;;  %v2532_v50 = vor.u32 %v2530_v17, %v2528_v52  ;;  %v2536_v38 = vrot.slane %v2534_v63, 1  ;;  %v10940_v53 = vsel %vm4110_vm5, %v4116_v23, %v4118_v18 }
 0x12b   : > { %v3683_v29 = vsel %vm3639_vm3, %v3673_v41, %v3682_v22  ;;  %v3692_v43 = vsel %vm3639_vm3, %v3682_v22, %v3691_v13  ;;  %v3721_v54 = vshrl.u32 %v10921_v26, 16  ;;  %v4120_v55 = vrot.slane %v10875_v44, 2 }
 0x12c   : > { %v3701_v41 = vsel %vm3639_vm3, %v3691_v13, %v3700_v48  ;;  %v3724_v52 = vshll.u32 %v10921_v26, 16  ;;  %v2537_v11 = vsel %vm2389_vm14, %v2532_v50, %v2536_v38  ;;  %v4124_v4 = vrot.slane %v10900_v10, 2 }
 0x12d   : > { %v10964_v12 = vsel %vm4110_vm5, %v4118_v18, %v4120_v55  ;;  %v3730_v34 = vshrl.u32 %v10944_v40, 16  ;;  %v4128_v13 = vrot.slane %v10921_v26, 2  ;;  %v4130_v28 = vrot.slane %v10944_v40, 2  ;;  %v11004_v18 = vld [vmem:[#allocation2 + $0x80] sm:$0xff]  }
 0x12e   : > { %9189 = vmatmul.mubr.bf16.gmra.mxu1 %v2489_v7  ;;  %9253 = vmatmul.mubr.bf16.gmra.mxu0 %v2875_v61  ;;  %v3302_v7 = vrot.slane %v10825_v15, 1  ;;  %v3305_v15 = vrot.slane %v10852_v35, 1  ;;  %v3726_v31 = vrot.slane %v3724_v52, 2 }
 0x12f   : > { %9192 = vmatprep.mubr.bf16.mxu1 %v2497_v8  ;;  %9324 = vmatprep.mubr.bf16.mxu0 %v3656_v57  ;;  %v10914_v8 = vld [vmem:[#allocation2 + $0x48] sm:$0xff]   ;;  %v3705_v57 = vrot.slane %v3703_v36, 1  ;;  %v9772_v36 = vld [vmem:[%s12540_s3 + $0x190] sm:$0xff]   ;;  %v10999_v63 = vsel %vm4110_vm5, %v4128_v13, %v4130_v28 }
 0x130   : > { %v3712_v30 = vshrl.u32 %v10914_v8, 16  ;;  %v3715_v51 = vshll.u32 %v10914_v8, 16  ;;  %v3304_v56 = vsel %vm2838_vm4, %v3302_v7, %v3303_v58  ;;  %v4126_v19 = vrot.slane %v10914_v8, 2 }
 0x131   : > { %v10955_v32 = vor.u32 %v3708_v33, %v3705_v57  ;;  %v3742_v7 = vshll.u32 %v10958_v24, 16 }
 0x132   : > { %v3714_v0 = vrot.slane %v3712_v30, 1  ;;  %v10980_v22 = vsel %vm4110_vm5, %v4124_v4, %v4126_v19  ;;  %v4136_v30 = vrot.slane %v10991_v5, 2 }
 0x133   : > { %v3710_v46 = vsel %vm3639_vm3, %v3700_v48, %v10955_v32 }
 0x136   : > { %9193 = vmatmul.mubr.bf16.gmra.mxu1 %v2505_v45  ;;  %9325 = vmatmul.mubr.bf16.vlgmr.msra.gmra.mxu0 %v3665_v14  ;;  %v10951_v45 = vsel %vm2838_vm4, %v3303_v58, %v3305_v15  ;;  %v4132_v58 = vrot.slane %v10958_v24, 2 }
 0x137   : > { %9196 = vmatprep.mubr.bf16.mxu1 %v2513_v27  ;;  %9413 = vmatpush3.bf16.msra.mxu0 %v10775_v25  ;;  %v4114_v25 = vrot.slane %v10852_v35, 2  ;;  %v4122_v27 = vrot.slane %v10889_v62, 2 }
 0x138   : > { %9328 = vmatprep.mubr.bf16.mxu0 %v3674_v16  ;;  %9414 = vmatprep.subr.bf16.mxu0 %v9754_v20  ;;  %v3717_v16 = vrot.slane %v3715_v51, 2  ;;  %v11007_v57 = vsel %vm4110_vm5, %v4130_v28, %v4132_v58 }
 0x139   : > { %v10924_v60 = vsel %vm4110_vm5, %v4112_v59, %v4114_v25  ;;  %v10937_v61 = vsel %vm4110_vm5, %v4114_v25, %v4116_v23  ;;  %v10968_v14 = vsel %vm4110_vm5, %v4120_v55, %v4122_v27  ;;  %v10977_v17 = vsel %vm4110_vm5, %v4122_v27, %v4124_v4  ;;  %v9776_v55 = vld [vmem:[%s12540_s3 + $0x188] sm:$0xff]  }
 0x13a   : > { %v3739_v59 = vshrl.u32 %v10958_v24, 16  ;;  %v10996_v25 = vsel %vm4110_vm5, %v4126_v19, %v4128_v13  ;;  %v3718_v23 = vor.u32 %v3717_v16, %v3714_v0  ;;  %v4140_v0 = vrot.slane %v11004_v18, 2 }
 0x13b   : > { %9415 = vmatpush3.bf16.msra.mxu0 %v9754_v20  ;;  %v3723_v20 = vrot.slane %v3721_v54, 1  ;;  %v11016_v54 = vld [vmem:[#allocation2 + $0x88] sm:$0xff]   ;;  %v3760_v4 = vshll.u32 %v10991_v5, 16  ;;  %v3309_v16 = vrot.slane %v10873_v21, 1  ;;  %v9781_v21 = vld [vmem:[%s12540_s3 + $0x180] sm:$0xff]  }
 0x13c   : > { %9416 = vmatprep.subr.bf16.mxu0 %v9759_v39  ;;  %v4142_v19 = vrot.slane %v11016_v54, 2 }
 0x13d   : > { %v3727_v50 = vor.u32 %v3726_v31, %v3723_v20  ;;  %v3311_v20 = vrot.slane %v10875_v44, 1 }
 0x13e   : > { %9197 = vmatmul.mubr.bf16.gmra.mxu1 %v2521_v6  ;;  %9329 = vmatmul.mubr.bf16.gmra.mxu0 %v3683_v29  ;;  %v3733_v6 = vshll.u32 %v10944_v40, 16  ;;  %v3307_v29 = vrot.slane %v10855_v42, 1  ;;  %v3741_v42 = vrot.slane %v3739_v59, 1  ;;  %v11051_v44 = vsel %vm4110_vm5, %v4140_v0, %v4142_v19 }
 0x13f   : > { %9200 = vmatprep.mubr.bf16.mxu1 %v2529_v9  ;;  %9332 = vmatprep.mubr.bf16.mxu0 %v3692_v43  ;;  %v10974_v9 = vld [vmem:[#allocation2 + $0x68] sm:$0xff]   ;;  %v3732_v43 = vrot.slane %v3730_v34, 1  ;;  %v3719_v34 = vsel %vm3639_vm3, %v10955_v32, %v3718_v23  ;;  %12577 = vst [vmem:[#allocation4_spill] sm:$0xff] %v11051_v44 }
 0x140   : > { %9417 = vmatpush3.bf16.msra.mxu0 %v9759_v39  ;;  %v10993_v39 = vld [vmem:[#allocation2 + $0x78] sm:$0xff]   ;;  %v4134_v37 = vrot.slane %v10974_v9, 2  ;;  %v3735_v48 = vrot.slane %v3733_v6, 2  ;;  %v3748_v38 = vshrl.u32 %v10974_v9, 16  ;;  %v3751_v51 = vshll.u32 %v10974_v9, 16 }
 0x141   : > { %9418 = vmatprep.subr.bf16.mxu0 %v9764_v47  ;;  %v3308_v52 = vsel %vm2838_vm4, %v3305_v15, %v3307_v29  ;;  %v12545_v15 = vrot.slane %v10889_v62, 1  ;;  %v3728_v6 = vsel %vm3639_vm3, %v3718_v23, %v3727_v50  ;;  %v3766_v31 = vshrl.u32 %v10993_v39, 16 }
 0x142   : > { %v11010_v33 = vsel %vm4110_vm5, %v4132_v58, %v4134_v37  ;;  %v3736_v13 = vor.u32 %v3735_v48, %v3732_v43  ;;  %v3750_v28 = vrot.slane %v3748_v38, 1  ;;  %v11062_v58 = vld [vmem:[#allocation2 + $0x98] ss:$0 sps:$4 sm:$0x33]   ;;  %v3769_v23 = vshll.u32 %v10993_v39, 16 }
 0x143   : > { %v4427_v43 = vld [vmem:[#allocation2 + $0x10] sm:$0xc]  ;;  %v4428_v48 = vld [vmem:[#allocation2 + $0x14] sm:$0xf] }
 0x144   : > { %9419 = vmatpush3.bf16.msra.mxu0 %v9764_v47  ;;  %v4138_v47 = vrot.slane %v10993_v39, 2 }
 0x145   : > { %9420 = vmatprep.subr.bf16.mxu0 %v9768_v2 }
 0x146   : > { %9201 = vmatmul.mubr.bf16.gmra.mxu1 %v2537_v11  ;;  %9333 = vmatmul.mubr.bf16.gmra.mxu0 %v3701_v41  ;;  %v11022_v41 = vsel %vm4110_vm5, %v4134_v37, %v4136_v30  ;;  %v11025_v27 = vsel %vm4110_vm5, %v4136_v30, %v4138_v47  ;;  %v3757_v11 = vshrl.u32 %v10991_v5, 16  ;;  %v11042_v35 = vsel %vm4110_vm5, %v4138_v47, %v4140_v0 }
 0x147   : > { %9272 = vmatprep.mubr.bf16.mxu1 %v3304_v56  ;;  %9336 = vmatprep.mubr.bf16.mxu0 %v3710_v46  ;;  %v3744_v56 = vrot.slane %v3742_v7, 2  ;;  %v3753_v46 = vrot.slane %v3751_v51, 2  ;;  %v3762_v7 = vrot.slane %v3760_v4, 2  ;;  %v3312_v37 = vsel %vm2838_vm4, %v3309_v16, %v3311_v20 }
 0x148   : > { %9421 = vmatpush3.bf16.msra.mxu0 %v9768_v2  ;;  %v9753_v2 = vld [vmem:[%s12540_s3 + $0x170] sm:$0xff]   ;;  %v3759_v59 = vrot.slane %v3757_v11, 1  ;;  %v11070_v30 = vsel %vm2838_vm4, %v3311_v20, %v12545_v15  ;;  %v12547_v47 = vrot.slane %v10900_v10, 1  ;;  %v4146_v0 = vrot.slane %v11062_v58, 2 }
 0x149   : > { %9422 = vmatprep.subr.bf16.mxu0 %v9772_v36  ;;  %v11057_v32 = vor.u32 %v3744_v56, %v3741_v42  ;;  %v3737_v42 = vsel %vm3639_vm3, %v3727_v50, %v3736_v13  ;;  %v3768_v56 = vrot.slane %v3766_v31, 1  ;;  %v9761_v50 = vld [vmem:[%s12540_s3 + $0x160] sm:$0xff]   ;;  %v11088_v4 = vcombine.low %v4427_v43, %v4428_v48 }
 0x14a   : > { %v11086_v11 = vor.u32 %v3762_v7, %v3759_v59 }
 0x14b   : > { %v3746_v51 = vsel %vm3639_vm3, %v3736_v13, %v11057_v32  ;;  %v3778_v13 = vshll.u32 %v11004_v18, 16  ;;  %v4916_v7 = vshll.u32 %v11088_v4, 16 }
 0x14c   : > { %9423 = vmatpush3.bf16.msra.mxu0 %v9772_v36  ;;  %v11060_v36 = vld [vmem:[#allocation2 + $0x90] sm:$0xff]  }
 0x14d   : > { %9424 = vmatprep.subr.bf16.mxu0 %v9776_v55  ;;  %v4144_v38 = vrot.slane %v11060_v36, 2 }
 0x14e   : > { %9273 = vmatmul.mubr.bf16.vlgmr.msra.gmra.mxu1 %v10951_v45  ;;  %v9757_v45 = vld [vmem:[%s12540_s3 + $0x168] sm:$0xff]   ;;  %9337 = vmatmul.mubr.bf16.gmra.mxu0 %v3719_v34  ;;  %v3771_v34 = vrot.slane %v3769_v23, 2 }
 0x14f   : > { %9361 = vmatpush3.bf16.msra.mxu1 %v10835_v49  ;;  %9276 = vmatprep.mubr.bf16.mxu1 %v3308_v52  ;;  %v3310_v49 = vsel %vm2838_vm4, %v3307_v29, %v3309_v16  ;;  %v11077_v29 = vld [vmem:[%s12540_s3 + $0x238] sm:$0xff]   ;;  %v5361_v52 = vld [vmem:[#allocation2 + $0x10] sm:$0x8] }
 0x150   : > { %9362 = vmatprep.subr.bf16.mxu1 %v9753_v2  ;;  %9340 = vmatprep.mubr.bf16.mxu0 %v3728_v6  ;;  %v11090_v16 = vld [vmem:[#allocation2 + $0x18] sm:$0xff]   ;;  %v8570_v20 = vcombine.low %v5361_v52, %v4428_v48  ;;  %v3775_v6 = vshrl.u32 %v11004_v18, 16 }
 0x151   : > { %9425 = vmatpush3.bf16.msra.mxu0 %v9776_v55  ;;  %v3754_v55 = vor.u32 %v3753_v46, %v3750_v28  ;;  %v11097_v28 = vld [vmem:[#allocation2 + $0x20] sm:$0xff]   ;;  %v11100_v46 = vsel %vm4110_vm5, %v4144_v38, %v4146_v0  ;;  %v5384_v59 = vrot.slane %v11090_v16, 3  ;;  %v4921_v23 = vshrl.u32 %v11090_v16, 16 }
 0x152   : > { %9426 = vmatprep.subr.bf16.mxu0 %v9781_v21  ;;  %12579 = vst [vmem:[#allocation6_spill] sm:$0xff] %v11100_v46  ;;  %v5383_v31 = vrot.slane %v8570_v20, 3  ;;  %v4924_v43 = vshll.u32 %v11090_v16, 16  ;;  %v4918_v0 = vrot.slane %v4916_v7, 3  ;;  %v4933_v15 = vshll.u32 %v11097_v28, 16 }
 0x153   : > { %9363 = vmatpush3.bf16.msra.mxu1 %v9753_v2  ;;  %v11093_v2 = vsel %vm4110_vm5, %v4142_v19, %v4144_v38  ;;  %v4913_v19 = vshrl.u32 %v11088_v4, 16  ;;  %v4923_v52 = vrot.slane %v4921_v23, 2  ;;  %v3755_v23 = vsel %vm3639_vm3, %v11057_v32, %v3754_v55 }
 0x154   : > { %9364 = vmatprep.subr.bf16.mxu1 %v9757_v45  ;;  %12578 = vst [vmem:[#allocation5_spill] sm:$0xff] %v11093_v2  ;;  %v11113_v48 = vsel %vm5382_vm6, %v5383_v31, %v5384_v59  ;;  %v4926_v20 = vrot.slane %v4924_v43, 3  ;;  %v3317_v31 = vrot.slane %v10914_v8, 1  ;;  %v4935_v46 = vrot.slane %v4933_v15, 3 }
 0x155   : > { %9427 = vmatpush3.bf16.msra.mxu0 %v9781_v21  ;;  %v5386_v21 = vrot.slane %v11097_v28, 3  ;;  %v4915_v38 = vrot.slane %v4913_v19, 2  ;;  %v3764_v43 = vsel %vm3639_vm3, %v3754_v55, %v11086_v11  ;;  %v3777_v8 = vrot.slane %v3775_v6, 1 }
 0x156   : > { %9277 = vmatmul.mubr.bf16.gmra.mxu1 %v3310_v49  ;;  %9516 = vmatprep.subr.bf16.mxu0 %v11077_v29  ;;  %v9766_v49 = vld [vmem:[%s12540_s3 + $0x158] sm:$0xff]   ;;  %v3787_v55 = vshll.u32 %v11016_v54, 16  ;;  %v12589_v2 = vrot.slane %v10921_v26, 1 }
 0x157   : > { %9280 = vmatprep.mubr.bf16.mxu1 %v3312_v37  ;;  %9365 = vmatpush3.bf16.msra.mxu1 %v9757_v45  ;;  %v4930_v45 = vshrl.u32 %v11097_v28, 16  ;;  %v11117_v37 = vsel %vm5382_vm6, %v5384_v59, %v5386_v21  ;;  %v4919_v19 = vor.u32 %v4918_v0, %v4915_v38  ;;  %v4927_v59 = vor.u32 %v4926_v20, %v4923_v52  ;;  %v11134_v0 = vld [vmem:[#allocation2 + $0x28] sm:$0xff]   ;;  %v11137_v52 = vld [vmem:[#allocation2 + $0x30] sm:$0xff]  }
 0x158   : > { %9366 = vmatprep.subr.bf16.mxu1 %v9761_v50  ;;  %9341 = vmatmul.mubr.bf16.gmra.mxu0 %v3737_v42  ;;  %v12580_v42 = vrot.slane %v10889_v62, 1  ;;  %v9771_v62 = vld [vmem:[%s12540_s3 + $0x150] sm:$0xff]   ;;  %v3780_v38 = vrot.slane %v3778_v13, 2  ;;  %v5388_v20 = vrot.slane %v11134_v0, 3  ;;  %v4939_v6 = vshrl.u32 %v11134_v0, 16 }
 0x159   : > { %9344 = vmatprep.mubr.bf16.mxu0 %v3746_v51  ;;  %v4932_v7 = vrot.slane %v4930_v45, 2  ;;  %v3784_v45 = vshrl.u32 %v11016_v54, 16  ;;  %v11140_v15 = vsel %vm4911_vm7, %v4919_v19, %v4927_v59  ;;  %v4942_v13 = vshll.u32 %v11134_v0, 16  ;;  %v9775_v19 = vld [vmem:[%s12540_s3 + $0x148] sm:$0xff]  }
 0x15a   : > { %v3316_v3 = vsel %vm2838_vm4, %v12580_v42, %v12547_v47  ;;  %12581 = vst [vmem:[#allocation7_spill] sm:$0xff] %v11140_v15  ;;  %v4948_v42 = vshrl.u32 %v11137_v52, 16 }
 0x15b   : > { %9367 = vmatpush3.bf16.msra.mxu1 %v9761_v50  ;;  %v3772_v50 = vor.u32 %v3771_v34, %v3768_v56  ;;  %v4936_v32 = vor.u32 %v4935_v46, %v4932_v7  ;;  %v5390_v34 = vrot.slane %v11137_v52, 3  ;;  %v4951_v46 = vshll.u32 %v11137_v52, 16 }
 0x15c   : > { %9368 = vmatprep.subr.bf16.mxu1 %v9766_v49  ;;  %v11157_v7 = vsel %vm5382_vm6, %v5386_v21, %v5388_v20  ;;  %v4950_v47 = vrot.slane %v4948_v42, 2  ;;  %v12586_v21 = vrot.slane %v10921_v26, 1  ;;  %v11220_v26 = vld [vmem:[#allocation2 + $0x50] sm:$0xff]  }
 0x15d   : > { %v11148_v56 = vsel %vm4911_vm7, %v4927_v59, %v4936_v32  ;;  %12583 = vst [vmem:[#allocation9_spill] sm:$0xff] %v11157_v7  ;;  %v3793_v59 = vshrl.u32 %v11060_v36, 16  ;;  %v11161_v51 = vsel %vm5382_vm6, %v5388_v20, %v5390_v34  ;;  %v3773_v42 = vsel %vm3639_vm3, %v11086_v11, %v3772_v50 }
 0x15e   : > { %9281 = vmatmul.mubr.bf16.gmra.mxu1 %v11070_v30  ;;  %12582 = vst [vmem:[#allocation8_spill] sm:$0xff] %v11148_v56  ;;  %v3781_v30 = vor.u32 %v3780_v38, %v3777_v8  ;;  %12584 = vst [vmem:[#allocation10_spill] sm:$0xff] %v11161_v51  ;;  %v4953_v56 = vrot.slane %v4951_v46, 3  ;;  %v12585_v38 = vrot.slane %v10900_v10, 1  ;;  %v3786_v46 = vrot.slane %v3784_v45, 1  ;;  %v9779_v10 = vld [vmem:[%s12540_s3 + $0x140] sm:$0xff]  }
 0x15f   : > { %9284 = vmatprep.mubr.bf16.mxu1 %v3316_v3  ;;  %9369 = vmatpush3.bf16.msra.mxu1 %v9766_v49  ;;  %v4941_v3 = vrot.slane %v4939_v6, 2  ;;  %v4944_v49 = vrot.slane %v4942_v13, 3  ;;  %v3320_v6 = vsel %vm2838_vm4, %v3317_v31, %v12586_v21 }
 0x160   : > { %9345 = vmatmul.mubr.bf16.gmra.mxu0 %v3755_v23  ;;  %9370 = vmatprep.subr.bf16.mxu1 %v9771_v62  ;;  %v3796_v23 = vshll.u32 %v11060_v36, 16  ;;  %v3318_v15 = vsel %vm2838_vm4, %v12585_v38, %v3317_v31  ;;  %v4954_v13 = vor.u32 %v4953_v56, %v4950_v47  ;;  %v3789_v31 = vrot.slane %v3787_v55, 2 }
 0x161   : > { %9348 = vmatprep.mubr.bf16.mxu0 %v3764_v43  ;;  %v4945_v8 = vor.u32 %v4944_v49, %v4941_v3  ;;  %v3321_v43 = vrot.slane %v10944_v40, 1  ;;  %v11177_v3 = vld [vmem:[#allocation2 + $0x38] sm:$0xff]   ;;  %v3782_v40 = vsel %vm3639_vm3, %v3772_v50, %v3781_v30  ;;  %v3795_v47 = vrot.slane %v3793_v59, 1 }
 0x162   : > { %v3798_v11 = vrot.slane %v3796_v23, 2  ;;  %v5392_v45 = vrot.slane %v11177_v3, 3  ;;  %v4957_v38 = vshrl.u32 %v11177_v3, 16  ;;  %v4960_v21 = vshll.u32 %v11177_v3, 16  ;;  %v11199_v23 = vld [vmem:[%s12540_s3 + $0x1f8] sm:$0xff]  }
 0x163   : > { %9371 = vmatpush3.bf16.msra.mxu1 %v9771_v62  ;;  %v11180_v49 = vsel %vm4911_vm7, %v4936_v32, %v4945_v8  ;;  %v11183_v62 = vld [vmem:[#allocation2 + $0x40] sm:$0xff]   ;;  %v11186_v56 = vsel %vm4911_vm7, %v4945_v8, %v4954_v13  ;;  %v3802_v32 = vshrl.u32 %v11062_v58, 16  ;;  %v3790_v20 = vor.u32 %v3789_v31, %v3786_v46  ;;  %v11214_v46 = vld [vmem:[#allocation2 + $0x48] sm:$0xff]  }
 0x164   : > { %9372 = vmatprep.subr.bf16.mxu1 %v9775_v19  ;;  %12587 = vst [vmem:[#allocation11_spill] sm:$0xff] %v11180_v49  ;;  %12588 = vst [vmem:[#allocation12_spill] sm:$0xff] %v11186_v56  ;;  %v5394_v50 = vrot.slane %v11183_v62, 3  ;;  %v4966_v55 = vshrl.u32 %v11183_v62, 16  ;;  %v4969_v59 = vshll.u32 %v11183_v62, 16  ;;  %v11202_v8 = vsel %vm5382_vm6, %v5390_v34, %v5392_v45 }
 0x165   : > { %v3799_v51 = vor.u32 %v3798_v11, %v3795_v47  ;;  %v3322_v44 = vsel %vm2838_vm4, %v12589_v2, %v3321_v43  ;;  %v12590_v34 = vrot.slane %v10958_v24, 1  ;;  %v3791_v31 = vsel %vm3639_vm3, %v3781_v30, %v3790_v20 }
 0x166   : > { %9285 = vmatmul.mubr.bf16.gmra.mxu1 %v3318_v15  ;;  %v3805_v15 = vshll.u32 %v11062_v58, 16  ;;  %v11205_v56 = vsel %vm5382_vm6, %v5392_v45, %v5394_v50  ;;  %v4968_v49 = vrot.slane %v4966_v55, 2  ;;  %v3804_v47 = vrot.slane %v3802_v32, 1 }
 0x167   : > { %9288 = vmatprep.mubr.bf16.mxu1 %v3320_v6  ;;  %9373 = vmatpush3.bf16.msra.mxu1 %v9775_v19  ;;  %v4959_v19 = vrot.slane %v4957_v38, 2  ;;  %v4962_v6 = vrot.slane %v4960_v21, 3  ;;  %v3324_v38 = vsel %vm2838_vm4, %v3321_v43, %v12590_v34  ;;  %v5396_v43 = vrot.slane %v11214_v46, 3 }
 0x168   : > { %9349 = vmatmul.mubr.bf16.gmra.mxu0 %v3773_v42  ;;  %9374 = vmatprep.subr.bf16.mxu1 %v9779_v10  ;;  %v4971_v42 = vrot.slane %v4969_v59, 3  ;;  %v3807_v11 = vrot.slane %v3805_v15, 2  ;;  %v4978_v45 = vshll.u32 %v11214_v46, 16  ;;  %v5398_v30 = vrot.slane %v11220_v26, 3 }
 0x169   : > { %9352 = vmatprep.mubr.bf16.mxu0 %v3782_v40  ;;  %v4963_v58 = vor.u32 %v4962_v6, %v4959_v19  ;;  %v4984_v21 = vshrl.u32 %v11220_v26, 16  ;;  %v4987_v32 = vshll.u32 %v11220_v26, 16  ;;  %v3327_v55 = vrot.slane %v10991_v5, 1 }
 0x16a   : > { %v4972_v7 = vor.u32 %v4971_v42, %v4968_v49  ;;  %v4975_v49 = vshrl.u32 %v11214_v46, 16  ;;  %v4980_v59 = vrot.slane %v4978_v45, 3  ;;  %v3808_v15 = vor.u32 %v3807_v11, %v3804_v47 }
 0x16b   : > { %9375 = vmatpush3.bf16.msra.mxu1 %v9779_v10  ;;  %v11217_v40 = vsel %vm4911_vm7, %v4954_v13, %v4963_v58  ;;  %v3800_v10 = vsel %vm3639_vm3, %v3790_v20, %v3799_v51  ;;  %v3325_v13 = vrot.slane %v10974_v9, 1  ;;  %v11238_v19 = vsel %vm5382_vm6, %v5396_v43, %v5398_v30 }
 0x16c   : > { %9464 = vmatprep.subr.bf16.mxu1 %v11199_v23  ;;  %v11223_v2 = vsel %vm4911_vm7, %v4963_v58, %v4972_v7  ;;  %v4977_v20 = vrot.slane %v4975_v49, 2  ;;  %v4986_v9 = vrot.slane %v4984_v21, 2  ;;  %v4989_v6 = vrot.slane %v4987_v32, 3  ;;  %v11246_v49 = vld [vmem:[#allocation2 + $0x58] sm:$0xff]  }
 0x16d   : > { %12591 = vst [vmem:[#allocation13_spill] sm:$0xff] %v11223_v2  ;;  %v4574_v42 = vrot.slane %v11088_v4, 2  ;;  %v4575_v58 = vrot.slane %v11090_v16, 2  ;;  %v12592_v5 = vrot.slane %v10958_v24, 1  ;;  %v3809_v11 = vsel %vm3639_vm3, %v3799_v51, %v3808_v15  ;;  %v11258_v16 = vpop.f32.mrf.mxu0 }
 0x16e   : > { %9289 = vmatmul.mubr.bf16.gmra.mxu1 %v3322_v44  ;;  %v11235_v44 = vsel %vm5382_vm6, %v5394_v50, %v5396_v43  ;;  %v4981_v34 = vor.u32 %v4980_v59, %v4977_v20  ;;  %v4990_v50 = vor.u32 %v4989_v6, %v4986_v9  ;;  %v5400_v43 = vrot.slane %v11246_v49, 3 }
 0x16f   : > { %9292 = vmatprep.mubr.bf16.mxu1 %v3324_v38  ;;  %v3326_v38 = vsel %vm2838_vm4, %v12592_v5, %v3325_v13  ;;  %v4576_v24 = vsel %vm4110_vm5, %v4574_v42, %v4575_v58  ;;  %v4993_v45 = vshrl.u32 %v11246_v49, 16  ;;  %v3331_v20 = vrot.slane %v11004_v18, 1 }
 0x170   : > { %9353 = vmatmul.mubr.bf16.gmra.mxu0 %v3791_v31  ;;  %v3328_v31 = vsel %vm2838_vm4, %v3325_v13, %v3327_v55  ;;  %v11249_v47 = vsel %vm4911_vm7, %v4972_v7, %v4981_v34  ;;  %v11255_v4 = vsel %vm4911_vm7, %v4981_v34, %v4990_v50  ;;  %v4996_v13 = vshll.u32 %v11246_v49, 16 }
 0x171   : > { %9356 = vmatprep.mubr.bf16.mxu0 %v3800_v10  ;;  %12593 = vst [vmem:[#allocation14_spill] sm:$0xff] %v11249_v47  ;;  %v11252_v10 = vld [vmem:[#allocation2 + $0x60] sm:$0xff]   ;;  %12594 = vst [vmem:[#allocation15_spill] sm:$0xff] %v11255_v4  ;;  %v3329_v7 = vrot.slane %v10993_v39, 1  ;;  %v11269_v59 = vsel %vm5382_vm6, %v5398_v30, %v5400_v43  ;;  %v4995_v15 = vrot.slane %v4993_v45, 2  ;;  %v4577_v6 = vrot.slane %v11097_v28, 2 }
 0x172   : > { %v5402_v51 = vrot.slane %v11252_v10, 3  ;;  %v5002_v21 = vshrl.u32 %v11252_v10, 16  ;;  %v5005_v32 = vshll.u32 %v11252_v10, 16  ;;  %v4998_v9 = vrot.slane %v4996_v13, 3  ;;  %v11280_v45 = vld [vmem:[#allocation2 + $0x68] sm:$0xff]  }
 0x173   : > { %v4579_v5 = vrot.slane %v11134_v0, 2  ;;  %v3330_v18 = vsel %vm2838_vm4, %v3327_v55, %v3329_v7  ;;  %v3332_v30 = vsel %vm2838_vm4, %v3329_v7, %v3331_v20  ;;  %v4578_v28 = vsel %vm4110_vm5, %v4575_v58, %v4577_v6  ;;  %v9791_v55 = vld [vmem:[%s12540_s3 + $0x230] sm:$0xff]  }
 0x174   : > { %v11273_v42 = vsel %vm5382_vm6, %v5400_v43, %v5402_v51  ;;  %v5004_v39 = vrot.slane %v5002_v21, 2  ;;  %v5007_v34 = vrot.slane %v5005_v32, 3  ;;  %v11286_v43 = vld [vmem:[#allocation2 + $0x70] sm:$0xff]   ;;  %v11292_v21 = vpop.f32.mrf.mxu1  ;;  %v5011_v58 = vshrl.u32 %v11280_v45, 16 }
 0x175   : > { %12595 = vst [vmem:[#allocation16_spill] sm:$0xff] %v11273_v42  ;;  %v4580_v0 = vsel %vm4110_vm5, %v4577_v6, %v4579_v5  ;;  %v5014_v32 = vshll.u32 %v11280_v45, 16  ;;  %v5020_v6 = vshrl.u32 %v11286_v43, 16  ;;  %v4585_v2 = vrot.slane %v11183_v62, 2 }
 0x176   : > { %9293 = vmatmul.mubr.bf16.gmra.mxu1 %v3326_v38  ;;  %v11276_v38 = vpop.f32.mrf.mxu0  ;;  %v11315_v47 = vpop.f32.mrf.mxu1 }
 0x177   : > { %9296 = vmatprep.mubr.bf16.mxu1 %v3328_v31  ;;  %v4999_v31 = vor.u32 %v4998_v9, %v4995_v15  ;;  %v3333_v15 = vrot.slane %v11016_v54, 1  ;;  %v5406_v9 = vrot.slane %v11286_v43, 3 }
 0x178   : > { %9357 = vmatmul.mubr.bf16.gmra.mxu0 %v3809_v11  ;;  %v5008_v11 = vor.u32 %v5007_v34, %v5004_v39  ;;  %v11297_v7 = vpop.f32.mrf.mxu0  ;;  %v5023_v39 = vshll.u32 %v11286_v43, 16  ;;  %v3335_v34 = vrot.slane %v11060_v36, 1  ;;  %v4583_v36 = vrot.slane %v11177_v3, 2 }
 0x179   : > { %9428 = vmatprep.mubr.bf16.mxu0 %v4576_v24  ;;  %v11283_v24 = vsel %vm4911_vm7, %v4990_v50, %v4999_v31  ;;  %v5404_v50 = vrot.slane %v11280_v45, 3 }
 0x17a   : > { %12596 = vst [vmem:[#allocation17_spill] sm:$0xff] %v11283_v24  ;;  %v11289_v13 = vsel %vm4911_vm7, %v4999_v31, %v5008_v11  ;;  %v5022_v24 = vrot.slane %v5020_v6, 2  ;;  %v5025_v4 = vrot.slane %v5023_v39, 3  ;;  %v11331_v39 = vld [vmem:[#allocation2 + $0x80] sm:$0xff]  }
 0x17b   : > { %12597 = vst [vmem:[#allocation18_spill] sm:$0xff] %v11289_v13  ;;  %v11308_v31 = vsel %vm5382_vm6, %v5402_v51, %v5404_v50  ;;  %v5016_v13 = vrot.slane %v5014_v32, 3  ;;  %v11313_v54 = vsel %vm5382_vm6, %v5404_v50, %v5406_v9  ;;  %v9796_v51 = vld [vmem:[%s12540_s3 + $0x228] sm:$0xff]   ;;  %v3336_v50 = vsel %vm2838_vm4, %v3333_v15, %v3335_v34  ;;  %v11325_v32 = vld [vmem:[#allocation2 + $0x78] sm:$0xff]  }
 0x17c   : > { %12598 = vst [vmem:[#allocation19_spill] sm:$0xff] %v11308_v31  ;;  %12599 = vst [vmem:[#allocation20_spill] sm:$0xff] %v11313_v54 }
 0x17e   : > { %9297 = vmatmul.mubr.bf16.gmra.mxu1 %v3330_v18  ;;  %v5013_v18 = vrot.slane %v5011_v58, 2  ;;  %v5026_v58 = vor.u32 %v5025_v4, %v5022_v24  ;;  %v5029_v24 = vshrl.u32 %v11325_v32, 16 }
 0x17f   : > { %9300 = vmatprep.mubr.bf16.mxu1 %v3332_v30  ;;  %v4581_v30 = vrot.slane %v11137_v52, 2  ;;  %v9780_v52 = vld [vmem:[#allocation2 + $0x98] ss:$0 sps:$4 sm:$0x11]  }
 0x180   : > { %9429 = vmatmul.mubr.bf16.vlgmr.msra.gmra.mxu0 %v4578_v28  ;;  %v11318_v28 = vpop.f32.mrf.mxu0 }
 0x181   : > { %9517 = vmatpush3.bf16.msra.mxu0 %v11077_v29  ;;  %9432 = vmatprep.mubr.bf16.mxu0 %v4580_v0  ;;  %v5017_v29 = vor.u32 %v5016_v13, %v5013_v18  ;;  %v3334_v0 = vsel %vm2838_vm4, %v3331_v20, %v3333_v15  ;;  %v4582_v3 = vsel %vm4110_vm5, %v4579_v5, %v4581_v30  ;;  %v11337_v13 = vpop.f32.mrf.mxu1  ;;  %v5408_v5 = vrot.slane %v11325_v32, 3 }
 0x182   : > { %9518 = vmatprep.subr.bf16.mxu0 %v9791_v55  ;;  %v4584_v20 = vsel %vm4110_vm5, %v4581_v30, %v4583_v36  ;;  %12602 = vst [vmem:[#allocation23_spill] sm:$0xff] %v11337_v13  ;;  %v11339_v4 = vpop.f32.mrf.mxu0  ;;  %v3337_v15 = vrot.slane %v9780_v52, 1  ;;  %v12548_v18 = vrot.slane %v11331_v39, 3  ;;  %v5038_v30 = vshrl.u32 %v11331_v39, 16 }
 0x183   : > { %v11328_v6 = vsel %vm4911_vm7, %v5008_v11, %v5017_v29  ;;  %v11334_v54 = vsel %vm4911_vm7, %v5017_v29, %v5026_v58  ;;  %v9801_v11 = vld [vmem:[%s12540_s3 + $0x220] sm:$0xff]   ;;  %v5041_v29 = vshll.u32 %v11331_v39, 16  ;;  %v11359_v13 = vpop.f32.mrf.mxu1 }
 0x184   : > { %12600 = vst [vmem:[#allocation21_spill] sm:$0xff] %v11328_v6  ;;  %12601 = vst [vmem:[#allocation22_spill] sm:$0xff] %v11334_v54  ;;  %v5031_v54 = vrot.slane %v5029_v24, 2  ;;  %v11357_v52 = vsel %vm5382_vm6, %v5408_v5, %v12548_v18  ;;  %v11362_v42 = vpop.f32.mrf.mxu0  ;;  %v4586_v24 = vsel %vm4110_vm5, %v4583_v36, %v4585_v2 }
 0x185   : > { %9519 = vmatpush3.bf16.msra.mxu0 %v9791_v55  ;;  %v5032_v55 = vshll.u32 %v11325_v32, 16  ;;  %v5043_v31 = vrot.slane %v5041_v29, 3 }
 0x186   : > { %9301 = vmatmul.mubr.bf16.gmra.mxu1 %v3334_v0  ;;  %9520 = vmatprep.subr.bf16.mxu0 %v9796_v51  ;;  %v11351_v0 = vsel %vm5382_vm6, %v5406_v9, %v5408_v5  ;;  %v9805_v9 = vld [vmem:[%s12540_s3 + $0x218] sm:$0xff]  }
 0x187   : > { %9304 = vmatprep.mubr.bf16.mxu1 %v3336_v50  ;;  %v5034_v6 = vrot.slane %v5032_v55, 3  ;;  %v5040_v50 = vrot.slane %v5038_v30, 2  ;;  %v11378_v55 = vpop.f32.mrf.mxu1 }
 0x188   : > { %9433 = vmatmul.mubr.bf16.gmra.mxu0 %v4582_v3  ;;  %v4587_v3 = vrot.slane %v11214_v46, 2 }
 0x189   : > { %9436 = vmatprep.mubr.bf16.mxu0 %v4584_v20  ;;  %9521 = vmatpush3.bf16.msra.mxu0 %v9796_v51  ;;  %v5035_v62 = vor.u32 %v5034_v6, %v5031_v54  ;;  %v3338_v51 = vsel %vm2838_vm4, %v3335_v34, %v3337_v15  ;;  %v11368_v20 = vor.u32 %v5043_v31, %v5040_v50  ;;  %v11381_v54 = vpop.f32.mrf.mxu0  ;;  %v9809_v34 = vld [vmem:[%s12540_s3 + $0x210] sm:$0xff]   ;;  %v4589_v31 = vrot.slane %v11220_v26, 2  ;;  %v11388_v36 = vpop.f32.mrf.mxu1  ;;  %v9813_v6 = vld [vmem:[%s12540_s3 + $0x208] sm:$0xff]  }
 0x18a   : > { %9522 = vmatprep.subr.bf16.mxu0 %v9801_v11  ;;  %v4588_v30 = vsel %vm4110_vm5, %v4585_v2, %v4587_v3  ;;  %v4591_v2 = vrot.slane %v11246_v49, 2  ;;  %v9817_v49 = vld [vmem:[%s12540_s3 + $0x200] sm:$0xff]   ;;  %v4593_v50 = vrot.slane %v11252_v10, 2 }
 0x18b   : > { %12603 = vst [vmem:[#allocation24_spill] sm:$0xff] %v11368_v20  ;;  %v11371_v5 = vsel %vm4911_vm7, %v5026_v58, %v5035_v62  ;;  %v11376_v46 = vsel %vm4911_vm7, %v5035_v62, %v11368_v20  ;;  %v11390_v58 = vpop.f32.mrf.mxu0  ;;  %v11401_v26 = vpop.f32.mrf.mxu1  ;;  %v4595_v62 = vrot.slane %v11280_v45, 2  ;;  %v9803_v45 = vld [vmem:[%s12540_s3 + $0x1d8] sm:$0xff]   ;;  %v9815_v20 = vld [vmem:[#allocation2 + $0xa0] ss:$0 sps:$4 sm:$0x33]  }
 0x18c   : > { %12604 = vst [vmem:[#allocation25_spill] sm:$0xff] %v11371_v5  ;;  %12605 = vst [vmem:[#allocation26_spill] sm:$0xff] %v11376_v46  ;;  %v4592_v15 = vsel %vm4110_vm5, %v4589_v31, %v4591_v2  ;;  %v4609_v5 = vrot.slane %v9815_v20, 2 }
 0x18d   : > { %9523 = vmatpush3.bf16.msra.mxu0 %v9801_v11  ;;  %v4590_v11 = vsel %vm4110_vm5, %v4587_v3, %v4589_v31  ;;  %v11404_v29 = vpop.f32.mrf.mxu0  ;;  %v11415_v3 = vpop.f32.mrf.mxu1  ;;  %v4599_v31 = vrot.slane %v11325_v32, 2 }
 0x18e   : > { %9305 = vmatmul.mubr.bf16.gmra.mxu1 %v3338_v51  ;;  %9524 = vmatprep.subr.bf16.mxu0 %v9805_v9 }
 0x18f   : > { %9376 = vmatprep.mubr.bf16.mxu1 %v10929_v1  ;;  %v9790_v1 = vld [vmem:[%s12540_s3 + $0x1f0] sm:$0xff]   ;;  %v11425_v10 = vpop.f32.mrf.mxu1 }
 0x190   : > { %9437 = vmatmul.mubr.bf16.gmra.mxu0 %v4586_v24  ;;  %v4596_v24 = vsel %vm4110_vm5, %v4593_v50, %v4595_v62 }
 0x191   : > { %9440 = vmatprep.mubr.bf16.mxu0 %v4588_v30  ;;  %9525 = vmatpush3.bf16.msra.mxu0 %v9805_v9  ;;  %v11417_v9 = vpop.f32.mrf.mxu0  ;;  %v4597_v30 = vrot.slane %v11286_v43, 2 }
 0x192   : > { %9526 = vmatprep.subr.bf16.mxu0 %v9809_v34 }
 0x193   : > { %v11427_v51 = vpop.f32.mrf.mxu0  ;;  %v4600_v43 = vsel %vm4110_vm5, %v4597_v30, %v4599_v31 }
 0x195   : > { %9527 = vmatpush3.bf16.msra.mxu0 %v9809_v34  ;;  %v11435_v34 = vpop.f32.mrf.mxu1 }
 0x196   : > { %9377 = vmatmul.mubr.bf16.vlgmr.msra.gmra.mxu1 %v10924_v60  ;;  %9528 = vmatprep.subr.bf16.mxu0 %v9813_v6  ;;  %v9794_v60 = vld [vmem:[%s12540_s3 + $0x1e8] sm:$0xff]  }
 0x197   : > { %9465 = vmatpush3.bf16.msra.mxu1 %v11199_v23  ;;  %9380 = vmatprep.mubr.bf16.mxu1 %v10937_v61  ;;  %v9798_v61 = vld [vmem:[%s12540_s3 + $0x1e0] sm:$0xff]   ;;  %v4594_v23 = vsel %vm4110_vm5, %v4591_v2, %v4593_v50  ;;  %v4598_v2 = vsel %vm4110_vm5, %v4595_v62, %v4597_v30 }
 0x198   : > { %9466 = vmatprep.subr.bf16.mxu1 %v9790_v1  ;;  %9441 = vmatmul.mubr.bf16.gmra.mxu0 %v4590_v11  ;;  %v11450_v11 = vld [vmem:[#allocation2 + $0x88] sm:$0xff]   ;;  %v9816_v62 = vld [vmem:[%s12540_s3 + $0x1c0] sm:$0xff]  }
 0x199   : > { %9444 = vmatprep.mubr.bf16.mxu0 %v4592_v15  ;;  %9529 = vmatpush3.bf16.msra.mxu0 %v9813_v6  ;;  %v11445_v6 = vpop.f32.mrf.mxu1  ;;  %v9812_v15 = vld [vmem:[%s12540_s3 + $0x1c8] sm:$0xff]   ;;  %v4603_v50 = vrot.slane %v11450_v11, 2 }
 0x19a   : > { %9530 = vmatprep.subr.bf16.mxu0 %v9817_v49 }
 0x19b   : > { %9467 = vmatpush3.bf16.msra.mxu1 %v9790_v1 }
 0x19c   : > { %9468 = vmatprep.subr.bf16.mxu1 %v9794_v60 }
 0x19d   : > { %9531 = vmatpush3.bf16.msra.mxu0 %v9817_v49  ;;  %v11459_v49 = vpop.f32.mrf.mxu1 }
 0x19e   : > { %9381 = vmatmul.mubr.bf16.gmra.mxu1 %v10940_v53  ;;  %v11437_v53 = vpop.f32.mrf.mxu0  ;;  %12606 = vst [vmem:[#allocation27_spill] sm:$0xff] %v11459_v49 }
 0x19f   : > { %9384 = vmatprep.mubr.bf16.mxu1 %v10964_v12  ;;  %9469 = vmatpush3.bf16.msra.mxu1 %v9794_v60  ;;  %v9808_v12 = vld [vmem:[%s12540_s3 + $0x1d0] sm:$0xff]  }
 0x1a0   : > { %9470 = vmatprep.subr.bf16.mxu1 %v9798_v61  ;;  %9445 = vmatmul.mubr.bf16.gmra.mxu0 %v4594_v23  ;;  %v11470_v23 = vld [vmem:[#allocation2 + $0x90] sm:$0xff]  }
 0x1a1   : > { %9448 = vmatprep.mubr.bf16.mxu0 %v4596_v24  ;;  %v11473_v24 = vpop.f32.mrf.mxu1 }
 0x1a2   : > { %12607 = vst [vmem:[#allocation28_spill] sm:$0xff] %v11473_v24 }
 0x1a3   : > { %9471 = vmatpush3.bf16.msra.mxu1 %v9798_v61 }
 0x1a4   : > { %9472 = vmatprep.subr.bf16.mxu1 %v9803_v45 }
 0x1a6   : > { %9385 = vmatmul.mubr.bf16.gmra.mxu1 %v10968_v14  ;;  %v11447_v1 = vpop.f32.mrf.mxu0  ;;  %v4601_v14 = vrot.slane %v11331_v39, 2 }
 0x1a7   : > { %9388 = vmatprep.mubr.bf16.mxu1 %v10977_v17  ;;  %9473 = vmatpush3.bf16.msra.mxu1 %v9803_v45 }
 0x1a8   : > { %9449 = vmatmul.mubr.bf16.gmra.mxu0 %v4598_v2  ;;  %v11453_v32 = vpop.f32.mrf.mxu0  ;;  %9474 = vmatprep.subr.bf16.mxu1 %v9808_v12  ;;  %v4602_v61 = vsel %vm4110_vm5, %v4599_v31, %v4601_v14  ;;  %v4604_v30 = vsel %vm4110_vm5, %v4601_v14, %v4603_v50  ;;  %v11476_v2 = vld [vmem:[#allocation2 + $0x98] sm:$0xff]   ;;  %v4605_v31 = vrot.slane %v11470_v23, 2 }
 0x1a9   : > { %9452 = vmatprep.mubr.bf16.mxu0 %v4600_v43  ;;  %12608 = vst [vmem:[#allocation29_spill] sm:$0xff] %v11476_v2  ;;  %v11480_v43 = vpop.f32.mrf.mxu1 }
 0x1aa   : > { %v11461_v60 = vpop.f32.mrf.mxu0  ;;  %12609 = vst [vmem:[#allocation30_spill] sm:$0xff] %v11480_v43  ;;  %v4606_v14 = vsel %vm4110_vm5, %v4603_v50, %v4605_v31 }
 0x1ab   : > { %9475 = vmatpush3.bf16.msra.mxu1 %v9808_v12 }
 0x1ac   : > { %v11464_v17 = vpop.f32.mrf.mxu0  ;;  %9476 = vmatprep.subr.bf16.mxu1 %v9812_v15 }
 0x1ae   : > { %9389 = vmatmul.mubr.bf16.gmra.mxu1 %v10980_v22  ;;  %v9222_v45 = vpop.f32.mrf.mxu0  ;;  %v4607_v22 = vrot.slane %v11476_v2, 2 }
 0x1af   : > { %9392 = vmatprep.mubr.bf16.mxu1 %v10996_v25  ;;  %9477 = vmatpush3.bf16.msra.mxu1 %v9812_v15  ;;  %v11485_v25 = vpop.f32.mrf.mxu1 }
 0x1b0   : > { %9453 = vmatmul.mubr.bf16.gmra.mxu0 %v4602_v61  ;;  %v2976_v12 = vpop.f32.mrf.mxu0  ;;  %9478 = vmatprep.subr.bf16.mxu1 %v9816_v62  ;;  %12610 = vst [vmem:[#allocation31_spill] sm:$0xff] %v11485_v25  ;;  %v4608_v61 = vsel %vm4110_vm5, %v4605_v31, %v4607_v22  ;;  %v4610_v50 = vsel %vm4110_vm5, %v4607_v22, %v4609_v5  ;;  %v11514_v5 = vld [vmem:[%s12541_s4] ss:$0 sm:$0xff] }
 0x1b1   : > { %9456 = vmatprep.mubr.bf16.mxu0 %v4604_v30  ;;  %v11489_v43 = vpop.f32.mrf.mxu1 }
 0x1b2   : > { %v9223_v18 = vpop.f32.mrf.mxu0  ;;  %12611 = vst [vmem:[#allocation32_spill] sm:$0xff] %v11489_v43  ;;  %v12616_v43 = vld [vmem:[#allocation9_spill] sm:$0xff] }
 0x1b3   : > { %9479 = vmatpush3.bf16.msra.mxu1 %v9816_v62 }
 0x1b4   : > { %v2979_v46 = vpop.f32.mrf.mxu0 }
 0x1b6   : > { %9393 = vmatmul.mubr.bf16.gmra.mxu1 %v10999_v63  ;;  %v9226_v15 = vpop.f32.mrf.mxu0 }
 0x1b7   : > { %9396 = vmatprep.mubr.bf16.mxu1 %v11007_v57 }
 0x1b8   : > { %9457 = vmatmul.mubr.bf16.gmra.mxu0 %v4606_v14  ;;  %v2992_v30 = vpop.f32.mrf.mxu0 }
 0x1b9   : > { %9460 = vmatprep.mubr.bf16.mxu0 %v4608_v61 }
 0x1ba   : > { %v11491_v62 = vpop.f32.mrf.mxu0 }
 0x1bc   : > { %v11493_v24 = vpop.f32.mrf.mxu0 }
 0x1be   : > { %v11496_v63 = vpop.f32.mrf.mxu1  ;;  %9397 = vmatmul.mubr.bf16.gmra.mxu1 %v11010_v33  ;;  %v11499_v25 = vpop.f32.mrf.mxu0 }
 0x1bf   : > { %12612 = vst [vmem:[#allocation33_spill] sm:$0xff] %v11496_v63  ;;  %9400 = vmatprep.mubr.bf16.mxu1 %v11022_v41  ;;  %v2208_v41 = vadd.f32 %v11258_v16, %v11514_v5  ;;  %v2209_v63 = vadd.f32 %v11297_v7, %v11514_v5  ;;  %v2212_v7 = vadd.f32 %v11339_v4, %v11514_v5 }
 0x1c0   : > { %v11502_v57 = vpop.f32.mrf.mxu1  ;;  %9461 = vmatmul.mubr.bf16.gmra.mxu0 %v4610_v50  ;;  %v11504_v20 = vpop.f32.mrf.mxu0  ;;  %v2206_v50 = vadd.f32 %v11514_v5, %v11276_v38  ;;  %v2207_v38 = vadd.f32 %v11514_v5, %v11318_v28  ;;  %v2210_v28 = vadd.f32 %v11514_v5, %v11362_v42 }
 0x1c1   : > { %12613 = vst [vmem:[#allocation34_spill] sm:$0xff] %v11502_v57  ;;  %9532 = vmatprep.mubr.bf16.mxu0 %v11113_v48 }
 0x1c2   : > { %v11507_v31 = vpop.f32.mrf.mxu1  ;;  %v11509_v14 = vpop.f32.mrf.mxu0 }
 0x1c3   : > { %12614 = vst [vmem:[#allocation35_spill] sm:$0xff] %v11507_v31 }
 0x1c4   : > { %v11516_v33 = vpop.f32.mrf.mxu1  ;;  %v11518_v22 = vpop.f32.mrf.mxu0 }
 0x1c5   : > { %12615 = vst [vmem:[#allocation36_spill] sm:$0xff] %v11516_v33 }
 0x1c6   : > { %v9170_v61 = vpop.f32.mrf.mxu1  ;;  %9401 = vmatmul.mubr.bf16.gmra.mxu1 %v11025_v27  ;;  %v11523_v48 = vpop.f32.mrf.mxu0 }
 0x1c7   : > { %v2783_v31 = vadd.f32 %v9170_v61, %v2208_v41  ;;  %9404 = vmatprep.mubr.bf16.mxu1 %v11042_v35 }
 0x1c8   : > { %v2638_v57 = vpop.f32.mrf.mxu1  ;;  %9533 = vmatmul.mubr.bf16.vlgmr.msra.gmra.mxu0 %v11117_v37  ;;  %v11529_v33 = vpop.f32.mrf.mxu0 }
 0x1c9   : > { %v2781_v16 = vadd.f32 %v2638_v57, %v2206_v50  ;;  %9536 = vmatprep.mubr.bf16.mxu0 %v12616_v43  ;;  %v11534_v27 = vadd.f32 %v9222_v45, %v2783_v31  ;;  %v12618_v43 = vld [vmem:[#allocation4_spill] sm:$0xff] }
 0x1ca   : > { %v9171_v49 = vpop.f32.mrf.mxu1  ;;  %v11536_v2 = vpop.f32.mrf.mxu0 }
 0x1cb   : > { %v2784_v35 = vadd.f32 %v9171_v49, %v2209_v63  ;;  %v11540_v41 = vadd.f32 %v2976_v12, %v2781_v16  ;;  %v12619_v12 = vld [vmem:[#allocation5_spill] sm:$0xff] }
 0x1cc   : > { %v2641_v37 = vpop.f32.mrf.mxu1  ;;  %v11542_v61 = vpop.f32.mrf.mxu0 }
 0x1cd   : > { %12617 = vst [vmem:[#allocation9_spill] sm:$0xff] %v11540_v41  ;;  %v2782_v57 = vadd.f32 %v2641_v37, %v2207_v38  ;;  %v11546_v50 = vadd.f32 %v9223_v18, %v2784_v35  ;;  %v12620_v41 = vld [vmem:[#allocation10_spill] sm:$0xff]  ;;  %v2213_v18 = vadd.f32 %v11381_v54, %v11514_v5  ;;  %v2216_v54 = vadd.f32 %v11404_v29, %v11514_v5 }
 0x1ce   : > { %v9174_v45 = vpop.f32.mrf.mxu1  ;;  %9405 = vmatmul.mubr.bf16.gmra.mxu1 %v12618_v43  ;;  %v11549_v31 = vpop.f32.mrf.mxu0 }
 0x1cf   : > { %v2787_v49 = vadd.f32 %v9174_v45, %v2212_v7  ;;  %9408 = vmatprep.mubr.bf16.mxu1 %v12619_v12  ;;  %v11554_v63 = vadd.f32 %v2979_v46, %v2782_v57  ;;  %v2211_v46 = vadd.f32 %v11514_v5, %v11390_v58  ;;  %v2214_v58 = vadd.f32 %v11514_v5, %v11417_v9  ;;  %v12622_v12 = vld [vmem:[#allocation7_spill] sm:$0xff] }
 0x1d0   : > { %v2654_v16 = vpop.f32.mrf.mxu1  ;;  %9537 = vmatmul.mubr.bf16.gmra.mxu0 %v12620_v41  ;;  %v11557_v4 = vpop.f32.mrf.mxu0 }
 0x1d1   : > { %v2785_v38 = vadd.f32 %v2654_v16, %v2210_v28  ;;  %9540 = vmatprep.mubr.bf16.mxu0 %v11202_v8  ;;  %v11562_v35 = vadd.f32 %v9226_v15, %v2787_v49  ;;  %v12621_v28 = vld [vmem:[#allocation6_spill] sm:$0xff] }
 0x1d2   : > { %v9175_v37 = vpop.f32.mrf.mxu1  ;;  %v11564_v42 = vpop.f32.mrf.mxu0 }
 0x1d3   : > { %v2788_v7 = vadd.f32 %v9175_v37, %v2213_v18  ;;  %v11568_v57 = vadd.f32 %v2992_v30, %v2785_v38 }
 0x1d4   : > { %v2657_v41 = vpop.f32.mrf.mxu1  ;;  %v11570_v45 = vpop.f32.mrf.mxu0 }
 0x1d5   : > { %v2786_v43 = vadd.f32 %v2657_v41, %v2211_v46  ;;  %v11575_v8 = vadd.f32 %v11491_v62, %v2788_v7  ;;  %v2217_v62 = vadd.f32 %v11427_v51, %v11514_v5  ;;  %v2220_v51 = vadd.f32 %v11447_v1, %v11514_v5 }
 0x1d6   : > { %v9178_v15 = vpop.f32.mrf.mxu1  ;;  %9409 = vmatmul.mubr.bf16.gmra.mxu1 %v12621_v28  ;;  %v11578_v49 = vpop.f32.mrf.mxu0 }
 0x1d7   : > { %v2791_v30 = vadd.f32 %v9178_v15, %v2216_v54  ;;  %9480 = vmatprep.mubr.bf16.mxu1 %v12622_v12  ;;  %v11584_v16 = vadd.f32 %v11493_v24, %v2786_v43  ;;  %v2215_v24 = vadd.f32 %v11514_v5, %v11437_v53  ;;  %v12623_v15 = vld [vmem:[#allocation8_spill] sm:$0xff]  ;;  %v2218_v53 = vadd.f32 %v11514_v5, %v11453_v32 }
 0x1d8   : > { %v2670_v18 = vpop.f32.mrf.mxu1  ;;  %9541 = vmatmul.mubr.bf16.gmra.mxu0 %v11205_v56  ;;  %v11587_v29 = vpop.f32.mrf.mxu0 }
 0x1d9   : > { %v2789_v38 = vadd.f32 %v2670_v18, %v2214_v58  ;;  %9544 = vmatprep.mubr.bf16.mxu0 %v11235_v44  ;;  %v11593_v37 = vadd.f32 %v11499_v25, %v2791_v30  ;;  %v12624_v58 = vld [vmem:[#allocation11_spill] sm:$0xff] }
 0x1da   : > { %v9179_v9 = vpop.f32.mrf.mxu1  ;;  %v11595_v46 = vpop.f32.mrf.mxu0 }
 0x1db   : > { %v2792_v7 = vadd.f32 %v9179_v9, %v2217_v62  ;;  %v11600_v56 = vadd.f32 %v11504_v20, %v2789_v38 }
 0x1dc   : > { %v2673_v41 = vpop.f32.mrf.mxu1  ;;  %v11602_v54 = vpop.f32.mrf.mxu0 }
 0x1dd   : > { %v2790_v44 = vadd.f32 %v2673_v41, %v2215_v24  ;;  %v11607_v25 = vadd.f32 %v11509_v14, %v2792_v7  ;;  %v2221_v14 = vadd.f32 %v11461_v60, %v11514_v5  ;;  %v2224_v60 = vadd.f32 %v11292_v21, %v11514_v5  ;;  %v12626_v21 = vld [vmem:[#allocation16_spill] sm:$0xff] }
 0x1de   : > { %v9182_v43 = vpop.f32.mrf.mxu1  ;;  %9481 = vmatmul.mubr.bf16.vlgmr.msra.gmra.mxu1 %v12623_v15  ;;  %v11610_v28 = vpop.f32.mrf.mxu0 }
 0x1df   : > { %v2795_v20 = vadd.f32 %v9182_v43, %v2220_v51  ;;  %9484 = vmatprep.mubr.bf16.mxu1 %v12624_v58  ;;  %v11616_v30 = vadd.f32 %v11518_v22, %v2790_v44  ;;  %v2219_v22 = vadd.f32 %v11514_v5, %v11464_v17  ;;  %v12625_v51 = vld [vmem:[#allocation12_spill] sm:$0xff]  ;;  %v2222_v17 = vadd.f32 %v11514_v5, %v11315_v47 }
 0x1e0   : > { %v2686_v12 = vpop.f32.mrf.mxu1  ;;  %9545 = vmatmul.mubr.bf16.gmra.mxu0 %v11238_v19  ;;  %v11619_v1 = vpop.f32.mrf.mxu0 }
 0x1e1   : > { %v2793_v18 = vadd.f32 %v2686_v12, %v2218_v53  ;;  %9548 = vmatprep.mubr.bf16.mxu0 %v11269_v59  ;;  %v11625_v62 = vadd.f32 %v11523_v48, %v2795_v20  ;;  %v12628_v12 = vld [vmem:[#allocation19_spill] sm:$0xff] }
 0x1e2   : > { %v9183_v32 = vpop.f32.mrf.mxu1  ;;  %v11627_v38 = vpop.f32.mrf.mxu0 }
 0x1e3   : > { %v2796_v9 = vadd.f32 %v9183_v32, %v2221_v14  ;;  %v11632_v19 = vadd.f32 %v11529_v33, %v2793_v18 }
 0x1e4   : > { %v2689_v24 = vpop.f32.mrf.mxu1  ;;  %v11634_v7 = vpop.f32.mrf.mxu0 }
 0x1e5   : > { %v2794_v59 = vadd.f32 %v2689_v24, %v2219_v22  ;;  %v11639_v48 = vadd.f32 %v11536_v2, %v2796_v9  ;;  %v12627_v2 = vld [vmem:[#allocation23_spill] sm:$0xff]  ;;  %v2228_v24 = vadd.f32 %v11378_v55, %v11514_v5  ;;  %v12631_v55 = vld [vmem:[#allocation20_spill] sm:$0xff] }
 0x1e6   : > { %v9186_v41 = vpop.f32.mrf.mxu1  ;;  %9485 = vmatmul.mubr.bf16.gmra.mxu1 %v12625_v51  ;;  %v11642_v44 = vpop.f32.mrf.mxu0  ;;  %v2225_v20 = vadd.f32 %v12627_v2, %v11514_v5 }
 0x1e7   : > { %v2799_v33 = vadd.f32 %v9186_v41, %v2224_v60  ;;  %9488 = vmatprep.mubr.bf16.mxu1 %v11217_v40  ;;  %v11648_v43 = vadd.f32 %v11542_v61, %v2794_v59  ;;  %v2223_v40 = vadd.f32 %v11514_v5, %v11359_v13  ;;  %v12629_v41 = vld [vmem:[#allocation13_spill] sm:$0xff]  ;;  %v2226_v13 = vadd.f32 %v11514_v5, %v11388_v36 }
 0x1e8   : > { %v2702_v15 = vpop.f32.mrf.mxu1  ;;  %9549 = vmatmul.mubr.bf16.gmra.mxu0 %v12626_v21  ;;  %v11651_v53 = vpop.f32.mrf.mxu0 }
 0x1e9   : > { %v2797_v58 = vadd.f32 %v2702_v15, %v2222_v17  ;;  %9552 = vmatprep.mubr.bf16.mxu0 %v12628_v12  ;;  %v11657_v14 = vadd.f32 %v11549_v31, %v2799_v33  ;;  %v12630_v17 = vld [vmem:[#allocation14_spill] sm:$0xff] }
 0x1ea   : > { %v9187_v47 = vpop.f32.mrf.mxu1  ;;  %v11659_v18 = vpop.f32.mrf.mxu0 }
 0x1eb   : > { %v2800_v61 = vadd.f32 %v9187_v47, %v2225_v20  ;;  %v11664_v32 = vadd.f32 %v11557_v4, %v2797_v58  ;;  %v2227_v58 = vadd.f32 %v11514_v5, %v11415_v3  ;;  %v12633_v3 = vrot.slane %v11331_v39, 3 }
 0x1ec   : > { %v2705_v22 = vpop.f32.mrf.mxu1  ;;  %v11666_v9 = vpop.f32.mrf.mxu0 }
 0x1ed   : > { %v2798_v60 = vadd.f32 %v2705_v22, %v2223_v40  ;;  %v11671_v31 = vadd.f32 %v11564_v42, %v2800_v61  ;;  %v2229_v42 = vadd.f32 %v11401_v26, %v11514_v5 }
 0x1ee   : > { %v9190_v59 = vpop.f32.mrf.mxu1  ;;  %9489 = vmatmul.mubr.bf16.gmra.mxu1 %v12629_v41  ;;  %v11680_v15 = vpop.f32.mrf.mxu0 }
 0x1ef   : > { %v2803_v51 = vadd.f32 %v9190_v59, %v2228_v24  ;;  %9492 = vmatprep.mubr.bf16.mxu1 %v12630_v17  ;;  %v11678_v4 = vadd.f32 %v11570_v45, %v2798_v60  ;;  %v5412_v45 = vrot.slane %v11450_v11, 3  ;;  %v12632_v24 = vld [vmem:[#allocation15_spill] sm:$0xff]  ;;  %v2230_v59 = vadd.f32 %v11514_v5, %v11435_v34 }
 0x1f0   : > { %v2718_v33 = vpop.f32.mrf.mxu1  ;;  %9553 = vmatmul.mubr.bf16.gmra.mxu0 %v12631_v55  ;;  %v11689_v20 = vpop.f32.mrf.mxu0  ;;  %v2233_v17 = vadd.f32 %v11445_v6, %v11514_v5 }
 0x1f1   : > { %v2801_v21 = vadd.f32 %v2718_v33, %v2226_v13  ;;  %9556 = vmatprep.mubr.bf16.mxu0 %v11351_v0  ;;  %v11687_v2 = vadd.f32 %v11578_v49, %v2803_v51  ;;  %v2232_v0 = vadd.f32 %v11425_v10, %v11514_v5  ;;  %v12634_v13 = vld [vmem:[#allocation17_spill] sm:$0xff]  ;;  %v5414_v33 = vrot.slane %v11470_v23, 3 }
 0x1f2   : > { %v9191_v36 = vpop.f32.mrf.mxu1  ;;  %v11697_v26 = vpop.f32.mrf.mxu0 }
 0x1f3   : > { %v2804_v12 = vadd.f32 %v9191_v36, %v2229_v42  ;;  %v11695_v47 = vadd.f32 %v11587_v29, %v2801_v21  ;;  %v5413_v29 = vsel %vm5382_vm6, %v12633_v3, %v5412_v45  ;;  %v12636_v36 = vld [vmem:[#allocation27_spill] sm:$0xff] }
 0x1f4   : > { %v2721_v40 = vpop.f32.mrf.mxu1  ;;  %v11705_v60 = vpop.f32.mrf.mxu0 }
 0x1f5   : > { %v2802_v49 = vadd.f32 %v2721_v40, %v2227_v58  ;;  %v11702_v61 = vadd.f32 %v11595_v46, %v2804_v12  ;;  %v2231_v58 = vadd.f32 %v11514_v5, %v12636_v36 }
 0x1f6   : > { %v9194_v22 = vpop.f32.mrf.mxu1  ;;  %9493 = vmatmul.mubr.bf16.gmra.mxu1 %v12632_v24  ;;  %v11716_v51 = vpop.f32.mrf.mxu0  ;;  %v11738_v24 = vld [vmem:[#allocation2 + $0xa0] ss:$0 sps:$4 sm:$0x77]  }
 0x1f7   : > { %v2807_v41 = vadd.f32 %v9194_v22, %v2232_v0  ;;  %9496 = vmatprep.mubr.bf16.mxu1 %v12634_v13  ;;  %v11714_v10 = vadd.f32 %v11602_v54, %v2802_v49  ;;  %v12635_v54 = vld [vmem:[#allocation29_spill] sm:$0xff]  ;;  %v12637_v0 = vld [vmem:[#allocation28_spill] sm:$0xff]  ;;  %v5415_v22 = vsel %vm5382_vm6, %v5412_v45, %v5414_v33  ;;  %v12639_v13 = vld [vmem:[#allocation30_spill] sm:$0xff] }
 0x1f8   : > { %v2734_v46 = vpop.f32.mrf.mxu1  ;;  %9557 = vmatmul.mubr.bf16.gmra.mxu0 %v11357_v52  ;;  %v11725_v42 = vpop.f32.mrf.mxu0  ;;  %v5416_v21 = vrot.slane %v12635_v54, 3  ;;  %v2236_v49 = vadd.f32 %v12637_v0, %v11514_v5  ;;  %v5418_v0 = vrot.slane %v11738_v24, 3 }
 0x1f9   : > { %v2805_v39 = vadd.f32 %v2734_v46, %v2230_v59  ;;  %9560 = vmatprep.mubr.bf16.mxu0 %v5413_v29  ;;  %v11723_v34 = vadd.f32 %v11610_v28, %v2807_v41  ;;  %v12638_v59 = vld [vmem:[#allocation18_spill] sm:$0xff]  ;;  %v2234_v46 = vadd.f32 %v11514_v5, %v12639_v13 }
 0x1fa   : > { %v9195_v55 = vpop.f32.mrf.mxu1  ;;  %v11733_v40 = vpop.f32.mrf.mxu0 }
 0x1fb   : > { %v2808_v12 = vadd.f32 %v9195_v55, %v2233_v17  ;;  %v11731_v52 = vadd.f32 %v11619_v1, %v2805_v39  ;;  %v5417_v1 = vsel %vm5382_vm6, %v5414_v33, %v5416_v21  ;;  %v12640_v39 = vld [vmem:[#allocation21_spill] sm:$0xff] }
 0x1fc   : > { %v2737_v6 = vpop.f32.mrf.mxu1  ;;  %v11744_v41 = vpop.f32.mrf.mxu0 }
 0x1fd   : > { %v2806_v28 = vadd.f32 %v2737_v6, %v2231_v58  ;;  %v11741_v3 = vadd.f32 %v11627_v38, %v2808_v12  ;;  %v5047_v38 = vshrl.u32 %v11450_v11, 16  ;;  %v5050_v58 = vshll.u32 %v11450_v11, 16  ;;  %v12642_v12 = vld [vmem:[#allocation31_spill] sm:$0xff] }
 0x1fe   : > { %v9198_v29 = vpop.f32.mrf.mxu1  ;;  %9497 = vmatmul.mubr.bf16.gmra.mxu1 %v12638_v59  ;;  %v11753_v36 = vpop.f32.mrf.mxu0  ;;  %v2237_v33 = vadd.f32 %v12642_v12, %v11514_v5 }
 0x1ff   : > { %v2811_v17 = vadd.f32 %v9198_v29, %v2236_v49  ;;  %9500 = vmatprep.mubr.bf16.mxu1 %v12640_v39  ;;  %v11751_v45 = vadd.f32 %v11634_v7, %v2806_v28  ;;  %v12644_v29 = vld [vmem:[#allocation32_spill] sm:$0xff]  ;;  %v5049_v39 = vrot.slane %v5047_v38, 2  ;;  %v5052_v12 = vrot.slane %v5050_v58, 3  ;;  %v12648_v58 = vld [vmem:[#allocation34_spill] sm:$0xff] }
 0x200   : > { %v2750_v55 = vpop.f32.mrf.mxu1  ;;  %9561 = vmatmul.mubr.bf16.gmra.mxu0 %v5415_v22  ;;  %v11763_v28 = vpop.f32.mrf.mxu0  ;;  %v2235_v22 = vadd.f32 %v11514_v5, %v12644_v29  ;;  %v12647_v29 = vld [vmem:[#allocation22_spill] sm:$0xff] }
 0x201   : > { %12641 = vst [vmem:[#allocation4_spill] sm:$0xff] %v11751_v45  ;;  %v2809_v6 = vadd.f32 %v2750_v55, %v2234_v46  ;;  %9564 = vmatprep.mubr.bf16.mxu0 %v5417_v1  ;;  %v11761_v49 = vadd.f32 %v11642_v44, %v2811_v17  ;;  %v12645_v1 = vld [vmem:[#allocation33_spill] sm:$0xff]  ;;  %v5419_v17 = vsel %vm5382_vm6, %v5416_v21, %v5418_v0 }
 0x202   : > { %v9199_v7 = vpop.f32.mrf.mxu1  ;;  %v11770_v46 = vpop.f32.mrf.mxu0  ;;  %v2240_v55 = vadd.f32 %v12645_v1, %v11514_v5  ;;  %v12649_v1 = vld [vmem:[#allocation25_spill] sm:$0xff]  ;;  %v5053_v0 = vor.u32 %v5052_v12, %v5049_v39  ;;  %v12653_v39 = vld [vmem:[#allocation36_spill] sm:$0xff] }
 0x203   : > { %12643 = vst [vmem:[#allocation5_spill] sm:$0xff] %v11761_v49  ;;  %v2812_v59 = vadd.f32 %v9199_v7, %v2237_v33  ;;  %v11768_v13 = vadd.f32 %v11651_v53, %v2809_v6  ;;  %v5056_v53 = vshrl.u32 %v11470_v23, 16  ;;  %v5059_v33 = vshll.u32 %v11470_v23, 16 }
 0x204   : > { %v2753_v11 = vpop.f32.mrf.mxu1  ;;  %v11781_v38 = vpop.f32.mrf.mxu0  ;;  %v2238_v6 = vadd.f32 %v11514_v5, %v12648_v58  ;;  %v5068_v23 = vshll.u32 %v12635_v54, 16  ;;  %v2239_v12 = vadd.f32 %v11514_v5, %v12653_v39  ;;  %v12656_v39 = vld [vmem:[#allocation9_spill] sm:$0xff] }
 0x205   : > { %v2810_v44 = vadd.f32 %v2753_v11, %v2235_v22  ;;  %v11776_v49 = vadd.f32 %v11659_v18, %v2812_v59  ;;  %v5065_v59 = vshrl.u32 %v12635_v54, 16  ;;  %v12651_v11 = vld [vmem:[#allocation35_spill] sm:$0xff]  ;;  %v5058_v58 = vrot.slane %v5056_v53, 2 }
 0x206   : > { %v9202_v45 = vpop.f32.mrf.mxu1  ;;  %9501 = vmatmul.mubr.bf16.gmra.mxu1 %v12647_v29  ;;  %v11789_v22 = vpop.f32.mrf.mxu0  ;;  %v2241_v29 = vadd.f32 %v12651_v11, %v11514_v5 }
 0x207   : > { %12646 = vst [vmem:[#allocation10_spill] sm:$0xff] %v11776_v49  ;;  %v2815_v7 = vadd.f32 %v9202_v45, %v2240_v55  ;;  %9504 = vmatprep.mubr.bf16.mxu1 %v12649_v1  ;;  %v11787_v21 = vadd.f32 %v11666_v9, %v2810_v44  ;;  %v5061_v9 = vrot.slane %v5059_v33, 3 }
 0x208   : > { %v2766_v18 = vpop.f32.mrf.mxu1  ;;  %9565 = vmatmul.mubr.bf16.gmra.mxu0 %v5419_v17  ;;  %v11798_v44 = vpop.f32.mrf.mxu0 }
 0x209   : > { %12650 = vst [vmem:[#allocation6_spill] sm:$0xff] %v11787_v21  ;;  %v2813_v49 = vadd.f32 %v2766_v18, %v2238_v6  ;;  %v11796_v45 = vadd.f32 %v11680_v15, %v2815_v7  ;;  %v12654_v21 = vld [vmem:[#allocation24_spill] sm:$0xff]  ;;  %v5067_v6 = vrot.slane %v5065_v59, 2  ;;  %v5070_v18 = vrot.slane %v5068_v23, 3 }
 0x20a   : > { %v9203_v55 = vpop.f32.mrf.mxu1  ;;  %v5054_v11 = vsel %vm4911_vm7, %v12654_v21, %v5053_v0  ;;  %v11807_v15 = vpop.f32.mrf.mxu0  ;;  %v5062_v5 = vor.u32 %v5061_v9, %v5058_v58  ;;  %v5077_v21 = vshll.u32 %v11738_v24, 16 }
 0x20b   : > { %12652 = vst [vmem:[#allocation7_spill] sm:$0xff] %v11796_v45  ;;  %v2816_v17 = vadd.f32 %v9203_v55, %v2241_v29  ;;  %v11803_v1 = vadd.f32 %v11689_v20, %v2813_v49  ;;  %v12655_v45 = vld [vmem:[#allocation26_spill] sm:$0xff]  ;;  %v5074_v49 = vshrl.u32 %v11738_v24, 16  ;;  %v5071_v55 = vor.u32 %v5070_v18, %v5067_v6 }
 0x20c   : > { %v2769_v54 = vpop.f32.mrf.mxu1  ;;  %v11813_v29 = vpop.f32.mrf.mxu0  ;;  %v5063_v9 = vsel %vm4911_vm7, %v5053_v0, %v5062_v5 }
 0x20d   : > { %v2814_v7 = vadd.f32 %v2769_v54, %v2239_v12  ;;  %v11810_v53 = vadd.f32 %v11697_v26, %v2816_v17  ;;  %v5076_v54 = vrot.slane %v5074_v49, 2  ;;  %v5072_v6 = vsel %vm4911_vm7, %v5062_v5, %v5071_v55 }
 0x20e   : > { %v9274_v33 = vpop.f32.mrf.mxu1  ;;  %9505 = vmatmul.mubr.bf16.gmra.mxu1 %v12655_v45  ;;  %v9338_v26 = vpop.f32.mrf.mxu0 }
 0x20f   : > { %v3584_v20 = vadd.f32 %v9274_v33, %v11534_v27  ;;  %9508 = vmatprep.mubr.bf16.mxu1 %v5054_v11  ;;  %v11819_v59 = vadd.f32 %v11705_v60, %v2814_v7  ;;  %v5079_v11 = vrot.slane %v5077_v21, 3 }
 0x210   : > { %v3439_v23 = vpop.f32.mrf.mxu1  ;;  %v3958_v27 = vpop.f32.mrf.mxu0 }
 0x211   : > { %v3582_v12 = vadd.f32 %v3439_v23, %v12656_v39  ;;  %v11823_v45 = vadd.f32 %v11716_v51, %v3584_v20 }
 0x212   : > { %v9275_v58 = vpop.f32.mrf.mxu1  ;;  %v9339_v18 = vpop.f32.mrf.mxu0 }
 0x213   : > { %v3585_v17 = vadd.f32 %v9275_v58, %v11546_v50  ;;  %v11828_v24 = vadd.f32 %v11725_v42, %v3582_v12  ;;  %v5080_v50 = vor.u32 %v5079_v11, %v5076_v54 }
 0x214   : > { %v3442_v60 = vpop.f32.mrf.mxu1  ;;  %v3961_v0 = vpop.f32.mrf.mxu0 }
 0x215   : > { %v3583_v7 = vadd.f32 %v3442_v60, %v11554_v63  ;;  %v11833_v51 = vadd.f32 %v11733_v40, %v3585_v17  ;;  %v5081_v12 = vsel %vm4911_vm7, %v5071_v55, %v5080_v50 }
 0x216   : > { %v9278_v33 = vpop.f32.mrf.mxu1  ;;  %9509 = vmatmul.mubr.bf16.gmra.mxu1 %v5063_v9 }
 0x217   : > { %v3588_v20 = vadd.f32 %v9278_v33, %v11562_v35  ;;  %9512 = vmatprep.mubr.bf16.mxu1 %v5072_v6  ;;  %v11837_v49 = vadd.f32 %v11744_v41, %v3583_v7 }
 0x218   : > { %v3455_v42 = vpop.f32.mrf.mxu1  ;;  %v9342_v21 = vpop.f32.mrf.mxu0 }
 0x219   : > { %v3586_v5 = vadd.f32 %v3455_v42, %v11568_v57  ;;  %v11841_v23 = vadd.f32 %v11753_v36, %v3588_v20 }
 0x21a   : > { %v9279_v63 = vpop.f32.mrf.mxu1  ;;  %v3974_v40 = vpop.f32.mrf.mxu0 }
 0x21b   : > { %v3589_v39 = vadd.f32 %v9279_v63, %v11575_v8  ;;  %v11846_v35 = vadd.f32 %v11763_v28, %v3586_v5 }
 0x21c   : > { %v3458_v58 = vpop.f32.mrf.mxu1  ;;  %v9343_v9 = vpop.f32.mrf.mxu0 }
 0x21d   : > { %v3587_v41 = vadd.f32 %v3458_v58, %v11584_v16  ;;  %v11850_v17 = vadd.f32 %v11770_v46, %v3589_v39 }
 0x21e   : > { %v9282_v57 = vpop.f32.mrf.mxu1  ;;  %9513 = vmatmul.mubr.bf16.gmra.mxu1 %v5081_v12  ;;  %v3977_v36 = vpop.f32.mrf.mxu0 }
 0x21f   : > { %v3592_v54 = vadd.f32 %v9282_v57, %v11593_v37  ;;  %v11854_v11 = vadd.f32 %v11781_v38, %v3587_v41 }
 0x220   : > { %v3471_v8 = vpop.f32.mrf.mxu1  ;;  %v9346_v55 = vpop.f32.mrf.mxu0 }
 0x221   : > { %v3590_v28 = vadd.f32 %v3471_v8, %v11600_v56  ;;  %v11858_v60 = vadd.f32 %v11789_v22, %v3592_v54 }
 0x222   : > { %v9283_v6 = vpop.f32.mrf.mxu1  ;;  %v3990_v16 = vpop.f32.mrf.mxu0 }
 0x223   : > { %v3593_v46 = vadd.f32 %v9283_v6, %v11607_v25  ;;  %v11862_v7 = vadd.f32 %v11798_v44, %v3590_v28 }
 0x224   : > { %v3474_v33 = vpop.f32.mrf.mxu1  ;;  %v9347_v20 = vpop.f32.mrf.mxu0 }
 0x225   : > { %v3591_v37 = vadd.f32 %v3474_v33, %v11616_v30  ;;  %v11866_v38 = vadd.f32 %v11807_v15, %v3593_v46 }
 0x226   : > { %v9286_v50 = vpop.f32.mrf.mxu1  ;;  %v3993_v42 = vpop.f32.mrf.mxu0 }
 0x227   : > { %v3596_v56 = vadd.f32 %v9286_v50, %v11625_v62  ;;  %v11870_v22 = vadd.f32 %v11813_v29, %v3591_v37 }
 0x228   : > { %v3487_v5 = vpop.f32.mrf.mxu1  ;;  %v9350_v63 = vpop.f32.mrf.mxu0 }
 0x229   : > { %v3594_v25 = vadd.f32 %v3487_v5, %v11632_v19  ;;  %v11873_v44 = vadd.f32 %v9338_v26, %v3596_v56 }
 0x22a   : > { %v9287_v39 = vpop.f32.mrf.mxu1  ;;  %v4006_v12 = vpop.f32.mrf.mxu0 }
 0x22b   : > { %v3597_v30 = vadd.f32 %v9287_v39, %v11639_v48  ;;  %v11876_v58 = vadd.f32 %v3958_v27, %v3594_v25 }
 0x22c   : > { %v3490_v15 = vpop.f32.mrf.mxu1  ;;  %v9351_v41 = vpop.f32.mrf.mxu0 }
 0x22d   : > { %v3595_v57 = vadd.f32 %v3490_v15, %v11648_v43  ;;  %v11879_v62 = vadd.f32 %v9339_v18, %v3597_v30 }
 0x22e   : > { %v9290_v29 = vpop.f32.mrf.mxu1  ;;  %v4009_v54 = vpop.f32.mrf.mxu0 }
 0x22f   : > { %v3600_v8 = vadd.f32 %v9290_v29, %v11657_v14  ;;  %v11882_v28 = vadd.f32 %v3961_v0, %v3595_v57 }
 0x230   : > { %v3503_v19 = vpop.f32.mrf.mxu1  ;;  %v9354_v26 = vpop.f32.mrf.mxu0 }
 0x231   : > { %v3598_v6 = vadd.f32 %v3503_v19, %v11664_v32  ;;  %v11885_v46 = vadd.f32 %v9342_v21, %v3600_v8 }
 0x232   : > { %v9291_v48 = vpop.f32.mrf.mxu1  ;;  %v4022_v27 = vpop.f32.mrf.mxu0 }
 0x233   : > { %v3601_v33 = vadd.f32 %v9291_v48, %v11671_v31  ;;  %v11888_v37 = vadd.f32 %v3974_v40, %v3598_v6 }
 0x234   : > { %v3506_v43 = vpop.f32.mrf.mxu1  ;;  %v9355_v18 = vpop.f32.mrf.mxu0 }
 0x235   : > { %v3599_v50 = vadd.f32 %v3506_v43, %v11678_v4  ;;  %v11891_v56 = vadd.f32 %v9343_v9, %v3601_v33 }
 0x236   : > { %v9294_v14 = vpop.f32.mrf.mxu1  ;;  %v4025_v0 = vpop.f32.mrf.mxu0 }
 0x237   : > { %v3604_v5 = vadd.f32 %v9294_v14, %v11687_v2  ;;  %v11894_v25 = vadd.f32 %v3977_v36, %v3599_v50  ;;  %v12657_v14 = vld [vmem:[#allocation4_spill] sm:$0xff] }
 0x238   : > { %v3519_v32 = vpop.f32.mrf.mxu1  ;;  %v9358_v21 = vpop.f32.mrf.mxu0 }
 0x239   : > { %v3602_v39 = vadd.f32 %v3519_v32, %v11695_v47  ;;  %v11897_v30 = vadd.f32 %v9346_v55, %v3604_v5 }
 0x23a   : > { %v9295_v31 = vpop.f32.mrf.mxu1  ;;  %v4038_v40 = vpop.f32.mrf.mxu0 }
 0x23b   : > { %v3605_v15 = vadd.f32 %v9295_v31, %v11702_v61  ;;  %v11900_v57 = vadd.f32 %v3990_v16, %v3602_v39  ;;  %v12658_v39 = vld [vmem:[#allocation5_spill] sm:$0xff] }
 0x23c   : > { %v3522_v4 = vpop.f32.mrf.mxu1  ;;  %v9359_v9 = vpop.f32.mrf.mxu0 }
 0x23d   : > { %v3603_v29 = vadd.f32 %v3522_v4, %v11714_v10  ;;  %v11903_v8 = vadd.f32 %v9347_v20, %v3605_v15 }
 0x23e   : > { %v9298_v2 = vpop.f32.mrf.mxu1  ;;  %v4041_v36 = vpop.f32.mrf.mxu0 }
 0x23f   : > { %v3608_v19 = vadd.f32 %v9298_v2, %v11723_v34  ;;  %v11906_v6 = vadd.f32 %v3993_v42, %v3603_v29  ;;  %v12659_v2 = vld [vmem:[#allocation10_spill] sm:$0xff] }
 0x240   : > { %v3535_v47 = vpop.f32.mrf.mxu1  ;;  %v9430_v55 = vpop.f32.mrf.mxu0 }
 0x241   : > { %v3606_v48 = vadd.f32 %v3535_v47, %v11731_v52  ;;  %v11909_v33 = vadd.f32 %v9350_v63, %v3608_v19 }
 0x242   : > { %v9299_v61 = vpop.f32.mrf.mxu1  ;;  %v4711_v16 = vpop.f32.mrf.mxu0 }
 0x243   : > { %v3609_v43 = vadd.f32 %v9299_v61, %v11741_v3  ;;  %v11912_v50 = vadd.f32 %v4006_v12, %v3606_v48  ;;  %v12660_v61 = vld [vmem:[#allocation6_spill] sm:$0xff] }
 0x244   : > { %v3538_v10 = vpop.f32.mrf.mxu1  ;;  %v9431_v20 = vpop.f32.mrf.mxu0 }
 0x245   : > { %v3607_v5 = vadd.f32 %v3538_v10, %v12657_v14  ;;  %v11915_v32 = vadd.f32 %v9351_v41, %v3609_v43 }
 0x246   : > { %v9302_v34 = vpop.f32.mrf.mxu1  ;;  %v4714_v42 = vpop.f32.mrf.mxu0 }
 0x247   : > { %v3612_v31 = vadd.f32 %v9302_v34, %v12658_v39  ;;  %v11918_v15 = vadd.f32 %v4009_v54, %v3607_v5  ;;  %v12661_v5 = vld [vmem:[#allocation7_spill] sm:$0xff] }
 0x248   : > { %v3551_v52 = vpop.f32.mrf.mxu1  ;;  %v9434_v63 = vpop.f32.mrf.mxu0 }
 0x249   : > { %v3610_v4 = vadd.f32 %v3551_v52, %v11768_v13  ;;  %v11921_v29 = vadd.f32 %v9354_v26, %v3612_v31 }
 0x24a   : > { %v9303_v3 = vpop.f32.mrf.mxu1  ;;  %v4727_v12 = vpop.f32.mrf.mxu0 }
 0x24b   : > { %v3613_v19 = vadd.f32 %v9303_v3, %v12659_v2  ;;  %v11924_v47 = vadd.f32 %v4022_v27, %v3610_v4 }
 0x24c   : > { %v3554_v41 = vpop.f32.mrf.mxu1  ;;  %v9435_v48 = vpop.f32.mrf.mxu0 }
 0x24d   : > { %v3611_v43 = vadd.f32 %v3554_v41, %v12660_v61  ;;  %v11927_v10 = vadd.f32 %v9355_v18, %v3613_v19 }
 0x24e   : > { %v9306_v54 = vpop.f32.mrf.mxu1  ;;  %v4730_v14 = vpop.f32.mrf.mxu0 }
 0x24f   : > { %v3616_v34 = vadd.f32 %v9306_v54, %v12661_v5  ;;  %v11930_v39 = vadd.f32 %v4025_v0, %v3611_v43 }
 0x250   : > { %v3567_v13 = vpop.f32.mrf.mxu1  ;;  %v9438_v26 = vpop.f32.mrf.mxu0 }
 0x251   : > { %v3614_v31 = vadd.f32 %v3567_v13, %v11803_v1  ;;  %v11933_v52 = vadd.f32 %v9358_v21, %v3616_v34 }
 0x252   : > { %v9307_v27 = vpop.f32.mrf.mxu1  ;;  %v4743_v4 = vpop.f32.mrf.mxu0 }
 0x253   : > { %v3617_v3 = vadd.f32 %v9307_v27, %v11810_v53  ;;  %v11936_v2 = vadd.f32 %v4038_v40, %v3614_v31 }
 0x254   : > { %v3570_v18 = vpop.f32.mrf.mxu1  ;;  %v9439_v19 = vpop.f32.mrf.mxu0 }
 0x255   : > { %v3615_v41 = vadd.f32 %v3570_v18, %v11819_v59  ;;  %v11939_v61 = vadd.f32 %v9359_v9, %v3617_v3 }
 0x256   : > { %v9378_v0 = vpop.f32.mrf.mxu1  ;;  %v4746_v43 = vpop.f32.mrf.mxu0 }
 0x257   : > { %v4393_v54 = vadd.f32 %v9378_v0, %v11823_v45  ;;  %v11942_v5 = vadd.f32 %v4041_v36, %v3615_v41 }
 0x258   : > { %v4248_v1 = vpop.f32.mrf.mxu1  ;;  %v9442_v21 = vpop.f32.mrf.mxu0 }
 0x259   : > { %v4391_v34 = vadd.f32 %v4248_v1, %v11828_v24  ;;  %v11945_v13 = vadd.f32 %v9430_v55, %v4393_v54 }
 0x25a   : > { %v9379_v53 = vpop.f32.mrf.mxu1  ;;  %v4759_v40 = vpop.f32.mrf.mxu0 }
 0x25b   : > { %v4394_v31 = vadd.f32 %v9379_v53, %v11833_v51  ;;  %v11948_v27 = vadd.f32 %v4711_v16, %v4391_v34 }
 0x25c   : > { %v4251_v59 = vpop.f32.mrf.mxu1  ;;  %v9443_v9 = vpop.f32.mrf.mxu0 }
 0x25d   : > { %v4392_v3 = vadd.f32 %v4251_v59, %v11837_v49  ;;  %v11951_v18 = vadd.f32 %v9431_v20, %v4394_v31 }
 0x25e   : > { %v9382_v45 = vpop.f32.mrf.mxu1  ;;  %v4762_v36 = vpop.f32.mrf.mxu0 }
 0x25f   : > { %v4397_v41 = vadd.f32 %v9382_v45, %v11841_v23  ;;  %v11954_v0 = vadd.f32 %v4714_v42, %v4392_v3 }
 0x260   : > { %v4264_v24 = vpop.f32.mrf.mxu1  ;;  %v9446_v55 = vpop.f32.mrf.mxu0 }
 0x261   : > { %v4395_v54 = vadd.f32 %v4264_v24, %v11846_v35  ;;  %v11957_v1 = vadd.f32 %v9434_v63, %v4397_v41 }
 0x262   : > { %v9383_v51 = vpop.f32.mrf.mxu1  ;;  %v4775_v16 = vpop.f32.mrf.mxu0 }
 0x263   : > { %v4398_v34 = vadd.f32 %v9383_v51, %v11850_v17  ;;  %v11960_v53 = vadd.f32 %v4727_v12, %v4395_v54 }
 0x264   : > { %v4267_v49 = vpop.f32.mrf.mxu1  ;;  %v9447_v20 = vpop.f32.mrf.mxu0 }
 0x265   : > { %v4396_v31 = vadd.f32 %v4267_v49, %v11854_v11  ;;  %v11963_v59 = vadd.f32 %v9435_v48, %v4398_v34 }
 0x266   : > { %v9386_v23 = vpop.f32.mrf.mxu1  ;;  %v4778_v42 = vpop.f32.mrf.mxu0 }
 0x267   : > { %v4401_v3 = vadd.f32 %v9386_v23, %v11858_v60  ;;  %v11966_v45 = vadd.f32 %v4730_v14, %v4396_v31 }
 0x268   : > { %v4280_v35 = vpop.f32.mrf.mxu1  ;;  %v9450_v63 = vpop.f32.mrf.mxu0 }
 0x269   : > { %v4399_v41 = vadd.f32 %v4280_v35, %v11862_v7  ;;  %v11969_v24 = vadd.f32 %v9438_v26, %v4401_v3 }
 0x26a   : > { %v9387_v17 = vpop.f32.mrf.mxu1  ;;  %v4791_v12 = vpop.f32.mrf.mxu0 }
 0x26b   : > { %v4402_v54 = vadd.f32 %v9387_v17, %v11866_v38  ;;  %v11972_v51 = vadd.f32 %v4743_v4, %v4399_v41 }
 0x26c   : > { %v4283_v11 = vpop.f32.mrf.mxu1  ;;  %v9451_v48 = vpop.f32.mrf.mxu0 }
 0x26d   : > { %v4400_v34 = vadd.f32 %v4283_v11, %v11870_v22  ;;  %v11975_v49 = vadd.f32 %v9439_v19, %v4402_v54 }
 0x26e   : > { %v9390_v60 = vpop.f32.mrf.mxu1  ;;  %v4794_v14 = vpop.f32.mrf.mxu0 }
 0x26f   : > { %v4405_v31 = vadd.f32 %v9390_v60, %v11873_v44  ;;  %v11978_v23 = vadd.f32 %v4746_v43, %v4400_v34 }
 0x270   : > { %v4296_v7 = vpop.f32.mrf.mxu1  ;;  %v9454_v26 = vpop.f32.mrf.mxu0 }
 0x271   : > { %v4403_v3 = vadd.f32 %v4296_v7, %v11876_v58  ;;  %v11981_v35 = vadd.f32 %v9442_v21, %v4405_v31 }
 0x272   : > { %v9391_v38 = vpop.f32.mrf.mxu1  ;;  %v4807_v4 = vpop.f32.mrf.mxu0 }
 0x273   : > { %v4406_v41 = vadd.f32 %v9391_v38, %v11879_v62  ;;  %v11984_v17 = vadd.f32 %v4759_v40, %v4403_v3 }
 0x274   : > { %v4299_v22 = vpop.f32.mrf.mxu1  ;;  %v9455_v54 = vpop.f32.mrf.mxu0 }
 0x275   : > { %v4404_v19 = vadd.f32 %v4299_v22, %v11882_v28  ;;  %v11987_v11 = vadd.f32 %v9443_v9, %v4406_v41 }
 0x276   : > { %v9394_v44 = vpop.f32.mrf.mxu1  ;;  %v4810_v60 = vpop.f32.mrf.mxu0 }
 0x277   : > { %v4409_v43 = vadd.f32 %v9394_v44, %v11885_v46  ;;  %v11990_v34 = vadd.f32 %v4762_v36, %v4404_v19 }
 0x278   : > { %v4312_v58 = vpop.f32.mrf.mxu1  ;;  %v9458_v3 = vpop.f32.mrf.mxu0 }
 0x279   : > { %v4407_v21 = vadd.f32 %v4312_v58, %v11888_v37  ;;  %v11993_v31 = vadd.f32 %v9446_v55, %v4409_v43 }
 0x27a   : > { %v9395_v62 = vpop.f32.mrf.mxu1  ;;  %v4823_v22 = vpop.f32.mrf.mxu0 }
 0x27b   : > { %v4410_v40 = vadd.f32 %v9395_v62, %v11891_v56  ;;  %v11996_v7 = vadd.f32 %v4775_v16, %v4407_v21 }
 0x27c   : > { %v4315_v28 = vpop.f32.mrf.mxu1  ;;  %v9459_v43 = vpop.f32.mrf.mxu0 }
 0x27d   : > { %v4408_v9 = vadd.f32 %v4315_v28, %v11894_v25  ;;  %v11999_v38 = vadd.f32 %v9447_v20, %v4410_v40 }
 0x27e   : > { %v9398_v46 = vpop.f32.mrf.mxu1  ;;  %v4826_v62 = vpop.f32.mrf.mxu0 }
 0x27f   : > { %v4413_v36 = vadd.f32 %v9398_v46, %v11897_v30  ;;  %v12002_v41 = vadd.f32 %v4778_v42, %v4408_v9 }
 0x280   : > { %v4328_v37 = vpop.f32.mrf.mxu1  ;;  %v9462_v9 = vpop.f32.mrf.mxu0 }
 0x281   : > { %v4411_v55 = vadd.f32 %v4328_v37, %v11900_v57  ;;  %v12005_v19 = vadd.f32 %v9450_v63, %v4413_v36 }
 0x282   : > { %v9399_v56 = vpop.f32.mrf.mxu1  ;;  %v4839_v37 = vpop.f32.mrf.mxu0 }
 0x283   : > { %v4414_v16 = vadd.f32 %v9399_v56, %v11903_v8  ;;  %v12008_v44 = vadd.f32 %v4791_v12, %v4411_v55 }
 0x284   : > { %v4331_v25 = vpop.f32.mrf.mxu1 }
 0x285   : > { %v4412_v20 = vadd.f32 %v4331_v25, %v11906_v6  ;;  %v12011_v58 = vadd.f32 %v9451_v48, %v4414_v16  ;;  %v9463_v16 = vpop.f32.mrf.mxu0 }
 0x286   : > { %v9402_v30 = vpop.f32.mrf.mxu1 }
 0x287   : > { %v4417_v42 = vadd.f32 %v9402_v30, %v11909_v33  ;;  %v12014_v21 = vadd.f32 %v4794_v14, %v4412_v20  ;;  %v9838_v20 = vmov 1983009808  }
 0x288   : > { %v4344_v57 = vpop.f32.mrf.mxu1  ;;  %v5737_v30 = vunpack.c.l.s4 %v9838_v20 }
 0x289   : > { %v4415_v63 = vadd.f32 %v4344_v57, %v11912_v50  ;;  %v12017_v40 = vadd.f32 %v9454_v26, %v4417_v42  ;;  %v4842_v57 = vpop.f32.mrf.mxu0 }
 0x28a   : > { %v9403_v8 = vpop.f32.mrf.mxu1 }
 0x28b   : > { %v4418_v12 = vadd.f32 %v9403_v8, %v11915_v32  ;;  %v12020_v28 = vadd.f32 %v4807_v4, %v4415_v63 }
 0x28c   : > { %v4347_v6 = vpop.f32.mrf.mxu1 }
 0x28d   : > { %v4416_v48 = vadd.f32 %v4347_v6, %v11918_v15  ;;  %v12023_v46 = vadd.f32 %v9455_v54, %v4418_v12  ;;  %v9534_v12 = vpop.f32.mrf.mxu0 }
 0x28e   : > { %v9406_v33 = vpop.f32.mrf.mxu1 }
 0x28f   : > { %v4421_v14 = vadd.f32 %v9406_v33, %v11921_v29  ;;  %v12026_v36 = vadd.f32 %v4810_v60, %v4416_v48  ;;  %v12668_v33 = vld [vmem:[#allocation3_spill] sm:$0xff] }
 0x290   : > { %v4360_v50 = vpop.f32.mrf.mxu1 }
 0x291   : > { %v4419_v26 = vadd.f32 %v4360_v50, %v11924_v47  ;;  %v12029_v55 = vadd.f32 %v9458_v3, %v4421_v14  ;;  %v5520_v50 = vpop.f32.mrf.mxu0 }
 0x292   : > { %v9407_v32 = vpop.f32.mrf.mxu1 }
 0x293   : > { %v4422_v4 = vadd.f32 %v9407_v32, %v11927_v10  ;;  %v12032_v56 = vadd.f32 %v4823_v22, %v4419_v26 }
 0x294   : > { %v4363_v15 = vpop.f32.mrf.mxu1 }
 0x295   : > { %12662 = vst [vmem:[#allocation8_spill] sm:$0xff] %v12032_v56  ;;  %v4420_v54 = vadd.f32 %v4363_v15, %v11930_v39  ;;  %v12035_v25 = vadd.f32 %v9459_v43, %v4422_v4  ;;  %v5738_v39 = vunpack.c.0.s8 %v5737_v30 }
 0x296   : > { %v9410_v29 = vpop.f32.mrf.mxu1 }
 0x297   : > { %12663 = vst [vmem:[#allocation11_spill] sm:$0xff] %v12035_v25  ;;  %v4425_v60 = vadd.f32 %v9410_v29, %v11933_v52  ;;  %v12038_v47 = vadd.f32 %v4826_v62, %v4420_v54  ;;  %v9535_v29 = vpop.f32.mrf.mxu0 }
 0x298   : > { %v4376_v3 = vpop.f32.mrf.mxu1 }
 0x299   : > { %12664 = vst [vmem:[#allocation12_spill] sm:$0xff] %v12038_v47  ;;  %v4423_v42 = vadd.f32 %v4376_v3, %v11936_v2  ;;  %v12041_v10 = vadd.f32 %v9462_v9, %v4425_v60  ;;  %v12051_v2 = vsub.s32 %v5738_v39, %v12668_v33  ;;  %v5523_v33 = vpop.f32.mrf.mxu0 }
 0x29a   : > { %v9411_v22 = vpop.f32.mrf.mxu1 }
 0x29b   : > { %12665 = vst [vmem:[#allocation16_spill] sm:$0xff] %v12041_v10  ;;  %v4426_v63 = vadd.f32 %v9411_v22, %v11939_v61  ;;  %v12044_v8 = vadd.f32 %v4839_v37, %v4423_v42 }
 0x29c   : > { %v4379_v43 = vpop.f32.mrf.mxu1 }
 0x29d   : > { %12666 = vst [vmem:[#allocation23_spill] sm:$0xff] %v12044_v8  ;;  %v4424_v52 = vadd.f32 %v4379_v43, %v11942_v5  ;;  %v12047_v6 = vadd.f32 %v9463_v16, %v4426_v63 }
 0x29e   : > { %v9482_v62 = vpop.f32.mrf.mxu1 }
 0x29f   : > { %12667 = vst [vmem:[#allocation19_spill] sm:$0xff] %v12047_v6  ;;  %v5327_v48 = vadd.f32 %v9482_v62, %v11945_v13  ;;  %v12053_v9 = vadd.f32 %v4842_v57, %v4424_v52 }
 0x2a0   : > { %v5182_v14 = vpop.f32.mrf.mxu1 }
 0x2a1   : > { %12669 = vst [vmem:[#allocation13_spill] sm:$0xff] %v12053_v9  ;;  %v5665_v61 = vadd.f32 %v9534_v12, %v5327_v48  ;;  %v5325_v26 = vadd.f32 %v5182_v14, %v11948_v27 }
 0x2a2   : > { %v9483_v37 = vpop.f32.mrf.mxu1 }
 0x2a3   : > { %v5769_v32 = vcombine.high %v5665_v61, %v5665_v61  ;;  %v5776_v4 = vrot.slane %v5665_v61, %v12051_v2  ;;  %v5663_v5 = vadd.f32 %v5520_v50, %v5325_v26  ;;  %v5328_v15 = vadd.f32 %v9483_v37, %v11951_v18 }
 0x2a4   : > { %v5185_v54 = vpop.f32.mrf.mxu1 }
 0x2a5   : > { %v5783_v13 = vrot.slane %v5769_v32, %v12051_v2  ;;  %v5784_v16 = vcombine.high %v5776_v4, %v5776_v4  ;;  %v5735_v60 = vcombine.high %v5663_v5, %v5663_v5  ;;  %v5742_v20 = vrot.slane %v5663_v5, %v12051_v2 }
 0x2a6   : > { %v5666_v30 = vadd.f32 %v9535_v29, %v5328_v15  ;;  %v5326_v3 = vadd.f32 %v5185_v54, %v11954_v0  ;;  %v9486_v14 = vpop.f32.mrf.mxu1 }
 0x2a7   : > { %v6501_v42 = vcombine.low %v5784_v16, %v5783_v13  ;;  %v7249_v27 = vmul.f32 %v5784_v16, %v5784_v16  ;;  %v7250_v57 = vmul.f32 %v5783_v13, %v5783_v13  ;;  %v5749_v22 = vrot.slane %v5735_v60, %v12051_v2 }
 0x2a8   : > { %v5750_v63 = vcombine.high %v5742_v20, %v5742_v20  ;;  %v7241_v39 = vmul.f32 %v5742_v20, %v5742_v20  ;;  %v5785_v43 = vcombine.high %v5783_v13, %v5783_v13  ;;  %v5786_v18 = vcombine.high %v5666_v30, %v5666_v30 }
 0x2a9   : > { %v6509_v12 = vrot.slane %v6501_v42, %v12051_v2  ;;  %v7531_v52 = vcombine.low %v7249_v27, %v7250_v57  ;;  %v5751_v62 = vcombine.high %v5749_v22, %v5749_v22  ;;  %v7243_v48 = vmul.f32 %v5749_v22, %v5749_v22  ;;  %v5198_v27 = vpop.f32.mrf.mxu1 }
 0x2aa   : > { %v6467_v50 = vcombine.low %v5742_v20, %v5750_v63  ;;  %v7242_v61 = vmul.f32 %v5750_v63, %v5750_v63  ;;  %v5793_v0 = vrot.slane %v5666_v30, %v12051_v2  ;;  %v5800_v26 = vrot.slane %v5786_v18, %v12051_v2  ;;  %v9538_v30 = vpop.f32.mrf.mxu0 }
 0x2ab   : > { %v12066_v37 = vrot.slane %v7531_v52, %v12051_v2  ;;  %v6468_v32 = vcombine.low %v5749_v22, %v5751_v62  ;;  %v7244_v4 = vmul.f32 %v5751_v62, %v5751_v62  ;;  %v7251_v5 = vmul.f32 %v5785_v43, %v5785_v43 }
 0x2ac   : > { %v6475_v15 = vrot.slane %v6467_v50, %v12051_v2  ;;  %v7497_v54 = vcombine.low %v7241_v39, %v7242_v61  ;;  %v5801_v13 = vcombine.high %v5793_v0, %v5793_v0  ;;  %v6502_v16 = vcombine.low %v5785_v43, %v5793_v0 }
 0x2ad   : > { %v6482_v29 = vrot.slane %v6468_v32, %v12051_v2  ;;  %v7498_v60 = vcombine.low %v7243_v48, %v7244_v4  ;;  %v7252_v20 = vmul.f32 %v5793_v0, %v5793_v0  ;;  %v12070_v42 = vmul.f32 %v5800_v26, %v5800_v26 }
 0x2ae   : > { %v12073_v57 = vrot.slane %v7497_v54, %v12051_v2  ;;  %v6516_v22 = vrot.slane %v6502_v16, %v12051_v2  ;;  %v6518_v63 = vcombine.low %v5801_v13, %v5800_v26  ;;  %v12076_v18 = vmul.f32 %v5801_v13, %v5801_v13  ;;  %v9487_v16 = vpop.f32.mrf.mxu1 }
 0x2af   : > { %v12078_v52 = vcombine.low %v6475_v15, %v6482_v29  ;;  %v12081_v39 = vrot.slane %v7498_v60, %v12051_v2  ;;  %v7532_v43 = vcombine.low %v7251_v5, %v7252_v20  ;;  %v5664_v62 = vadd.f32 %v5523_v33, %v5326_v3  ;;  %v5536_v5 = vpop.f32.mrf.mxu0 }
 0x2b0   : > { %v12083_v48 = vcombine.low %v6509_v12, %v6516_v22  ;;  %v5331_v61 = vadd.f32 %v9486_v14, %v11957_v1  ;;  %v5329_v0 = vadd.f32 %v5198_v27, %v11960_v53  ;;  %v5802_v33 = vcombine.high %v5800_v26, %v5800_v26  ;;  %v5201_v1 = vpop.f32.mrf.mxu1 }
 0x2b1   : > { %v12092_v4 = vrot.slane %v7532_v43, %v12051_v2  ;;  %v5752_v15 = vcombine.high %v5664_v62, %v5664_v62  ;;  %v5759_v54 = vrot.slane %v5664_v62, %v12051_v2  ;;  %v6526_v13 = vrot.slane %v6518_v63, %v12051_v2 }
 0x2b2   : > { %v5669_v3 = vadd.f32 %v9538_v30, %v5331_v61  ;;  %v5667_v12 = vadd.f32 %v5536_v5, %v5329_v0  ;;  %v9539_v5 = vpop.f32.mrf.mxu0  ;;  %v5332_v25 = vadd.f32 %v9487_v16, %v11963_v59 }
 0x2b3   : > { %v5766_v53 = vrot.slane %v5752_v15, %v12051_v2  ;;  %v5767_v14 = vcombine.high %v5759_v54, %v5759_v54  ;;  %v7245_v29 = vmul.f32 %v5759_v54, %v5759_v54  ;;  %v12672_v16 = vcombine.low %v12066_v37, %v12092_v4 }
 0x2b4   : > { %v5836_v60 = vcombine.high %v5669_v3, %v5669_v3  ;;  %v5843_v20 = vrot.slane %v5669_v3, %v12051_v2  ;;  %v5803_v27 = vcombine.high %v5667_v12, %v5667_v12  ;;  %v5810_v22 = vrot.slane %v5667_v12, %v12051_v2 }
 0x2b5   : > { %v5768_v43 = vcombine.high %v5766_v53, %v5766_v53  ;;  %v6484_v30 = vcombine.low %v5759_v54, %v5767_v14  ;;  %v7246_v62 = vmul.f32 %v5767_v14, %v5767_v14  ;;  %v7247_v26 = vmul.f32 %v5766_v53, %v5766_v53 }
 0x2b6   : > { %v5850_v63 = vrot.slane %v5836_v60, %v12051_v2  ;;  %v5851_v61 = vcombine.high %v5843_v20, %v5843_v20  ;;  %v7263_v0 = vmul.f32 %v5843_v20, %v5843_v20  ;;  %v5817_v15 = vrot.slane %v5803_v27, %v12051_v2 }
 0x2b7   : > { %v6485_v32 = vcombine.low %v5766_v53, %v5768_v43  ;;  %v6492_v50 = vrot.slane %v6484_v30, %v12051_v2  ;;  %v7248_v3 = vmul.f32 %v5768_v43, %v5768_v43  ;;  %v7514_v9 = vcombine.low %v7245_v29, %v7246_v62  ;;  %v5539_v30 = vpop.f32.mrf.mxu0 }
 0x2b8   : > { %v12104_v6 = vcombine.high %v5850_v63, %v5850_v63  ;;  %v6553_v12 = vcombine.low %v5843_v20, %v5851_v61  ;;  %v7264_v54 = vmul.f32 %v5851_v61, %v5851_v61  ;;  %v5818_v14 = vcombine.high %v5817_v15, %v5817_v15  ;;  %v9490_v20 = vpop.f32.mrf.mxu1 }
 0x2b9   : > { %v6499_v8 = vrot.slane %v6485_v32, %v12051_v2  ;;  %v7515_v60 = vcombine.low %v7247_v26, %v7248_v3  ;;  %v7522_v10 = vrot.slane %v7514_v9, %v12051_v2  ;;  %v6519_v47 = vcombine.low %v5802_v33, %v5810_v22 }
 0x2ba   : > { %v12110_v27 = vrot.slane %v6553_v12, %v12051_v2  ;;  %v12114_v53 = vmul.f32 %v12104_v6, %v12104_v6  ;;  %v7583_v29 = vcombine.low %v7263_v0, %v7264_v54  ;;  %v6535_v43 = vcombine.low %v5817_v15, %v5818_v14  ;;  %v5214_v56 = vpop.f32.mrf.mxu1 }
 0x2bb   : > { %v6500_v62 = vcombine.low %v6492_v50, %v6499_v8  ;;  %v7529_v63 = vrot.slane %v7515_v60, %v12051_v2  ;;  %v6533_v32 = vrot.slane %v6519_v47, %v12051_v2  ;;  %v7255_v26 = vmul.f32 %v5802_v33, %v5802_v33 }
 0x2bc   : > { %v12124_v9 = vrot.slane %v7583_v29, %v12051_v2  ;;  %v12127_v61 = vrot.slane %v6535_v43, %v12051_v2  ;;  %v7256_v0 = vmul.f32 %v5810_v22, %v5810_v22  ;;  %v7257_v3 = vmul.f32 %v5817_v15, %v5817_v15  ;;  %v9542_v43 = vpop.f32.mrf.mxu0 }
 0x2bd   : > { %v8757_v8 = vpack.c.bf16 %v6500_v62, %v12078_v52  ;;  %v7203_v50 = vadd.f32 %v6500_v62, %v12078_v52  ;;  %v7530_v47 = vcombine.low %v7522_v10, %v7529_v63  ;;  %v6534_v33 = vcombine.low %v6526_v13, %v6533_v32 }
 0x2be   : > { %v7258_v12 = vmul.f32 %v5818_v14, %v5818_v14  ;;  %v7549_v54 = vcombine.low %v7255_v26, %v7256_v0  ;;  %v12670_v60 = vcombine.low %v12076_v18, %v12070_v42  ;;  %v12671_v22 = vcombine.low %v12073_v57, %v12081_v39 }
 0x2bf   : > { %8758 = vst [vmem:[%s12121_s30] sm:$0xff] %v8757_v8   ;;  %v8762_v10 = vpack.c.bf16 %v6534_v33, %v12083_v48  ;;  %v7204_v52 = vadd.f32 %v7203_v50, %v12083_v48  ;;  %v5330_v13 = vadd.f32 %v5201_v1, %v11966_v45  ;;  %v5670_v42 = vadd.f32 %v9539_v5, %v5332_v25  ;;  %v5552_v1 = vpop.f32.mrf.mxu0  ;;  %v12158_v50 = vpop.f32.mrf.mxu1 }
 0x2c0   : > { %v7556_v29 = vrot.slane %v12670_v60, %v12051_v2  ;;  %v8073_v15 = vadd.f32 %v7530_v47, %v12671_v22  ;;  %v7563_v14 = vrot.slane %v7549_v54, %v12051_v2  ;;  %v7565_v62 = vcombine.low %v7257_v3, %v7258_v12 }
 0x2c1   : > { %v5335_v18 = vadd.f32 %v9490_v20, %v11969_v24  ;;  %8851 = vst [vmem:[%s12121_s30 + $0x8] sm:$0xff] %v8762_v10   ;;  %v7205_v59 = vadd.f32 %v7204_v52, %v6534_v33  ;;  %v5668_v57 = vadd.f32 %v5539_v30, %v5330_v13  ;;  %v5333_v39 = vadd.f32 %v5214_v56, %v11972_v51 }
 0x2c2   : > { %v8074_v63 = vadd.f32 %v8073_v15, %v12672_v16  ;;  %v7564_v32 = vcombine.low %v7556_v29, %v7563_v14  ;;  %v7573_v48 = vrot.slane %v7565_v62, %v12051_v2  ;;  %v5853_v26 = vcombine.high %v5670_v42, %v5670_v42 }
 0x2c3   : > { %v5860_v45 = vrot.slane %v5670_v42, %v12051_v2  ;;  %v5819_v0 = vcombine.high %v5668_v57, %v5668_v57  ;;  %v5826_v25 = vrot.slane %v5668_v57, %v12051_v2  ;;  %v5673_v24 = vadd.f32 %v9542_v43, %v5335_v18  ;;  %v5217_v18 = vpop.f32.mrf.mxu1 }
 0x2c4   : > { %v12153_v5 = vadd.f32 %v5552_v1, %v5333_v39  ;;  %v8075_v20 = vadd.f32 %v8074_v63, %v7564_v32  ;;  %v5867_v37 = vrot.slane %v5853_v26, %v12051_v2 }
 0x2c5   : > { %v5868_v4 = vcombine.high %v5860_v45, %v5860_v45  ;;  %v6569_v30 = vcombine.low %v12104_v6, %v5860_v45  ;;  %v7266_v51 = vmul.f32 %v5860_v45, %v5860_v45  ;;  %v5833_v56 = vrot.slane %v5819_v0, %v12051_v2 }
 0x2c6   : > { %v5834_v3 = vcombine.high %v5826_v25, %v5826_v25  ;;  %v7259_v8 = vmul.f32 %v5826_v25, %v5826_v25  ;;  %v7268_v54 = vmul.f32 %v5867_v37, %v5867_v37  ;;  %v5903_v52 = vcombine.high %v5673_v24, %v5673_v24 }
 0x2c7   : > { %v6570_v47 = vcombine.low %v5868_v4, %v5867_v37  ;;  %v6577_v33 = vrot.slane %v6569_v30, %v12051_v2  ;;  %v7267_v12 = vmul.f32 %v5868_v4, %v5868_v4  ;;  %v7599_v60 = vcombine.low %v12114_v53, %v7266_v51  ;;  %v9543_v30 = vpop.f32.mrf.mxu0 }
 0x2c8   : > { %v5835_v29 = vcombine.high %v5833_v56, %v5833_v56  ;;  %v6536_v43 = vcombine.low %v5826_v25, %v5834_v3  ;;  %v7260_v22 = vmul.f32 %v5834_v3, %v5834_v3  ;;  %v7261_v10 = vmul.f32 %v5833_v56, %v5833_v56 }
 0x2c9   : > { %v6584_v15 = vrot.slane %v6570_v47, %v12051_v2  ;;  %v7600_v6 = vcombine.low %v7267_v12, %v7268_v54  ;;  %v7607_v13 = vrot.slane %v7599_v60, %v12051_v2  ;;  %v5910_v57 = vrot.slane %v5673_v24, %v12051_v2 }
 0x2ca   : > { %v6550_v14 = vrot.slane %v6536_v43, %v12051_v2  ;;  %v6552_v62 = vcombine.low %v5833_v56, %v5835_v29  ;;  %v7262_v42 = vmul.f32 %v5835_v29, %v5835_v29  ;;  %v7566_v53 = vcombine.low %v7259_v8, %v7260_v22  ;;  %v9494_v8 = vpop.f32.mrf.mxu1 }
 0x2cb   : > { %v12165_v16 = vcombine.low %v6577_v33, %v6584_v15  ;;  %v7614_v63 = vrot.slane %v7600_v6, %v12051_v2  ;;  %v5917_v45 = vrot.slane %v5903_v52, %v12051_v2  ;;  %v5918_v25 = vcombine.high %v5910_v57, %v5910_v57 }
 0x2cc   : > { %v6551_v39 = vcombine.low %v12127_v61, %v6550_v14  ;;  %v6560_v32 = vrot.slane %v6552_v62, %v12051_v2  ;;  %v7582_v26 = vcombine.low %v7261_v10, %v7262_v42  ;;  %v7580_v0 = vrot.slane %v7566_v53, %v12051_v2  ;;  %v5230_v14 = vpop.f32.mrf.mxu1 }
 0x2cd   : > { %v7615_v1 = vcombine.low %v7607_v13, %v7614_v63  ;;  %v7277_v4 = vmul.f32 %v5910_v57, %v5910_v57  ;;  %v5919_v24 = vcombine.high %v5917_v45, %v5917_v45  ;;  %v6620_v47 = vcombine.low %v5910_v57, %v5918_v25 }
 0x2ce   : > { %v6568_v51 = vcombine.low %v6560_v32, %v12110_v27  ;;  %v7206_v56 = vadd.f32 %v7205_v59, %v6551_v39  ;;  %v7590_v3 = vrot.slane %v7582_v26, %v12051_v2  ;;  %v7581_v61 = vcombine.low %v7573_v48, %v7580_v0  ;;  %v5555_v59 = vpop.f32.mrf.mxu0 }
 0x2cf   : > { %v7278_v33 = vmul.f32 %v5918_v25, %v5918_v25  ;;  %v7279_v12 = vmul.f32 %v5917_v45, %v5917_v45  ;;  %v6621_v43 = vcombine.low %v5917_v45, %v5919_v24  ;;  %v6628_v15 = vrot.slane %v6620_v47, %v12051_v2 }
 0x2d0   : > { %v8767_v54 = vpack.c.bf16 %v6568_v51, %v6551_v39  ;;  %v7207_v60 = vadd.f32 %v7206_v56, %v6568_v51  ;;  %v7598_v29 = vcombine.low %v7590_v3, %v12124_v9  ;;  %v8076_v22 = vadd.f32 %v8075_v20, %v7581_v61  ;;  %v9546_v45 = vpop.f32.mrf.mxu0  ;;  %v9495_v56 = vpop.f32.mrf.mxu1 }
 0x2d1   : > { %v7280_v6 = vmul.f32 %v5919_v24, %v5919_v24  ;;  %v7650_v27 = vcombine.low %v7277_v4, %v7278_v33  ;;  %v6635_v10 = vrot.slane %v6621_v43, %v12051_v2  ;;  %v5869_v52 = vcombine.high %v5867_v37, %v5867_v37 }
 0x2d2   : > { %8852 = vst [vmem:[%s12121_s30 + $0x10] sm:$0xff] %v8767_v54   ;;  %v5870_v48 = vcombine.high %v12153_v5, %v12153_v5  ;;  %v5877_v13 = vrot.slane %v12153_v5, %v12051_v2  ;;  %v8077_v62 = vadd.f32 %v8076_v22, %v7598_v29  ;;  %v7208_v42 = vadd.f32 %v7207_v60, %v12165_v16  ;;  %v5568_v22 = vpop.f32.mrf.mxu0 }
 0x2d3   : > { %v7651_v9 = vcombine.low %v7279_v12, %v7280_v6  ;;  %v12184_v20 = vrot.slane %v7650_v27, %v12051_v2  ;;  %v12187_v63 = vcombine.low %v6628_v15, %v6635_v10  ;;  %v7269_v32 = vmul.f32 %v5869_v52, %v5869_v52 }
 0x2d4   : > { %v5884_v53 = vrot.slane %v5870_v48, %v12051_v2  ;;  %v5885_v57 = vcombine.high %v5877_v13, %v5877_v13  ;;  %v6586_v37 = vcombine.low %v5869_v52, %v5877_v13  ;;  %v7270_v26 = vmul.f32 %v5877_v13, %v5877_v13 }
 0x2d5   : > { %v12191_v39 = vrot.slane %v7651_v9, %v12051_v2  ;;  %v8078_v5 = vadd.f32 %v8077_v62, %v7615_v1  ;;  %v5336_v61 = vadd.f32 %v12158_v50, %v11975_v49  ;;  %v5334_v47 = vadd.f32 %v5217_v18, %v11978_v23 }
 0x2d6   : > { %v6587_v0 = vcombine.low %v5885_v57, %v5884_v53  ;;  %v6594_v25 = vrot.slane %v6586_v37, %v12051_v2  ;;  %v7271_v4 = vmul.f32 %v5885_v57, %v5885_v57  ;;  %v7272_v51 = vmul.f32 %v5884_v53, %v5884_v53 }
 0x2d7   : > { %v7666_v3 = vcombine.low %v12184_v20, %v12191_v39  ;;  %v7616_v24 = vcombine.low %v7269_v32, %v7270_v26  ;;  %v5339_v1 = vadd.f32 %v9494_v8, %v11981_v35  ;;  %v5337_v54 = vadd.f32 %v5230_v14, %v11984_v17 }
 0x2d8   : > { %v6601_v33 = vrot.slane %v6587_v0, %v12051_v2  ;;  %v7617_v12 = vcombine.low %v7271_v4, %v7272_v51  ;;  %v5674_v29 = vadd.f32 %v9543_v30, %v5336_v61  ;;  %v5672_v43 = vadd.f32 %v5555_v59, %v5334_v47 }
 0x2d9   : > { %v7624_v60 = vrot.slane %v7616_v24, %v12051_v2  ;;  %v12204_v15 = vadd.f32 %v9495_v56, %v11987_v11  ;;  %v5677_v23 = vadd.f32 %v9546_v45, %v5339_v1  ;;  %v5675_v50 = vadd.f32 %v5568_v22, %v5337_v54 }
 0x2da   : > { %v6602_v6 = vcombine.low %v6594_v25, %v6601_v33  ;;  %v7631_v49 = vrot.slane %v7617_v12, %v12051_v2  ;;  %v5920_v18 = vcombine.high %v5674_v29, %v5674_v29  ;;  %v5927_v27 = vrot.slane %v5674_v29, %v12051_v2 }
 0x2db   : > { %v5886_v35 = vcombine.high %v5672_v43, %v5672_v43  ;;  %v5893_v17 = vrot.slane %v5672_v43, %v12051_v2  ;;  %v5970_v10 = vcombine.high %v5677_v23, %v5677_v23  ;;  %v5977_v9 = vrot.slane %v5677_v23, %v12051_v2 }
 0x2dc   : > { %v8772_v8 = vpack.c.bf16 %v6602_v6, %v12165_v16  ;;  %v7209_v30 = vadd.f32 %v7208_v42, %v6602_v6  ;;  %v7632_v59 = vcombine.low %v7624_v60, %v7631_v49  ;;  %v5934_v11 = vrot.slane %v5920_v18, %v12051_v2 }
 0x2dd   : > { %v5935_v52 = vcombine.high %v5927_v27, %v5927_v27  ;;  %v5900_v48 = vrot.slane %v5886_v35, %v12051_v2  ;;  %v5901_v13 = vcombine.high %v5893_v17, %v5893_v17  ;;  %v7273_v62 = vmul.f32 %v5893_v17, %v5893_v17  ;;  %v5233_v27 = vpop.f32.mrf.mxu1 }
 0x2de   : > { %8853 = vst [vmem:[%s12121_s30 + $0x18] sm:$0xff] %v8772_v8   ;;  %v8079_v14 = vadd.f32 %v8078_v5, %v7632_v59  ;;  %v5984_v53 = vrot.slane %v5970_v10, %v12051_v2  ;;  %v7282_v32 = vmul.f32 %v5934_v11, %v5934_v11  ;;  %v5985_v0 = vcombine.high %v5977_v9, %v5977_v9  ;;  %v9547_v8 = vpop.f32.mrf.mxu0 }
 0x2df   : > { %v6637_v57 = vcombine.low %v5935_v52, %v5934_v11  ;;  %v7281_v37 = vmul.f32 %v5935_v52, %v5935_v52  ;;  %v5902_v16 = vcombine.high %v5900_v48, %v5900_v48  ;;  %v6603_v42 = vcombine.low %v5893_v17, %v5901_v13 }
 0x2e0   : > { %v7274_v26 = vmul.f32 %v5901_v13, %v5901_v13  ;;  %v7275_v45 = vmul.f32 %v5900_v48, %v5900_v48  ;;  %v5986_v61 = vcombine.high %v5984_v53, %v5984_v53  ;;  %v6672_v47 = vcombine.low %v5977_v9, %v5985_v0 }
 0x2e1   : > { %v6645_v25 = vrot.slane %v6637_v57, %v12051_v2  ;;  %v7667_v4 = vcombine.low %v7281_v37, %v7282_v32  ;;  %v6604_v51 = vcombine.low %v5900_v48, %v5902_v16  ;;  %v7276_v56 = vmul.f32 %v5902_v16, %v5902_v16 }
 0x2e2   : > { %v6611_v5 = vrot.slane %v6603_v42, %v12051_v2  ;;  %v7633_v24 = vcombine.low %v7273_v62, %v7274_v26  ;;  %v7291_v54 = vmul.f32 %v5977_v9, %v5977_v9  ;;  %v12223_v29 = vrot.slane %v6672_v47, %v12051_v2 }
 0x2e3   : > { %v12218_v33 = vrot.slane %v7667_v4, %v12051_v2  ;;  %v6618_v12 = vrot.slane %v6604_v51, %v12051_v2  ;;  %v7634_v1 = vcombine.low %v7275_v45, %v7276_v56  ;;  %v6688_v43 = vcombine.low %v5984_v53, %v5986_v61  ;;  %v5571_v51 = vpop.f32.mrf.mxu0 }
 0x2e4   : > { %v7641_v60 = vrot.slane %v7633_v24, %v12051_v2  ;;  %v7292_v22 = vmul.f32 %v5985_v0, %v5985_v0  ;;  %v7293_v23 = vmul.f32 %v5984_v53, %v5984_v53  ;;  %v7294_v18 = vmul.f32 %v5986_v61, %v5986_v61 }
 0x2e5   : > { %v6619_v6 = vcombine.low %v6611_v5, %v6618_v12  ;;  %v7648_v49 = vrot.slane %v7634_v1, %v12051_v2  ;;  %v6696_v35 = vrot.slane %v6688_v43, %v12051_v2  ;;  %v5936_v59 = vcombine.high %v5934_v11, %v5934_v11 }
 0x2e6   : > { %v7702_v17 = vcombine.low %v7291_v54, %v7292_v22  ;;  %v5937_v10 = vcombine.high %v5675_v50, %v5675_v50  ;;  %v7718_v62 = vcombine.low %v7293_v23, %v7294_v18  ;;  %v5944_v57 = vrot.slane %v5675_v50, %v12051_v2 }
 0x2e7   : > { %v8777_v52 = vpack.c.bf16 %v12187_v63, %v6619_v6  ;;  %v7210_v48 = vadd.f32 %v7209_v30, %v6619_v6  ;;  %v7649_v13 = vcombine.low %v7641_v60, %v7648_v49  ;;  %v7283_v37 = vmul.f32 %v5936_v59, %v5936_v59  ;;  %v9498_v30 = vpop.f32.mrf.mxu1 }
 0x2e8   : > { %v12229_v9 = vrot.slane %v7702_v17, %v12051_v2  ;;  %v5951_v53 = vrot.slane %v5937_v10, %v12051_v2  ;;  %v12235_v16 = vrot.slane %v7718_v62, %v12051_v2  ;;  %v5678_v11 = vadd.f32 %v9547_v8, %v12204_v15 }
 0x2e9   : > { %8854 = vst [vmem:[%s12121_s30 + $0x20] sm:$0xff] %v8777_v52   ;;  %v8080_v32 = vadd.f32 %v8079_v14, %v7649_v13  ;;  %v5338_v42 = vadd.f32 %v5233_v27, %v11990_v34  ;;  %v5952_v26 = vcombine.high %v5944_v57, %v5944_v57  ;;  %v6638_v45 = vcombine.low %v5936_v59, %v5944_v57  ;;  %v5246_v60 = vpop.f32.mrf.mxu1 }
 0x2ea   : > { %v7284_v0 = vmul.f32 %v5944_v57, %v5944_v57  ;;  %v7286_v4 = vmul.f32 %v5951_v53, %v5951_v53  ;;  %v5987_v56 = vcombine.high %v5678_v11, %v5678_v11  ;;  %v5994_v50 = vrot.slane %v5678_v11, %v12051_v2  ;;  %v9550_v57 = vpop.f32.mrf.mxu0 }
 0x2eb   : > { %v5676_v5 = vadd.f32 %v5571_v51, %v5338_v42  ;;  %v5953_v24 = vcombine.high %v5951_v53, %v5951_v53  ;;  %v6652_v14 = vrot.slane %v6638_v45, %v12051_v2  ;;  %v6654_v61 = vcombine.low %v5952_v26, %v5951_v53 }
 0x2ec   : > { %v7285_v47 = vmul.f32 %v5952_v26, %v5952_v26  ;;  %v7668_v12 = vcombine.low %v7283_v37, %v7284_v0  ;;  %v6001_v15 = vrot.slane %v5987_v56, %v12051_v2  ;;  %v6002_v1 = vcombine.high %v5994_v50, %v5994_v50  ;;  %v9499_v37 = vpop.f32.mrf.mxu1 }
 0x2ed   : > { %v7295_v34 = vmul.f32 %v5994_v50, %v5994_v50  ;;  %v5954_v54 = vcombine.high %v5676_v5, %v5676_v5  ;;  %v6653_v43 = vcombine.low %v6645_v25, %v6652_v14  ;;  %v5961_v49 = vrot.slane %v5676_v5, %v12051_v2 }
 0x2ee   : > { %v7682_v22 = vrot.slane %v7668_v12, %v12051_v2  ;;  %v7684_v6 = vcombine.low %v7285_v47, %v7286_v4  ;;  %v12244_v23 = vcombine.high %v6001_v15, %v6001_v15  ;;  %v6689_v18 = vcombine.low %v5994_v50, %v6002_v1  ;;  %v5249_v47 = vpop.f32.mrf.mxu1 }
 0x2ef   : > { %v7296_v27 = vmul.f32 %v6002_v1, %v6002_v1  ;;  %v5968_v17 = vrot.slane %v5954_v54, %v12051_v2  ;;  %v6655_v59 = vcombine.low %v5953_v24, %v5961_v49  ;;  %v6662_v10 = vrot.slane %v6654_v61, %v12051_v2  ;;  %v5584_v61 = vpop.f32.mrf.mxu0 }
 0x2f0   : > { %v7683_v8 = vcombine.low %v12218_v33, %v7682_v22  ;;  %v7211_v52 = vadd.f32 %v7210_v48, %v12187_v63  ;;  %v6703_v25 = vrot.slane %v6689_v18, %v12051_v2  ;;  %v12253_v13 = vmul.f32 %v12244_v23, %v12244_v23 }
 0x2f1   : > { %v7719_v62 = vcombine.low %v7295_v34, %v7296_v27  ;;  %v5969_v53 = vcombine.high %v5968_v17, %v5968_v17  ;;  %v6669_v11 = vrot.slane %v6655_v59, %v12051_v2  ;;  %v7287_v26 = vmul.f32 %v5953_v24, %v5953_v24  ;;  %v9551_v18 = vpop.f32.mrf.mxu0 }
 0x2f2   : > { %v7212_v42 = vadd.f32 %v7211_v52, %v6653_v43  ;;  %v7288_v33 = vmul.f32 %v5961_v49, %v5961_v49  ;;  %v6704_v45 = vcombine.low %v6696_v35, %v6703_v25  ;;  %v7289_v63 = vmul.f32 %v5968_v17, %v5968_v17 }
 0x2f3   : > { %v7733_v0 = vrot.slane %v7719_v62, %v12051_v2  ;;  %v6671_v4 = vcombine.low %v5968_v17, %v5969_v53  ;;  %v6670_v48 = vcombine.low %v6662_v10, %v6669_v11  ;;  %v7290_v51 = vmul.f32 %v5969_v53, %v5969_v53 }
 0x2f4   : > { %v7685_v56 = vcombine.low %v7287_v26, %v7288_v33  ;;  %v7692_v50 = vrot.slane %v7684_v6, %v12051_v2  ;;  %v8081_v24 = vadd.f32 %v8080_v32, %v7666_v3  ;;  %v5343_v35 = vadd.f32 %v9498_v30, %v11993_v31 }
 0x2f5   : > { %v7734_v5 = vcombine.low %v12235_v16, %v7733_v0  ;;  %v6679_v14 = vrot.slane %v6671_v4, %v12051_v2  ;;  %v8782_v12 = vpack.c.bf16 %v6670_v48, %v6653_v43  ;;  %v7213_v15 = vadd.f32 %v7212_v42, %v6670_v48 }
 0x2f6   : > { %v7699_v1 = vrot.slane %v7685_v56, %v12051_v2  ;;  %v7701_v34 = vcombine.low %v7289_v63, %v7290_v51  ;;  %v8082_v22 = vadd.f32 %v8081_v24, %v7683_v8  ;;  %v5681_v6 = vadd.f32 %v9550_v57, %v5343_v35 }
 0x2f7   : > { %v6687_v54 = vcombine.low %v6679_v14, %v12223_v29  ;;  %v5341_v16 = vadd.f32 %v5246_v60, %v11996_v7  ;;  %8855 = vst [vmem:[%s12121_s30 + $0x28] sm:$0xff] %v8782_v12   ;;  %v5344_v39 = vadd.f32 %v9499_v37, %v11999_v38  ;;  %v5342_v31 = vadd.f32 %v5249_v47, %v12002_v41  ;;  %v5587_v47 = vpop.f32.mrf.mxu0 }
 0x2f8   : > { %v7700_v49 = vcombine.low %v7692_v50, %v7699_v1  ;;  %v7709_v20 = vrot.slane %v7701_v34, %v12051_v2  ;;  %v6037_v30 = vcombine.high %v5681_v6, %v5681_v6  ;;  %v6044_v43 = vrot.slane %v5681_v6, %v12051_v2  ;;  %v9502_v50 = vpop.f32.mrf.mxu1 }
 0x2f9   : > { %v8787_v3 = vpack.c.bf16 %v6704_v45, %v6687_v54  ;;  %v7214_v32 = vadd.f32 %v7213_v15, %v6687_v54  ;;  %v5679_v17 = vadd.f32 %v5584_v61, %v5341_v16  ;;  %v5682_v8 = vadd.f32 %v9551_v18, %v5344_v39 }
 0x2fa   : > { %v7717_v29 = vcombine.low %v7709_v20, %v12229_v9  ;;  %v8083_v27 = vadd.f32 %v8082_v22, %v7700_v49  ;;  %v6051_v60 = vrot.slane %v6037_v30, %v12051_v2  ;;  %v6052_v59 = vcombine.high %v6044_v43, %v6044_v43  ;;  %v5262_v39 = vpop.f32.mrf.mxu1 }
 0x2fb   : > { %8856 = vst [vmem:[%s12121_s30 + $0x30] sm:$0xff] %v8787_v3   ;;  %v7215_v7 = vadd.f32 %v7214_v32, %v6704_v45  ;;  %v7305_v10 = vmul.f32 %v6044_v43, %v6044_v43  ;;  %v6004_v52 = vcombine.high %v5679_v17, %v5679_v17  ;;  %v6011_v41 = vrot.slane %v5679_v17, %v12051_v2 }
 0x2fc   : > { %v8084_v38 = vadd.f32 %v8083_v27, %v7717_v29  ;;  %v6054_v25 = vcombine.high %v5682_v8, %v5682_v8  ;;  %v6053_v62 = vcombine.high %v6051_v60, %v6051_v60  ;;  %v6739_v57 = vcombine.low %v6044_v43, %v6052_v59 }
 0x2fd   : > { %v7306_v53 = vmul.f32 %v6052_v59, %v6052_v59  ;;  %v7307_v37 = vmul.f32 %v6051_v60, %v6051_v60  ;;  %v6018_v9 = vrot.slane %v6004_v52, %v12051_v2  ;;  %v6019_v42 = vcombine.high %v6011_v41, %v6011_v41 }
 0x2fe   : > { %v8085_v11 = vadd.f32 %v8084_v38, %v7734_v5  ;;  %v6705_v26 = vcombine.low %v12244_v23, %v6011_v41  ;;  %v6740_v33 = vcombine.low %v6051_v60, %v6053_v62  ;;  %v6747_v45 = vrot.slane %v6739_v57, %v12051_v2 }
 0x2ff   : > { %v7308_v0 = vmul.f32 %v6053_v62, %v6053_v62  ;;  %v7769_v4 = vcombine.low %v7305_v10, %v7306_v53  ;;  %v6706_v63 = vcombine.low %v6019_v42, %v6018_v9  ;;  %v7298_v51 = vmul.f32 %v6011_v41, %v6011_v41 }
 0x300   : > { %v6713_v48 = vrot.slane %v6705_v26, %v12051_v2  ;;  %v7299_v56 = vmul.f32 %v6019_v42, %v6019_v42  ;;  %v6754_v14 = vrot.slane %v6740_v33, %v12051_v2  ;;  %v7300_v61 = vmul.f32 %v6018_v9, %v6018_v9 }
 0x301   : > { %v7770_v24 = vcombine.low %v7307_v37, %v7308_v0  ;;  %v12282_v5 = vrot.slane %v7769_v4, %v12051_v2  ;;  %v6720_v23 = vrot.slane %v6706_v63, %v12051_v2  ;;  %v7735_v35 = vcombine.low %v12253_v13, %v7298_v51 }
 0x302   : > { %v6061_v12 = vrot.slane %v5682_v8, %v12051_v2  ;;  %v6068_v15 = vrot.slane %v6054_v25, %v12051_v2  ;;  %v12288_v1 = vcombine.low %v6747_v45, %v6754_v14  ;;  %v7736_v54 = vcombine.low %v7299_v56, %v7300_v61  ;;  %v9554_v8 = vpop.f32.mrf.mxu0  ;;  %v9503_v25 = vpop.f32.mrf.mxu1 }
 0x303   : > { %v12291_v34 = vrot.slane %v7770_v24, %v12051_v2  ;;  %v5680_v22 = vadd.f32 %v5587_v47, %v5342_v31  ;;  %v12293_v6 = vcombine.low %v6713_v48, %v6720_v23  ;;  %v7743_v16 = vrot.slane %v7735_v35, %v12051_v2 }
 0x304   : > { %v6069_v49 = vcombine.high %v6061_v12, %v6061_v12  ;;  %v6070_v20 = vcombine.high %v6068_v15, %v6068_v15  ;;  %v7750_v3 = vrot.slane %v7736_v54, %v12051_v2  ;;  %v7309_v32 = vmul.f32 %v6061_v12, %v6061_v12  ;;  %v5600_v4 = vpop.f32.mrf.mxu0  ;;  %v5265_v56 = vpop.f32.mrf.mxu1 }
 0x305   : > { %v7785_v13 = vcombine.low %v12282_v5, %v12291_v34  ;;  %v7311_v30 = vmul.f32 %v6068_v15, %v6068_v15  ;;  %v7216_v43 = vadd.f32 %v7215_v7, %v12293_v6  ;;  %v6020_v60 = vcombine.high %v6018_v9, %v6018_v9 }
 0x306   : > { %v6756_v18 = vcombine.low %v6061_v12, %v6069_v49  ;;  %v6757_v29 = vcombine.low %v6068_v15, %v6070_v20  ;;  %v7310_v27 = vmul.f32 %v6069_v49, %v6069_v49  ;;  %v7751_v31 = vcombine.low %v7743_v16, %v7750_v3  ;;  %v9555_v15 = vpop.f32.mrf.mxu0 }
 0x307   : > { %v7312_v17 = vmul.f32 %v6070_v20, %v6070_v20  ;;  %v6021_v59 = vcombine.high %v5680_v22, %v5680_v22  ;;  %v6028_v41 = vrot.slane %v5680_v22, %v12051_v2  ;;  %v7301_v53 = vmul.f32 %v6020_v60, %v6020_v60 }
 0x308   : > { %v6764_v10 = vrot.slane %v6756_v18, %v12051_v2  ;;  %v6771_v38 = vrot.slane %v6757_v29, %v12051_v2  ;;  %v7786_v52 = vcombine.low %v7309_v32, %v7310_v27  ;;  %v8086_v62 = vadd.f32 %v8085_v11, %v7751_v31 }
 0x309   : > { %v7787_v57 = vcombine.low %v7311_v30, %v7312_v17  ;;  %v6035_v7 = vrot.slane %v6021_v59, %v12051_v2  ;;  %v6036_v9 = vcombine.high %v6028_v41, %v6028_v41  ;;  %v6722_v26 = vcombine.low %v6020_v60, %v6028_v41 }
 0x30a   : > { %v12304_v37 = vcombine.low %v6764_v10, %v6771_v38  ;;  %v12307_v42 = vrot.slane %v7786_v52, %v12051_v2  ;;  %v7302_v45 = vmul.f32 %v6028_v41, %v6028_v41  ;;  %v5347_v11 = vadd.f32 %v9502_v50, %v12005_v19 }
 0x30b   : > { %v12310_v33 = vrot.slane %v7787_v57, %v12051_v2  ;;  %v7304_v0 = vmul.f32 %v6035_v7, %v6035_v7  ;;  %v6723_v48 = vcombine.low %v6036_v9, %v6035_v7  ;;  %v7303_v51 = vmul.f32 %v6036_v9, %v6036_v9  ;;  %v5603_v7 = vpop.f32.mrf.mxu0 }
 0x30c   : > { %v8797_v63 = vpack.c.bf16 %v12304_v37, %v12288_v1  ;;  %v7752_v24 = vcombine.low %v7301_v53, %v7302_v45  ;;  %v5685_v61 = vadd.f32 %v9554_v8, %v5347_v11  ;;  %v5345_v23 = vadd.f32 %v5262_v39, %v12008_v44  ;;  %v9506_v45 = vpop.f32.mrf.mxu1 }
 0x30d   : > { %v7802_v14 = vcombine.low %v12307_v42, %v12310_v33  ;;  %v6730_v35 = vrot.slane %v6722_v26, %v12051_v2  ;;  %v6737_v47 = vrot.slane %v6723_v48, %v12051_v2  ;;  %v7753_v12 = vcombine.low %v7303_v51, %v7304_v0 }
 0x30e   : > { %8858 = vst [vmem:[%s12121_s30 + $0x40] sm:$0xff] %v8797_v63   ;;  %v5348_v19 = vadd.f32 %v9503_v25, %v12011_v58  ;;  %v6105_v50 = vcombine.high %v5685_v61, %v5685_v61  ;;  %v5683_v54 = vadd.f32 %v5600_v4, %v5345_v23  ;;  %v5346_v22 = vadd.f32 %v5265_v56, %v12014_v21 }
 0x30f   : > { %v6738_v16 = vcombine.low %v6730_v35, %v6737_v47  ;;  %v7760_v49 = vrot.slane %v7752_v24, %v12051_v2  ;;  %v7767_v20 = vrot.slane %v7753_v12, %v12051_v2  ;;  %v12326_v39 = vrot.slane %v5685_v61, %v12051_v2  ;;  %v9558_v35 = vpop.f32.mrf.mxu0 }
 0x310   : > { %v5686_v44 = vadd.f32 %v9555_v15, %v5348_v19  ;;  %v6119_v3 = vrot.slane %v6105_v50, %v12051_v2  ;;  %v6071_v32 = vcombine.high %v5683_v54, %v5683_v54  ;;  %v6078_v58 = vrot.slane %v5683_v54, %v12051_v2  ;;  %v5278_v50 = vpop.f32.mrf.mxu1 }
 0x311   : > { %v8792_v30 = vpack.c.bf16 %v6738_v16, %v12293_v6  ;;  %v7217_v18 = vadd.f32 %v7216_v43, %v6738_v16  ;;  %v7768_v29 = vcombine.low %v7760_v49, %v7767_v20  ;;  %v5684_v26 = vadd.f32 %v5603_v7, %v5346_v22  ;;  %v5616_v33 = vpop.f32.mrf.mxu0 }
 0x312   : > { %v6121_v21 = vcombine.high %v5686_v44, %v5686_v44  ;;  %v6120_v27 = vcombine.high %v6119_v3, %v6119_v3  ;;  %v7321_v31 = vmul.f32 %v6119_v3, %v6119_v3  ;;  %v6085_v17 = vrot.slane %v6071_v32, %v12051_v2 }
 0x313   : > { %v6086_v8 = vcombine.high %v6078_v58, %v6078_v58  ;;  %8857 = vst [vmem:[%s12121_s30 + $0x38] sm:$0xff] %v8792_v30   ;;  %v7218_v60 = vadd.f32 %v7217_v18, %v12288_v1  ;;  %v8087_v59 = vadd.f32 %v8086_v62, %v7768_v29  ;;  %v6128_v10 = vrot.slane %v5686_v44, %v12051_v2 }
 0x314   : > { %v12336_v38 = vrot.slane %v6121_v21, %v12051_v2  ;;  %v6807_v52 = vcombine.low %v6119_v3, %v6120_v27  ;;  %v7322_v41 = vmul.f32 %v6120_v27, %v6120_v27  ;;  %v7314_v57 = vmul.f32 %v6085_v17, %v6085_v17 }
 0x315   : > { %v6773_v6 = vcombine.low %v6086_v8, %v6085_v17  ;;  %v7313_v43 = vmul.f32 %v6086_v8, %v6086_v8  ;;  %v8088_v25 = vadd.f32 %v8087_v59, %v7785_v13  ;;  %v6136_v53 = vcombine.high %v6128_v10, %v6128_v10  ;;  %v9507_v8 = vpop.f32.mrf.mxu1 }
 0x316   : > { %v12343_v1 = vcombine.high %v12336_v38, %v12336_v38  ;;  %v12347_v62 = vmul.f32 %v12326_v39, %v12326_v39  ;;  %v7837_v9 = vcombine.low %v7321_v31, %v7322_v41  ;;  %v6815_v0 = vrot.slane %v6807_v52, %v12051_v2 }
 0x317   : > { %v6808_v4 = vcombine.low %v6128_v10, %v6136_v53  ;;  %v7323_v11 = vmul.f32 %v6128_v10, %v6128_v10  ;;  %v7324_v5 = vmul.f32 %v6136_v53, %v6136_v53  ;;  %v6781_v34 = vrot.slane %v6773_v6, %v12051_v2 }
 0x318   : > { %v7803_v13 = vcombine.low %v7313_v43, %v7314_v57  ;;  %v6824_v63 = vcombine.low %v12336_v38, %v12343_v1  ;;  %v6087_v48 = vcombine.high %v6085_v17, %v6085_v17  ;;  %v12354_v51 = vrot.slane %v7837_v9, %v12051_v2  ;;  %v5281_v9 = vpop.f32.mrf.mxu1 }
 0x319   : > { %v6822_v56 = vrot.slane %v6808_v4, %v12051_v2  ;;  %v7325_v24 = vmul.f32 %v12336_v38, %v12336_v38  ;;  %v7838_v61 = vcombine.low %v7323_v11, %v7324_v5  ;;  %v7326_v23 = vmul.f32 %v12343_v1, %v12343_v1  ;;  %v9559_v5 = vpop.f32.mrf.mxu0 }
 0x31a   : > { %v6088_v47 = vcombine.high %v5684_v26, %v5684_v26  ;;  %v6095_v12 = vrot.slane %v5684_v26, %v12051_v2  ;;  %v7219_v19 = vadd.f32 %v7218_v60, %v12304_v37  ;;  %v7315_v22 = vmul.f32 %v6087_v48, %v6087_v48 }
 0x31b   : > { %v12363_v15 = vcombine.low %v6815_v0, %v6822_v56  ;;  %v12366_v54 = vrot.slane %v7838_v61, %v12051_v2  ;;  %v8089_v16 = vadd.f32 %v8088_v25, %v7802_v14  ;;  %v7811_v49 = vrot.slane %v7803_v13, %v12051_v2 }
 0x31c   : > { %v6102_v20 = vrot.slane %v6088_v47, %v12051_v2  ;;  %v6103_v44 = vcombine.high %v6095_v12, %v6095_v12  ;;  %v6774_v3 = vcombine.low %v6087_v48, %v6095_v12  ;;  %v7316_v32 = vmul.f32 %v6095_v12, %v6095_v12 }
 0x31d   : > { %v7853_v37 = vcombine.low %v12354_v51, %v12366_v54  ;;  %v5351_v58 = vadd.f32 %v9506_v45, %v12017_v40  ;;  %v5349_v30 = vadd.f32 %v5278_v50, %v12020_v28  ;;  %v7854_v60 = vcombine.low %v7325_v24, %v7326_v23  ;;  %v9510_v23 = vpop.f32.mrf.mxu1 }
 0x31e   : > { %v6104_v18 = vcombine.high %v6102_v20, %v6102_v20  ;;  %v6788_v29 = vrot.slane %v6774_v3, %v12051_v2  ;;  %v6790_v21 = vcombine.low %v6103_v44, %v6102_v20  ;;  %v7317_v42 = vmul.f32 %v6103_v44, %v6103_v44 }
 0x31f   : > { %v7318_v14 = vmul.f32 %v6102_v20, %v6102_v20  ;;  %v7804_v27 = vcombine.low %v7315_v22, %v7316_v32  ;;  %v5689_v31 = vadd.f32 %v9558_v35, %v5351_v58  ;;  %v5687_v17 = vadd.f32 %v5616_v33, %v5349_v30  ;;  %v5619_v22 = vpop.f32.mrf.mxu0 }
 0x320   : > { %v6789_v59 = vcombine.low %v6781_v34, %v6788_v29  ;;  %v6791_v10 = vcombine.low %v6104_v18, %v12326_v39  ;;  %v7319_v38 = vmul.f32 %v6104_v18, %v6104_v18  ;;  %v6798_v6 = vrot.slane %v6790_v21, %v12051_v2 }
 0x321   : > { %v7818_v40 = vrot.slane %v7804_v27, %v12051_v2  ;;  %v7820_v52 = vcombine.low %v7317_v42, %v7318_v14  ;;  %v6172_v28 = vcombine.high %v5689_v31, %v5689_v31  ;;  %v12381_v41 = vrot.slane %v5689_v31, %v12051_v2  ;;  %v9562_v14 = vpop.f32.mrf.mxu0 }
 0x322   : > { %v6805_v43 = vrot.slane %v6791_v10, %v12051_v2  ;;  %v7220_v25 = vadd.f32 %v7219_v19, %v6789_v59  ;;  %v7821_v57 = vcombine.low %v7319_v38, %v12347_v62  ;;  %v6138_v1 = vcombine.high %v5687_v17, %v5687_v17 }
 0x323   : > { %v7819_v7 = vcombine.low %v7811_v49, %v7818_v40  ;;  %v6186_v53 = vrot.slane %v6172_v28, %v12051_v2  ;;  %v6187_v39 = vcombine.high %v12381_v41, %v12381_v41  ;;  %v7828_v45 = vrot.slane %v7820_v52, %v12051_v2 }
 0x324   : > { %v6806_v26 = vcombine.low %v6798_v6, %v6805_v43  ;;  %v7835_v0 = vrot.slane %v7821_v57, %v12051_v2  ;;  %v6145_v4 = vrot.slane %v5687_v17, %v12051_v2  ;;  %v6832_v62 = vrot.slane %v6824_v63, %v12051_v2 }
 0x325   : > { %v8090_v11 = vadd.f32 %v8089_v16, %v7819_v7  ;;  %v7862_v51 = vrot.slane %v7854_v60, %v12051_v2  ;;  %v7335_v56 = vmul.f32 %v6187_v39, %v6187_v39  ;;  %v7336_v24 = vmul.f32 %v6186_v53, %v6186_v53 }
 0x326   : > { %v8802_v34 = vpack.c.bf16 %v6806_v26, %v6789_v59  ;;  %v7221_v13 = vadd.f32 %v7220_v25, %v6806_v26  ;;  %v7836_v48 = vcombine.low %v7828_v45, %v7835_v0  ;;  %v6153_v61 = vcombine.high %v6145_v4, %v6145_v4  ;;  %v12673_v25 = vld [vmem:[#allocation8_spill] sm:$0xff]  ;;  %v12674_v45 = vld [vmem:[#allocation11_spill] sm:$0xff] }
 0x327   : > { %v6152_v47 = vrot.slane %v6138_v1, %v12051_v2  ;;  %v5352_v19 = vadd.f32 %v9507_v8, %v12023_v46  ;;  %v7327_v54 = vmul.f32 %v6145_v4, %v6145_v4  ;;  %v5350_v16 = vadd.f32 %v5281_v9, %v12026_v36  ;;  %v5294_v46 = vpop.f32.mrf.mxu1 }
 0x328   : > { %8859 = vst [vmem:[%s12121_s30 + $0x48] sm:$0xff] %v8802_v34   ;;  %v8091_v35 = vadd.f32 %v8090_v11, %v7836_v48  ;;  %v7222_v12 = vadd.f32 %v7221_v13, %v12363_v15  ;;  %v6825_v50 = vcombine.low %v6145_v4, %v6153_v61  ;;  %v7328_v63 = vmul.f32 %v6153_v61, %v6153_v61 }
 0x329   : > { %v6859_v49 = vcombine.low %v6187_v39, %v6186_v53  ;;  %v5690_v44 = vadd.f32 %v9559_v5, %v5352_v19  ;;  %v5355_v3 = vadd.f32 %v9510_v23, %v12029_v55  ;;  %v12402_v32 = vmul.f32 %v12381_v41, %v12381_v41  ;;  %v9511_v52 = vpop.f32.mrf.mxu1 }
 0x32a   : > { %v8092_v20 = vadd.f32 %v8091_v35, %v7853_v37  ;;  %v6839_v58 = vrot.slane %v6825_v50, %v12051_v2  ;;  %v7855_v30 = vcombine.low %v7327_v54, %v7328_v63  ;;  %v5688_v18 = vadd.f32 %v5619_v22, %v5350_v16  ;;  %v5632_v22 = vpop.f32.mrf.mxu0 }
 0x32b   : > { %v7889_v29 = vcombine.low %v7335_v56, %v7336_v24  ;;  %v6154_v21 = vcombine.high %v6152_v47, %v6152_v47  ;;  %v6188_v42 = vcombine.high %v5690_v44, %v5690_v44  ;;  %v6195_v33 = vrot.slane %v5690_v44, %v12051_v2 }
 0x32c   : > { %v6840_v36 = vcombine.low %v6832_v62, %v6839_v58  ;;  %v7869_v37 = vrot.slane %v7855_v30, %v12051_v2  ;;  %v6155_v55 = vcombine.high %v5688_v18, %v5688_v18  ;;  %v6162_v27 = vrot.slane %v5688_v18, %v12051_v2 }
 0x32d   : > { %v6873_v31 = vrot.slane %v6859_v49, %v12051_v2  ;;  %v6202_v17 = vrot.slane %v6188_v42, %v12051_v2  ;;  %v6203_v8 = vcombine.high %v6195_v33, %v6195_v33  ;;  %v5693_v60 = vadd.f32 %v9562_v14, %v5355_v3  ;;  %v5297_v42 = vpop.f32.mrf.mxu1  ;;  %v9563_v14 = vpop.f32.mrf.mxu0 }
 0x32e   : > { %v8807_v59 = vpack.c.bf16 %v6840_v36, %v12363_v15  ;;  %v7223_v10 = vadd.f32 %v7222_v12, %v6840_v36  ;;  %v7870_v38 = vcombine.low %v7862_v51, %v7869_v37  ;;  %v6169_v40 = vrot.slane %v6155_v55, %v12051_v2 }
 0x32f   : > { %v12413_v28 = vrot.slane %v7889_v29, %v12051_v2  ;;  %v7329_v6 = vmul.f32 %v6154_v21, %v6154_v21  ;;  %v6204_v43 = vcombine.high %v6202_v17, %v6202_v17  ;;  %v5353_v57 = vadd.f32 %v5294_v46, %v12673_v25 }
 0x330   : > { %8860 = vst [vmem:[%s12121_s30 + $0x50] sm:$0xff] %v8807_v59   ;;  %v8093_v7 = vadd.f32 %v8092_v20, %v7870_v38  ;;  %v6170_v53 = vcombine.high %v6162_v27, %v6162_v27  ;;  %v6171_v39 = vcombine.high %v6169_v40, %v6169_v40  ;;  %v6841_v1 = vcombine.low %v6154_v21, %v6162_v27  ;;  %v12675_v38 = vld [vmem:[#allocation12_spill] sm:$0xff] }
 0x331   : > { %v7337_v9 = vmul.f32 %v6195_v33, %v6195_v33  ;;  %v7338_v26 = vmul.f32 %v6203_v8, %v6203_v8  ;;  %v6239_v15 = vcombine.high %v5693_v60, %v5693_v60  ;;  %v5356_v0 = vadd.f32 %v9511_v52, %v12674_v45 }
 0x332   : > { %v6875_v4 = vcombine.low %v6195_v33, %v6203_v8  ;;  %v6842_v11 = vcombine.low %v6170_v53, %v6169_v40  ;;  %v6858_v5 = vcombine.low %v6171_v39, %v12381_v41  ;;  %v7330_v62 = vmul.f32 %v6162_v27, %v6162_v27 }
 0x333   : > { %v6876_v34 = vcombine.low %v6202_v17, %v6204_v43  ;;  %v7339_v13 = vmul.f32 %v6202_v17, %v6202_v17  ;;  %v6849_v48 = vrot.slane %v6841_v1, %v12051_v2  ;;  %v7331_v51 = vmul.f32 %v6170_v53, %v6170_v53 }
 0x334   : > { %v6856_v56 = vrot.slane %v6842_v11, %v12051_v2  ;;  %v6866_v24 = vrot.slane %v6858_v5, %v12051_v2  ;;  %v7332_v61 = vmul.f32 %v6169_v40, %v6169_v40  ;;  %v7333_v23 = vmul.f32 %v6171_v39, %v6171_v39 }
 0x335   : > { %v7340_v35 = vmul.f32 %v6204_v43, %v6204_v43  ;;  %v7905_v47 = vcombine.low %v7337_v9, %v7338_v26  ;;  %v7871_v12 = vcombine.low %v7329_v6, %v7330_v62  ;;  %v12423_v19 = vrot.slane %v5693_v60, %v12051_v2  ;;  %v5635_v9 = vpop.f32.mrf.mxu0 }
 0x336   : > { %v6857_v50 = vcombine.low %v6849_v48, %v6856_v56  ;;  %v6874_v41 = vcombine.low %v6866_v24, %v6873_v31  ;;  %v7872_v54 = vcombine.low %v7331_v51, %v7332_v61  ;;  %v7888_v63 = vcombine.low %v7333_v23, %v12402_v32  ;;  %v9514_v48 = vpop.f32.mrf.mxu1 }
 0x337   : > { %v6890_v16 = vrot.slane %v6876_v34, %v12051_v2  ;;  %v7879_v49 = vrot.slane %v7871_v12, %v12051_v2  ;;  %v6253_v20 = vrot.slane %v6239_v15, %v12051_v2  ;;  %v6254_v44 = vcombine.high %v12423_v19, %v12423_v19 }
 0x338   : > { %v8812_v3 = vpack.c.bf16 %v6874_v41, %v6857_v50  ;;  %v7224_v58 = vadd.f32 %v7223_v10, %v6857_v50  ;;  %v7886_v30 = vrot.slane %v7872_v54, %v12051_v2  ;;  %v7896_v18 = vrot.slane %v7888_v63, %v12051_v2 }
 0x339   : > { %v6883_v46 = vrot.slane %v6875_v4, %v12051_v2  ;;  %v7906_v29 = vcombine.low %v7339_v13, %v7340_v35  ;;  %v7349_v32 = vmul.f32 %v6254_v44, %v6254_v44  ;;  %v7350_v21 = vmul.f32 %v6253_v20, %v6253_v20 }
 0x33a   : > { %8861 = vst [vmem:[%s12121_s30 + $0x58] sm:$0xff] %v8812_v3   ;;  %v7225_v33 = vadd.f32 %v7224_v58, %v6874_v41  ;;  %v7887_v36 = vcombine.low %v7879_v49, %v7886_v30  ;;  %v7904_v37 = vcombine.low %v7896_v18, %v12413_v28  ;;  %v5691_v55 = vadd.f32 %v5632_v22, %v5353_v57 }
 0x33b   : > { %v12436_v27 = vcombine.low %v6883_v46, %v6890_v16  ;;  %v7913_v31 = vrot.slane %v7905_v47, %v12051_v2  ;;  %v5694_v17 = vadd.f32 %v9563_v14, %v5356_v0  ;;  %v6255_v8 = vcombine.high %v6253_v20, %v6253_v20 }
 0x33c   : > { %v8094_v60 = vadd.f32 %v8093_v7, %v7887_v36  ;;  %v6205_v59 = vcombine.high %v5691_v55, %v5691_v55  ;;  %v6212_v10 = vrot.slane %v5691_v55, %v12051_v2  ;;  %v5354_v40 = vadd.f32 %v5297_v42, %v12675_v38  ;;  %v12676_v42 = vld [vmem:[#allocation16_spill] sm:$0xff] }
 0x33d   : > { %v7920_v52 = vrot.slane %v7906_v29, %v12051_v2  ;;  %v6926_v6 = vcombine.low %v6254_v44, %v6253_v20  ;;  %v6263_v43 = vrot.slane %v5694_v17, %v12051_v2  ;;  %v7351_v28 = vmul.f32 %v6255_v8, %v6255_v8  ;;  %v5310_v44 = vpop.f32.mrf.mxu1  ;;  %v9566_v29 = vpop.f32.mrf.mxu0 }
 0x33e   : > { %v8095_v25 = vadd.f32 %v8094_v60, %v7904_v37  ;;  %v7956_v57 = vcombine.low %v7349_v32, %v7350_v21  ;;  %v6219_v53 = vrot.slane %v6205_v59, %v12051_v2  ;;  %v6220_v39 = vcombine.high %v6212_v10, %v6212_v10 }
 0x33f   : > { %v7341_v1 = vmul.f32 %v6212_v10, %v6212_v10  ;;  %v6256_v26 = vcombine.high %v5694_v17, %v5694_v17  ;;  %v6927_v7 = vcombine.low %v6255_v8, %v6263_v43  ;;  %v7352_v15 = vmul.f32 %v6263_v43, %v6263_v43 }
 0x340   : > { %v6221_v45 = vcombine.high %v6219_v53, %v6219_v53  ;;  %v6892_v0 = vcombine.low %v6212_v10, %v6220_v39  ;;  %v7342_v4 = vmul.f32 %v6220_v39, %v6220_v39  ;;  %v5692_v11 = vadd.f32 %v5635_v9, %v5354_v40  ;;  %v9515_v10 = vpop.f32.mrf.mxu1  ;;  %v12678_v9 = vld [vmem:[#allocation19_spill] sm:$0xff] }
 0x341   : > { %v7921_v5 = vcombine.low %v7913_v31, %v7920_v52  ;;  %v6934_v62 = vrot.slane %v6926_v6, %v12051_v2  ;;  %v6941_v34 = vrot.slane %v6927_v7, %v12051_v2  ;;  %v7957_v13 = vcombine.low %v7351_v28, %v7352_v15  ;;  %v12677_v52 = vld [vmem:[#allocation23_spill] sm:$0xff] }
 0x342   : > { %v6893_v51 = vcombine.low %v6219_v53, %v6221_v45  ;;  %v7343_v56 = vmul.f32 %v6219_v53, %v6219_v53  ;;  %v7344_v24 = vmul.f32 %v6221_v45, %v6221_v45  ;;  %v7922_v61 = vcombine.low %v7341_v1, %v7342_v4 }
 0x343   : > { %v12447_v23 = vrot.slane %v6256_v26, %v12051_v2  ;;  %v6942_v35 = vcombine.low %v6934_v62, %v6941_v34  ;;  %v12450_v47 = vrot.slane %v7956_v57, %v12051_v2  ;;  %v12453_v12 = vrot.slane %v7957_v13, %v12051_v2 }
 0x344   : > { %v6900_v50 = vrot.slane %v6892_v0, %v12051_v2  ;;  %v6907_v41 = vrot.slane %v6893_v51, %v12051_v2  ;;  %v7923_v54 = vcombine.low %v7343_v56, %v7344_v24  ;;  %v6222_v63 = vcombine.high %v5692_v11, %v5692_v11 }
 0x345   : > { %v7348_v22 = vmul.f32 %v12423_v19, %v12423_v19  ;;  %v7930_v16 = vrot.slane %v7922_v61, %v12051_v2  ;;  %v7972_v49 = vcombine.low %v12450_v47, %v12453_v12  ;;  %v6229_v20 = vrot.slane %v5692_v11, %v12051_v2 }
 0x346   : > { %v6908_v3 = vcombine.low %v6900_v50, %v6907_v41  ;;  %v7937_v58 = vrot.slane %v7923_v54, %v12051_v2  ;;  %v6236_v30 = vrot.slane %v6222_v63, %v12051_v2  ;;  %v7226_v18 = vadd.f32 %v7225_v33, %v12436_v27 }
 0x347   : > { %v6271_v46 = vcombine.high %v12447_v23, %v12447_v23  ;;  %v6237_v32 = vcombine.high %v6229_v20, %v6229_v20  ;;  %v8096_v21 = vadd.f32 %v8095_v25, %v7921_v5  ;;  %v5359_v36 = vadd.f32 %v9514_v48, %v12676_v42 }
 0x348   : > { %v8817_v37 = vpack.c.bf16 %v6908_v3, %v12436_v27  ;;  %v7938_v14 = vcombine.low %v7930_v16, %v7937_v58  ;;  %v6238_v55 = vcombine.high %v6236_v30, %v6236_v30  ;;  %v7227_v31 = vadd.f32 %v7226_v18, %v6908_v3  ;;  %v5648_v27 = vpop.f32.mrf.mxu0 }
 0x349   : > { %v6909_v17 = vcombine.low %v6237_v32, %v6236_v30  ;;  %v7345_v8 = vmul.f32 %v6237_v32, %v6237_v32  ;;  %v7346_v60 = vmul.f32 %v6236_v30, %v6236_v30  ;;  %v5697_v59 = vadd.f32 %v9566_v29, %v5359_v36 }
 0x34a   : > { %8862 = vst [vmem:[%s12121_s30 + $0x60] sm:$0xff] %v8817_v37   ;;  %v6910_v33 = vcombine.low %v6238_v55, %v12423_v19  ;;  %v7347_v38 = vmul.f32 %v6238_v55, %v6238_v55  ;;  %v8097_v40 = vadd.f32 %v8096_v21, %v7938_v14  ;;  %v5357_v6 = vadd.f32 %v5310_v44, %v12677_v52  ;;  %v9567_v13 = vpop.f32.mrf.mxu0  ;;  %v5313_v44 = vpop.f32.mrf.mxu1  ;;  %v12679_v37 = vld [vmem:[#allocation13_spill] sm:$0xff] }
 0x34b   : > { %v7354_v43 = vmul.f32 %v6271_v46, %v6271_v46  ;;  %v6917_v28 = vrot.slane %v6909_v17, %v12051_v2  ;;  %v7939_v25 = vcombine.low %v7345_v8, %v7346_v60  ;;  %v6306_v57 = vcombine.high %v5697_v59, %v5697_v59 }
 0x34c   : > { %v6924_v53 = vrot.slane %v6910_v33, %v12051_v2  ;;  %v7940_v39 = vcombine.low %v7347_v38, %v7348_v22  ;;  %v5695_v1 = vadd.f32 %v5648_v27, %v5357_v6  ;;  %v5360_v26 = vadd.f32 %v9515_v10, %v12678_v9  ;;  %v5651_v17 = vpop.f32.mrf.mxu0 }
 0x34d   : > { %v7353_v7 = vmul.f32 %v12447_v23, %v12447_v23  ;;  %v7947_v19 = vrot.slane %v7939_v25, %v12051_v2  ;;  %v12480_v15 = vrot.slane %v5697_v59, %v12051_v2  ;;  %v6943_v5 = vcombine.low %v12447_v23, %v6271_v46 }
 0x34e   : > { %v6925_v45 = vcombine.low %v6917_v28, %v6924_v53  ;;  %v7954_v0 = vrot.slane %v7940_v39, %v12051_v2  ;;  %v6272_v4 = vcombine.high %v5695_v1, %v5695_v1  ;;  %v6279_v11 = vrot.slane %v5695_v1, %v12051_v2 }
 0x34f   : > { %v7973_v62 = vcombine.low %v7353_v7, %v7354_v43  ;;  %v12486_v34 = vrot.slane %v6306_v57, %v12051_v2  ;;  %v5698_v24 = vadd.f32 %v9567_v13, %v5360_v26  ;;  %v6321_v63 = vcombine.high %v12480_v15, %v12480_v15 }
 0x350   : > { %v8822_v48 = vpack.c.bf16 %v6942_v35, %v6925_v45  ;;  %v7228_v51 = vadd.f32 %v7227_v31, %v6925_v45  ;;  %v7955_v56 = vcombine.low %v7947_v19, %v7954_v0  ;;  %v6286_v61 = vrot.slane %v6272_v4, %v12051_v2 }
 0x351   : > { %v6287_v50 = vcombine.high %v6279_v11, %v6279_v11  ;;  %v7355_v23 = vmul.f32 %v6279_v11, %v6279_v11  ;;  %v6322_v20 = vcombine.high %v12486_v34, %v12486_v34  ;;  %v6951_v3 = vrot.slane %v6943_v5, %v12051_v2 }
 0x352   : > { %8863 = vst [vmem:[%s12121_s30 + $0x68] sm:$0xff] %v8822_v48   ;;  %v7229_v41 = vadd.f32 %v7228_v51, %v6942_v35  ;;  %v8098_v54 = vadd.f32 %v8097_v40, %v7955_v56  ;;  %v7981_v58 = vrot.slane %v7973_v62, %v12051_v2  ;;  %v6323_v35 = vcombine.high %v5698_v24, %v5698_v24 }
 0x353   : > { %v6944_v22 = vcombine.low %v6279_v11, %v6287_v50  ;;  %v7356_v16 = vmul.f32 %v6287_v50, %v6287_v50  ;;  %v6288_v18 = vcombine.high %v6286_v61, %v6286_v61  ;;  %v6330_v32 = vrot.slane %v5698_v24, %v12051_v2 }
 0x354   : > { %v8099_v30 = vadd.f32 %v8098_v54, %v7972_v49  ;;  %v7363_v21 = vmul.f32 %v6321_v63, %v6321_v63  ;;  %v6337_v42 = vrot.slane %v6323_v35, %v12051_v2  ;;  %v7365_v36 = vmul.f32 %v6322_v20, %v6322_v20 }
 0x355   : > { %v6958_v46 = vrot.slane %v6944_v22, %v12051_v2  ;;  %v7974_v29 = vcombine.low %v7355_v23, %v7356_v16  ;;  %v5358_v14 = vadd.f32 %v5313_v44, %v12679_v37  ;;  %v6338_v8 = vcombine.high %v6330_v32, %v6330_v32 }
 0x356   : > { %v6994_v47 = vcombine.low %v6322_v20, %v6330_v32  ;;  %v7364_v12 = vmul.f32 %v12486_v34, %v12486_v34  ;;  %v7366_v49 = vmul.f32 %v6330_v32, %v6330_v32  ;;  %v7368_v60 = vmul.f32 %v6337_v42, %v6337_v42 }
 0x357   : > { %v6959_v55 = vcombine.low %v6951_v3, %v6958_v46  ;;  %v7988_v31 = vrot.slane %v7974_v29, %v12051_v2  ;;  %v5696_v59 = vadd.f32 %v5651_v17, %v5358_v14  ;;  %v6960_v10 = vcombine.low %v6286_v61, %v6288_v18 }
 0x358   : > { %v6995_v40 = vcombine.low %v6338_v8, %v6337_v42  ;;  %v7367_v52 = vmul.f32 %v6338_v8, %v6338_v8  ;;  %v8024_v6 = vcombine.low %v7365_v36, %v7366_v49  ;;  %v7358_v25 = vmul.f32 %v6288_v18, %v6288_v18 }
 0x359   : > { %v7230_v33 = vadd.f32 %v7229_v41, %v6959_v55  ;;  %v7989_v38 = vcombine.low %v7981_v58, %v7988_v31  ;;  %v6289_v43 = vcombine.high %v5696_v59, %v5696_v59  ;;  %v6296_v28 = vrot.slane %v5696_v59, %v12051_v2 }
 0x35a   : > { %v7002_v57 = vrot.slane %v6994_v47, %v12051_v2  ;;  %v7009_v53 = vrot.slane %v6995_v40, %v12051_v2  ;;  %v7362_v39 = vmul.f32 %v12480_v15, %v12480_v15  ;;  %v8025_v1 = vcombine.low %v7367_v52, %v7368_v60 }
 0x35b   : > { %v8100_v27 = vadd.f32 %v8099_v30, %v7989_v38  ;;  %v6303_v9 = vrot.slane %v6289_v43, %v12051_v2  ;;  %v6304_v26 = vcombine.high %v6296_v28, %v6296_v28  ;;  %v6978_v7 = vcombine.low %v6321_v63, %v12486_v34 }
 0x35c   : > { %v7357_v19 = vmul.f32 %v6286_v61, %v6286_v61  ;;  %v7010_v45 = vcombine.low %v7002_v57, %v7009_v53  ;;  %v8032_v0 = vrot.slane %v8024_v6, %v12051_v2  ;;  %v8039_v4 = vrot.slane %v8025_v1, %v12051_v2 }
 0x35d   : > { %v6305_v11 = vcombine.high %v6303_v9, %v6303_v9  ;;  %v6961_v5 = vcombine.low %v6296_v28, %v6304_v26  ;;  %v7360_v62 = vmul.f32 %v6304_v26, %v6304_v26  ;;  %v8008_v13 = vcombine.low %v7363_v21, %v7364_v12 }
 0x35e   : > { %v6968_v48 = vrot.slane %v6960_v10, %v12051_v2  ;;  %v7990_v51 = vcombine.low %v7357_v19, %v7358_v25  ;;  %v7359_v56 = vmul.f32 %v6296_v28, %v6296_v28  ;;  %v8040_v24 = vcombine.low %v8032_v0, %v8039_v4 }
 0x35f   : > { %v6975_v50 = vrot.slane %v6961_v5, %v12051_v2  ;;  %v6977_v34 = vcombine.low %v6305_v11, %v12480_v15  ;;  %v7361_v61 = vmul.f32 %v6305_v11, %v6305_v11  ;;  %v6992_v54 = vrot.slane %v6978_v7, %v12051_v2 }
 0x360   : > { %v7991_v41 = vcombine.low %v7359_v56, %v7360_v62  ;;  %v8022_v16 = vrot.slane %v8008_v13, %v12051_v2  ;;  %v7998_v20 = vrot.slane %v7990_v51, %v12051_v2 }
 0x361   : > { %v6976_v63 = vcombine.low %v6968_v48, %v6975_v50  ;;  %v6985_v22 = vrot.slane %v6977_v34, %v12051_v2  ;;  %v8007_v23 = vcombine.low %v7361_v61, %v7362_v39 }
 0x362   : > { %v8005_v44 = vrot.slane %v7991_v41, %v12051_v2 }
 0x363   : > { %v6993_v3 = vcombine.low %v6985_v22, %v6992_v54  ;;  %v8827_v58 = vpack.c.bf16 %v6976_v63, %v6959_v55  ;;  %v7231_v30 = vadd.f32 %v7230_v33, %v6976_v63  ;;  %v8015_v15 = vrot.slane %v8007_v23, %v12051_v2 }
 0x364   : > { %v8006_v35 = vcombine.low %v7998_v20, %v8005_v44 }
 0x365   : > { %8864 = vst [vmem:[%s12121_s30 + $0x70] sm:$0xff] %v8827_v58   ;;  %v8832_v18 = vpack.c.bf16 %v7010_v45, %v6993_v3  ;;  %v7232_v46 = vadd.f32 %v7231_v30, %v6993_v3  ;;  %v8023_v29 = vcombine.low %v8015_v15, %v8022_v16 }
 0x366   : > { %v8101_v32 = vadd.f32 %v8100_v27, %v8006_v35 }
 0x367   : > { %8865 = vst [vmem:[%s12121_s30 + $0x78] sm:$0xff] %v8832_v18   ;;  %v7233_v21 = vadd.f32 %v7232_v46, %v7010_v45 }
 0x368   : > { %v8102_v42 = vadd.f32 %v8101_v32, %v8023_v29 }
 0x369   : > { %v7234_v36 = vrot.slane %v7233_v21, 4 }
 0x36a   : > { %v8103_v37 = vadd.f32 %v8102_v42, %v8040_v24 }
 0x36b   : > { %v7235_v14 = vadd.f32 %v7234_v36, %v7233_v21 }
 0x36c   : > { %v8104_v31 = vrot.slane %v8103_v37, 4 }
 0x36d   : > { %v7236_v17 = vrot.slane %v7235_v14, 2 }
 0x36e   : > { %v8105_v55 = vadd.f32 %v8104_v31, %v8103_v37 }
 0x36f   : > { %v7237_v8 = vadd.f32 %v7236_v17, %v7235_v14 }
 0x370   : > { %v8106_v47 = vrot.slane %v8105_v55, 2 }
 0x371   : > { %v7238_v2 = vrot.slane %v7237_v8, 1 }
 0x372   : > { %v8107_v12 = vadd.f32 %v8106_v47, %v8105_v55 }
 0x373   : > { %v7239_v49 = vadd.f32 %v7238_v2, %v7237_v8 }
 0x374   : > { %v8108_v60 = vrot.slane %v8107_v12, 1 }
 0x375   : > { %7240 = vst [vmem:[%s292_s10] sm:$0x1] %v7239_v49 }
 0x376   : > { %v8109_v59 = vadd.f32 %v8108_v60, %v8107_v12 }
 0x378   : > { %8110 = vst [vmem:[%s295_s13] sm:$0x1] %v8109_v59 }
 0x379 PF: > { %s18_s24 = sadd.s32 1, %s9834_s24  }
 0x37a   : > { %p15_p4 = scmp.ge.s32.totalorder %s18_s24, 4  }
 0x37c   :  { %17 = sbr.rel (!%p15_p4) target bundleno = 1 (0x1), region = 102 }

</bundles_post_ra>
